<compile_context>
chip_gen: v6e
topology: v6e:2x2x1
jax: 0.10.0
libtpu: 0.0.40
codegen_flags: <defaults>
</compile_context>

<pallas_src>
import math

import jax
import jax.numpy as jnp
from jax.experimental import pallas as pl
from jax.experimental.pallas import tpu as pltpu

BN_EPS = 1e-5
ODIM = 3          # PointGenCon output channels (xyz)
ODIM_PAD = 128    # lane-dense padding of the final layer


# ----------------------------- Pallas kernel --------------------------------
def _mlp_stack(pts, w1, s1, b1, w2, s2, b2, w3, s3, b3, w4, b4):
    """One PointGenCon stack on a (tile_n, k) point block (k = 2/3, tiny).

    The broadcast-latent contribution f @ W1[k:] is already folded into b1, so
    layer 1 is just k broadcast FMAs on the VPU.  w2/w3/w4 are bf16 refs
    (MXU bf16 path); all elementwise math stays f32.
    """
    w1a = w1[...]                                           # (k, C1) f32
    lin = pts[:, 0:1] * w1a[0:1, :]
    for d in range(1, pts.shape[1]):
        lin = lin + pts[:, d:d + 1] * w1a[d:d + 1, :]
    h = jnp.maximum(lin * s1[...] + b1[...], 0.0)           # relu(bn1(conv1))
    h = jnp.dot(h.astype(jnp.bfloat16), w2[...],
                preferred_element_type=jnp.float32)
    h = jnp.maximum(h * s2[...] + b2[...], 0.0)             # relu(bn2(conv2))
    h = jnp.dot(h.astype(jnp.bfloat16), w3[...],
                preferred_element_type=jnp.float32)
    h = jnp.maximum(h * s3[...] + b3[...], 0.0)             # relu(bn3(conv3))
    h = jnp.dot(h.astype(jnp.bfloat16), w4[...],
                preferred_element_type=jnp.float32)
    return jnp.tanh(h + b4[...])                            # th(conv4), (tn, 128)


def _fused_kernel(g_ref,
                  d_w1, d_s1, d_b1, d_w2, d_s2, d_b2,
                  d_w3, d_s3, d_b3, d_w4, d_b4,
                  i_w1, i_s1, i_b1, i_w2, i_s2, i_b2,
                  i_w3, i_s3, i_b3, i_w4, i_b4,
                  y_ref, inv_ref):
    y = _mlp_stack(g_ref[...], d_w1, d_s1, d_b1, d_w2, d_s2, d_b2,
                   d_w3, d_s3, d_b3, d_w4, d_b4)
    y_ref[...] = y
    # inverse decoder consumes y in-register: no HBM round trip, no 2nd launch
    inv_ref[...] = _mlp_stack(y[:, :ODIM], i_w1, i_s1, i_b1, i_w2, i_s2, i_b2,
                              i_w3, i_s3, i_b3, i_w4, i_b4)


def _stack_args(p, b1_eff):
    return (p["w1_pt"], p["s1"], b1_eff, p["w2"], p["s2"], p["b2"],
            p["w3"], p["s3"], p["b3"], p["w4"], p["b4"])


def fused_decoders_pallas(grid_nc, dec, d_b1_eff, inv, i_b1_eff, *, tile_n=512):
    """Run decoder + inv_decoder fused, tiled over the point dimension."""
    N, gd = grid_nc.shape
    tn = min(tile_n, N)
    # keep >=2 grid steps so the "parallel" axis can shard over v7x's 2 TCs
    if N // tn < 2 and N % 16 == 0:
        tn = N // 2
    assert N % tn == 0 and tn % 8 == 0, (N, tn)

    dec_args = _stack_args(dec, d_b1_eff)
    inv_args = _stack_args(inv, i_b1_eff)

    def const_spec(a):
        # grid-invariant weight/scale/bias: same block every step
        return pl.BlockSpec(a.shape, lambda i: (0, 0))

    in_specs = [pl.BlockSpec((tn, gd), lambda i: (i, 0))]
    in_specs += [const_spec(a) for a in (*dec_args, *inv_args)]
    out_spec = pl.BlockSpec((tn, ODIM_PAD), lambda i: (i, 0))

    y_pad, inv_pad = pl.pallas_call(
        _fused_kernel,
        out_shape=(jax.ShapeDtypeStruct((N, ODIM_PAD), jnp.float32),
                   jax.ShapeDtypeStruct((N, ODIM_PAD), jnp.float32)),
        grid=(N // tn,),
        in_specs=in_specs,
        out_specs=[out_spec, out_spec],
        compiler_params=pltpu.CompilerParams(
            dimension_semantics=("parallel",),
            vmem_limit_bytes=48 * 1024 * 1024),
    )(grid_nc, *dec_args, *inv_args)
    return y_pad[:, :ODIM], inv_pad[:, :ODIM]


# ------------------------ parameter construction ----------------------------
def _conv1d_params(key, cin, cout):
    kw, kb = jax.random.split(key)
    # _init_layers: Conv1d weight ~ N(0, 0.02); bias keeps PyTorch default
    w = 0.02 * jax.random.normal(kw, (cin, cout), jnp.float32)
    bound = 1.0 / math.sqrt(cin)
    b = jax.random.uniform(kb, (1, cout), jnp.float32, -bound, bound)
    return w, b


def _bn_fold(key, c, conv_bias):
    # _init_layers: BN weight ~ N(1, 0.02), bias = 0.  Eval-mode fold with
    # fresh-init running stats (mean=0, var=1); use real stats for checkpoints.
    gamma = 1.0 + 0.02 * jax.random.normal(key, (1, c), jnp.float32)
    beta = jnp.zeros((1, c), jnp.float32)
    mean = jnp.zeros((1, c), jnp.float32)
    var = jnp.ones((1, c), jnp.float32)
    scale = gamma / jnp.sqrt(var + BN_EPS)
    shift = beta + scale * (conv_bias - mean)
    return scale, shift


def make_pointgencon_params(key, n_pt_cols, feat_dim):
    """PointGenCon(bottleneck_size = n_pt_cols + feat_dim) parameters.

    conv1's weight is split into its point-coordinate rows (w1_pt, used in the
    kernel) and its latent rows (w1_f, folded into the layer-1 bias at forward
    time since f is identical for every point).
    """
    cin = n_pt_cols + feat_dim
    c1, c2, c3 = cin, cin // 2, cin // 4
    ks = jax.random.split(key, 7)
    w1, cb1 = _conv1d_params(ks[0], cin, c1)
    w2, cb2 = _conv1d_params(ks[1], c1, c2)
    w3, cb3 = _conv1d_params(ks[2], c2, c3)
    w4, cb4 = _conv1d_params(ks[3], c3, ODIM)
    s1, b1 = _bn_fold(ks[4], c1, cb1)
    s2, b2 = _bn_fold(ks[5], c2, cb2)
    s3, b3 = _bn_fold(ks[6], c3, cb3)
    # lane-dense last layer: zero-pad (c3, 3) -> (c3, 128) so stores are unmasked
    w4p = jnp.zeros((c3, ODIM_PAD), jnp.float32).at[:, :ODIM].set(w4)
    b4p = jnp.zeros((1, ODIM_PAD), jnp.float32).at[:, :ODIM].set(cb4)
    return {
        "w1_pt": w1[:n_pt_cols],                  # (n_pt_cols, c1) f32 (VPU path)
        "w1_f": w1[n_pt_cols:],                   # (feat_dim, c1) f32 (folded)
        "s1": s1, "b1": b1,
        "w2": w2.astype(jnp.bfloat16), "s2": s2, "b2": b2,
        "w3": w3.astype(jnp.bfloat16), "s3": s3, "b3": b3,
        "w4": w4p.astype(jnp.bfloat16), "b4": b4p,
    }


def make_inv_atlasnet_params(key, bottleneck_size, grid_dim):
    k_f, k_dec, k_inv = jax.random.split(key, 3)
    # OptEncoder: f ~ N(0, sqrt(2/F)), shape (1, F)
    f = math.sqrt(2.0 / float(bottleneck_size)) * jax.random.normal(
        k_f, (1, bottleneck_size), jnp.float32)
    return {
        "f": f,
        "decoder": make_pointgencon_params(k_dec, grid_dim, bottleneck_size),
        "inv_decoder": make_pointgencon_params(k_inv, ODIM, bottleneck_size),
    }


# ------------------------------- forward ------------------------------------
def inv_atlasnet_forward(x, grid, params, *, grid_num):
    """InvAtlasNet.forward (mode='OPT', eval).

    x    : (1, C>=3, H, W) — sliced to 3 channels, then ignored by OptEncoder.
    grid : (1, grid_dim, N) explicit grid (input[1]).
    grid_num is static (Python int).
    """
    if x.ndim == 4:
        x = x[:, :3, :, :]              # kept for fidelity; OptEncoder ignores it
    f = params["f"]                     # (1, F) == self.encoder(x) in OPT mode
    B, gd, N = grid.shape
    assert B == 1, "OPT mode: encoder latent f has batch 1"
    grid_t = jnp.transpose(grid[0])     # (N, gd)

    dec, inv = params["decoder"], params["inv_decoder"]
    # fold the broadcast latent f through layer 1: x@W1 = pts@W1[:k] + f@W1[k:]
    d_b1 = dec["b1"] + dec["s1"] * (f @ dec["w1_f"])
    i_b1 = inv["b1"] + inv["s1"] * (f @ inv["w1_f"])

    y, inv_y = fused_decoders_pallas(grid_t, dec, d_b1, inv, i_b1)

    # OPT mode shares one decoder, so torch.cat(outs, 2).transpose(2, 1) is
    # just y replicated grid_num times along the point axis (no HBM copies).
    yout = jnp.broadcast_to(y[None], (grid_num, N, ODIM)).reshape(
        1, grid_num * N, ODIM)
    return {"y": yout, "inv_x": inv_y[None], "grid_x": grid_t[None]}


# ----------------------------- reference (jnp) -------------------------------
def _stack_ref(pts, p, b1_eff):
    h = jnp.maximum((pts @ p["w1_pt"]) * p["s1"] + b1_eff, 0.0)
    h = jnp.dot(h.astype(jnp.bfloat16), p["w2"], preferred_element_type=jnp.float32)
    h = jnp.maximum(h * p["s2"] + p["b2"], 0.0)
    h = jnp.dot(h.astype(jnp.bfloat16), p["w3"], preferred_element_type=jnp.float32)
    h = jnp.maximum(h * p["s3"] + p["b3"], 0.0)
    h = jnp.dot(h.astype(jnp.bfloat16), p["w4"], preferred_element_type=jnp.float32)
    return jnp.tanh(h + p["b4"])[:, :ODIM]


def _forward_ref(x, grid, params, *, grid_num):
    f = params["f"]
    N = grid.shape[2]
    grid_t = jnp.transpose(grid[0])
    dec, inv = params["decoder"], params["inv_decoder"]
    d_b1 = dec["b1"] + dec["s1"] * (f @ dec["w1_f"])
    i_b1 = inv["b1"] + inv["s1"] * (f @ inv["w1_f"])
    y = _stack_ref(grid_t, dec, d_b1)
    inv_y = _stack_ref(y, inv, i_b1)
    yout = jnp.broadcast_to(y[None], (grid_num, N, ODIM)).reshape(
        1, grid_num * N, ODIM)
    return {"y": yout, "inv_x": inv_y[None], "grid_x": grid_t[None]}


# --------------------------------- main --------------------------------------
if __name__ == "__main__":
    # Small shapes consistent with the module (production: bottleneck=1024).
    bottleneck_size = 256
    grid_dim = 3
    grid_num = 2
    n_pts = 512          # points per grid patch (pts_num // grid_num)

    key = jax.random.PRNGKey(0)
    k_p, k_x, k_g = jax.random.split(key, 3)
    params = make_inv_atlasnet_params(k_p, bottleneck_size, grid_dim)

    # input image (unused by the OPT encoder; kept for signature fidelity)
    x = jax.random.normal(k_x, (1, 3, 16, 16), jnp.float32)

    # grid_dim == 3 branch of rand_grid: unit-normalized Gaussian directions
    g = jax.random.normal(k_g, (1, grid_dim, n_pts), jnp.float32) + 1e-9
    grid = g / jnp.linalg.norm(g, axis=1, keepdims=True)

    fwd = jax.jit(inv_atlasnet_forward, static_argnames=("grid_num",))
    out = jax.block_until_ready(fwd(x, grid, params, grid_num=grid_num))

    ref = _forward_ref(x, grid, params, grid_num=grid_num)

    assert out["y"].shape == (1, grid_num * n_pts, 3)
    assert out["inv_x"].shape == (1, n_pts, 3)
    assert out["grid_x"].shape == (1, n_pts, grid_dim)
    for name in ("y", "inv_x", "grid_x"):
        assert jnp.allclose(out[name], ref[name], atol=2e-3, rtol=2e-3), name

    print("KERNEL_OK")
</pallas_src>

<mosaic_0001>
module attributes {stable_mosaic.version = 11 : i64} {
  func.func @_fused_kernel(%arg0: i32, %arg1: memref<256x3xf32, #tpu.memory_space<vmem>>, %arg2: memref<3x259xf32, #tpu.memory_space<vmem>>, %arg3: memref<1x259xf32, #tpu.memory_space<vmem>>, %arg4: memref<1x259xf32, #tpu.memory_space<vmem>>, %arg5: memref<259x129xbf16, #tpu.memory_space<vmem>>, %arg6: memref<1x129xf32, #tpu.memory_space<vmem>>, %arg7: memref<1x129xf32, #tpu.memory_space<vmem>>, %arg8: memref<129x64xbf16, #tpu.memory_space<vmem>>, %arg9: memref<1x64xf32, #tpu.memory_space<vmem>>, %arg10: memref<1x64xf32, #tpu.memory_space<vmem>>, %arg11: memref<64x128xbf16, #tpu.memory_space<vmem>>, %arg12: memref<1x128xf32, #tpu.memory_space<vmem>>, %arg13: memref<3x259xf32, #tpu.memory_space<vmem>>, %arg14: memref<1x259xf32, #tpu.memory_space<vmem>>, %arg15: memref<1x259xf32, #tpu.memory_space<vmem>>, %arg16: memref<259x129xbf16, #tpu.memory_space<vmem>>, %arg17: memref<1x129xf32, #tpu.memory_space<vmem>>, %arg18: memref<1x129xf32, #tpu.memory_space<vmem>>, %arg19: memref<129x64xbf16, #tpu.memory_space<vmem>>, %arg20: memref<1x64xf32, #tpu.memory_space<vmem>>, %arg21: memref<1x64xf32, #tpu.memory_space<vmem>>, %arg22: memref<64x128xbf16, #tpu.memory_space<vmem>>, %arg23: memref<1x128xf32, #tpu.memory_space<vmem>>, %arg24: memref<256x128xf32, #tpu.memory_space<vmem>>, %arg25: memref<256x128xf32, #tpu.memory_space<vmem>>) attributes {dimension_semantics = [#tpu.dimension_semantics<parallel>], iteration_bounds = array<i64: 2>, scalar_prefetch = 0 : i64, scratch_operands = 0 : i64, tpu.core_type = #tpu.core_type<tc>, window_params = [{transform_indices = @transform_0, window_bounds = array<i64: 256, 3>}, {pipeline_mode = #tpu.pipeline_mode<synchronous>, transform_indices = @transform_1, window_bounds = array<i64: 3, 259>}, {pipeline_mode = #tpu.pipeline_mode<synchronous>, transform_indices = @transform_2, window_bounds = array<i64: 1, 259>}, {pipeline_mode = #tpu.pipeline_mode<synchronous>, transform_indices = @transform_3, window_bounds = array<i64: 1, 259>}, {pipeline_mode = #tpu.pipeline_mode<synchronous>, transform_indices = @transform_4, window_bounds = array<i64: 259, 129>}, {pipeline_mode = #tpu.pipeline_mode<synchronous>, transform_indices = @transform_5, window_bounds = array<i64: 1, 129>}, {pipeline_mode = #tpu.pipeline_mode<synchronous>, transform_indices = @transform_6, window_bounds = array<i64: 1, 129>}, {pipeline_mode = #tpu.pipeline_mode<synchronous>, transform_indices = @transform_7, window_bounds = array<i64: 129, 64>}, {pipeline_mode = #tpu.pipeline_mode<synchronous>, transform_indices = @transform_8, window_bounds = array<i64: 1, 64>}, {pipeline_mode = #tpu.pipeline_mode<synchronous>, transform_indices = @transform_9, window_bounds = array<i64: 1, 64>}, {pipeline_mode = #tpu.pipeline_mode<synchronous>, transform_indices = @transform_10, window_bounds = array<i64: 64, 128>}, {pipeline_mode = #tpu.pipeline_mode<synchronous>, transform_indices = @transform_11, window_bounds = array<i64: 1, 128>}, {pipeline_mode = #tpu.pipeline_mode<synchronous>, transform_indices = @transform_12, window_bounds = array<i64: 3, 259>}, {pipeline_mode = #tpu.pipeline_mode<synchronous>, transform_indices = @transform_13, window_bounds = array<i64: 1, 259>}, {pipeline_mode = #tpu.pipeline_mode<synchronous>, transform_indices = @transform_14, window_bounds = array<i64: 1, 259>}, {pipeline_mode = #tpu.pipeline_mode<synchronous>, transform_indices = @transform_15, window_bounds = array<i64: 259, 129>}, {pipeline_mode = #tpu.pipeline_mode<synchronous>, transform_indices = @transform_16, window_bounds = array<i64: 1, 129>}, {pipeline_mode = #tpu.pipeline_mode<synchronous>, transform_indices = @transform_17, window_bounds = array<i64: 1, 129>}, {pipeline_mode = #tpu.pipeline_mode<synchronous>, transform_indices = @transform_18, window_bounds = array<i64: 129, 64>}, {pipeline_mode = #tpu.pipeline_mode<synchronous>, transform_indices = @transform_19, window_bounds = array<i64: 1, 64>}, {pipeline_mode = #tpu.pipeline_mode<synchronous>, transform_indices = @transform_20, window_bounds = array<i64: 1, 64>}, {pipeline_mode = #tpu.pipeline_mode<synchronous>, transform_indices = @transform_21, window_bounds = array<i64: 64, 128>}, {pipeline_mode = #tpu.pipeline_mode<synchronous>, transform_indices = @transform_22, window_bounds = array<i64: 1, 128>}, {transform_indices = @transform_23, window_bounds = array<i64: 256, 128>}, {transform_indices = @transform_24, window_bounds = array<i64: 256, 128>}]} {
    %c0 = arith.constant 0 : index
    %c0_0 = arith.constant 0 : index
    %0 = vector.load %arg1[%c0, %c0_0] : memref<256x3xf32, #tpu.memory_space<vmem>>, vector<256x3xf32>
    %c0_1 = arith.constant 0 : index
    %c0_2 = arith.constant 0 : index
    %1 = vector.load %arg2[%c0_1, %c0_2] : memref<3x259xf32, #tpu.memory_space<vmem>>, vector<3x259xf32>
    %2 = vector.extract_strided_slice %0 {offsets = [0, 0], sizes = [256, 1], strides = [1, 1]} : vector<256x3xf32> to vector<256x1xf32>
    %3 = vector.extract_strided_slice %1 {offsets = [0, 0], sizes = [1, 259], strides = [1, 1]} : vector<3x259xf32> to vector<1x259xf32>
    %4 = vector.broadcast %2 : vector<256x1xf32> to vector<256x259xf32>
    %5 = vector.broadcast %3 : vector<1x259xf32> to vector<256x259xf32>
    %6 = arith.mulf %4, %5 : vector<256x259xf32>
    %7 = vector.extract_strided_slice %0 {offsets = [0, 1], sizes = [256, 1], strides = [1, 1]} : vector<256x3xf32> to vector<256x1xf32>
    %8 = vector.extract_strided_slice %1 {offsets = [1, 0], sizes = [1, 259], strides = [1, 1]} : vector<3x259xf32> to vector<1x259xf32>
    %9 = vector.broadcast %7 : vector<256x1xf32> to vector<256x259xf32>
    %10 = vector.broadcast %8 : vector<1x259xf32> to vector<256x259xf32>
    %11 = arith.mulf %9, %10 : vector<256x259xf32>
    %12 = arith.addf %6, %11 : vector<256x259xf32>
    %13 = vector.extract_strided_slice %0 {offsets = [0, 2], sizes = [256, 1], strides = [1, 1]} : vector<256x3xf32> to vector<256x1xf32>
    %14 = vector.extract_strided_slice %1 {offsets = [2, 0], sizes = [1, 259], strides = [1, 1]} : vector<3x259xf32> to vector<1x259xf32>
    %15 = vector.broadcast %13 : vector<256x1xf32> to vector<256x259xf32>
    %16 = vector.broadcast %14 : vector<1x259xf32> to vector<256x259xf32>
    %17 = arith.mulf %15, %16 : vector<256x259xf32>
    %18 = arith.addf %12, %17 : vector<256x259xf32>
    %c0_3 = arith.constant 0 : index
    %c0_4 = arith.constant 0 : index
    %19 = vector.load %arg3[%c0_3, %c0_4] : memref<1x259xf32, #tpu.memory_space<vmem>>, vector<1x259xf32>
    %20 = vector.broadcast %19 : vector<1x259xf32> to vector<256x259xf32>
    %21 = arith.mulf %18, %20 : vector<256x259xf32>
    %c0_5 = arith.constant 0 : index
    %c0_6 = arith.constant 0 : index
    %22 = vector.load %arg4[%c0_5, %c0_6] : memref<1x259xf32, #tpu.memory_space<vmem>>, vector<1x259xf32>
    %23 = vector.broadcast %22 : vector<1x259xf32> to vector<256x259xf32>
    %24 = arith.addf %21, %23 : vector<256x259xf32>
    %cst = arith.constant 0.000000e+00 : f32
    %25 = vector.broadcast %cst : f32 to vector<256x259xf32>
    %26 = arith.maximumf %24, %25 : vector<256x259xf32>
    %27 = arith.truncf %26 : vector<256x259xf32> to vector<256x259xbf16>
    %c0_7 = arith.constant 0 : index
    %c0_8 = arith.constant 0 : index
    %28 = vector.load %arg5[%c0_7, %c0_8] : memref<259x129xbf16, #tpu.memory_space<vmem>>, vector<259x129xbf16>
    %cst_9 = arith.constant dense<0.000000e+00> : vector<256x129xf32>
    %29 = tpu.matmul %27, %28, %cst_9 {dimension_numbers = #tpu.dot_dimension_numbers<[1], [0], [0], [1], [0, 0, 1, 1], [], []>} : vector<256x259xbf16>, vector<259x129xbf16>, vector<256x129xf32> -> vector<256x129xf32>
    %c0_10 = arith.constant 0 : index
    %c0_11 = arith.constant 0 : index
    %30 = vector.load %arg6[%c0_10, %c0_11] : memref<1x129xf32, #tpu.memory_space<vmem>>, vector<1x129xf32>
    %31 = vector.broadcast %30 : vector<1x129xf32> to vector<256x129xf32>
    %32 = arith.mulf %29, %31 : vector<256x129xf32>
    %c0_12 = arith.constant 0 : index
    %c0_13 = arith.constant 0 : index
    %33 = vector.load %arg7[%c0_12, %c0_13] : memref<1x129xf32, #tpu.memory_space<vmem>>, vector<1x129xf32>
    %34 = vector.broadcast %33 : vector<1x129xf32> to vector<256x129xf32>
    %35 = arith.addf %32, %34 : vector<256x129xf32>
    %cst_14 = arith.constant 0.000000e+00 : f32
    %36 = vector.broadcast %cst_14 : f32 to vector<256x129xf32>
    %37 = arith.maximumf %35, %36 : vector<256x129xf32>
    %38 = arith.truncf %37 : vector<256x129xf32> to vector<256x129xbf16>
    %c0_15 = arith.constant 0 : index
    %c0_16 = arith.constant 0 : index
    %39 = vector.load %arg8[%c0_15, %c0_16] : memref<129x64xbf16, #tpu.memory_space<vmem>>, vector<129x64xbf16>
    %cst_17 = arith.constant dense<0.000000e+00> : vector<256x64xf32>
    %40 = tpu.matmul %38, %39, %cst_17 {dimension_numbers = #tpu.dot_dimension_numbers<[1], [0], [0], [1], [0, 0, 1, 1], [], []>} : vector<256x129xbf16>, vector<129x64xbf16>, vector<256x64xf32> -> vector<256x64xf32>
    %c0_18 = arith.constant 0 : index
    %c0_19 = arith.constant 0 : index
    %41 = vector.load %arg9[%c0_18, %c0_19] : memref<1x64xf32, #tpu.memory_space<vmem>>, vector<1x64xf32>
    %42 = vector.broadcast %41 : vector<1x64xf32> to vector<256x64xf32>
    %43 = arith.mulf %40, %42 : vector<256x64xf32>
    %c0_20 = arith.constant 0 : index
    %c0_21 = arith.constant 0 : index
    %44 = vector.load %arg10[%c0_20, %c0_21] : memref<1x64xf32, #tpu.memory_space<vmem>>, vector<1x64xf32>
    %45 = vector.broadcast %44 : vector<1x64xf32> to vector<256x64xf32>
    %46 = arith.addf %43, %45 : vector<256x64xf32>
    %cst_22 = arith.constant 0.000000e+00 : f32
    %47 = vector.broadcast %cst_22 : f32 to vector<256x64xf32>
    %48 = arith.maximumf %46, %47 : vector<256x64xf32>
    %49 = arith.truncf %48 : vector<256x64xf32> to vector<256x64xbf16>
    %c0_23 = arith.constant 0 : index
    %c0_24 = arith.constant 0 : index
    %50 = vector.load %arg11[%c0_23, %c0_24] : memref<64x128xbf16, #tpu.memory_space<vmem>>, vector<64x128xbf16>
    %cst_25 = arith.constant dense<0.000000e+00> : vector<256x128xf32>
    %51 = tpu.matmul %49, %50, %cst_25 {dimension_numbers = #tpu.dot_dimension_numbers<[1], [0], [0], [1], [0, 0, 1, 1], [], []>} : vector<256x64xbf16>, vector<64x128xbf16>, vector<256x128xf32> -> vector<256x128xf32>
    %c0_26 = arith.constant 0 : index
    %c0_27 = arith.constant 0 : index
    %52 = vector.load %arg12[%c0_26, %c0_27] : memref<1x128xf32, #tpu.memory_space<vmem>>, vector<1x128xf32>
    %53 = vector.broadcast %52 : vector<1x128xf32> to vector<256x128xf32>
    %54 = arith.addf %51, %53 : vector<256x128xf32>
    %55 = math.tanh %54 : vector<256x128xf32>
    %c0_28 = arith.constant 0 : index
    %c0_29 = arith.constant 0 : index
    %56 = vector.load %arg24[%c0_28, %c0_29] : memref<256x128xf32, #tpu.memory_space<vmem>>, vector<256x128xf32>
    tpu.vector_store %arg24[%c0_28, %c0_29], %55 {strides = array<i32>} : memref<256x128xf32, #tpu.memory_space<vmem>>, vector<256x128xf32>,
    %57 = vector.extract_strided_slice %55 {offsets = [0, 0], sizes = [256, 3], strides = [1, 1]} : vector<256x128xf32> to vector<256x3xf32>
    %c0_30 = arith.constant 0 : index
    %c0_31 = arith.constant 0 : index
    %58 = vector.load %arg13[%c0_30, %c0_31] : memref<3x259xf32, #tpu.memory_space<vmem>>, vector<3x259xf32>
    %59 = vector.extract_strided_slice %57 {offsets = [0, 0], sizes = [256, 1], strides = [1, 1]} : vector<256x3xf32> to vector<256x1xf32>
    %60 = vector.extract_strided_slice %58 {offsets = [0, 0], sizes = [1, 259], strides = [1, 1]} : vector<3x259xf32> to vector<1x259xf32>
    %61 = vector.broadcast %59 : vector<256x1xf32> to vector<256x259xf32>
    %62 = vector.broadcast %60 : vector<1x259xf32> to vector<256x259xf32>
    %63 = arith.mulf %61, %62 : vector<256x259xf32>
    %64 = vector.extract_strided_slice %57 {offsets = [0, 1], sizes = [256, 1], strides = [1, 1]} : vector<256x3xf32> to vector<256x1xf32>
    %65 = vector.extract_strided_slice %58 {offsets = [1, 0], sizes = [1, 259], strides = [1, 1]} : vector<3x259xf32> to vector<1x259xf32>
    %66 = vector.broadcast %64 : vector<256x1xf32> to vector<256x259xf32>
    %67 = vector.broadcast %65 : vector<1x259xf32> to vector<256x259xf32>
    %68 = arith.mulf %66, %67 : vector<256x259xf32>
    %69 = arith.addf %63, %68 : vector<256x259xf32>
    %70 = vector.extract_strided_slice %57 {offsets = [0, 2], sizes = [256, 1], strides = [1, 1]} : vector<256x3xf32> to vector<256x1xf32>
    %71 = vector.extract_strided_slice %58 {offsets = [2, 0], sizes = [1, 259], strides = [1, 1]} : vector<3x259xf32> to vector<1x259xf32>
    %72 = vector.broadcast %70 : vector<256x1xf32> to vector<256x259xf32>
    %73 = vector.broadcast %71 : vector<1x259xf32> to vector<256x259xf32>
    %74 = arith.mulf %72, %73 : vector<256x259xf32>
    %75 = arith.addf %69, %74 : vector<256x259xf32>
    %c0_32 = arith.constant 0 : index
    %c0_33 = arith.constant 0 : index
    %76 = vector.load %arg14[%c0_32, %c0_33] : memref<1x259xf32, #tpu.memory_space<vmem>>, vector<1x259xf32>
    %77 = vector.broadcast %76 : vector<1x259xf32> to vector<256x259xf32>
    %78 = arith.mulf %75, %77 : vector<256x259xf32>
    %c0_34 = arith.constant 0 : index
    %c0_35 = arith.constant 0 : index
    %79 = vector.load %arg15[%c0_34, %c0_35] : memref<1x259xf32, #tpu.memory_space<vmem>>, vector<1x259xf32>
    %80 = vector.broadcast %79 : vector<1x259xf32> to vector<256x259xf32>
    %81 = arith.addf %78, %80 : vector<256x259xf32>
    %cst_36 = arith.constant 0.000000e+00 : f32
    %82 = vector.broadcast %cst_36 : f32 to vector<256x259xf32>
    %83 = arith.maximumf %81, %82 : vector<256x259xf32>
    %84 = arith.truncf %83 : vector<256x259xf32> to vector<256x259xbf16>
    %c0_37 = arith.constant 0 : index
    %c0_38 = arith.constant 0 : index
    %85 = vector.load %arg16[%c0_37, %c0_38] : memref<259x129xbf16, #tpu.memory_space<vmem>>, vector<259x129xbf16>
    %cst_39 = arith.constant dense<0.000000e+00> : vector<256x129xf32>
    %86 = tpu.matmul %84, %85, %cst_39 {dimension_numbers = #tpu.dot_dimension_numbers<[1], [0], [0], [1], [0, 0, 1, 1], [], []>} : vector<256x259xbf16>, vector<259x129xbf16>, vector<256x129xf32> -> vector<256x129xf32>
    %c0_40 = arith.constant 0 : index
    %c0_41 = arith.constant 0 : index
    %87 = vector.load %arg17[%c0_40, %c0_41] : memref<1x129xf32, #tpu.memory_space<vmem>>, vector<1x129xf32>
    %88 = vector.broadcast %87 : vector<1x129xf32> to vector<256x129xf32>
    %89 = arith.mulf %86, %88 : vector<256x129xf32>
    %c0_42 = arith.constant 0 : index
    %c0_43 = arith.constant 0 : index
    %90 = vector.load %arg18[%c0_42, %c0_43] : memref<1x129xf32, #tpu.memory_space<vmem>>, vector<1x129xf32>
    %91 = vector.broadcast %90 : vector<1x129xf32> to vector<256x129xf32>
    %92 = arith.addf %89, %91 : vector<256x129xf32>
    %cst_44 = arith.constant 0.000000e+00 : f32
    %93 = vector.broadcast %cst_44 : f32 to vector<256x129xf32>
    %94 = arith.maximumf %92, %93 : vector<256x129xf32>
    %95 = arith.truncf %94 : vector<256x129xf32> to vector<256x129xbf16>
    %c0_45 = arith.constant 0 : index
    %c0_46 = arith.constant 0 : index
    %96 = vector.load %arg19[%c0_45, %c0_46] : memref<129x64xbf16, #tpu.memory_space<vmem>>, vector<129x64xbf16>
    %cst_47 = arith.constant dense<0.000000e+00> : vector<256x64xf32>
    %97 = tpu.matmul %95, %96, %cst_47 {dimension_numbers = #tpu.dot_dimension_numbers<[1], [0], [0], [1], [0, 0, 1, 1], [], []>} : vector<256x129xbf16>, vector<129x64xbf16>, vector<256x64xf32> -> vector<256x64xf32>
    %c0_48 = arith.constant 0 : index
    %c0_49 = arith.constant 0 : index
    %98 = vector.load %arg20[%c0_48, %c0_49] : memref<1x64xf32, #tpu.memory_space<vmem>>, vector<1x64xf32>
    %99 = vector.broadcast %98 : vector<1x64xf32> to vector<256x64xf32>
    %100 = arith.mulf %97, %99 : vector<256x64xf32>
    %c0_50 = arith.constant 0 : index
    %c0_51 = arith.constant 0 : index
    %101 = vector.load %arg21[%c0_50, %c0_51] : memref<1x64xf32, #tpu.memory_space<vmem>>, vector<1x64xf32>
    %102 = vector.broadcast %101 : vector<1x64xf32> to vector<256x64xf32>
    %103 = arith.addf %100, %102 : vector<256x64xf32>
    %cst_52 = arith.constant 0.000000e+00 : f32
    %104 = vector.broadcast %cst_52 : f32 to vector<256x64xf32>
    %105 = arith.maximumf %103, %104 : vector<256x64xf32>
    %106 = arith.truncf %105 : vector<256x64xf32> to vector<256x64xbf16>
    %c0_53 = arith.constant 0 : index
    %c0_54 = arith.constant 0 : index
    %107 = vector.load %arg22[%c0_53, %c0_54] : memref<64x128xbf16, #tpu.memory_space<vmem>>, vector<64x128xbf16>
    %cst_55 = arith.constant dense<0.000000e+00> : vector<256x128xf32>
    %108 = tpu.matmul %106, %107, %cst_55 {dimension_numbers = #tpu.dot_dimension_numbers<[1], [0], [0], [1], [0, 0, 1, 1], [], []>} : vector<256x64xbf16>, vector<64x128xbf16>, vector<256x128xf32> -> vector<256x128xf32>
    %c0_56 = arith.constant 0 : index
    %c0_57 = arith.constant 0 : index
    %109 = vector.load %arg23[%c0_56, %c0_57] : memref<1x128xf32, #tpu.memory_space<vmem>>, vector<1x128xf32>
    %110 = vector.broadcast %109 : vector<1x128xf32> to vector<256x128xf32>
    %111 = arith.addf %108, %110 : vector<256x128xf32>
    %112 = math.tanh %111 : vector<256x128xf32>
    %c0_58 = arith.constant 0 : index
    %c0_59 = arith.constant 0 : index
    %113 = vector.load %arg25[%c0_58, %c0_59] : memref<256x128xf32, #tpu.memory_space<vmem>>, vector<256x128xf32>
    tpu.vector_store %arg25[%c0_58, %c0_59], %112 {strides = array<i32>} : memref<256x128xf32, #tpu.memory_space<vmem>>, vector<256x128xf32>,
    return
  }
  func.func @transform_0(%arg0: i32) -> (i32, i32) {
    %c0_i32 = arith.constant 0 : i32
    %c0_i32_0 = arith.constant 0 : i32
    return %arg0, %c0_i32 : i32, i32
  }
  func.func @transform_1(%arg0: i32) -> (i32, i32) {
    %c0_i32 = arith.constant 0 : i32
    %c0_i32_0 = arith.constant 0 : i32
    %c0_i32_1 = arith.constant 0 : i32
    return %c0_i32, %c0_i32_0 : i32, i32
  }
  func.func @transform_2(%arg0: i32) -> (i32, i32) {
    %c0_i32 = arith.constant 0 : i32
    %c0_i32_0 = arith.constant 0 : i32
    %c0_i32_1 = arith.constant 0 : i32
    return %c0_i32, %c0_i32_0 : i32, i32
  }
  func.func @transform_3(%arg0: i32) -> (i32, i32) {
    %c0_i32 = arith.constant 0 : i32
    %c0_i32_0 = arith.constant 0 : i32
    %c0_i32_1 = arith.constant 0 : i32
    return %c0_i32, %c0_i32_0 : i32, i32
  }
  func.func @transform_4(%arg0: i32) -> (i32, i32) {
    %c0_i32 = arith.constant 0 : i32
    %c0_i32_0 = arith.constant 0 : i32
    %c0_i32_1 = arith.constant 0 : i32
    return %c0_i32, %c0_i32_0 : i32, i32
  }
  func.func @transform_5(%arg0: i32) -> (i32, i32) {
    %c0_i32 = arith.constant 0 : i32
    %c0_i32_0 = arith.constant 0 : i32
    %c0_i32_1 = arith.constant 0 : i32
    return %c0_i32, %c0_i32_0 : i32, i32
  }
  func.func @transform_6(%arg0: i32) -> (i32, i32) {
    %c0_i32 = arith.constant 0 : i32
    %c0_i32_0 = arith.constant 0 : i32
    %c0_i32_1 = arith.constant 0 : i32
    return %c0_i32, %c0_i32_0 : i32, i32
  }
  func.func @transform_7(%arg0: i32) -> (i32, i32) {
    %c0_i32 = arith.constant 0 : i32
    %c0_i32_0 = arith.constant 0 : i32
    %c0_i32_1 = arith.constant 0 : i32
    return %c0_i32, %c0_i32_0 : i32, i32
  }
  func.func @transform_8(%arg0: i32) -> (i32, i32) {
    %c0_i32 = arith.constant 0 : i32
    %c0_i32_0 = arith.constant 0 : i32
    %c0_i32_1 = arith.constant 0 : i32
    return %c0_i32, %c0_i32_0 : i32, i32
  }
  func.func @transform_9(%arg0: i32) -> (i32, i32) {
    %c0_i32 = arith.constant 0 : i32
    %c0_i32_0 = arith.constant 0 : i32
    %c0_i32_1 = arith.constant 0 : i32
    return %c0_i32, %c0_i32_0 : i32, i32
  }
  func.func @transform_10(%arg0: i32) -> (i32, i32) {
    %c0_i32 = arith.constant 0 : i32
    %c0_i32_0 = arith.constant 0 : i32
    %c0_i32_1 = arith.constant 0 : i32
    return %c0_i32, %c0_i32_0 : i32, i32
  }
  func.func @transform_11(%arg0: i32) -> (i32, i32) {
    %c0_i32 = arith.constant 0 : i32
    %c0_i32_0 = arith.constant 0 : i32
    %c0_i32_1 = arith.constant 0 : i32
    return %c0_i32, %c0_i32_0 : i32, i32
  }
  func.func @transform_12(%arg0: i32) -> (i32, i32) {
    %c0_i32 = arith.constant 0 : i32
    %c0_i32_0 = arith.constant 0 : i32
    %c0_i32_1 = arith.constant 0 : i32
    return %c0_i32, %c0_i32_0 : i32, i32
  }
  func.func @transform_13(%arg0: i32) -> (i32, i32) {
    %c0_i32 = arith.constant 0 : i32
    %c0_i32_0 = arith.constant 0 : i32
    %c0_i32_1 = arith.constant 0 : i32
    return %c0_i32, %c0_i32_0 : i32, i32
  }
  func.func @transform_14(%arg0: i32) -> (i32, i32) {
    %c0_i32 = arith.constant 0 : i32
    %c0_i32_0 = arith.constant 0 : i32
    %c0_i32_1 = arith.constant 0 : i32
    return %c0_i32, %c0_i32_0 : i32, i32
  }
  func.func @transform_15(%arg0: i32) -> (i32, i32) {
    %c0_i32 = arith.constant 0 : i32
    %c0_i32_0 = arith.constant 0 : i32
    %c0_i32_1 = arith.constant 0 : i32
    return %c0_i32, %c0_i32_0 : i32, i32
  }
  func.func @transform_16(%arg0: i32) -> (i32, i32) {
    %c0_i32 = arith.constant 0 : i32
    %c0_i32_0 = arith.constant 0 : i32
    %c0_i32_1 = arith.constant 0 : i32
    return %c0_i32, %c0_i32_0 : i32, i32
  }
  func.func @transform_17(%arg0: i32) -> (i32, i32) {
    %c0_i32 = arith.constant 0 : i32
    %c0_i32_0 = arith.constant 0 : i32
    %c0_i32_1 = arith.constant 0 : i32
    return %c0_i32, %c0_i32_0 : i32, i32
  }
  func.func @transform_18(%arg0: i32) -> (i32, i32) {
    %c0_i32 = arith.constant 0 : i32
    %c0_i32_0 = arith.constant 0 : i32
    %c0_i32_1 = arith.constant 0 : i32
    return %c0_i32, %c0_i32_0 : i32, i32
  }
  func.func @transform_19(%arg0: i32) -> (i32, i32) {
    %c0_i32 = arith.constant 0 : i32
    %c0_i32_0 = arith.constant 0 : i32
    %c0_i32_1 = arith.constant 0 : i32
    return %c0_i32, %c0_i32_0 : i32, i32
  }
  func.func @transform_20(%arg0: i32) -> (i32, i32) {
    %c0_i32 = arith.constant 0 : i32
    %c0_i32_0 = arith.constant 0 : i32
    %c0_i32_1 = arith.constant 0 : i32
    return %c0_i32, %c0_i32_0 : i32, i32
  }
  func.func @transform_21(%arg0: i32) -> (i32, i32) {
    %c0_i32 = arith.constant 0 : i32
    %c0_i32_0 = arith.constant 0 : i32
    %c0_i32_1 = arith.constant 0 : i32
    return %c0_i32, %c0_i32_0 : i32, i32
  }
  func.func @transform_22(%arg0: i32) -> (i32, i32) {
    %c0_i32 = arith.constant 0 : i32
    %c0_i32_0 = arith.constant 0 : i32
    %c0_i32_1 = arith.constant 0 : i32
    return %c0_i32, %c0_i32_0 : i32, i32
  }
  func.func @transform_23(%arg0: i32) -> (i32, i32) {
    %c0_i32 = arith.constant 0 : i32
    %c0_i32_0 = arith.constant 0 : i32
    return %arg0, %c0_i32 : i32, i32
  }
  func.func @transform_24(%arg0: i32) -> (i32, i32) {
    %c0_i32 = arith.constant 0 : i32
    %c0_i32_0 = arith.constant 0 : i32
    return %arg0, %c0_i32 : i32, i32
  }
}

</mosaic_0001>

<bundles_post_ra>
// kernel: inv_atlasnet_forward.1
= control target key start
LH: loop header
LB: loop body
LE: loop exit
PB: predicated region body
PF: predicated region fallthrough
CT: control target
= control target key end

     0   :  { %s10869_s0 = inlined_call_operand.vmem [shape: f32[512,3], index: 0, kind: input, shape index: {}]   ;;  %s10870_s1 = inlined_call_operand.vmem [shape: f32[3,259], index: 1, kind: input, shape index: {}]   ;;  %s10871_s2 = inlined_call_operand.vmem [shape: f32[1,259], index: 2, kind: input, shape index: {}]   ;;  %s10872_s3 = inlined_call_operand.vmem [shape: f32[1,259], index: 3, kind: input, shape index: {}]   ;;  %s10873_s4 = inlined_call_operand.vmem [shape: bf16[259,129], index: 4, kind: input, shape index: {}]   ;;  %s10874_s5 = inlined_call_operand.vmem [shape: f32[1,129], index: 5, kind: input, shape index: {}]   ;;  %s10875_s6 = inlined_call_operand.vmem [shape: f32[1,129], index: 6, kind: input, shape index: {}]   ;;  %s10876_s7 = inlined_call_operand.vmem [shape: bf16[129,64], index: 7, kind: input, shape index: {}]   ;;  %s10877_s8 = inlined_call_operand.vmem [shape: f32[1,64], index: 8, kind: input, shape index: {}]   ;;  %s10878_s9 = inlined_call_operand.vmem [shape: f32[1,64], index: 9, kind: input, shape index: {}]   ;;  %s10879_s10 = inlined_call_operand.vmem [shape: bf16[64,128], index: 10, kind: input, shape index: {}]   ;;  %s10880_s11 = inlined_call_operand.vmem [shape: f32[1,128], index: 11, kind: input, shape index: {}]   ;;  %s10881_s12 = inlined_call_operand.vmem [shape: f32[3,259], index: 12, kind: input, shape index: {}]   ;;  %s10882_s13 = inlined_call_operand.vmem [shape: f32[1,259], index: 13, kind: input, shape index: {}]   ;;  %s10883_s14 = inlined_call_operand.vmem [shape: f32[1,259], index: 14, kind: input, shape index: {}]   ;;  %s10884_s15 = inlined_call_operand.vmem [shape: bf16[259,129], index: 15, kind: input, shape index: {}]   ;;  %s10885_s16 = inlined_call_operand.vmem [shape: f32[1,129], index: 16, kind: input, shape index: {}]   ;;  %s10886_s17 = inlined_call_operand.vmem [shape: f32[1,129], index: 17, kind: input, shape index: {}]   ;;  %s10887_s18 = inlined_call_operand.vmem [shape: bf16[129,64], index: 18, kind: input, shape index: {}]   ;;  %s10888_s19 = inlined_call_operand.vmem [shape: f32[1,64], index: 19, kind: input, shape index: {}]   ;;  %s10889_s20 = inlined_call_operand.vmem [shape: f32[1,64], index: 20, kind: input, shape index: {}]   ;;  %s10890_s21 = inlined_call_operand.vmem [shape: bf16[64,128], index: 21, kind: input, shape index: {}]   ;;  %s10891_s22 = inlined_call_operand.vmem [shape: f32[1,128], index: 22, kind: input, shape index: {}]   ;;  %s10892_s23 = inlined_call_operand.vmem [shape: f32[512,128], index: 23, kind: output, shape index: {0}]   ;;  %s10893_s24 = inlined_call_operand.vmem [shape: f32[512,128], index: 24, kind: output, shape index: {1}]  }
   0x1   :  { %10928 = sst [smem:[#allocation18_spill]] %s10869_s0 }
   0x2   :  { %10929 = sst [smem:[#allocation19_spill]] %s10870_s1 }
   0x3   :  { %10930 = sst [smem:[#allocation20_spill]] %s10871_s2 }
   0x4   :  { %10931 = sst [smem:[#allocation21_spill]] %s10872_s3 }
   0x5   :  { %10932 = sst [smem:[#allocation22_spill]] %s10873_s4 }
   0x6   :  { %10933 = sst [smem:[#allocation23_spill]] %s10874_s5  ;;  %s7685_s5 = smov 0  }
   0x7   :  { %10934 = sst [smem:[#allocation24_spill]] %s10875_s6 }
   0x8   :  { %10935 = sst [smem:[#allocation25_spill]] %s10876_s7 }
   0x9   :  { %10936 = sst [smem:[#allocation26_spill]] %s10877_s8 }
   0xa LB: > { %s6797_s26 = sadd.s32 4294967295, %s7554_s5   ;;  %p6801_p0 = scmp.ge.s32.totalorder %s7554_s5, 1  ;;  %s7554_s5 = sphi %s7685_s5, %s35_s5  }
   0xb   : > { %p666_p1 = scmp.lt.s32.totalorder %s7554_s5, 3 }
   0xd   : > { %p667_p2 = pnand %p6801_p0, %p666_p1 }
   0xf   : > { %670 = sbr.rel (%p667_p2) target bundleno = 2116 (0x844), region = 112 }
  0x14   : > { %s6802_s27 = sshll.u32 %s6797_s26, 5  ;;  %v10906_v0 = vmov 2   ;;  %v10900_v1 = vmov 1   ;;  %s10937_s2 = sld [smem:[#allocation22_spill]]  ;;  %v10902_v5 = vmov 0   ;;  %vm2386_vm0 = vcmask 1040384  }
  0x15   : > { %7171 = vset.pattern.permute.xlu0 %v10906_v0  ;;  %7170 = vset.pattern.permute.xlu1 %v10900_v1  ;;  %p738_p3 = scmp.lt.s32.totalorder %s6802_s27, 63  ;;  %s10938_s26 = sld [smem:[#allocation18_spill]]  ;;  %vm2387_vm1 = vcmask 1041408   ;;  %v7559_v26 = vmov 65535   ;;  %vm2337_vm2 = vcmask 23552   ;;  %vm3098_vm3 = vcmask 7168  }
  0x16   : > { %2621 = vmatprep.mubr.bf16.mxu1 %v10902_v5  ;;  %v2388_v27 = vsel %vm2386_vm0, 4294967295, %v7559_v26  ;;  %s10942_s30 = sld [smem:[#allocation19_spill]]  ;;  %vm3478_vm4 = vcmask 523264  }
  0x17   : > { %s11017_s27 = smov (!%p738_p3, %s6802_s27), 63  ;;  %v7769_v30 = vsel %vm2387_vm1, %v2388_v27, 0  ;;  %s10950_s25 = sld [smem:[#allocation25_spill]] }
  0x18   : > { %s7705_s3 = sshll.u32 %s11017_s27, 3  ;;  %10939 = vst [vmem:[#allocation2_spill] sm:$0xff] %v7769_v30  ;;  %s10946_s27 = sld [smem:[#allocation21_spill]] }
  0x19   : > { %s10960_s0 = sld [smem:[#allocation23_spill]]  ;;  %s9112_s7 = scalar_lea.vmem %s10892_s23, %s7705_s3 }
  0x1a   : > { %v7283_v2 = vld [vmem:[%s10937_s2 + $0x74] ss:$8 sps:$4 sm:$0xff]   ;;  %v7285_v3 = vld [vmem:[%s10937_s2 + $0x70] ss:$8 sps:$4 sm:$0xff]   ;;  %v7286_v4 = vld [vmem:[%s10937_s2 + $0x64] ss:$8 sps:$4 sm:$0xff]  }
  0x1b   : > { %2396 = vmatprep.subr.bf16.mxu0 %v7283_v2  ;;  %v7288_v6 = vld [vmem:[%s10937_s2 + $0x60] ss:$8 sps:$4 sm:$0xff]   ;;  %s7714_s28 = scalar_lea.vmem %s10938_s26, %s7705_s3  ;;  %v7289_v7 = vld [vmem:[%s10937_s2 + $0x54] ss:$8 sps:$4 sm:$0xff]   ;;  %v7291_v11 = vld [vmem:[%s10937_s2 + $0x50] ss:$8 sps:$4 sm:$0xff]  }
  0x1c   : > { %2397 = vmatpush1.bf16.msra.mxu0 %v7285_v3  ;;  %v756_v8 = vld [vmem:[%s7714_s28] sm:$0xff]  ;;  %v758_v9 = vld [vmem:[%s7714_s28 + $0x10] sm:$0xff]  ;;  %v757_v10 = vld [vmem:[%s7714_s28 + $0x8] sm:$0xff]  ;;  %s10945_s26 = sld [smem:[#allocation20_spill]] }
  0x1d   : > { %2398 = vmatprep.subr.bf16.mxu0 %v7286_v4  ;;  %1423 = vperm.xlu0 %7171, %v756_v8   ;;  %v7292_v12 = vld [vmem:[%s10937_s2 + $0x44] ss:$8 sps:$4 sm:$0xff]   ;;  %v7294_v13 = vld [vmem:[%s10937_s2 + $0x40] ss:$8 sps:$4 sm:$0xff]   ;;  %v7295_v15 = vld [vmem:[%s10937_s2 + $0x34] ss:$8 sps:$4 sm:$0xff]  }
  0x1e   : > { %1076 = vperm.xlu1 %7170, %v756_v8   ;;  %v7732_v14 = vld [vmem:[%s7714_s28 + $0x20] sm:$0xff]  ;;  %v7297_v16 = vld [vmem:[%s10937_s2 + $0x30] ss:$8 sps:$4 sm:$0xff]   ;;  %v7301_v19 = vld [vmem:[%s10937_s2 + $0x14] ss:$8 sps:$4 sm:$0xff]   ;;  %s10961_s8 = sld [smem:[#allocation24_spill]] }
  0x1f   : > { %v7298_v17 = vld [vmem:[%s10937_s2 + $0x24] ss:$8 sps:$4 sm:$0xff]   ;;  %v7300_v18 = vld [vmem:[%s10937_s2 + $0x20] ss:$8 sps:$4 sm:$0xff]   ;;  %v759_v20 = vld [vmem:[%s7714_s28 + $0x18] sm:$0xff]  ;;  %s10970_s4 = sld [smem:[#allocation26_spill]] }
  0x20   : > { %2399 = vmatpush1.bf16.msra.mxu0 %v7288_v6  ;;  %v7303_v21 = vld [vmem:[%s10937_s2 + $0x10] ss:$8 sps:$4 sm:$0xff]   ;;  %v7304_v22 = vld [vmem:[%s10937_s2 + $0x4] ss:$8 sps:$4 sm:$0xff]   ;;  %v7306_v29 = vld [vmem:[%s10937_s2] ss:$8 sps:$4 sm:$0xff]  }
  0x21   : > { %2400 = vmatprep.subr.bf16.mxu0 %v7289_v7  ;;  %1431 = vperm.xlu0 %7171, %v758_v9   ;;  %v2171_v23 = vld [vmem:[%s10937_s2 + $0x100] sm:$0x33]  ;;  %v761_v24 = vld [vmem:[%s7714_s28 + $0x28] sm:$0xff]  ;;  %v7307_v31 = vld [vmem:[%s10937_s2 + $0xf4] ss:$8 sps:$4 sm:$0xff]  }
  0x22   : > { %1080 = vperm.xlu1 %7170, %v757_v10   ;;  %v6841_v25 = vcombine.high %v2171_v23, %v2171_v23  ;;  %v6840_v28 = vcombine.low %v2171_v23, %v2171_v23  ;;  %v7777_v34 = vld [vmem:[%s7714_s28 + $0x38] sm:$0xff]  ;;  %v7310_v36 = vld [vmem:[%s10937_s2 + $0xe4] ss:$8 sps:$4 sm:$0xff]   ;;  %v7312_v38 = vld [vmem:[%s10937_s2 + $0xe0] ss:$8 sps:$4 sm:$0xff]  }
  0x23   : > { %v7309_v35 = vld [vmem:[%s10937_s2 + $0xf0] ss:$8 sps:$4 sm:$0xff]   ;;  %v7787_v37 = vld [vmem:[%s7714_s28 + $0x48] sm:$0xff]  ;;  %v7313_v39 = vld [vmem:[%s10937_s2 + $0xd4] ss:$8 sps:$4 sm:$0xff]  }
  0x24   : > { %2401 = vmatpush1.bf16.msra.mxu0 %v7291_v11  ;;  %v2394_v32 = vand.u32 %v6841_v25, %v7769_v30  ;;  %v2391_v33 = vand.u32 %v6840_v28, %v7769_v30  ;;  %v7799_v40 = vld [vmem:[%s7714_s28 + $0x58] sm:$0xff]  ;;  %v7316_v42 = vld [vmem:[%s10937_s2 + $0xc4] ss:$8 sps:$4 sm:$0xff]   ;;  %v7318_v44 = vld [vmem:[%s10937_s2 + $0xc0] ss:$8 sps:$4 sm:$0xff]  }
  0x25   : > { %2402 = vmatprep.subr.bf16.mxu0 %v7292_v12  ;;  %1439 = vperm.xlu0 %7171, %v7732_v14   ;;  %v7315_v41 = vld [vmem:[%s10937_s2 + $0xd0] ss:$8 sps:$4 sm:$0xff]   ;;  %v7810_v43 = vld [vmem:[%s7714_s28 + $0x68] sm:$0xff]  ;;  %v7319_v45 = vld [vmem:[%s10937_s2 + $0xb4] ss:$8 sps:$4 sm:$0xff]  }
  0x26   : > { %7172 = vset.pattern.permute.xlu1 %v10906_v0  ;;  %2603 = vmatprep.subr.bf16.mxu1 %v2394_v32  ;;  %v7822_v46 = vld [vmem:[%s7714_s28 + $0x78] sm:$0xff]  ;;  %v7322_v48 = vld [vmem:[%s10937_s2 + $0xa4] ss:$8 sps:$4 sm:$0xff]   ;;  %v7324_v49 = vld [vmem:[%s10937_s2 + $0xa0] ss:$8 sps:$4 sm:$0xff]  }
  0x27   : > { %1427 = vperm.xlu1 %7172, %v757_v10   ;;  %2604 = vmatpush1.bf16.msra.mxu1 %v2391_v33  ;;  %v7321_v47 = vld [vmem:[%s10937_s2 + $0xb0] ss:$8 sps:$4 sm:$0xff]   ;;  %v7325_v51 = vld [vmem:[%s10937_s2 + $0x94] ss:$8 sps:$4 sm:$0xff]   ;;  %v7329_v53 = vld [vmem:[%s10937_s2 + $0x84] ss:$8 sps:$4 sm:$0xff]  }
  0x28   : > { %2403 = vmatpush1.bf16.msra.mxu0 %v7294_v13  ;;  %3152 = vmatprep.subr.bf16.mxu1 %v10902_v5  ;;  %v762_v50 = vld [vmem:[%s7714_s28 + $0x30] sm:$0xff]  ;;  %v764_v54 = vld [vmem:[%s7714_s28 + $0x40] sm:$0xff]  ;;  %v7878_v62 = vld [vmem:[%s7714_s28 + $0x88] sm:$0xff] }
  0x29   : > { %2404 = vmatprep.subr.bf16.mxu0 %v7295_v15  ;;  %7178 = vset.pattern.permute.xlu0 %v10902_v5  ;;  %v7327_v52 = vld [vmem:[%s10937_s2 + $0x90] ss:$8 sps:$4 sm:$0xff]   ;;  %v7332_v55 = vld [vmem:[%s10937_s2 + $0x80] ss:$8 sps:$4 sm:$0xff]  }
  0x2a   : > { %792 = vperm.xlu0 %7178, %v756_v8   ;;  %v766_v56 = vld [vmem:[%s7714_s28 + $0x50] sm:$0xff]  ;;  %v768_v57 = vld [vmem:[%s7714_s28 + $0x60] sm:$0xff]  ;;  %v7884_v63 = vld [vmem:[%s7714_s28 + $0x98] sm:$0xff] }
  0x2b   : > { %7173 = vset.pattern.permute.xlu1 %v10902_v5  ;;  %v7858_v58 = vld [vmem:[%s7714_s28 + $0x70] sm:$0xff]  ;;  %v7863_v59 = vld [vmem:[%s7714_s28 + $0x80] sm:$0xff]  ;;  %v7889_v2 = vld [vmem:[%s7714_s28 + $0xa8] sm:$0xff] }
  0x2c   : > { %802 = vperm.xlu1 %7173, %v758_v9   ;;  %2405 = vmatpush1.bf16.msra.mxu0 %v7297_v16  ;;  %v7868_v60 = vld [vmem:[%s7714_s28 + $0x90] sm:$0xff]  ;;  %v7873_v61 = vld [vmem:[%s7714_s28 + $0xa0] sm:$0xff]  ;;  %v7894_v3 = vld [vmem:[%s7714_s28 + $0xb8] sm:$0xff] }
  0x2d   : > { %2406 = vmatprep.subr.bf16.mxu0 %v7298_v17  ;;  %v7899_v4 = vld [vmem:[%s7714_s28 + $0xc8] sm:$0xff]  ;;  %v783_v6 = vld [vmem:[%s7714_s28 + $0xd8] sm:$0xff]  ;;  %v7907_v7 = vld [vmem:[%s7714_s28 + $0xb0] sm:$0xff] }
  0x2e   : > { %797 = vperm.xlu0 %7178, %v757_v10   ;;  %v7913_v8 = vld [vmem:[%s7714_s28 + $0xc0] sm:$0xff]  ;;  %v7918_v10 = vld [vmem:[%s7714_s28 + $0xd0] sm:$0xff] }
  0x2f   : > { %v788_v16 = vld [vmem:[%s10942_s30] sm:$0x77] }
  0x30   : > { %7174 = vset.pattern.permute.xlu1 %v10900_v1  ;;  %2407 = vmatpush1.bf16.msra.mxu0 %v7300_v18  ;;  %v789_v18 = vld [vmem:[%s10942_s30 + $0x8] sm:$0x7] }
  0x31   : > { %1084 = vperm.xlu1 %7174, %v758_v9   ;;  %2408 = vmatprep.subr.bf16.mxu0 %v7301_v19  ;;  %v952_v9 = vlaneseq }
  0x32   : > { %807 = vperm.xlu0 %7178, %v759_v20  }
  0x33   : > { %v7922_v11 = vshrl.u32 %v952_v9, 7 }
  0x34   : > { %2409 = vmatpush1.bf16.msra.mxu0 %v7303_v21 }
  0x35   : > { %1088 = vperm.xlu1 %7174, %v759_v20   ;;  %2410 = vmatprep.subr.bf16.mxu0 %v7304_v22  ;;  %10940 = vst [vmem:[#allocation3_spill] sm:$0xff] %v7922_v11  ;;  %v7927_v12 = vsub.s32 1, %v7922_v11  ;;  %v10898_v13 = vsub.s32 5, %v7922_v11  ;;  %v7934_v17 = vsub.s32 2, %v7922_v11  ;;  %v10897_v19 = vsub.s32 6, %v7922_v11 }
  0x36   : > { %817 = vperm.xlu0 %7178, %v761_v24   ;;  %v10899_v21 = vsub.s32 4, %v7922_v11 }
  0x37   : > { %10941 = vst [vmem:[#allocation4_spill] sm:$0xff] %v7927_v12  ;;  %10943 = vst [vmem:[#allocation5_spill] sm:$0xff] %v7934_v17  ;;  %v1206_v22 = vrot.slane %v788_v16, %v7927_v12  ;;  %v1210_v23 = vrot.slane %v788_v16, %v10898_v13  ;;  %v1214_v26 = vrot.slane %v789_v18, %v7927_v12 }
  0x38   : > { %2411 = vmatpush1.bf16.msra.mxu0 %v7306_v29  ;;  %v1553_v27 = vrot.slane %v788_v16, %v7934_v17  ;;  %v1557_v28 = vrot.slane %v788_v16, %v10897_v19  ;;  %v1561_v33 = vrot.slane %v789_v18, %v7934_v17 }
  0x39   : > { %7175 = vset.pattern.permute.xlu1 %v10906_v0  ;;  %2412 = vmatprep.subr.bf16.mxu0 %v7307_v31  ;;  %v959_v31 = vrot.slane %v788_v16, %v10899_v21 }
  0x3a   : > { %1435 = vperm.xlu1 %7175, %v759_v20   ;;  %827 = vperm.xlu0 %7178, %v7777_v34   ;;  %v7941_v20 = vsub.s32 0, %v7922_v11 }
  0x3c   : > { %2413 = vmatpush2.bf16.msra.mxu0 %v7309_v35  ;;  %10944 = vst [vmem:[#allocation6_spill] sm:$0xff] %v7941_v20  ;;  %v955_v29 = vrot.slane %v788_v16, %v7941_v20  ;;  %v963_v32 = vrot.slane %v789_v18, %v7941_v20  ;;  %v7962_v35 = vrot.slane %v1210_v23, %v7927_v12 }
  0x3d   : > { %2414 = vmatprep.subr.bf16.mxu0 %v7310_v36 }
  0x3e   : > { %7176 = vset.pattern.permute.xlu1 %v10902_v5  ;;  %837 = vperm.xlu0 %7178, %v7787_v37  }
  0x3f   : > { %812 = vperm.xlu1 %7176, %v7732_v14  }
  0x40   : > { %2415 = vmatpush2.bf16.msra.mxu0 %v7312_v38  ;;  %v7970_v38 = vrot.slane %v1214_v26, %v7927_v12  ;;  %v8026_v26 = vld [vmem:[%s7714_s28 + $0xe0] sm:$0xff] }
  0x41   : > { %2416 = vmatprep.subr.bf16.mxu0 %v7313_v39  ;;  %v7973_v39 = vrot.slane %v1553_v27, %v7934_v17 }
  0x42   : > { %847 = vperm.xlu0 %7178, %v7799_v40  }
  0x43   : > { %7177 = vset.pattern.permute.xlu1 %v10900_v1 }
  0x44   : > { %1092 = vperm.xlu1 %7177, %v7732_v14   ;;  %2417 = vmatpush2.bf16.msra.mxu0 %v7315_v41  ;;  %v7979_v41 = vld [vmem:[%s10946_s27] sm:$0x7] }
  0x45   : > { %2418 = vmatprep.subr.bf16.mxu0 %v7316_v42  ;;  %v7982_v42 = vrot.slane %v1557_v28, %v7934_v17 }
  0x46   : > { %857 = vperm.xlu0 %7178, %v7810_v43  }
  0x48   : > { %1096 = vperm.xlu1 %7177, %v761_v24   ;;  %2419 = vmatpush2.bf16.msra.mxu0 %v7318_v44  ;;  %v7989_v44 = vrot.slane %v959_v31, %v7941_v20 }
  0x49   : > { %2420 = vmatprep.subr.bf16.mxu0 %v7319_v45  ;;  %v7992_v45 = vrot.slane %v963_v32, %v7941_v20 }
  0x4a   : > { %867 = vperm.xlu0 %7178, %v7822_v46  }
  0x4c   : > { %7179 = vset.pattern.permute.xlu1 %v10906_v0  ;;  %2421 = vmatpush2.bf16.msra.mxu0 %v7321_v47  ;;  %v7995_v47 = vrot.slane %v1561_v33, %v7934_v17 }
  0x4d   : > { %1443 = vperm.xlu1 %7179, %v761_v24   ;;  %2422 = vmatprep.subr.bf16.mxu0 %v7322_v48 }
  0x4e   : > { %7193 = vset.pattern.permute.xlu0 %v10906_v0 }
  0x4f   : > { %1447 = vperm.xlu0 %7193, %v762_v50  }
  0x50   : > { %2423 = vmatpush2.bf16.msra.mxu0 %v7324_v49 }
  0x51   : > { %7180 = vset.pattern.permute.xlu1 %v10902_v5  ;;  %2424 = vmatprep.subr.bf16.mxu0 %v7325_v51 }
  0x52   : > { %822 = vperm.xlu1 %7180, %v762_v50  }
  0x53   : > { %1455 = vperm.xlu0 %7193, %v764_v54  }
  0x54   : > { %2425 = vmatpush2.bf16.msra.mxu0 %v7327_v52 }
  0x55   : > { %2426 = vmatprep.subr.bf16.mxu0 %v7329_v53  ;;  %v8010_v53 = vrot.slane %v7979_v41, %v7927_v12 }
  0x56   : > { %7181 = vset.pattern.permute.xlu1 %v10900_v1 }
  0x57   : > { %1100 = vperm.xlu1 %7181, %v762_v50   ;;  %1463 = vperm.xlu0 %7193, %v766_v56  }
  0x58   : > { %2427 = vmatpush2.bf16.msra.mxu0 %v7332_v55 }
  0x5b   : > { %1104 = vperm.xlu1 %7181, %v7777_v34   ;;  %1471 = vperm.xlu0 %7193, %v768_v57  }
  0x5f   : > { %7182 = vset.pattern.permute.xlu1 %v10906_v0  ;;  %1479 = vperm.xlu0 %7193, %v7858_v58  }
  0x60   : > { %1451 = vperm.xlu1 %7182, %v7777_v34   ;;  %v7959_v34 = vrot.slane %v1206_v22, %v7927_v12 }
  0x63   : > { %1487 = vperm.xlu0 %7193, %v7863_v59  }
  0x64   : > { %7183 = vset.pattern.permute.xlu1 %v10902_v5 }
  0x65   : > { %832 = vperm.xlu1 %7183, %v764_v54  }
  0x67   : > { %1495 = vperm.xlu0 %7193, %v7868_v60  }
  0x69   : > { %7184 = vset.pattern.permute.xlu1 %v10900_v1 }
  0x6a   : > { %1108 = vperm.xlu1 %7184, %v764_v54   ;;  %v8014_v54 = vrot.slane %v7979_v41, %v7934_v17 }
  0x6b   : > { %1503 = vperm.xlu0 %7193, %v7873_v61  }
  0x6e   : > { %1112 = vperm.xlu1 %7184, %v7787_v37  }
  0x6f   : > { %7204 = vset.pattern.permute.xlu0 %v10902_v5 }
  0x70   : > { %877 = vperm.xlu0 %7204, %v7878_v62  }
  0x72   : > { %7185 = vset.pattern.permute.xlu1 %v10906_v0 }
  0x73   : > { %1459 = vperm.xlu1 %7185, %v7787_v37   ;;  %v1769_v37 = vld [vmem:[%s10945_s26] sm:$0x7] }
  0x74   : > { %887 = vperm.xlu0 %7204, %v7884_v63   ;;  %v7998_v48 = vrot.slane %v1769_v37, %v7934_v17  ;;  %v8001_v49 = vrot.slane %v1769_v37, %v7927_v12  ;;  %v8004_v50 = vrot.slane %v1769_v37, %v7941_v20 }
  0x77   : > { %7186 = vset.pattern.permute.xlu1 %v10902_v5 }
  0x78   : > { %842 = vperm.xlu1 %7186, %v766_v56   ;;  %897 = vperm.xlu0 %7204, %v7889_v2  }
  0x7c   : > { %7187 = vset.pattern.permute.xlu1 %v10900_v1  ;;  %907 = vperm.xlu0 %7204, %v7894_v3  }
  0x7d   : > { %1116 = vperm.xlu1 %7187, %v766_v56  }
  0x80   : > { %917 = vperm.xlu0 %7204, %v7899_v4  }
  0x81   : > { %1120 = vperm.xlu1 %7187, %v7799_v40  }
  0x84   : > { %927 = vperm.xlu0 %7204, %v783_v6  }
  0x85   : > { %7188 = vset.pattern.permute.xlu1 %v10906_v0 }
  0x86   : > { %1467 = vperm.xlu1 %7188, %v7799_v40  }
  0x88   : > { %7213 = vset.pattern.permute.xlu0 %v10906_v0 }
  0x89   : > { %1511 = vperm.xlu0 %7213, %v7907_v7  }
  0x8a   : > { %7189 = vset.pattern.permute.xlu1 %v10902_v5 }
  0x8b   : > { %852 = vperm.xlu1 %7189, %v768_v57  }
  0x8d   : > { %1519 = vperm.xlu0 %7213, %v7913_v8  }
  0x8f   : > { %7190 = vset.pattern.permute.xlu1 %v10900_v1 }
  0x90   : > { %1124 = vperm.xlu1 %7190, %v768_v57  }
  0x91   : > { %1527 = vperm.xlu0 %7213, %v7918_v10  }
  0x94   : > { %1128 = vperm.xlu1 %7190, %v7810_v43  }
  0x95   : > { %1535 = vperm.xlu0 %7213, %v8026_v26  }
  0x98   : > { %7191 = vset.pattern.permute.xlu1 %v10906_v0  ;;  %v1424_v15 = vpop.permute.xlu0 %1423 }
  0x99   : > { %1475 = vperm.xlu1 %7191, %v7810_v43   ;;  %v1077_v14 = vpop.permute.xlu1 %1076  ;;  %v7986_v43 = vrot.slane %v955_v29, %v7941_v20  ;;  %v1577_v56 = vmul.f32 %v7973_v39, %v1424_v15  ;;  %v1578_v57 = vmul.f32 %v7982_v42, %v1424_v15 }
  0x9a   : > { %v1230_v51 = vmul.f32 %v7959_v34, %v1077_v14  ;;  %v1231_v52 = vmul.f32 %v7962_v35, %v1077_v14  ;;  %v1232_v55 = vmul.f32 %v7970_v38, %v1077_v14 }
  0x9c   : > { %v1432_v25 = vpop.permute.xlu0 %1431 }
  0x9d   : > { %7192 = vset.pattern.permute.xlu1 %v10902_v5  ;;  %v1081_v24 = vpop.permute.xlu1 %1080  ;;  %v1584_v28 = vmul.f32 %v7982_v42, %v1432_v25  ;;  %v1585_v29 = vmul.f32 %v7995_v47, %v1432_v25 }
  0x9e   : > { %862 = vperm.xlu1 %7192, %v7858_v58   ;;  %v1233_v9 = vmul.f32 %v7959_v34, %v1081_v24  ;;  %v1234_v14 = vmul.f32 %v7962_v35, %v1081_v24  ;;  %v1235_v27 = vmul.f32 %v7970_v38, %v1081_v24 }
  0xa0   : > { %v7964_v36 = vpop.permute.xlu0 %1439 }
  0xa2   : > { %7194 = vset.pattern.permute.xlu1 %v10900_v1  ;;  %v1428_v40 = vpop.permute.xlu1 %1427 }
  0xa3   : > { %1132 = vperm.xlu1 %7194, %v7858_v58   ;;  %v1579_v58 = vmul.f32 %v7995_v47, %v1424_v15  ;;  %v1583_v15 = vmul.f32 %v7973_v39, %v1432_v25  ;;  %v1580_v37 = vmul.f32 %v7973_v39, %v1428_v40  ;;  %v1582_v19 = vmul.f32 %v7995_v47, %v1428_v40 }
  0xa5   : > { %v793_v6 = vpop.permute.xlu0 %792 }
  0xa6   : > { %v979_v16 = vmul.f32 %v7986_v43, %v793_v6  ;;  %v980_v18 = vmul.f32 %v7989_v44, %v793_v6  ;;  %v981_v22 = vmul.f32 %v7992_v45, %v793_v6  ;;  %v1581_v6 = vmul.f32 %v7982_v42, %v1428_v40 }
  0xa7   : > { %1136 = vperm.xlu1 %7194, %v7822_v46   ;;  %v803_v23 = vpop.permute.xlu1 %802 }
  0xa8   : > { %v1326_v31 = vadd.f32 %v1230_v51, %v979_v16  ;;  %v1327_v32 = vadd.f32 %v1231_v52, %v980_v18  ;;  %v1328_v33 = vadd.f32 %v1232_v55, %v981_v22  ;;  %v985_v24 = vmul.f32 %v7986_v43, %v803_v23  ;;  %v8047_v18 = vld [vmem:[%s7714_s28 + $0xe8] sm:$0xff] }
  0xa9   : > { %v798_v13 = vpop.permute.xlu0 %797  ;;  %v986_v1 = vmul.f32 %v7989_v44, %v803_v23  ;;  %v987_v51 = vmul.f32 %v7992_v45, %v803_v23  ;;  %v10947_v16 = vmov 0  }
  0xaa   : > { %v1675_v21 = vadd.f32 %v1579_v58, %v1328_v33  ;;  %v982_v5 = vmul.f32 %v7986_v43, %v798_v13  ;;  %v983_v25 = vmul.f32 %v7989_v44, %v798_v13  ;;  %v984_v52 = vmul.f32 %v7992_v45, %v798_v13  ;;  %7218 = vset.pattern.permute.xlu0 %v10947_v16 }
  0xab   : > { %7195 = vset.pattern.permute.xlu1 %v10906_v0  ;;  %v1674_v40 = vadd.f32 %v1578_v57, %v1327_v32  ;;  %v1673_v58 = vadd.f32 %v1577_v56, %v1326_v31  ;;  %937 = vperm.xlu0 %7218, %v8047_v18  }
  0xac   : > { %1483 = vperm.xlu1 %7195, %v7822_v46   ;;  %v1085_v55 = vpop.permute.xlu1 %1084  ;;  %v1788_v22 = vmul.f32 %v7998_v48, %v1675_v21  ;;  %v1329_v33 = vadd.f32 %v1233_v9, %v982_v5  ;;  %v1330_v0 = vadd.f32 %v1234_v14, %v983_v25  ;;  %v1331_v23 = vadd.f32 %v1235_v27, %v984_v52 }
  0xad   : > { %v1236_v30 = vmul.f32 %v7959_v34, %v1085_v55  ;;  %v1237_v13 = vmul.f32 %v7962_v35, %v1085_v55  ;;  %v1238_v46 = vmul.f32 %v7970_v38, %v1085_v55  ;;  %v808_v17 = vpop.permute.xlu0 %807  ;;  %v1787_v56 = vmul.f32 %v8001_v49, %v1674_v40 }
  0xae   : > { %v1676_v57 = vadd.f32 %v1580_v37, %v1329_v33  ;;  %v988_v11 = vmul.f32 %v7986_v43, %v808_v17  ;;  %v1678_v31 = vadd.f32 %v1582_v19, %v1331_v23  ;;  %v989_v9 = vmul.f32 %v7989_v44, %v808_v17 }
  0xaf   : > { %v1332_v32 = vadd.f32 %v1236_v30, %v985_v24  ;;  %v1333_v21 = vadd.f32 %v1237_v13, %v986_v1  ;;  %v1334_v5 = vadd.f32 %v1238_v46, %v987_v51  ;;  %v990_v27 = vmul.f32 %v7992_v45, %v808_v17 }
  0xb0   : > { %7196 = vset.pattern.permute.xlu1 %v10947_v16  ;;  %v1089_v14 = vpop.permute.xlu1 %1088  ;;  %v1791_v37 = vmul.f32 %v7998_v48, %v1678_v31  ;;  %v1677_v19 = vadd.f32 %v1581_v6, %v1330_v0  ;;  %v8066_v1 = vrot.slane %v7979_v41, %v7941_v20  ;;  %v1900_v23 = vadd.f32 %v8010_v53, %v1787_v56 }
  0xb1   : > { %v1239_v25 = vmul.f32 %v7959_v34, %v1089_v14  ;;  %v1240_v52 = vmul.f32 %v7962_v35, %v1089_v14  ;;  %v1241_v30 = vmul.f32 %v7970_v38, %v1089_v14  ;;  %872 = vperm.xlu1 %7196, %v7863_v59   ;;  %v8068_v24 = vpop.permute.xlu0 %817  ;;  %v1679_v51 = vadd.f32 %v1583_v15, %v1332_v32 }
  0xb2   : > { %v1680_v17 = vadd.f32 %v1584_v28, %v1333_v21  ;;  %v1681_v55 = vadd.f32 %v1585_v29, %v1334_v5  ;;  %v1790_v33 = vmul.f32 %v8001_v49, %v1677_v19  ;;  %v1901_v13 = vadd.f32 %v8014_v54, %v1788_v22 }
  0xb3   : > { %v1335_v40 = vadd.f32 %v1239_v25, %v988_v11  ;;  %v1904_v46 = vadd.f32 %v8014_v54, %v1791_v37  ;;  %v1336_v0 = vadd.f32 %v1240_v52, %v989_v9  ;;  %v1337_v6 = vadd.f32 %v1241_v30, %v990_v27 }
  0xb4   : > { %v10948_v31 = vmov 1   ;;  %v1786_v14 = vmul.f32 %v8004_v50, %v1673_v58  ;;  %v1789_v15 = vmul.f32 %v8004_v50, %v1676_v57  ;;  %v1903_v22 = vadd.f32 %v8010_v53, %v1790_v33 }
  0xb5   : > { %7197 = vset.pattern.permute.xlu1 %v10948_v31  ;;  %v1436_v41 = vpop.permute.xlu1 %1435  ;;  %v8082_v32 = vpop.permute.xlu0 %827  ;;  %v1997_v56 = vmax.f32 %v1901_v13, 0.0  ;;  %v2000_v21 = vmax.f32 %v1904_v46, 0.0  ;;  %v1794_v57 = vmul.f32 %v7998_v48, %v1681_v55  ;;  %v1996_v27 = vmax.f32 %v1900_v23, 0.0 }
  0xb6   : > { %v1586_v28 = vmul.f32 %v7973_v39, %v1436_v41  ;;  %v1587_v11 = vmul.f32 %v7982_v42, %v1436_v41  ;;  %v1588_v29 = vmul.f32 %v7995_v47, %v1436_v41  ;;  %1140 = vperm.xlu1 %7197, %v7863_v59   ;;  %v1899_v5 = vadd.f32 %v8066_v1, %v1786_v14 }
  0xb7   : > { %v1902_v58 = vadd.f32 %v8066_v1, %v1789_v15  ;;  %v1999_v25 = vmax.f32 %v1903_v22, 0.0  ;;  %v2093_v30 = vpack.c.bf16 %v2000_v21, %v1997_v56  ;;  %v1590_v23 = vmul.f32 %v7982_v42, %v7964_v36 }
  0xb8   : > { %v1684_v9 = vadd.f32 %v1588_v29, %v1337_v6  ;;  %v1683_v52 = vadd.f32 %v1587_v11, %v1336_v0  ;;  %v1995_v37 = vmax.f32 %v1899_v5, 0.0  ;;  %v1682_v19 = vadd.f32 %v1586_v28, %v1335_v40  ;;  %v8099_v6 = vld [vmem:[%s7714_s28 + $0xf8] sm:$0xff] }
  0xb9   : > { %v1998_v59 = vmax.f32 %v1902_v58, 0.0  ;;  %v2092_v41 = vpack.c.bf16 %v1999_v25, %v1996_v27  ;;  %v8089_v46 = vpop.permute.xlu0 %837  ;;  %6842 = vmatmul.mubr.msk.bf16.vlgmr.msra.gmra.mxu1 %vm2337_vm2, %v2093_v30  ;;  %v1591_v0 = vmul.f32 %v7995_v47, %v7964_v36  ;;  %v1793_v40 = vmul.f32 %v8001_v49, %v1680_v17  ;;  %947 = vperm.xlu0 %7218, %v8099_v6  }
  0xba   : > { %v1797_v33 = vmul.f32 %v7998_v48, %v1684_v9  ;;  %1144 = vperm.xlu1 %7197, %v7878_v62   ;;  %v813_v13 = vpop.permute.xlu1 %812  ;;  %2631 = vmatprep.mubr.bf16.mxu1 %v10947_v16  ;;  %v1796_v14 = vmul.f32 %v8001_v49, %v1683_v52  ;;  %v1907_v15 = vadd.f32 %v8014_v54, %v1794_v57  ;;  %v10949_v56 = vmov 2  }
  0xbb   : > { %v2091_v55 = vpack.c.bf16 %v1998_v59, %v1995_v37  ;;  %2428 = vmatprep.mubr.bf16.mxu0 %v2092_v41  ;;  %v1792_v11 = vmul.f32 %v8004_v50, %v1679_v51  ;;  %v991_v29 = vmul.f32 %v7986_v43, %v813_v13  ;;  %v992_v22 = vmul.f32 %v7989_v44, %v813_v13 }
  0xbc   : > { %v1910_v28 = vadd.f32 %v8014_v54, %v1797_v33  ;;  %v1906_v21 = vadd.f32 %v8010_v53, %v1793_v40  ;;  %v1795_v17 = vmul.f32 %v8004_v50, %v1682_v19  ;;  %v1909_v57 = vadd.f32 %v8010_v53, %v1796_v14 }
  0xbd   : > { %2429 = vmatmul.mubr.bf16.vlgmr.msra.gmra.mxu0 %v2091_v55  ;;  %v8110_v5 = vpop.permute.xlu0 %847  ;;  %v2003_v9 = vmax.f32 %v1907_v15, 0.0  ;;  %v1905_v51 = vadd.f32 %v8066_v1, %v1792_v11  ;;  %v993_v25 = vmul.f32 %v7992_v45, %v813_v13  ;;  %v1589_v41 = vmul.f32 %v7973_v39, %v7964_v36  ;;  %7222 = vset.pattern.permute.xlu0 %v10949_v56 }
  0xbe   : > { %7198 = vset.pattern.permute.xlu1 %v10949_v56  ;;  %v2006_v27 = vmax.f32 %v1910_v28, 0.0  ;;  %v2002_v59 = vmax.f32 %v1906_v21, 0.0  ;;  %v2005_v19 = vmax.f32 %v1909_v57, 0.0  ;;  %v1908_v33 = vadd.f32 %v8066_v1, %v1795_v17 }
  0xbf   : > { %1491 = vperm.xlu1 %7198, %v7878_v62   ;;  %v1093_v58 = vpop.permute.xlu1 %1092  ;;  %v994_v13 = vmul.f32 %v7986_v43, %v8068_v24  ;;  %v2001_v11 = vmax.f32 %v1905_v51, 0.0  ;;  %v995_v17 = vmul.f32 %v7989_v44, %v8068_v24  ;;  %v996_v36 = vmul.f32 %v7992_v45, %v8068_v24 }
  0xc0   : > { %v1242_v52 = vmul.f32 %v7959_v34, %v1093_v58  ;;  %v1243_v30 = vmul.f32 %v7962_v35, %v1093_v58  ;;  %v1244_v37 = vmul.f32 %v7970_v38, %v1093_v58  ;;  %v2096_v62 = vpack.c.bf16 %v2006_v27, %v2003_v9 }
  0xc1   : > { %v8123_v15 = vpop.permute.xlu0 %857  ;;  %v2095_v28 = vpack.c.bf16 %v2005_v19, %v2002_v59  ;;  %v2004_v21 = vmax.f32 %v1908_v33, 0.0 }
  0xc2   : > { %v1338_v55 = vadd.f32 %v1242_v52, %v991_v29  ;;  %v1339_v40 = vadd.f32 %v1243_v30, %v992_v22  ;;  %v1340_v14 = vadd.f32 %v1244_v37, %v993_v25  ;;  %6843 = vmatmul.mubr.msk.bf16.gmra.mxu1 %vm2337_vm2, %v2096_v62 }
  0xc3   : > { %7199 = vset.pattern.permute.xlu1 %v10947_v16  ;;  %v1097_v58 = vpop.permute.xlu1 %1096  ;;  %2438 = vmatprep.mubr.bf16.mxu0 %v2095_v28  ;;  %v2094_v9 = vpack.c.bf16 %v2004_v21, %v2001_v11 }
  0xc4   : > { %v1687_v29 = vadd.f32 %v1591_v0, %v1340_v14  ;;  %v1245_v22 = vmul.f32 %v7959_v34, %v1097_v58  ;;  %882 = vperm.xlu1 %7199, %v7868_v60   ;;  %v1686_v57 = vadd.f32 %v1590_v23, %v1339_v40  ;;  %v1246_v27 = vmul.f32 %v7962_v35, %v1097_v58 }
  0xc5   : > { %v1247_v51 = vmul.f32 %v7970_v38, %v1097_v58  ;;  %v1685_v25 = vadd.f32 %v1589_v41, %v1338_v55  ;;  %2641 = vmatprep.mubr.bf16.mxu1 %v10947_v16  ;;  %2439 = vmatmul.mubr.bf16.gmra.mxu0 %v2094_v9  ;;  %v8138_v52 = vpop.permute.xlu0 %867  ;;  %v8149_v55 = vld [vmem:[%s7714_s28 + $0xf0] sm:$0xff] }
  0xc6   : > { %v1800_v24 = vmul.f32 %v7998_v48, %v1687_v29  ;;  %v1341_v0 = vadd.f32 %v1245_v22, %v994_v13  ;;  %v1342_v30 = vadd.f32 %v1246_v27, %v995_v17  ;;  %v1799_v33 = vmul.f32 %v8001_v49, %v1686_v57  ;;  %1543 = vperm.xlu0 %7222, %v8149_v55  }
  0xc7   : > { %v1343_v37 = vadd.f32 %v1247_v51, %v996_v36  ;;  %v1798_v41 = vmul.f32 %v8004_v50, %v1685_v25 }
  0xc8   : > { %7200 = vset.pattern.permute.xlu1 %v10948_v31  ;;  %v1444_v23 = vpop.permute.xlu1 %1443  ;;  %v1913_v28 = vadd.f32 %v8014_v54, %v1800_v24  ;;  %v1912_v17 = vadd.f32 %v8010_v53, %v1799_v33 }
  0xc9   : > { %v1592_v59 = vmul.f32 %v7973_v39, %v1444_v23  ;;  %v1593_v19 = vmul.f32 %v7982_v42, %v1444_v23  ;;  %v1594_v62 = vmul.f32 %v7995_v47, %v1444_v23  ;;  %1148 = vperm.xlu1 %7200, %v7868_v60   ;;  %v1911_v29 = vadd.f32 %v8066_v1, %v1798_v41 }
  0xca   : > { %v1448_v21 = vpop.permute.xlu0 %1447  ;;  %7228 = vset.pattern.permute.xlu0 %v10947_v16  ;;  %v2009_v25 = vmax.f32 %v1913_v28, 0.0  ;;  %v2008_v24 = vmax.f32 %v1912_v17, 0.0 }
  0xcb   : > { %v1688_v40 = vadd.f32 %v1592_v59, %v1341_v0  ;;  %v1689_v14 = vadd.f32 %v1593_v19, %v1342_v30  ;;  %v1690_v13 = vadd.f32 %v1594_v62, %v1343_v37  ;;  %v1596_v27 = vmul.f32 %v7982_v42, %v1448_v21 }
  0xcc   : > { %v1597_v51 = vmul.f32 %v7995_v47, %v1448_v21  ;;  %v2007_v33 = vmax.f32 %v1911_v29, 0.0  ;;  %v1001_v29 = vmul.f32 %v7989_v44, %v8082_v32 }
  0xcd   : > { %v1803_v11 = vmul.f32 %v7998_v48, %v1690_v13  ;;  %1152 = vperm.xlu1 %7200, %v7884_v63   ;;  %v823_v60 = vpop.permute.xlu1 %822  ;;  %v1802_v58 = vmul.f32 %v8001_v49, %v1689_v14  ;;  %v1801_v36 = vmul.f32 %v8004_v50, %v1688_v40 }
  0xce   : > { %v997_v23 = vmul.f32 %v7986_v43, %v823_v60  ;;  %v998_v59 = vmul.f32 %v7989_v44, %v823_v60  ;;  %v999_v19 = vmul.f32 %v7992_v45, %v823_v60 }
  0xcf   : > { %v1915_v22 = vadd.f32 %v8010_v53, %v1802_v58  ;;  %v1916_v57 = vadd.f32 %v8014_v54, %v1803_v11  ;;  %v1914_v9 = vadd.f32 %v8066_v1, %v1801_v36 }
  0xd1   : > { %7201 = vset.pattern.permute.xlu1 %v10949_v56  ;;  %v2011_v0 = vmax.f32 %v1915_v22, 0.0  ;;  %v2012_v30 = vmax.f32 %v1916_v57, 0.0  ;;  %v2010_v37 = vmax.f32 %v1914_v9, 0.0  ;;  %v1595_v22 = vmul.f32 %v7973_v39, %v1448_v21 }
  0xd2   : > { %1499 = vperm.xlu1 %7201, %v7884_v63   ;;  %v1101_v62 = vpop.permute.xlu1 %1100  ;;  %v1000_v63 = vmul.f32 %v7986_v43, %v8082_v32  ;;  %v1002_v21 = vmul.f32 %v7992_v45, %v8082_v32 }
  0xd3   : > { %v1248_v41 = vmul.f32 %v7959_v34, %v1101_v62  ;;  %v1249_v40 = vmul.f32 %v7962_v35, %v1101_v62  ;;  %v1250_v14 = vmul.f32 %v7970_v38, %v1101_v62  ;;  %v2098_v13 = vpack.c.bf16 %v2011_v0, %v2008_v24 }
  0xd4   : > { %v2099_v28 = vpack.c.bf16 %v2012_v30, %v2009_v25  ;;  %v2097_v11 = vpack.c.bf16 %v2010_v37, %v2007_v33 }
  0xd5   : > { %v1344_v58 = vadd.f32 %v1248_v41, %v997_v23  ;;  %v1345_v17 = vadd.f32 %v1249_v40, %v998_v59  ;;  %v1346_v36 = vadd.f32 %v1250_v14, %v999_v19  ;;  %2448 = vmatprep.mubr.bf16.mxu0 %v2098_v13 }
  0xd6   : > { %6844 = vmatmul.mubr.msk.bf16.gmra.mxu1 %vm2337_vm2, %v2099_v28  ;;  %7202 = vset.pattern.permute.xlu1 %v10947_v16  ;;  %v1105_v60 = vpop.permute.xlu1 %1104 }
  0xd7   : > { %v1692_v57 = vadd.f32 %v1596_v27, %v1345_v17  ;;  %v1693_v9 = vadd.f32 %v1597_v51, %v1346_v36  ;;  %2449 = vmatmul.mubr.bf16.gmra.mxu0 %v2097_v11  ;;  %v1251_v25 = vmul.f32 %v7959_v34, %v1105_v60  ;;  %v1252_v24 = vmul.f32 %v7962_v35, %v1105_v60  ;;  %v1456_v17 = vpop.permute.xlu0 %1455 }
  0xd8   : > { %v1253_v0 = vmul.f32 %v7970_v38, %v1105_v60  ;;  %892 = vperm.xlu1 %7202, %v7873_v61   ;;  %2651 = vmatprep.mubr.bf16.mxu1 %v10947_v16  ;;  %v1691_v30 = vadd.f32 %v1595_v22, %v1344_v58 }
  0xd9   : > { %v1806_v37 = vmul.f32 %v7998_v48, %v1693_v9  ;;  %v1347_v23 = vadd.f32 %v1251_v25, %v1000_v63  ;;  %v1348_v27 = vadd.f32 %v1252_v24, %v1001_v29  ;;  %v1805_v59 = vmul.f32 %v8001_v49, %v1692_v57 }
  0xda   : > { %v1349_v19 = vadd.f32 %v1253_v0, %v1002_v21  ;;  %v1804_v41 = vmul.f32 %v8004_v50, %v1691_v30  ;;  %v1602_v9 = vmul.f32 %v7982_v42, %v1456_v17  ;;  %v1603_v25 = vmul.f32 %v7995_v47, %v1456_v17 }
  0xdb   : > { %v1452_v51 = vpop.permute.xlu1 %1451  ;;  %v1918_v28 = vadd.f32 %v8010_v53, %v1805_v59  ;;  %v1919_v22 = vadd.f32 %v8014_v54, %v1806_v37 }
  0xdc   : > { %7203 = vset.pattern.permute.xlu1 %v10948_v31  ;;  %v1598_v32 = vmul.f32 %v7973_v39, %v1452_v51  ;;  %v1599_v62 = vmul.f32 %v7982_v42, %v1452_v51  ;;  %v1600_v33 = vmul.f32 %v7995_v47, %v1452_v51 }
  0xdd   : > { %1156 = vperm.xlu1 %7203, %v7873_v61   ;;  %v1917_v61 = vadd.f32 %v8066_v1, %v1804_v41  ;;  %v2014_v21 = vmax.f32 %v1918_v28, 0.0  ;;  %v2015_v0 = vmax.f32 %v1919_v22, 0.0  ;;  %v1007_v22 = vmul.f32 %v7989_v44, %v8089_v46 }
  0xde   : > { %v1694_v40 = vadd.f32 %v1598_v32, %v1347_v23  ;;  %v1695_v14 = vadd.f32 %v1599_v62, %v1348_v27  ;;  %v1696_v13 = vadd.f32 %v1600_v33, %v1349_v19 }
  0xdf   : > { %v2013_v19 = vmax.f32 %v1917_v61, 0.0 }
  0xe0   : > { %v1809_v11 = vmul.f32 %v7998_v48, %v1696_v13  ;;  %v833_v58 = vpop.permute.xlu1 %832  ;;  %v1808_v36 = vmul.f32 %v8001_v49, %v1695_v14  ;;  %v1807_v63 = vmul.f32 %v8004_v50, %v1694_v40 }
  0xe1   : > { %1160 = vperm.xlu1 %7203, %v7889_v2   ;;  %v1003_v23 = vmul.f32 %v7986_v43, %v833_v58  ;;  %v1004_v27 = vmul.f32 %v7989_v44, %v833_v58  ;;  %v1005_v51 = vmul.f32 %v7992_v45, %v833_v58  ;;  %v1601_v58 = vmul.f32 %v7973_v39, %v1456_v17 }
  0xe2   : > { %v1921_v60 = vadd.f32 %v8010_v53, %v1808_v36  ;;  %v1922_v29 = vadd.f32 %v8014_v54, %v1809_v11  ;;  %v1920_v57 = vadd.f32 %v8066_v1, %v1807_v63  ;;  %v1006_v36 = vmul.f32 %v7986_v43, %v8089_v46 }
  0xe3   : > { %v1008_v17 = vmul.f32 %v7992_v45, %v8089_v46 }
  0xe4   : > { %v2017_v24 = vmax.f32 %v1921_v60, 0.0  ;;  %v2018_v30 = vmax.f32 %v1922_v29, 0.0  ;;  %v2016_v37 = vmax.f32 %v1920_v57, 0.0 }
  0xe5   : > { %7205 = vset.pattern.permute.xlu1 %v10949_v56  ;;  %v1109_v59 = vpop.permute.xlu1 %1108 }
  0xe6   : > { %1507 = vperm.xlu1 %7205, %v7889_v2   ;;  %v1254_v32 = vmul.f32 %v7959_v34, %v1109_v59  ;;  %v1255_v62 = vmul.f32 %v7962_v35, %v1109_v59  ;;  %v1256_v33 = vmul.f32 %v7970_v38, %v1109_v59  ;;  %v2101_v41 = vpack.c.bf16 %v2017_v24, %v2014_v21 }
  0xe7   : > { %v2102_v40 = vpack.c.bf16 %v2018_v30, %v2015_v0  ;;  %v2100_v14 = vpack.c.bf16 %v2016_v37, %v2013_v19 }
  0xe8   : > { %v1350_v13 = vadd.f32 %v1254_v32, %v1003_v23  ;;  %v1351_v28 = vadd.f32 %v1255_v62, %v1004_v27  ;;  %v1352_v11 = vadd.f32 %v1256_v33, %v1005_v51  ;;  %2458 = vmatprep.mubr.bf16.mxu0 %v2101_v41 }
  0xe9   : > { %6845 = vmatmul.mubr.msk.bf16.gmra.mxu1 %vm2337_vm2, %v2102_v40  ;;  %2459 = vmatmul.mubr.bf16.gmra.mxu0 %v2100_v14  ;;  %v1113_v2 = vpop.permute.xlu1 %1112  ;;  %v1464_v40 = vpop.permute.xlu0 %1463 }
  0xea   : > { %v1698_v63 = vadd.f32 %v1602_v9, %v1351_v28  ;;  %v1699_v61 = vadd.f32 %v1603_v25, %v1352_v11  ;;  %7206 = vset.pattern.permute.xlu1 %v10947_v16  ;;  %v1257_v60 = vmul.f32 %v7959_v34, %v1113_v2  ;;  %v1258_v29 = vmul.f32 %v7962_v35, %v1113_v2 }
  0xeb   : > { %v1259_v57 = vmul.f32 %v7970_v38, %v1113_v2  ;;  %902 = vperm.xlu1 %7206, %v7907_v7   ;;  %2661 = vmatprep.mubr.bf16.mxu1 %v10947_v16  ;;  %v1697_v21 = vadd.f32 %v1601_v58, %v1350_v13  ;;  %v1608_v2 = vmul.f32 %v7982_v42, %v1464_v40 }
  0xec   : > { %v1812_v24 = vmul.f32 %v7998_v48, %v1699_v61  ;;  %v1353_v9 = vadd.f32 %v1257_v60, %v1006_v36  ;;  %v1354_v25 = vadd.f32 %v1258_v29, %v1007_v22  ;;  %v1811_v30 = vmul.f32 %v8001_v49, %v1698_v63 }
  0xed   : > { %v1355_v37 = vadd.f32 %v1259_v57, %v1008_v17  ;;  %v1810_v51 = vmul.f32 %v8004_v50, %v1697_v21  ;;  %v1609_v22 = vmul.f32 %v7995_v47, %v1464_v40 }
  0xee   : > { %v1460_v0 = vpop.permute.xlu1 %1459  ;;  %v1924_v62 = vadd.f32 %v8010_v53, %v1811_v30  ;;  %v1925_v13 = vadd.f32 %v8014_v54, %v1812_v24 }
  0xef   : > { %7207 = vset.pattern.permute.xlu1 %v10948_v31  ;;  %v1604_v46 = vmul.f32 %v7973_v39, %v1460_v0  ;;  %v1605_v23 = vmul.f32 %v7982_v42, %v1460_v0  ;;  %v1606_v27 = vmul.f32 %v7995_v47, %v1460_v0 }
  0xf0   : > { %1164 = vperm.xlu1 %7207, %v7907_v7   ;;  %v1923_v7 = vadd.f32 %v8066_v1, %v1810_v51  ;;  %v2020_v63 = vmax.f32 %v1924_v62, 0.0  ;;  %v2021_v60 = vmax.f32 %v1925_v13, 0.0  ;;  %v1012_v62 = vmul.f32 %v7986_v43, %v8110_v5 }
  0xf1   : > { %v1700_v59 = vadd.f32 %v1604_v46, %v1353_v9  ;;  %v1701_v19 = vadd.f32 %v1605_v23, %v1354_v25  ;;  %v1702_v32 = vadd.f32 %v1606_v27, %v1355_v37 }
  0xf2   : > { %v2019_v25 = vmax.f32 %v1923_v7, 0.0 }
  0xf3   : > { %v1815_v33 = vmul.f32 %v7998_v48, %v1702_v32  ;;  %v843_v41 = vpop.permute.xlu1 %842  ;;  %v1814_v14 = vmul.f32 %v8001_v49, %v1701_v19  ;;  %v1813_v28 = vmul.f32 %v8004_v50, %v1700_v59  ;;  %v1607_v32 = vmul.f32 %v7973_v39, %v1464_v40 }
  0xf4   : > { %1168 = vperm.xlu1 %7207, %v7894_v3   ;;  %v1009_v57 = vmul.f32 %v7986_v43, %v843_v41  ;;  %v1010_v21 = vmul.f32 %v7989_v44, %v843_v41  ;;  %v1011_v24 = vmul.f32 %v7992_v45, %v843_v41  ;;  %v1014_v40 = vmul.f32 %v7992_v45, %v8110_v5 }
  0xf5   : > { %v1927_v11 = vadd.f32 %v8010_v53, %v1814_v14  ;;  %v1928_v58 = vadd.f32 %v8014_v54, %v1815_v33  ;;  %v1926_v36 = vadd.f32 %v8066_v1, %v1813_v28  ;;  %v1013_v33 = vmul.f32 %v7989_v44, %v8110_v5 }
  0xf7   : > { %v2023_v61 = vmax.f32 %v1927_v11, 0.0  ;;  %v2024_v17 = vmax.f32 %v1928_v58, 0.0  ;;  %v2022_v29 = vmax.f32 %v1926_v36, 0.0 }
  0xf8   : > { %7208 = vset.pattern.permute.xlu1 %v10949_v56  ;;  %v1117_v9 = vpop.permute.xlu1 %1116 }
  0xf9   : > { %1515 = vperm.xlu1 %7208, %v7894_v3   ;;  %v1260_v0 = vmul.f32 %v7959_v34, %v1117_v9  ;;  %v1261_v30 = vmul.f32 %v7962_v35, %v1117_v9  ;;  %v1262_v37 = vmul.f32 %v7970_v38, %v1117_v9  ;;  %v2104_v46 = vpack.c.bf16 %v2023_v61, %v2020_v63 }
  0xfa   : > { %v2105_v23 = vpack.c.bf16 %v2024_v17, %v2021_v60  ;;  %v2103_v27 = vpack.c.bf16 %v2022_v29, %v2019_v25 }
  0xfb   : > { %v1356_v51 = vadd.f32 %v1260_v0, %v1009_v57  ;;  %v1357_v59 = vadd.f32 %v1261_v30, %v1010_v21  ;;  %v1358_v19 = vadd.f32 %v1262_v37, %v1011_v24  ;;  %2468 = vmatprep.mubr.bf16.mxu0 %v2104_v46  ;;  %v1472_v30 = vpop.permute.xlu0 %1471 }
  0xfc   : > { %6846 = vmatmul.mubr.msk.bf16.gmra.mxu1 %vm2337_vm2, %v2105_v23  ;;  %2469 = vmatmul.mubr.bf16.gmra.mxu0 %v2103_v27  ;;  %v1121_v3 = vpop.permute.xlu1 %1120 }
  0xfd   : > { %v1704_v41 = vadd.f32 %v1608_v2, %v1357_v59  ;;  %v1705_v14 = vadd.f32 %v1609_v22, %v1358_v19  ;;  %7209 = vset.pattern.permute.xlu1 %v10947_v16  ;;  %v1263_v13 = vmul.f32 %v7959_v34, %v1121_v3  ;;  %v1264_v28 = vmul.f32 %v7962_v35, %v1121_v3 }
  0xfe   : > { %v1265_v7 = vmul.f32 %v7970_v38, %v1121_v3  ;;  %912 = vperm.xlu1 %7209, %v7913_v8   ;;  %2671 = vmatprep.mubr.bf16.mxu1 %v10947_v16  ;;  %v1703_v11 = vadd.f32 %v1607_v32, %v1356_v51  ;;  %v1614_v19 = vmul.f32 %v7982_v42, %v1472_v30 }
  0xff   : > { %v1818_v58 = vmul.f32 %v7998_v48, %v1705_v14  ;;  %v1359_v36 = vadd.f32 %v1263_v13, %v1012_v62  ;;  %v1360_v2 = vadd.f32 %v1264_v28, %v1013_v33  ;;  %v1817_v63 = vmul.f32 %v8001_v49, %v1704_v41 }
 0x100   : > { %v1361_v61 = vadd.f32 %v1265_v7, %v1014_v40  ;;  %v1816_v29 = vmul.f32 %v8004_v50, %v1703_v11  ;;  %v1615_v32 = vmul.f32 %v7995_v47, %v1472_v30 }
 0x101   : > { %v1468_v22 = vpop.permute.xlu1 %1467  ;;  %v1930_v9 = vadd.f32 %v8010_v53, %v1817_v63  ;;  %v1931_v46 = vadd.f32 %v8014_v54, %v1818_v58 }
 0x102   : > { %7210 = vset.pattern.permute.xlu1 %v10948_v31  ;;  %v1610_v5 = vmul.f32 %v7973_v39, %v1468_v22  ;;  %v1611_v60 = vmul.f32 %v7982_v42, %v1468_v22  ;;  %v1612_v17 = vmul.f32 %v7995_v47, %v1468_v22 }
 0x103   : > { %1172 = vperm.xlu1 %7210, %v7913_v8   ;;  %v1929_v8 = vadd.f32 %v8066_v1, %v1816_v29  ;;  %v2026_v62 = vmax.f32 %v1930_v9, 0.0  ;;  %v2027_v33 = vmax.f32 %v1931_v46, 0.0  ;;  %v1613_v29 = vmul.f32 %v7973_v39, %v1472_v30 }
 0x104   : > { %v1706_v57 = vadd.f32 %v1610_v5, %v1359_v36  ;;  %v1707_v21 = vadd.f32 %v1611_v60, %v1360_v2  ;;  %v1708_v24 = vadd.f32 %v1612_v17, %v1361_v61 }
 0x105   : > { %v2025_v11 = vmax.f32 %v1929_v8, 0.0 }
 0x106   : > { %v1821_v25 = vmul.f32 %v7998_v48, %v1708_v24  ;;  %v853_v0 = vpop.permute.xlu1 %852  ;;  %v1820_v37 = vmul.f32 %v8001_v49, %v1707_v21  ;;  %v1819_v23 = vmul.f32 %v8004_v50, %v1706_v57  ;;  %v1018_v57 = vmul.f32 %v7986_v43, %v8123_v15 }
 0x107   : > { %1176 = vperm.xlu1 %7210, %v7899_v4   ;;  %v1015_v13 = vmul.f32 %v7986_v43, %v853_v0  ;;  %v1016_v40 = vmul.f32 %v7989_v44, %v853_v0  ;;  %v1017_v28 = vmul.f32 %v7992_v45, %v853_v0  ;;  %v1019_v21 = vmul.f32 %v7989_v44, %v8123_v15 }
 0x108   : > { %v1933_v27 = vadd.f32 %v8010_v53, %v1820_v37  ;;  %v1934_v51 = vadd.f32 %v8014_v54, %v1821_v25  ;;  %v1932_v59 = vadd.f32 %v8066_v1, %v1819_v23  ;;  %v1020_v0 = vmul.f32 %v7992_v45, %v8123_v15 }
 0x10a   : > { %v2029_v3 = vmax.f32 %v1933_v27, 0.0  ;;  %v2030_v41 = vmax.f32 %v1934_v51, 0.0  ;;  %v2028_v14 = vmax.f32 %v1932_v59, 0.0 }
 0x10b   : > { %7211 = vset.pattern.permute.xlu1 %v10949_v56  ;;  %v1125_v7 = vpop.permute.xlu1 %1124 }
 0x10c   : > { %1523 = vperm.xlu1 %7211, %v7899_v4   ;;  %v1266_v58 = vmul.f32 %v7959_v34, %v1125_v7  ;;  %v1267_v36 = vmul.f32 %v7962_v35, %v1125_v7  ;;  %v1268_v2 = vmul.f32 %v7970_v38, %v1125_v7  ;;  %v2107_v22 = vpack.c.bf16 %v2029_v3, %v2026_v62  ;;  %v1480_v7 = vpop.permute.xlu0 %1479 }
 0x10d   : > { %v2108_v63 = vpack.c.bf16 %v2030_v41, %v2027_v33  ;;  %v2106_v61 = vpack.c.bf16 %v2028_v14, %v2025_v11 }
 0x10e   : > { %v1362_v5 = vadd.f32 %v1266_v58, %v1015_v13  ;;  %v1363_v60 = vadd.f32 %v1267_v36, %v1016_v40  ;;  %v1364_v17 = vadd.f32 %v1268_v2, %v1017_v28  ;;  %2478 = vmatprep.mubr.bf16.mxu0 %v2107_v22  ;;  %v7537_v2 = vld [vmem:[%s7714_s28 + $0xd8] sm:$0xff] }
 0x10f   : > { %6847 = vmatmul.mubr.msk.bf16.gmra.mxu1 %vm2337_vm2, %v2108_v63  ;;  %2479 = vmatmul.mubr.bf16.gmra.mxu0 %v2106_v61  ;;  %v1129_v4 = vpop.permute.xlu1 %1128 }
 0x110   : > { %v1710_v24 = vadd.f32 %v1614_v19, %v1363_v60  ;;  %v1711_v9 = vadd.f32 %v1615_v32, %v1364_v17  ;;  %7212 = vset.pattern.permute.xlu1 %v10947_v16  ;;  %v1269_v25 = vmul.f32 %v7959_v34, %v1129_v4  ;;  %v1270_v30 = vmul.f32 %v7962_v35, %v1129_v4 }
 0x111   : > { %v1271_v37 = vmul.f32 %v7970_v38, %v1129_v4  ;;  %922 = vperm.xlu1 %7212, %v7918_v10   ;;  %2681 = vmatprep.mubr.bf16.mxu1 %v10947_v16  ;;  %v1709_v46 = vadd.f32 %v1613_v29, %v1362_v5  ;;  %v1620_v5 = vmul.f32 %v7982_v42, %v1480_v7 }
 0x112   : > { %v1824_v23 = vmul.f32 %v7998_v48, %v1711_v9  ;;  %v1365_v8 = vadd.f32 %v1269_v25, %v1018_v57  ;;  %v1366_v27 = vadd.f32 %v1270_v30, %v1019_v21  ;;  %v1823_v59 = vmul.f32 %v8001_v49, %v1710_v24 }
 0x113   : > { %v1367_v19 = vadd.f32 %v1271_v37, %v1020_v0  ;;  %v1822_v3 = vmul.f32 %v8004_v50, %v1709_v46  ;;  %v1621_v60 = vmul.f32 %v7995_v47, %v1480_v7 }
 0x114   : > { %v1476_v51 = vpop.permute.xlu1 %1475  ;;  %v1936_v13 = vadd.f32 %v8010_v53, %v1823_v59  ;;  %v1937_v58 = vadd.f32 %v8014_v54, %v1824_v23  ;;  %v8341_v59 = vpop.permute.xlu0 %1487 }
 0x115   : > { %7214 = vset.pattern.permute.xlu1 %v10948_v31  ;;  %v1616_v15 = vmul.f32 %v7973_v39, %v1476_v51  ;;  %v1617_v32 = vmul.f32 %v7982_v42, %v1476_v51  ;;  %v1618_v62 = vmul.f32 %v7995_v47, %v1476_v51 }
 0x116   : > { %1180 = vperm.xlu1 %7214, %v7918_v10   ;;  %v1935_v10 = vadd.f32 %v8066_v1, %v1822_v3  ;;  %v2032_v17 = vmax.f32 %v1936_v13, 0.0  ;;  %v2033_v57 = vmax.f32 %v1937_v58, 0.0  ;;  %v1024_v3 = vmul.f32 %v7986_v43, %v8138_v52 }
 0x117   : > { %v1712_v33 = vadd.f32 %v1616_v15, %v1365_v8  ;;  %v1713_v41 = vadd.f32 %v1617_v32, %v1366_v27  ;;  %v1714_v14 = vadd.f32 %v1618_v62, %v1367_v19  ;;  %v1619_v62 = vmul.f32 %v7973_v39, %v1480_v7 }
 0x118   : > { %v2031_v30 = vmax.f32 %v1935_v10, 0.0 }
 0x119   : > { %v1827_v40 = vmul.f32 %v7998_v48, %v1714_v14  ;;  %v863_v28 = vpop.permute.xlu1 %862  ;;  %v1826_v11 = vmul.f32 %v8001_v49, %v1713_v41  ;;  %v1825_v36 = vmul.f32 %v8004_v50, %v1712_v33  ;;  %v1025_v41 = vmul.f32 %v7989_v44, %v8138_v52 }
 0x11a   : > { %1184 = vperm.xlu1 %7214, %v7537_v2   ;;  %v1021_v24 = vmul.f32 %v7986_v43, %v863_v28  ;;  %v1022_v9 = vmul.f32 %v7989_v44, %v863_v28  ;;  %v1023_v25 = vmul.f32 %v7992_v45, %v863_v28  ;;  %v1026_v28 = vmul.f32 %v7992_v45, %v8138_v52 }
 0x11b   : > { %v1939_v22 = vadd.f32 %v8010_v53, %v1826_v11  ;;  %v1940_v63 = vadd.f32 %v8014_v54, %v1827_v40  ;;  %v1938_v61 = vadd.f32 %v8066_v1, %v1825_v36  ;;  %v8357_v36 = vpop.permute.xlu0 %1495 }
 0x11d   : > { %v2035_v29 = vmax.f32 %v1939_v22, 0.0  ;;  %v2036_v4 = vmax.f32 %v1940_v63, 0.0  ;;  %v2034_v21 = vmax.f32 %v1938_v61, 0.0 }
 0x11e   : > { %7215 = vset.pattern.permute.xlu1 %v10949_v56  ;;  %v1133_v0 = vpop.permute.xlu1 %1132 }
 0x11f   : > { %1531 = vperm.xlu1 %7215, %v7537_v2   ;;  %v1272_v37 = vmul.f32 %v7959_v34, %v1133_v0  ;;  %v1273_v46 = vmul.f32 %v7962_v35, %v1133_v0  ;;  %v1274_v23 = vmul.f32 %v7970_v38, %v1133_v0  ;;  %v2110_v8 = vpack.c.bf16 %v2035_v29, %v2032_v17 }
 0x120   : > { %v2111_v27 = vpack.c.bf16 %v2036_v4, %v2033_v57  ;;  %v2109_v51 = vpack.c.bf16 %v2034_v21, %v2031_v30 }
 0x121   : > { %v1368_v19 = vadd.f32 %v1272_v37, %v1021_v24  ;;  %v1369_v15 = vadd.f32 %v1273_v46, %v1022_v9  ;;  %v1370_v32 = vadd.f32 %v1274_v23, %v1023_v25  ;;  %2488 = vmatprep.mubr.bf16.mxu0 %v2110_v8  ;;  %v7333_v9 = vld [vmem:[%s10950_s25 + $0x38] sm:$0xff]   ;;  %v8373_v37 = vpop.permute.xlu0 %1503 }
 0x122   : > { %6848 = vmatmul.mubr.msk.bf16.gmra.mxu1 %vm2337_vm2, %v2111_v27  ;;  %2489 = vmatmul.mubr.bf16.gmra.mxu0 %v2109_v51  ;;  %v1137_v33 = vpop.permute.xlu1 %1136 }
 0x123   : > { %v1716_v14 = vadd.f32 %v1620_v5, %v1369_v15  ;;  %v1717_v13 = vadd.f32 %v1621_v60, %v1370_v32  ;;  %7216 = vset.pattern.permute.xlu1 %v10947_v16  ;;  %v1275_v40 = vmul.f32 %v7959_v34, %v1137_v33  ;;  %v1276_v7 = vmul.f32 %v7962_v35, %v1137_v33 }
 0x124   : > { %v1277_v11 = vmul.f32 %v7970_v38, %v1137_v33  ;;  %932 = vperm.xlu1 %7216, %v8026_v26   ;;  %2691 = vmatprep.mubr.bf16.mxu1 %v10947_v16  ;;  %v1715_v58 = vadd.f32 %v1619_v62, %v1368_v19  ;;  %v1626_v19 = vmul.f32 %v7982_v42, %v8341_v59 }
 0x125   : > { %v1829_v2 = vmul.f32 %v8001_v49, %v1716_v14  ;;  %v1830_v10 = vmul.f32 %v7998_v48, %v1717_v13  ;;  %v1371_v22 = vadd.f32 %v1275_v40, %v1024_v3  ;;  %v1372_v63 = vadd.f32 %v1276_v7, %v1025_v41  ;;  %3153 = vmatpush1.bf16.msra.mxu1 %v7333_v9  ;;  %v7538_v7 = vld [vmem:[%s7714_s28 + $0xe8] sm:$0xff]  ;;  %s10804_s28 = scalar_lea.vmem %s10893_s24, %s7705_s3 }
 0x126   : > { %v1373_v5 = vadd.f32 %v1277_v11, %v1026_v28  ;;  %v1828_v29 = vmul.f32 %v8004_v50, %v1715_v58  ;;  %3154 = vmatprep.subr.bf16.mxu1 %v10947_v16  ;;  %v1627_v15 = vmul.f32 %v7995_v47, %v8341_v59 }
 0x127   : > { %v1484_v61 = vpop.permute.xlu1 %1483  ;;  %v1942_v24 = vadd.f32 %v8010_v53, %v1829_v2  ;;  %v1943_v25 = vadd.f32 %v8014_v54, %v1830_v10 }
 0x128   : > { %7217 = vset.pattern.permute.xlu1 %v10948_v31  ;;  %v1622_v52 = vmul.f32 %v7973_v39, %v1484_v61  ;;  %v1623_v60 = vmul.f32 %v7982_v42, %v1484_v61  ;;  %v1624_v17 = vmul.f32 %v7995_v47, %v1484_v61  ;;  %v1941_v23 = vadd.f32 %v8066_v1, %v1828_v29 }
 0x129   : > { %1188 = vperm.xlu1 %7217, %v8026_v26   ;;  %v2038_v32 = vmax.f32 %v1942_v24, 0.0  ;;  %v2039_v62 = vmax.f32 %v1943_v25, 0.0 }
 0x12a   : > { %v1718_v57 = vadd.f32 %v1622_v52, %v1371_v22  ;;  %v1719_v4 = vadd.f32 %v1623_v60, %v1372_v63  ;;  %v1720_v21 = vadd.f32 %v1624_v17, %v1373_v5  ;;  %v2037_v28 = vmax.f32 %v1941_v23, 0.0  ;;  %v878_v22 = vpop.permute.xlu0 %877 }
 0x12b   : > { %v1625_v5 = vmul.f32 %v7973_v39, %v8341_v59  ;;  %v1030_v29 = vmul.f32 %v7986_v43, %v878_v22  ;;  %v1031_v24 = vmul.f32 %v7989_v44, %v878_v22  ;;  %v1032_v59 = vmul.f32 %v7992_v45, %v878_v22 }
 0x12c   : > { %v1833_v0 = vmul.f32 %v7998_v48, %v1720_v21  ;;  %v873_v30 = vpop.permute.xlu1 %872  ;;  %v1832_v46 = vmul.f32 %v8001_v49, %v1719_v4  ;;  %v1831_v26 = vmul.f32 %v8004_v50, %v1718_v57 }
 0x12d   : > { %1192 = vperm.xlu1 %7217, %v8047_v18   ;;  %v1027_v41 = vmul.f32 %v7986_v43, %v873_v30  ;;  %v1028_v14 = vmul.f32 %v7989_v44, %v873_v30  ;;  %v1029_v13 = vmul.f32 %v7992_v45, %v873_v30  ;;  %v7334_v30 = vld [vmem:[%s10950_s25 + $0x30] sm:$0xff]  }
 0x12e   : > { %v1945_v8 = vadd.f32 %v8010_v53, %v1832_v46  ;;  %v1946_v27 = vadd.f32 %v8014_v54, %v1833_v0  ;;  %v1944_v51 = vadd.f32 %v8066_v1, %v1831_v26  ;;  %3155 = vmatpush1.bf16.msra.mxu1 %v7334_v30 }
 0x12f   : > { %3156 = vmatprep.subr.bf16.mxu1 %v10947_v16 }
 0x130   : > { %v2041_v18 = vmax.f32 %v1945_v8, 0.0  ;;  %v2042_v3 = vmax.f32 %v1946_v27, 0.0  ;;  %v2040_v33 = vmax.f32 %v1944_v51, 0.0 }
 0x131   : > { %7219 = vset.pattern.permute.xlu1 %v10949_v56  ;;  %v1141_v40 = vpop.permute.xlu1 %1140 }
 0x132   : > { %1539 = vperm.xlu1 %7219, %v7538_v7   ;;  %v1278_v11 = vmul.f32 %v7959_v34, %v1141_v40  ;;  %v1279_v58 = vmul.f32 %v7962_v35, %v1141_v40  ;;  %v1280_v2 = vmul.f32 %v7970_v38, %v1141_v40  ;;  %v2113_v10 = vpack.c.bf16 %v2041_v18, %v2038_v32 }
 0x133   : > { %v2114_v63 = vpack.c.bf16 %v2042_v3, %v2039_v62  ;;  %v2112_v61 = vpack.c.bf16 %v2040_v33, %v2037_v28 }
 0x134   : > { %v1374_v52 = vadd.f32 %v1278_v11, %v1027_v41  ;;  %v1375_v60 = vadd.f32 %v1279_v58, %v1028_v14  ;;  %v1376_v17 = vadd.f32 %v1280_v2, %v1029_v13  ;;  %2498 = vmatprep.mubr.bf16.mxu0 %v2113_v10  ;;  %v7335_v58 = vld [vmem:[%s10950_s25 + $0x28] sm:$0xff]  }
 0x135   : > { %6849 = vmatmul.mubr.msk.bf16.gmra.mxu1 %vm2337_vm2, %v2114_v63  ;;  %2499 = vmatmul.mubr.bf16.gmra.mxu0 %v2112_v61  ;;  %v1145_v57 = vpop.permute.xlu1 %1144  ;;  %v1632_v63 = vmul.f32 %v7982_v42, %v8357_v36  ;;  %v1633_v61 = vmul.f32 %v7995_v47, %v8357_v36 }
 0x136   : > { %v1722_v4 = vadd.f32 %v1626_v19, %v1375_v60  ;;  %v1723_v21 = vadd.f32 %v1627_v15, %v1376_v17  ;;  %7220 = vset.pattern.permute.xlu1 %v10947_v16  ;;  %v1281_v9 = vmul.f32 %v7959_v34, %v1145_v57  ;;  %v1282_v25 = vmul.f32 %v7962_v35, %v1145_v57 }
 0x137   : > { %v1283_v0 = vmul.f32 %v7970_v38, %v1145_v57  ;;  %942 = vperm.xlu1 %7220, %v8149_v55   ;;  %2701 = vmatprep.mubr.bf16.mxu1 %v10947_v16  ;;  %v1721_v46 = vadd.f32 %v1625_v5, %v1374_v52  ;;  %v7336_v57 = vld [vmem:[%s10950_s25 + $0x20] sm:$0xff]  }
 0x138   : > { %v1836_v26 = vmul.f32 %v7998_v48, %v1723_v21  ;;  %v1377_v23 = vadd.f32 %v1281_v9, %v1030_v29  ;;  %v1378_v8 = vadd.f32 %v1282_v25, %v1031_v24  ;;  %v1835_v51 = vmul.f32 %v8001_v49, %v1722_v4  ;;  %3157 = vmatpush1.bf16.msra.mxu1 %v7335_v58 }
 0x139   : > { %v1379_v19 = vadd.f32 %v1283_v0, %v1032_v59  ;;  %v1834_v62 = vmul.f32 %v8004_v50, %v1721_v46  ;;  %3158 = vmatprep.subr.bf16.mxu1 %v10947_v16 }
 0x13a   : > { %v1492_v27 = vpop.permute.xlu1 %1491  ;;  %v1948_v14 = vadd.f32 %v8010_v53, %v1835_v51  ;;  %v1949_v7 = vadd.f32 %v8014_v54, %v1836_v26  ;;  %v888_v26 = vpop.permute.xlu0 %887 }
 0x13b   : > { %7221 = vset.pattern.permute.xlu1 %v10948_v31  ;;  %v1628_v15 = vmul.f32 %v7973_v39, %v1492_v27  ;;  %v1629_v32 = vmul.f32 %v7982_v42, %v1492_v27  ;;  %v1630_v18 = vmul.f32 %v7995_v47, %v1492_v27  ;;  %v1631_v27 = vmul.f32 %v7973_v39, %v8357_v36 }
 0x13c   : > { %1196 = vperm.xlu1 %7221, %v8149_v55   ;;  %v1947_v55 = vadd.f32 %v8066_v1, %v1834_v62  ;;  %v2044_v5 = vmax.f32 %v1948_v14, 0.0  ;;  %v2045_v60 = vmax.f32 %v1949_v7, 0.0  ;;  %3159 = vmatpush1.bf16.msra.mxu1 %v7336_v57 }
 0x13d   : > { %v1724_v3 = vadd.f32 %v1628_v15, %v1377_v23  ;;  %v1725_v33 = vadd.f32 %v1629_v32, %v1378_v8  ;;  %v1726_v41 = vadd.f32 %v1630_v18, %v1379_v19  ;;  %v7337_v18 = vld [vmem:[%s10950_s25 + $0x18] sm:$0xff]   ;;  %3160 = vmatprep.subr.bf16.mxu1 %v10947_v16 }
 0x13e   : > { %v2043_v59 = vmax.f32 %v1947_v55, 0.0 }
 0x13f   : > { %v1839_v13 = vmul.f32 %v7998_v48, %v1726_v41  ;;  %v883_v40 = vpop.permute.xlu1 %882  ;;  %v1838_v28 = vmul.f32 %v8001_v49, %v1725_v33  ;;  %v1837_v11 = vmul.f32 %v8004_v50, %v1724_v3  ;;  %v1037_v33 = vmul.f32 %v7989_v44, %v888_v26 }
 0x140   : > { %1200 = vperm.xlu1 %7221, %v8099_v6   ;;  %v1033_v4 = vmul.f32 %v7986_v43, %v883_v40  ;;  %v1034_v21 = vmul.f32 %v7989_v44, %v883_v40  ;;  %v1035_v24 = vmul.f32 %v7992_v45, %v883_v40  ;;  %v1038_v41 = vmul.f32 %v7992_v45, %v888_v26 }
 0x141   : > { %v1951_v2 = vadd.f32 %v8010_v53, %v1838_v28  ;;  %v1952_v10 = vadd.f32 %v8014_v54, %v1839_v13  ;;  %v1950_v22 = vadd.f32 %v8066_v1, %v1837_v11  ;;  %3161 = vmatpush1.bf16.msra.mxu1 %v7337_v18  ;;  %v7338_v28 = vld [vmem:[%s10950_s25 + $0x10] sm:$0xff]  }
 0x142   : > { %3162 = vmatprep.subr.bf16.mxu1 %v10947_v16 }
 0x143   : > { %v2047_v52 = vmax.f32 %v1951_v2, 0.0  ;;  %v2048_v17 = vmax.f32 %v1952_v10, 0.0  ;;  %v2046_v29 = vmax.f32 %v1950_v22, 0.0 }
 0x144   : > { %7223 = vset.pattern.permute.xlu1 %v10949_v56  ;;  %v1149_v9 = vpop.permute.xlu1 %1148 }
 0x145   : > { %1547 = vperm.xlu1 %7223, %v8099_v6   ;;  %v1284_v25 = vmul.f32 %v7959_v34, %v1149_v9  ;;  %v1285_v0 = vmul.f32 %v7962_v35, %v1149_v9  ;;  %v1286_v30 = vmul.f32 %v7970_v38, %v1149_v9  ;;  %v2116_v46 = vpack.c.bf16 %v2047_v52, %v2044_v5  ;;  %v898_v5 = vpop.permute.xlu0 %897 }
 0x146   : > { %v2117_v23 = vpack.c.bf16 %v2048_v17, %v2045_v60  ;;  %v2115_v8 = vpack.c.bf16 %v2046_v29, %v2043_v59  ;;  %v1036_v6 = vmul.f32 %v7986_v43, %v888_v26  ;;  %3163 = vmatpush1.bf16.msra.mxu1 %v7338_v28  ;;  %v7339_v60 = vld [vmem:[%s10950_s25 + $0x8] sm:$0xff]  }
 0x147   : > { %v1380_v51 = vadd.f32 %v1284_v25, %v1033_v4  ;;  %v1381_v19 = vadd.f32 %v1285_v0, %v1034_v21  ;;  %v1382_v15 = vadd.f32 %v1286_v30, %v1035_v24  ;;  %2508 = vmatprep.mubr.bf16.mxu0 %v2116_v46  ;;  %3164 = vmatprep.subr.bf16.mxu1 %v10947_v16  ;;  %v7340_v30 = vld [vmem:[%s10950_s25] sm:$0xff]  }
 0x148   : > { %6850 = vmatmul.mubr.msk.bf16.gmra.mxu1 %vm2337_vm2, %v2117_v23  ;;  %2509 = vmatmul.mubr.bf16.gmra.mxu0 %v2115_v8  ;;  %v1153_v32 = vpop.permute.xlu1 %1152  ;;  %v8492_v23 = vsel %vm2386_vm0, 65535, %v10947_v16 }
 0x149   : > { %v1728_v62 = vadd.f32 %v1632_v63, %v1381_v19  ;;  %v1729_v3 = vadd.f32 %v1633_v61, %v1382_v15  ;;  %v1287_v36 = vmul.f32 %v7959_v34, %v1153_v32  ;;  %2711 = vmatprep.mubr.bf16.mxu1 %v10947_v16  ;;  %v1288_v14 = vmul.f32 %v7962_v35, %v1153_v32  ;;  %v8487_v26 = vpop.permute.xlu0 %907 }
 0x14a   : > { %v1289_v13 = vmul.f32 %v7970_v38, %v1153_v32  ;;  %7224 = vset.pattern.permute.xlu1 %v10947_v16  ;;  %v1727_v40 = vadd.f32 %v1631_v27, %v1380_v51  ;;  %3165 = vmatpush1.bf16.msra.mxu1 %v7339_v60  ;;  %10951 = vst [vmem:[#allocation7_spill] sm:$0xff] %v8492_v23 }
 0x14b   : > { %v1842_v7 = vmul.f32 %v7998_v48, %v1729_v3  ;;  %v1383_v11 = vadd.f32 %v1287_v36, %v1036_v6  ;;  %v1384_v55 = vadd.f32 %v1288_v14, %v1037_v33  ;;  %v1841_v2 = vmul.f32 %v8001_v49, %v1728_v62  ;;  %3166 = vmatprep.subr.bf16.mxu1 %v10947_v16  ;;  %v7341_v33 = vld [vmem:[%s10950_s25 + $0x40] ss:$0 sps:$4 sm:$0x11]  }
 0x14c   : > { %v1385_v10 = vadd.f32 %v1289_v13, %v1038_v41  ;;  %v1840_v52 = vmul.f32 %v8004_v50, %v1727_v40  ;;  %v1638_v51 = vmul.f32 %v7982_v42, %v8373_v37  ;;  %v1639_v32 = vmul.f32 %v7995_v47, %v8373_v37 }
 0x14d   : > { %v1500_v58 = vpop.permute.xlu1 %1499  ;;  %v1954_v4 = vadd.f32 %v8010_v53, %v1841_v2  ;;  %v1955_v9 = vadd.f32 %v8014_v54, %v1842_v7  ;;  %v8510_v2 = vpop.permute.xlu0 %917  ;;  %v1042_v60 = vmul.f32 %v7986_v43, %v898_v5 }
 0x14e   : > { %v1634_v22 = vmul.f32 %v7973_v39, %v1500_v58  ;;  %v1635_v63 = vmul.f32 %v7982_v42, %v1500_v58  ;;  %v1636_v61 = vmul.f32 %v7995_v47, %v1500_v58  ;;  %v1953_v0 = vadd.f32 %v8066_v1, %v1840_v52  ;;  %3167 = vmatpush1.bf16.msra.mxu1 %v7340_v30 }
 0x14f   : > { %v2050_v19 = vmax.f32 %v1954_v4, 0.0  ;;  %v2051_v6 = vmax.f32 %v1955_v9, 0.0  ;;  %3182 = vmatprep.subr.bf16.mxu1 %v10947_v16  ;;  %v1043_v4 = vmul.f32 %v7989_v44, %v898_v5 }
 0x150   : > { %v1730_v17 = vadd.f32 %v1634_v22, %v1383_v11  ;;  %v1731_v29 = vadd.f32 %v1635_v63, %v1384_v55  ;;  %v1732_v57 = vadd.f32 %v1636_v61, %v1385_v10  ;;  %v2049_v62 = vmax.f32 %v1953_v0, 0.0 }
 0x151   : > { %v3150_v10 = vand.u32 %v7341_v33, %v8492_v23  ;;  %v1637_v22 = vmul.f32 %v7973_v39, %v8373_v37  ;;  %v1044_v37 = vmul.f32 %v7992_v45, %v898_v5 }
 0x152   : > { %v1845_v21 = vmul.f32 %v7998_v48, %v1732_v57  ;;  %v1844_v24 = vmul.f32 %v8001_v49, %v1731_v29  ;;  %v1843_v59 = vmul.f32 %v8004_v50, %v1730_v17 }
 0x153   : > { %v893_v25 = vpop.permute.xlu1 %892  ;;  %3183 = vmatpush2.bf16.msra.mxu1 %v3150_v10 }
 0x154   : > { %v1957_v46 = vadd.f32 %v8010_v53, %v1844_v24  ;;  %v1958_v8 = vadd.f32 %v8014_v54, %v1845_v21  ;;  %v1956_v27 = vadd.f32 %v8066_v1, %v1843_v59  ;;  %v1039_v36 = vmul.f32 %v7986_v43, %v893_v25 }
 0x155   : > { %v1040_v41 = vmul.f32 %v7989_v44, %v893_v25  ;;  %v1041_v14 = vmul.f32 %v7992_v45, %v893_v25  ;;  %v8523_v25 = vpop.permute.xlu0 %927 }
 0x156   : > { %v2053_v15 = vmax.f32 %v1957_v46, 0.0  ;;  %v2054_v18 = vmax.f32 %v1958_v8, 0.0  ;;  %v2052_v3 = vmax.f32 %v1956_v27, 0.0 }
 0x158   : > { %v1157_v13 = vpop.permute.xlu1 %1156  ;;  %v2119_v40 = vpack.c.bf16 %v2053_v15, %v2050_v19  ;;  %v2120_v55 = vpack.c.bf16 %v2054_v18, %v2051_v6  ;;  %v2118_v58 = vpack.c.bf16 %v2052_v3, %v2049_v62 }
 0x159   : > { %v1290_v28 = vmul.f32 %v7959_v34, %v1157_v13  ;;  %v1291_v7 = vmul.f32 %v7962_v35, %v1157_v13  ;;  %v1292_v11 = vmul.f32 %v7970_v38, %v1157_v13 }
 0x15a   : > { %2518 = vmatprep.mubr.bf16.mxu0 %v2119_v40  ;;  %6851 = vmatmul.mubr.msk.bf16.gmra.mxu1 %vm2337_vm2, %v2120_v55 }
 0x15b   : > { %v1386_v63 = vadd.f32 %v1290_v28, %v1039_v36  ;;  %v1387_v61 = vadd.f32 %v1291_v7, %v1040_v41  ;;  %v1388_v52 = vadd.f32 %v1292_v11, %v1041_v14  ;;  %2519 = vmatmul.mubr.bf16.gmra.mxu0 %v2118_v58  ;;  %2721 = vmatprep.mubr.bf16.mxu1 %v10947_v16  ;;  %v1512_v41 = vpop.permute.xlu0 %1511 }
 0x15c   : > { %v1161_v17 = vpop.permute.xlu1 %1160  ;;  %v1644_v58 = vmul.f32 %v7982_v42, %v1512_v41 }
 0x15d   : > { %v1734_v29 = vadd.f32 %v1638_v51, %v1387_v61  ;;  %v1735_v57 = vadd.f32 %v1639_v32, %v1388_v52  ;;  %v1293_v21 = vmul.f32 %v7959_v34, %v1161_v17  ;;  %v1294_v24 = vmul.f32 %v7962_v35, %v1161_v17 }
 0x15e   : > { %v1295_v9 = vmul.f32 %v7970_v38, %v1161_v17  ;;  %v1733_v59 = vadd.f32 %v1637_v22, %v1386_v63 }
 0x15f   : > { %v1848_v0 = vmul.f32 %v7998_v48, %v1735_v57  ;;  %v1389_v30 = vadd.f32 %v1293_v21, %v1042_v60  ;;  %v1390_v46 = vadd.f32 %v1294_v24, %v1043_v4  ;;  %v1847_v27 = vmul.f32 %v8001_v49, %v1734_v29 }
 0x160   : > { %v1391_v51 = vadd.f32 %v1295_v9, %v1044_v37  ;;  %v1846_v6 = vmul.f32 %v8004_v50, %v1733_v59  ;;  %v1643_v59 = vmul.f32 %v7973_v39, %v1512_v41 }
 0x161   : > { %v1508_v8 = vpop.permute.xlu1 %1507  ;;  %v1960_v3 = vadd.f32 %v8010_v53, %v1847_v27  ;;  %v1961_v13 = vadd.f32 %v8014_v54, %v1848_v0 }
 0x162   : > { %v1640_v19 = vmul.f32 %v7973_v39, %v1508_v8  ;;  %v1641_v15 = vmul.f32 %v7982_v42, %v1508_v8  ;;  %v1642_v5 = vmul.f32 %v7995_v47, %v1508_v8  ;;  %v1959_v28 = vadd.f32 %v8066_v1, %v1846_v6 }
 0x163   : > { %v2056_v10 = vmax.f32 %v1960_v3, 0.0  ;;  %v2057_v63 = vmax.f32 %v1961_v13, 0.0 }
 0x164   : > { %v1736_v32 = vadd.f32 %v1640_v19, %v1389_v30  ;;  %v1737_v18 = vadd.f32 %v1641_v15, %v1390_v46  ;;  %v1738_v62 = vadd.f32 %v1642_v5, %v1391_v51  ;;  %v2055_v4 = vmax.f32 %v1959_v28, 0.0 }
 0x165   : > { %v1645_v51 = vmul.f32 %v7995_v47, %v1512_v41  ;;  %v1048_v15 = vmul.f32 %v7986_v43, %v8487_v26  ;;  %v1049_v5 = vmul.f32 %v7989_v44, %v8487_v26 }
 0x166   : > { %v1851_v33 = vmul.f32 %v7998_v48, %v1738_v62  ;;  %v903_v36 = vpop.permute.xlu1 %902  ;;  %v1850_v14 = vmul.f32 %v8001_v49, %v1737_v18  ;;  %v1849_v40 = vmul.f32 %v8004_v50, %v1736_v32  ;;  %v1050_v18 = vmul.f32 %v7992_v45, %v8487_v26 }
 0x167   : > { %v1045_v60 = vmul.f32 %v7986_v43, %v903_v36  ;;  %v1046_v17 = vmul.f32 %v7989_v44, %v903_v36  ;;  %v1047_v29 = vmul.f32 %v7992_v45, %v903_v36 }
 0x168   : > { %v1963_v7 = vadd.f32 %v8010_v53, %v1850_v14  ;;  %v1964_v11 = vadd.f32 %v8014_v54, %v1851_v33  ;;  %v1962_v55 = vadd.f32 %v8066_v1, %v1849_v40 }
 0x16a   : > { %v2059_v22 = vmax.f32 %v1963_v7, 0.0  ;;  %v2060_v61 = vmax.f32 %v1964_v11, 0.0  ;;  %v2058_v52 = vmax.f32 %v1962_v55, 0.0 }
 0x16b   : > { %v1165_v57 = vpop.permute.xlu1 %1164 }
 0x16c   : > { %v1296_v21 = vmul.f32 %v7959_v34, %v1165_v57  ;;  %v1297_v37 = vmul.f32 %v7962_v35, %v1165_v57  ;;  %v1298_v24 = vmul.f32 %v7970_v38, %v1165_v57  ;;  %v2122_v9 = vpack.c.bf16 %v2059_v22, %v2056_v10 }
 0x16d   : > { %v2123_v0 = vpack.c.bf16 %v2060_v61, %v2057_v63  ;;  %v2121_v30 = vpack.c.bf16 %v2058_v52, %v2055_v4 }
 0x16e   : > { %v1392_v46 = vadd.f32 %v1296_v21, %v1045_v60  ;;  %v1393_v8 = vadd.f32 %v1297_v37, %v1046_v17  ;;  %v1394_v27 = vadd.f32 %v1298_v24, %v1047_v29  ;;  %2528 = vmatprep.mubr.bf16.mxu0 %v2122_v9  ;;  %v1520_v60 = vpop.permute.xlu0 %1519 }
 0x16f   : > { %6852 = vmatmul.mubr.msk.bf16.gmra.mxu1 %vm2337_vm2, %v2123_v0  ;;  %2529 = vmatmul.mubr.bf16.gmra.mxu0 %v2121_v30  ;;  %v1169_v19 = vpop.permute.xlu1 %1168 }
 0x170   : > { %v1740_v6 = vadd.f32 %v1644_v58, %v1393_v8  ;;  %v1299_v32 = vmul.f32 %v7959_v34, %v1169_v19  ;;  %2731 = vmatprep.mubr.bf16.mxu1 %v10947_v16  ;;  %v1300_v62 = vmul.f32 %v7962_v35, %v1169_v19  ;;  %v1301_v3 = vmul.f32 %v7970_v38, %v1169_v19 }
 0x171   : > { %v1739_v33 = vadd.f32 %v1643_v59, %v1392_v46  ;;  %v1741_v36 = vadd.f32 %v1645_v51, %v1394_v27  ;;  %v1650_v59 = vmul.f32 %v7982_v42, %v1520_v60 }
 0x172   : > { %v1853_v41 = vmul.f32 %v8001_v49, %v1740_v6  ;;  %v1395_v14 = vadd.f32 %v1299_v32, %v1048_v15  ;;  %v1396_v13 = vadd.f32 %v1300_v62, %v1049_v5  ;;  %v1397_v28 = vadd.f32 %v1301_v3, %v1050_v18 }
 0x173   : > { %v1852_v26 = vmul.f32 %v8004_v50, %v1739_v33  ;;  %v1854_v58 = vmul.f32 %v7998_v48, %v1741_v36  ;;  %v1651_v33 = vmul.f32 %v7995_v47, %v1520_v60 }
 0x174   : > { %v1516_v40 = vpop.permute.xlu1 %1515  ;;  %v1966_v29 = vadd.f32 %v8010_v53, %v1853_v41 }
 0x175   : > { %v1646_v7 = vmul.f32 %v7973_v39, %v1516_v40  ;;  %v1647_v11 = vmul.f32 %v7982_v42, %v1516_v40  ;;  %v1648_v55 = vmul.f32 %v7995_v47, %v1516_v40  ;;  %v1967_v4 = vadd.f32 %v8014_v54, %v1854_v58 }
 0x176   : > { %v1965_v21 = vadd.f32 %v8066_v1, %v1852_v26  ;;  %v2062_v0 = vmax.f32 %v1966_v29, 0.0 }
 0x177   : > { %v1742_v10 = vadd.f32 %v1646_v7, %v1395_v14  ;;  %v1743_v22 = vadd.f32 %v1647_v11, %v1396_v13  ;;  %v1744_v63 = vadd.f32 %v1648_v55, %v1397_v28  ;;  %v2063_v15 = vmax.f32 %v1967_v4, 0.0 }
 0x178   : > { %v2061_v5 = vmax.f32 %v1965_v21, 0.0  ;;  %v1649_v28 = vmul.f32 %v7973_v39, %v1520_v60  ;;  %v1054_v11 = vmul.f32 %v7986_v43, %v8510_v2  ;;  %v1055_v55 = vmul.f32 %v7989_v44, %v8510_v2 }
 0x179   : > { %v1857_v61 = vmul.f32 %v7998_v48, %v1744_v63  ;;  %v913_v52 = vpop.permute.xlu1 %912  ;;  %v1856_v17 = vmul.f32 %v8001_v49, %v1743_v22  ;;  %v1855_v57 = vmul.f32 %v8004_v50, %v1742_v10  ;;  %v1056_v22 = vmul.f32 %v7992_v45, %v8510_v2 }
 0x17a   : > { %v1052_v27 = vmul.f32 %v7989_v44, %v913_v52  ;;  %v1053_v51 = vmul.f32 %v7992_v45, %v913_v52  ;;  %v1051_v3 = vmul.f32 %v7986_v43, %v913_v52 }
 0x17b   : > { %v1969_v37 = vadd.f32 %v8010_v53, %v1856_v17  ;;  %v1970_v24 = vadd.f32 %v8014_v54, %v1857_v61  ;;  %v1968_v9 = vadd.f32 %v8066_v1, %v1855_v57 }
 0x17d   : > { %v2065_v30 = vmax.f32 %v1969_v37, 0.0  ;;  %v2066_v46 = vmax.f32 %v1970_v24, 0.0  ;;  %v2064_v8 = vmax.f32 %v1968_v9, 0.0 }
 0x17e   : > { %v1173_v19 = vpop.permute.xlu1 %1172 }
 0x17f   : > { %v1302_v6 = vmul.f32 %v7959_v34, %v1173_v19  ;;  %v1303_v32 = vmul.f32 %v7962_v35, %v1173_v19  ;;  %v1304_v18 = vmul.f32 %v7970_v38, %v1173_v19  ;;  %v2125_v62 = vpack.c.bf16 %v2065_v30, %v2062_v0 }
 0x180   : > { %v2126_v36 = vpack.c.bf16 %v2066_v46, %v2063_v15  ;;  %v2124_v41 = vpack.c.bf16 %v2064_v8, %v2061_v5  ;;  %v1528_v8 = vpop.permute.xlu0 %1527 }
 0x181   : > { %v1399_v14 = vadd.f32 %v1303_v32, %v1052_v27  ;;  %v1400_v13 = vadd.f32 %v1304_v18, %v1053_v51  ;;  %2538 = vmatprep.mubr.bf16.mxu0 %v2125_v62  ;;  %v1398_v40 = vadd.f32 %v1302_v6, %v1051_v3  ;;  %v8603_v27 = vpop.f32.mrf.mxu0  ;;  %v1655_v6 = vmul.f32 %v7973_v39, %v1528_v8 }
 0x182   : > { %6853 = vmatmul.mubr.msk.bf16.gmra.mxu1 %vm2337_vm2, %v2126_v36  ;;  %2539 = vmatmul.mubr.bf16.gmra.mxu0 %v2124_v41  ;;  %v1177_v7 = vpop.permute.xlu1 %1176  ;;  %v1656_v62 = vmul.f32 %v7982_v42, %v1528_v8 }
 0x183   : > { %2741 = vmatprep.mubr.bf16.mxu1 %v10947_v16  ;;  %v1746_v26 = vadd.f32 %v1650_v59, %v1399_v14  ;;  %v1747_v58 = vadd.f32 %v1651_v33, %v1400_v13  ;;  %v1305_v10 = vmul.f32 %v7959_v34, %v1177_v7  ;;  %v1306_v63 = vmul.f32 %v7962_v35, %v1177_v7  ;;  %v8601_v59 = vpop.f32.mrf.mxu1  ;;  %v8616_v41 = vpop.f32.mrf.mxu0 }
 0x184   : > { %v1745_v61 = vadd.f32 %v1649_v28, %v1398_v40  ;;  %v1307_v52 = vmul.f32 %v7970_v38, %v1177_v7  ;;  %v1657_v13 = vmul.f32 %v7995_v47, %v1528_v8 }
 0x185   : > { %v1859_v60 = vmul.f32 %v8001_v49, %v1746_v26  ;;  %v1860_v17 = vmul.f32 %v7998_v48, %v1747_v58  ;;  %v1401_v29 = vadd.f32 %v1305_v10, %v1054_v11  ;;  %v1402_v57 = vadd.f32 %v1306_v63, %v1055_v55  ;;  %v8610_v18 = vpop.f32.mrf.mxu1 }
 0x186   : > { %v1403_v21 = vadd.f32 %v1307_v52, %v1056_v22  ;;  %v1858_v2 = vmul.f32 %v8004_v50, %v1745_v61 }
 0x187   : > { %v1524_v4 = vpop.permute.xlu1 %1523  ;;  %v1973_v51 = vadd.f32 %v8014_v54, %v1860_v17  ;;  %v1972_v15 = vadd.f32 %v8010_v53, %v1859_v60  ;;  %v8626_v52 = vpop.f32.mrf.mxu1 }
 0x188   : > { %v1652_v37 = vmul.f32 %v7973_v39, %v1524_v4  ;;  %v1653_v24 = vmul.f32 %v7982_v42, %v1524_v4  ;;  %v1654_v9 = vmul.f32 %v7995_v47, %v1524_v4  ;;  %v1971_v32 = vadd.f32 %v8066_v1, %v1858_v2  ;;  %v8629_v4 = vpop.f32.mrf.mxu0 }
 0x189   : > { %v2068_v40 = vmax.f32 %v1972_v15, 0.0  ;;  %v2069_v28 = vmax.f32 %v1973_v51, 0.0  ;;  %v8634_v51 = vpop.f32.mrf.mxu1 }
 0x18a   : > { %v1748_v0 = vadd.f32 %v1652_v37, %v1401_v29  ;;  %v1749_v30 = vadd.f32 %v1653_v24, %v1402_v57  ;;  %v1750_v46 = vadd.f32 %v1654_v9, %v1403_v21  ;;  %v2067_v61 = vmax.f32 %v1971_v32, 0.0  ;;  %v8639_v32 = vpop.f32.mrf.mxu0 }
 0x18c   : > { %v923_v19 = vpop.permute.xlu1 %922  ;;  %v1863_v5 = vmul.f32 %v7998_v48, %v1750_v46  ;;  %v1862_v3 = vmul.f32 %v8001_v49, %v1749_v30  ;;  %v1861_v36 = vmul.f32 %v8004_v50, %v1748_v0 }
 0x18d   : > { %v1057_v14 = vmul.f32 %v7986_v43, %v923_v19  ;;  %v1058_v7 = vmul.f32 %v7989_v44, %v923_v19  ;;  %v1059_v10 = vmul.f32 %v7992_v45, %v923_v19 }
 0x18e   : > { %v1976_v33 = vadd.f32 %v8014_v54, %v1863_v5  ;;  %v1975_v55 = vadd.f32 %v8010_v53, %v1862_v3  ;;  %v1974_v58 = vadd.f32 %v8066_v1, %v1861_v36  ;;  %v1060_v5 = vmul.f32 %v7986_v43, %v8523_v25 }
 0x190   : > { %v2072_v26 = vmax.f32 %v1976_v33, 0.0  ;;  %v2071_v17 = vmax.f32 %v1975_v55, 0.0  ;;  %v2070_v57 = vmax.f32 %v1974_v58, 0.0 }
 0x191   : > { %v1181_v11 = vpop.permute.xlu1 %1180 }
 0x192   : > { %v1308_v22 = vmul.f32 %v7959_v34, %v1181_v11  ;;  %v1309_v63 = vmul.f32 %v7962_v35, %v1181_v11  ;;  %v1310_v60 = vmul.f32 %v7970_v38, %v1181_v11  ;;  %v2129_v29 = vpack.c.bf16 %v2072_v26, %v2069_v28  ;;  %v8653_v26 = vpop.f32.mrf.mxu0 }
 0x193   : > { %v2128_v9 = vpack.c.bf16 %v2071_v17, %v2068_v40  ;;  %v2127_v2 = vpack.c.bf16 %v2070_v57, %v2067_v61  ;;  %v8648_v40 = vpop.f32.mrf.mxu1 }
 0x194   : > { %v1404_v21 = vadd.f32 %v1308_v22, %v1057_v14  ;;  %v1405_v37 = vadd.f32 %v1309_v63, %v1058_v7  ;;  %v1406_v24 = vadd.f32 %v1310_v60, %v1059_v10  ;;  %6854 = vmatmul.mubr.msk.bf16.gmra.mxu1 %vm2337_vm2, %v2129_v29 }
 0x195   : > { %v1185_v0 = vpop.permute.xlu1 %1184  ;;  %2751 = vmatprep.mubr.bf16.mxu1 %v10947_v16  ;;  %2548 = vmatprep.mubr.bf16.mxu0 %v2128_v9  ;;  %v8657_v60 = vpop.f32.mrf.mxu1 }
 0x196   : > { %v1751_v30 = vadd.f32 %v1655_v6, %v1404_v21  ;;  %v1752_v46 = vadd.f32 %v1656_v62, %v1405_v37  ;;  %v1311_v8 = vmul.f32 %v7959_v34, %v1185_v0  ;;  %v1753_v19 = vadd.f32 %v1657_v13, %v1406_v24  ;;  %2549 = vmatmul.mubr.bf16.gmra.mxu0 %v2127_v2  ;;  %v8663_v24 = vpop.f32.mrf.mxu0 }
 0x197   : > { %v1312_v15 = vmul.f32 %v7962_v35, %v1185_v0  ;;  %v1313_v3 = vmul.f32 %v7970_v38, %v1185_v0  ;;  %v1061_v6 = vmul.f32 %v7989_v44, %v8523_v25  ;;  %v1062_v62 = vmul.f32 %v7992_v45, %v8523_v25  ;;  %v1536_v0 = vpop.permute.xlu0 %1535 }
 0x198   : > { %v1864_v33 = vmul.f32 %v8004_v50, %v1751_v30  ;;  %v1865_v36 = vmul.f32 %v8001_v49, %v1752_v46  ;;  %v1407_v14 = vadd.f32 %v1311_v8, %v1060_v5  ;;  %v1866_v28 = vmul.f32 %v7998_v48, %v1753_v19  ;;  %v8669_v19 = vpop.f32.mrf.mxu1 }
 0x199   : > { %v1408_v7 = vadd.f32 %v1312_v15, %v1061_v6  ;;  %v1409_v58 = vadd.f32 %v1313_v3, %v1062_v62  ;;  %v8672_v62 = vpop.f32.mrf.mxu0 }
 0x19a   : > { %v1532_v13 = vpop.permute.xlu1 %1531  ;;  %v1978_v61 = vadd.f32 %v8010_v53, %v1865_v36  ;;  %v1979_v17 = vadd.f32 %v8014_v54, %v1866_v28  ;;  %v1977_v37 = vadd.f32 %v8066_v1, %v1864_v33 }
 0x19b   : > { %v1658_v11 = vmul.f32 %v7973_v39, %v1532_v13  ;;  %v1659_v55 = vmul.f32 %v7982_v42, %v1532_v13  ;;  %v1660_v25 = vmul.f32 %v7995_v47, %v1532_v13 }
 0x19c   : > { %v2074_v30 = vmax.f32 %v1978_v61, 0.0  ;;  %v2075_v3 = vmax.f32 %v1979_v17, 0.0  ;;  %v2073_v6 = vmax.f32 %v1977_v37, 0.0  ;;  %v8680_v61 = vpop.f32.mrf.mxu1  ;;  %v1663_v17 = vmul.f32 %v7995_v47, %v1536_v0  ;;  %v8683_v37 = vpop.f32.mrf.mxu0 }
 0x19d   : > { %v1754_v10 = vadd.f32 %v1658_v11, %v1407_v14  ;;  %v1755_v22 = vadd.f32 %v1659_v55, %v1408_v7  ;;  %v1756_v63 = vadd.f32 %v1660_v25, %v1409_v58  ;;  %v1662_v25 = vmul.f32 %v7982_v42, %v1536_v0 }
 0x19f   : > { %v933_v29 = vpop.permute.xlu1 %932  ;;  %v1868_v57 = vmul.f32 %v8001_v49, %v1755_v22  ;;  %v1867_v21 = vmul.f32 %v8004_v50, %v1754_v10  ;;  %v1869_v9 = vmul.f32 %v7998_v48, %v1756_v63  ;;  %v938_v22 = vpop.permute.xlu0 %937 }
 0x1a0   : > { %v1063_v15 = vmul.f32 %v7986_v43, %v933_v29  ;;  %v1064_v33 = vmul.f32 %v7989_v44, %v933_v29  ;;  %v1065_v36 = vmul.f32 %v7992_v45, %v933_v29 }
 0x1a1   : > { %v1981_v2 = vadd.f32 %v8010_v53, %v1868_v57  ;;  %v1982_v46 = vadd.f32 %v8014_v54, %v1869_v9  ;;  %v1980_v8 = vadd.f32 %v8066_v1, %v1867_v21  ;;  %v1661_v9 = vmul.f32 %v7973_v39, %v1536_v0 }
 0x1a3   : > { %v2077_v5 = vmax.f32 %v1981_v2, 0.0  ;;  %v2078_v13 = vmax.f32 %v1982_v46, 0.0  ;;  %v2076_v28 = vmax.f32 %v1980_v8, 0.0 }
 0x1a4   : > { %v1189_v14 = vpop.permute.xlu1 %1188 }
 0x1a5   : > { %v1314_v7 = vmul.f32 %v7959_v34, %v1189_v14  ;;  %v1315_v11 = vmul.f32 %v7962_v35, %v1189_v14  ;;  %v1316_v55 = vmul.f32 %v7970_v38, %v1189_v14  ;;  %v2131_v58 = vpack.c.bf16 %v2077_v5, %v2074_v30  ;;  %v8687_v30 = vpop.f32.mrf.mxu1 }
 0x1a6   : > { %v2132_v10 = vpack.c.bf16 %v2078_v13, %v2075_v3  ;;  %v2130_v63 = vpack.c.bf16 %v2076_v28, %v2073_v6  ;;  %10952 = vst [vmem:[#allocation8_spill] sm:$0xff] %v8687_v30  ;;  %v1066_v5 = vmul.f32 %v7986_v43, %v938_v22  ;;  %v8698_v13 = vpop.permute.xlu0 %947 }
 0x1a7   : > { %v1410_v29 = vadd.f32 %v1314_v7, %v1063_v15  ;;  %v1411_v57 = vadd.f32 %v1315_v11, %v1064_v33  ;;  %v1412_v21 = vadd.f32 %v1316_v55, %v1065_v36  ;;  %2558 = vmatprep.mubr.bf16.mxu0 %v2131_v58  ;;  %v8692_v15 = vpop.f32.mrf.mxu0  ;;  %v1067_v33 = vmul.f32 %v7989_v44, %v938_v22  ;;  %v8700_v28 = vpop.f32.mrf.mxu1 }
 0x1a8   : > { %6855 = vmatmul.mubr.msk.bf16.gmra.mxu1 %vm2337_vm2, %v2132_v10  ;;  %2559 = vmatmul.mubr.bf16.gmra.mxu0 %v2130_v63  ;;  %v1193_v2 = vpop.permute.xlu1 %1192  ;;  %10953 = vst [vmem:[#allocation9_spill] sm:$0xff] %v8692_v15  ;;  %v1068_v36 = vmul.f32 %v7992_v45, %v938_v22  ;;  %10954 = vst [vmem:[#allocation10_spill] sm:$0xff] %v8700_v28 }
 0x1a9   : > { %v1758_v46 = vadd.f32 %v1662_v25, %v1411_v57  ;;  %v1759_v8 = vadd.f32 %v1663_v17, %v1412_v21  ;;  %v1317_v3 = vmul.f32 %v7959_v34, %v1193_v2  ;;  %2761 = vmatprep.mubr.bf16.mxu1 %v10947_v16  ;;  %v1757_v6 = vadd.f32 %v1661_v9, %v1410_v29  ;;  %v8704_v25 = vpop.f32.mrf.mxu0 }
 0x1aa   : > { %v1318_v0 = vmul.f32 %v7962_v35, %v1193_v2  ;;  %v1319_v14 = vmul.f32 %v7970_v38, %v1193_v2  ;;  %10955 = vst [vmem:[#allocation11_spill] sm:$0xff] %v8704_v25  ;;  %v8710_v2 = vpop.f32.mrf.mxu1 }
 0x1ab   : > { %v1872_v7 = vmul.f32 %v7998_v48, %v1759_v8  ;;  %v1413_v11 = vadd.f32 %v1317_v3, %v1066_v5  ;;  %v1871_v58 = vmul.f32 %v8001_v49, %v1758_v46  ;;  %v1870_v22 = vmul.f32 %v8004_v50, %v1757_v6  ;;  %10956 = vst [vmem:[#allocation12_spill] sm:$0xff] %v8710_v2  ;;  %v1544_v5 = vpop.permute.xlu0 %1543  ;;  %v8713_v3 = vpop.f32.mrf.mxu0 }
 0x1ac   : > { %v1414_v10 = vadd.f32 %v1318_v0, %v1067_v33  ;;  %v1415_v29 = vadd.f32 %v1319_v14, %v1068_v36  ;;  %10957 = vst [vmem:[#allocation13_spill] sm:$0xff] %v8713_v3  ;;  %v1669_v28 = vmul.f32 %v7995_v47, %v1544_v5 }
 0x1ad   : > { %v1540_v55 = vpop.permute.xlu1 %1539  ;;  %v1984_v46 = vadd.f32 %v8010_v53, %v1871_v58  ;;  %v1985_v23 = vadd.f32 %v8014_v54, %v1872_v7  ;;  %v1983_v36 = vadd.f32 %v8066_v1, %v1870_v22  ;;  %v1667_v58 = vmul.f32 %v7973_v39, %v1544_v5  ;;  %v8727_v7 = vpop.f32.mrf.mxu0 }
 0x1ae   : > { %v1664_v63 = vmul.f32 %v7973_v39, %v1540_v55  ;;  %v1665_v17 = vmul.f32 %v7982_v42, %v1540_v55  ;;  %v1666_v57 = vmul.f32 %v7995_v47, %v1540_v55 }
 0x1af   : > { %v2079_v22 = vmax.f32 %v1983_v36, 0.0  ;;  %v8734_v15 = vpop.f32.mrf.mxu0 }
 0x1b0   : > { %v1760_v21 = vadd.f32 %v1664_v63, %v1413_v11  ;;  %v1761_v9 = vadd.f32 %v1665_v17, %v1414_v10  ;;  %v1762_v8 = vadd.f32 %v1666_v57, %v1415_v29  ;;  %v8722_v10 = vpop.f32.mrf.mxu1  ;;  %v1668_v63 = vmul.f32 %v7982_v42, %v1544_v5  ;;  %10959 = vst [vmem:[#allocation15_spill] sm:$0xff] %v8734_v15 }
 0x1b1   : > { %v2080_v17 = vmax.f32 %v1984_v46, 0.0  ;;  %v2630_v15 = vadd.f32 %v8634_v51, %v8639_v32  ;;  %v8745_v25 = vpop.f32.mrf.mxu0  ;;  %v2626_v32 = vadd.f32 %v8610_v18, %v8616_v41  ;;  %v2858_v41 = vld [vmem:[%s10961_s8] sm:$0x3] }
 0x1b2   : > { %v943_v33 = vpop.permute.xlu1 %942  ;;  %v1874_v0 = vmul.f32 %v8001_v49, %v1761_v9  ;;  %v1873_v6 = vmul.f32 %v8004_v50, %v1760_v21  ;;  %v1875_v14 = vmul.f32 %v7998_v48, %v1762_v8  ;;  %v2081_v21 = vmax.f32 %v1985_v23, 0.0  ;;  %v8729_v8 = vpop.f32.mrf.mxu1 }
 0x1b3   : > { %10958 = vst [vmem:[#allocation14_spill] sm:$0xff] %v8729_v8  ;;  %v1071_v56 = vmul.f32 %v7992_v45, %v943_v33 }
 0x1b4   : > { %v1987_v11 = vadd.f32 %v8010_v53, %v1874_v0  ;;  %v1986_v55 = vadd.f32 %v8066_v1, %v1873_v6  ;;  %v1988_v29 = vadd.f32 %v8014_v54, %v1875_v14  ;;  %v1069_v0 = vmul.f32 %v7986_v43, %v943_v33 }
 0x1b5   : > { %v1070_v6 = vmul.f32 %v7989_v44, %v943_v33  ;;  %v8740_v33 = vpop.f32.mrf.mxu1 }
 0x1b6   : > { %v2083_v57 = vmax.f32 %v1987_v11, 0.0  ;;  %v2082_v9 = vmax.f32 %v1986_v55, 0.0  ;;  %v2084_v30 = vmax.f32 %v1988_v29, 0.0 }
 0x1b7   : > { %v1197_v31 = vpop.permute.xlu1 %1196 }
 0x1b8   : > { %v1320_v46 = vmul.f32 %v7959_v34, %v1197_v31  ;;  %v1321_v14 = vmul.f32 %v7962_v35, %v1197_v31  ;;  %v1322_v23 = vmul.f32 %v7970_v38, %v1197_v31  ;;  %v2134_v36 = vpack.c.bf16 %v2083_v57, %v2080_v17 }
 0x1b9   : > { %v2135_v11 = vpack.c.bf16 %v2084_v30, %v2081_v21  ;;  %v2133_v55 = vpack.c.bf16 %v2082_v9, %v2079_v22  ;;  %v8778_v9 = vrot.slane %v2858_v41, %v7927_v12 }
 0x1ba   : > { %v1416_v8 = vadd.f32 %v1320_v46, %v1069_v0  ;;  %v1417_v2 = vadd.f32 %v1321_v14, %v1070_v6  ;;  %v1418_v3 = vadd.f32 %v1322_v23, %v1071_v56  ;;  %2568 = vmatprep.mubr.bf16.mxu0 %v2134_v36  ;;  %v2782_v56 = vld [vmem:[%s10960_s0] sm:$0x3]  ;;  %v2628_v14 = vadd.f32 %v8626_v52, %v8629_v4 }
 0x1bb   : > { %6856 = vmatmul.mubr.msk.bf16.gmra.mxu1 %vm2337_vm2, %v2135_v11  ;;  %2569 = vmatmul.mubr.bf16.gmra.mxu0 %v2133_v55  ;;  %v1201_v29 = vpop.permute.xlu1 %1200  ;;  %v8754_v57 = vrot.slane %v2782_v56, %v7927_v12  ;;  %v2624_v52 = vadd.f32 %v8601_v59, %v8603_v27  ;;  %v8799_v4 = vrot.slane %v2782_v56, %v7941_v20 }
 0x1bc   : > { %v1763_v31 = vadd.f32 %v1667_v58, %v1416_v8  ;;  %v1764_v30 = vadd.f32 %v1668_v63, %v1417_v2  ;;  %2771 = vmatprep.mubr.bf16.mxu1 %v10947_v16  ;;  %v1323_v5 = vmul.f32 %v7959_v34, %v1201_v29  ;;  %v1324_v17 = vmul.f32 %v7962_v35, %v1201_v29  ;;  %v8759_v2 = vpop.f32.mrf.mxu1  ;;  %v8766_v35 = vpop.f32.mrf.mxu0 }
 0x1bd   : > { %v1765_v21 = vadd.f32 %v1669_v28, %v1418_v3  ;;  %v1325_v51 = vmul.f32 %v7970_v38, %v1201_v29  ;;  %v1072_v58 = vmul.f32 %v7986_v43, %v8698_v13  ;;  %v1073_v63 = vmul.f32 %v7989_v44, %v8698_v13 }
 0x1be   : > { %v2797_v34 = vmul.f32 %v8754_v57, %v2630_v15  ;;  %v1074_v28 = vmul.f32 %v7992_v45, %v8698_v13  ;;  %v1876_v38 = vmul.f32 %v8004_v50, %v1763_v31  ;;  %v1877_v3 = vmul.f32 %v8001_v49, %v1764_v30  ;;  %v8790_v36 = vpop.f32.mrf.mxu0 }
 0x1bf   : > { %v1419_v43 = vadd.f32 %v1323_v5, %v1072_v58  ;;  %v1420_v22 = vadd.f32 %v1324_v17, %v1073_v63  ;;  %v1878_v45 = vmul.f32 %v7998_v48, %v1765_v21  ;;  %v2795_v0 = vmul.f32 %v8754_v57, %v2626_v32 }
 0x1c0   : > { %v1548_v18 = vpop.permute.xlu1 %1547  ;;  %v1421_v13 = vadd.f32 %v1325_v51, %v1074_v28  ;;  %v2873_v23 = vadd.f32 %v8778_v9, %v2797_v34  ;;  %v1989_v31 = vadd.f32 %v8066_v1, %v1876_v38  ;;  %v8804_v30 = vpop.f32.mrf.mxu0  ;;  %v2796_v27 = vmul.f32 %v8799_v4, %v2628_v14 }
 0x1c1   : > { %v1670_v44 = vmul.f32 %v7973_v39, %v1548_v18  ;;  %v1671_v15 = vmul.f32 %v7982_v42, %v1548_v18  ;;  %v1672_v8 = vmul.f32 %v7995_v47, %v1548_v18  ;;  %v2640_v39 = vadd.f32 %v8680_v61, %v8683_v37  ;;  %v8788_v42 = vpop.f32.mrf.mxu1 }
 0x1c2   : > { %v1990_v47 = vadd.f32 %v8010_v53, %v1877_v3  ;;  %v1991_v61 = vadd.f32 %v8014_v54, %v1878_v45  ;;  %v2871_v5 = vadd.f32 %v8778_v9, %v2795_v0  ;;  %v2937_v56 = vmax.f32 %v2873_v23, 0.0 }
 0x1c3   : > { %v1766_v6 = vadd.f32 %v1670_v44, %v1419_v43  ;;  %v1767_v46 = vadd.f32 %v1671_v15, %v1420_v22  ;;  %v1768_v11 = vadd.f32 %v1672_v8, %v1421_v13  ;;  %v8802_v37 = vpop.f32.mrf.mxu1  ;;  %v2801_v21 = vmul.f32 %v8754_v57, %v2640_v39 }
 0x1c4   : > { %v2086_v32 = vmax.f32 %v1990_v47, 0.0  ;;  %v2085_v63 = vmax.f32 %v1989_v31, 0.0  ;;  %v2794_v34 = vmul.f32 %v8799_v4, %v2624_v52  ;;  %v8817_v28 = vrot.slane %v2858_v41, %v7941_v20 }
 0x1c5   : > { %v1880_v55 = vmul.f32 %v8001_v49, %v1767_v46  ;;  %v1879_v29 = vmul.f32 %v8004_v50, %v1766_v6  ;;  %v1881_v49 = vmul.f32 %v7998_v48, %v1768_v11  ;;  %v2636_v50 = vadd.f32 %v8657_v60, %v8663_v24  ;;  %v8819_v60 = vpop.f32.mrf.mxu1  ;;  %v10963_v46 = vld [vmem:[#allocation10_spill] sm:$0xff] }
 0x1c6   : > { %v2935_v38 = vmax.f32 %v2871_v5, 0.0  ;;  %v2872_v43 = vadd.f32 %v8817_v28, %v2796_v27  ;;  %v2638_v22 = vadd.f32 %v8669_v19, %v8672_v62  ;;  %v2877_v41 = vadd.f32 %v8778_v9, %v2801_v21  ;;  %v10962_v62 = vld [vmem:[#allocation11_spill] sm:$0xff] }
 0x1c7   : > { %v1993_v17 = vadd.f32 %v8010_v53, %v1880_v55  ;;  %v1992_v59 = vadd.f32 %v8066_v1, %v1879_v29  ;;  %v1994_v51 = vadd.f32 %v8014_v54, %v1881_v49  ;;  %v8821_v53 = vpop.f32.mrf.mxu0  ;;  %v2087_v1 = vmax.f32 %v1991_v61, 0.0  ;;  %v8833_v0 = vpop.f32.mrf.mxu1  ;;  %v10964_v61 = vld [vmem:[#allocation13_spill] sm:$0xff]  ;;  %v10965_v49 = vld [vmem:[#allocation12_spill] sm:$0xff] }
 0x1c8   : > { %v2799_v3 = vmul.f32 %v8754_v57, %v2636_v50  ;;  %v2650_v15 = vadd.f32 %v8722_v10, %v8727_v7  ;;  %v2999_v45 = vpack.c.bf16 %v2937_v56, %v2935_v38  ;;  %v2870_v13 = vadd.f32 %v8817_v28, %v2794_v34 }
 0x1c9   : > { %v2089_v58 = vmax.f32 %v1993_v17, 0.0  ;;  %v2088_v48 = vmax.f32 %v1992_v59, 0.0  ;;  %v2090_v24 = vmax.f32 %v1994_v51, 0.0  ;;  %v2634_v8 = vadd.f32 %v8648_v40, %v8653_v26  ;;  %v8835_v6 = vpop.f32.mrf.mxu0  ;;  %v2669_v11 = vpop.f32.mrf.mxu1  ;;  %v10966_v51 = vld [vmem:[#allocation9_spill] sm:$0xff] }
 0x1ca   : > { %v2875_v19 = vadd.f32 %v8778_v9, %v2799_v3  ;;  %v2646_v14 = vadd.f32 %v10963_v46, %v10962_v62  ;;  %v2936_v10 = vmax.f32 %v2872_v43, 0.0  ;;  %v2800_v7 = vmul.f32 %v8799_v4, %v2638_v22  ;;  %v10969_v62 = vld [vmem:[#allocation14_spill] sm:$0xff] }
 0x1cb   : > { %v2137_v18 = vpack.c.bf16 %v2089_v58, %v2086_v32  ;;  %v2136_v54 = vpack.c.bf16 %v2088_v48, %v2085_v63  ;;  %v2138_v44 = vpack.c.bf16 %v2090_v24, %v2087_v1  ;;  %v2941_v23 = vmax.f32 %v2877_v41, 0.0  ;;  %v2476_v55 = vpop.f32.mrf.mxu0  ;;  %v10967_v32 = vld [vmem:[#allocation8_spill] sm:$0xff] }
 0x1cc   : > { %v2805_v40 = vmul.f32 %v8754_v57, %v2650_v15  ;;  %v2934_v26 = vmax.f32 %v2870_v13, 0.0  ;;  %v2798_v39 = vmul.f32 %v8799_v4, %v2634_v8  ;;  %v2939_v47 = vmax.f32 %v2875_v19, 0.0  ;;  %v10968_v19 = vld [vmem:[#allocation15_spill] sm:$0xff] }
 0x1cd   : > { %2578 = vmatprep.mubr.bf16.mxu0 %v2137_v18  ;;  %6857 = vmatmul.mubr.msk.bf16.gmra.mxu1 %vm2337_vm2, %v2138_v44  ;;  %v2803_v29 = vmul.f32 %v8754_v57, %v2646_v14  ;;  %v2876_v52 = vadd.f32 %v8817_v28, %v2800_v7  ;;  %v2648_v5 = vadd.f32 %v10965_v49, %v10964_v61 }
 0x1ce   : > { %2579 = vmatmul.mubr.bf16.gmra.mxu0 %v2136_v54  ;;  %6867 = vmatprep.mubr.msk.bf16.mxu1 %vm3098_vm3, %v2999_v45  ;;  %v2998_v31 = vpack.c.bf16 %v2936_v10, %v2934_v26  ;;  %v2881_v59 = vadd.f32 %v8778_v9, %v2805_v40  ;;  %v2660_v27 = vadd.f32 %v8788_v42, %v8790_v36 }
 0x1cf   : > { %v8849_v50 = vpop.f32.mrf.mxu1  ;;  %v8851_v17 = vpop.f32.mrf.mxu0  ;;  %v3001_v56 = vpack.c.bf16 %v2941_v23, %v2939_v47  ;;  %v2874_v21 = vadd.f32 %v8817_v28, %v2798_v39  ;;  %v2644_v58 = vadd.f32 %v10967_v32, %v10966_v51  ;;  %v2879_v63 = vadd.f32 %v8778_v9, %v2803_v29 }
 0x1d0   : > { %v2656_v48 = vadd.f32 %v8740_v33, %v8745_v25  ;;  %v2940_v34 = vmax.f32 %v2876_v52, 0.0  ;;  %v2804_v1 = vmul.f32 %v8799_v4, %v2648_v5  ;;  %v2945_v42 = vmax.f32 %v2881_v59, 0.0 }
 0x1d1   : > { %v2675_v24 = vpop.f32.mrf.mxu1  ;;  %v2482_v38 = vpop.f32.mrf.mxu0  ;;  %v2809_v36 = vmul.f32 %v8754_v57, %v2660_v27  ;;  %v2938_v3 = vmax.f32 %v2874_v21, 0.0  ;;  %v2802_v18 = vmul.f32 %v8799_v4, %v2644_v58  ;;  %v2943_v54 = vmax.f32 %v2879_v63, 0.0 }
 0x1d2   : > { %v2807_v43 = vmul.f32 %v8754_v57, %v2656_v48  ;;  %v2880_v22 = vadd.f32 %v8817_v28, %v2804_v1  ;;  %v2658_v25 = vadd.f32 %v8759_v2, %v8766_v35  ;;  %v2670_v45 = vadd.f32 %v2669_v11, %v2476_v55 }
 0x1d3   : > { %v2677_v33 = vpop.f32.mrf.mxu1  ;;  %v2484_v44 = vpop.f32.mrf.mxu0  ;;  %v3000_v41 = vpack.c.bf16 %v2940_v34, %v2938_v3  ;;  %v2885_v15 = vadd.f32 %v8778_v9, %v2809_v36  ;;  %v3003_v13 = vpack.c.bf16 %v2945_v42, %v2943_v54  ;;  %v2878_v8 = vadd.f32 %v8817_v28, %v2802_v18 }
 0x1d4   : > { %v2654_v46 = vadd.f32 %v10969_v62, %v10968_v19  ;;  %v2883_v14 = vadd.f32 %v8778_v9, %v2807_v43  ;;  %v2666_v10 = vadd.f32 %v8819_v60, %v8821_v53  ;;  %v2944_v2 = vmax.f32 %v2880_v22, 0.0 }
 0x1d5   : > { %3185 = vmatmul.mubr.bf16.vlgmr.msra.gmra.mxu1 %v2998_v31  ;;  %v2808_v35 = vmul.f32 %v8799_v4, %v2658_v25  ;;  %v2679_v7 = vpop.f32.mrf.mxu1  ;;  %v2486_v23 = vpop.f32.mrf.mxu0  ;;  %v2949_v40 = vmax.f32 %v2885_v15, 0.0  ;;  %v2813_v26 = vmul.f32 %v8754_v57, %v2670_v45  ;;  %v2942_v39 = vmax.f32 %v2878_v8, 0.0 }
 0x1d6   : > { %6868 = vmatprep.mubr.msk.bf16.mxu1 %vm3098_vm3, %v3001_v56  ;;  %v2806_v11 = vmul.f32 %v8799_v4, %v2654_v46  ;;  %v2947_v29 = vmax.f32 %v2883_v14, 0.0  ;;  %v2811_v31 = vmul.f32 %v8754_v57, %v2666_v10  ;;  %v2668_v53 = vadd.f32 %v8833_v0, %v8835_v6 }
 0x1d7   : > { %v2884_v60 = vadd.f32 %v8817_v28, %v2808_v35  ;;  %v3002_v49 = vpack.c.bf16 %v2944_v2, %v2942_v39  ;;  %v2889_v5 = vadd.f32 %v8778_v9, %v2813_v26  ;;  %v2680_v59 = vadd.f32 %v2679_v7, %v2486_v23 }
 0x1d8   : > { %v3005_v27 = vpack.c.bf16 %v2949_v40, %v2947_v29  ;;  %v2882_v56 = vadd.f32 %v8817_v28, %v2806_v11  ;;  %v2664_v21 = vadd.f32 %v8802_v37, %v8804_v30  ;;  %v2887_v58 = vadd.f32 %v8778_v9, %v2811_v31 }
 0x1d9   : > { %v2676_v63 = vadd.f32 %v2675_v24, %v2482_v38  ;;  %v2948_v0 = vmax.f32 %v2884_v60, 0.0  ;;  %v2812_v6 = vmul.f32 %v8799_v4, %v2668_v53  ;;  %v2953_v48 = vmax.f32 %v2889_v5, 0.0 }
 0x1da   : > { %v2817_v34 = vmul.f32 %v8754_v57, %v2680_v59  ;;  %v2946_v1 = vmax.f32 %v2882_v56, 0.0  ;;  %v2810_v42 = vmul.f32 %v8799_v4, %v2664_v21  ;;  %v2951_v37 = vmax.f32 %v2887_v58, 0.0 }
 0x1db   : > { %v2815_v30 = vmul.f32 %v8754_v57, %v2676_v63  ;;  %v2888_v18 = vadd.f32 %v8817_v28, %v2812_v6  ;;  %v2678_v54 = vadd.f32 %v2677_v33, %v2484_v44 }
 0x1dc   : > { %v3004_v24 = vpack.c.bf16 %v2948_v0, %v2946_v1  ;;  %v2893_v38 = vadd.f32 %v8778_v9, %v2817_v34  ;;  %v3007_v22 = vpack.c.bf16 %v2953_v48, %v2951_v37  ;;  %v2886_v25 = vadd.f32 %v8817_v28, %v2810_v42 }
 0x1dd   : > { %3193 = vmatmul.mubr.bf16.gmra.mxu1 %v3000_v41  ;;  %v2674_v41 = vadd.f32 %v8849_v50, %v8851_v17  ;;  %v2891_v15 = vadd.f32 %v8778_v9, %v2815_v30  ;;  %v2816_v8 = vmul.f32 %v8799_v4, %v2678_v54 }
 0x1de   : > { %6869 = vmatprep.mubr.msk.bf16.mxu1 %vm3098_vm3, %v3003_v13  ;;  %v2952_v13 = vmax.f32 %v2888_v18, 0.0  ;;  %v2957_v33 = vmax.f32 %v2893_v38, 0.0  ;;  %v2950_v19 = vmax.f32 %v2886_v25, 0.0 }
 0x1df   : > { %v2814_v62 = vmul.f32 %v8799_v4, %v2674_v41  ;;  %v2955_v46 = vmax.f32 %v2891_v15, 0.0  ;;  %v2892_v50 = vadd.f32 %v8817_v28, %v2816_v8 }
 0x1e0   : > { %v3006_v10 = vpack.c.bf16 %v2952_v13, %v2950_v19 }
 0x1e1   : > { %v3009_v23 = vpack.c.bf16 %v2957_v33, %v2955_v46  ;;  %v2890_v40 = vadd.f32 %v8817_v28, %v2814_v62  ;;  %v2956_v31 = vmax.f32 %v2892_v50, 0.0 }
 0x1e2   : > { %v2683_v55 = vpop.f32.mrf.mxu1  ;;  %v2490_v47 = vpop.f32.mrf.mxu0 }
 0x1e3   : > { %v2684_v26 = vadd.f32 %v2683_v55, %v2490_v47  ;;  %v2954_v5 = vmax.f32 %v2890_v40, 0.0 }
 0x1e4   : > { %v2685_v52 = vpop.f32.mrf.mxu1  ;;  %v2492_v61 = vpop.f32.mrf.mxu0 }
 0x1e5   : > { %3201 = vmatmul.mubr.bf16.gmra.mxu1 %v3002_v49  ;;  %v2686_v45 = vadd.f32 %v2685_v52, %v2492_v61  ;;  %v2818_v59 = vmul.f32 %v8799_v4, %v2684_v26  ;;  %v3008_v58 = vpack.c.bf16 %v2956_v31, %v2954_v5 }
 0x1e6   : > { %v2687_v51 = vpop.f32.mrf.mxu1  ;;  %v2494_v32 = vpop.f32.mrf.mxu0  ;;  %6870 = vmatprep.mubr.msk.bf16.mxu1 %vm3098_vm3, %v3005_v27 }
 0x1e7   : > { %v2819_v14 = vmul.f32 %v8754_v57, %v2686_v45  ;;  %v2688_v17 = vadd.f32 %v2687_v51, %v2494_v32  ;;  %v2894_v0 = vadd.f32 %v8817_v28, %v2818_v59 }
 0x1e8   : > { %v2689_v36 = vpop.f32.mrf.mxu1  ;;  %v2496_v3 = vpop.f32.mrf.mxu0 }
 0x1e9   : > { %v2690_v43 = vadd.f32 %v2689_v36, %v2496_v3  ;;  %v2895_v39 = vadd.f32 %v8778_v9, %v2819_v14  ;;  %v2820_v60 = vmul.f32 %v8799_v4, %v2688_v17  ;;  %v2958_v3 = vmax.f32 %v2894_v0, 0.0 }
 0x1eb   : > { %v2821_v44 = vmul.f32 %v8754_v57, %v2690_v43  ;;  %v2959_v55 = vmax.f32 %v2895_v39, 0.0  ;;  %v2896_v21 = vadd.f32 %v8817_v28, %v2820_v60 }
 0x1ed   : > { %3209 = vmatmul.mubr.bf16.gmra.mxu1 %v3004_v24  ;;  %v2897_v2 = vadd.f32 %v8778_v9, %v2821_v44  ;;  %v2960_v1 = vmax.f32 %v2896_v21, 0.0 }
 0x1ee   : > { %6871 = vmatprep.mubr.msk.bf16.mxu1 %vm3098_vm3, %v3007_v22 }
 0x1ef   : > { %v2961_v52 = vmax.f32 %v2897_v2, 0.0  ;;  %v3010_v24 = vpack.c.bf16 %v2960_v1, %v2958_v3 }
 0x1f1   : > { %v3011_v63 = vpack.c.bf16 %v2961_v52, %v2959_v55 }
 0x1f5   : > { %v2693_v35 = vpop.f32.mrf.mxu1  ;;  %v2500_v7 = vpop.f32.mrf.mxu0  ;;  %3217 = vmatmul.mubr.bf16.gmra.mxu1 %v3006_v10 }
 0x1f6   : > { %6872 = vmatprep.mubr.msk.bf16.mxu1 %vm3098_vm3, %v3009_v23  ;;  %v2694_v6 = vadd.f32 %v2693_v35, %v2500_v7 }
 0x1f7   : > { %v2695_v11 = vpop.f32.mrf.mxu1  ;;  %v2502_v29 = vpop.f32.mrf.mxu0 }
 0x1f8   : > { %v2696_v53 = vadd.f32 %v2695_v11, %v2502_v29  ;;  %v2822_v37 = vmul.f32 %v8799_v4, %v2694_v6 }
 0x1f9   : > { %v2697_v61 = vpop.f32.mrf.mxu1  ;;  %v2504_v49 = vpop.f32.mrf.mxu0 }
 0x1fa   : > { %v2823_v27 = vmul.f32 %v8754_v57, %v2696_v53  ;;  %v2698_v51 = vadd.f32 %v2697_v61, %v2504_v49  ;;  %v2898_v43 = vadd.f32 %v8817_v28, %v2822_v37 }
 0x1fb   : > { %v2699_v47 = vpop.f32.mrf.mxu1  ;;  %v2506_v56 = vpop.f32.mrf.mxu0 }
 0x1fc   : > { %v2700_v32 = vadd.f32 %v2699_v47, %v2506_v56  ;;  %v2899_v48 = vadd.f32 %v8778_v9, %v2823_v27  ;;  %v2824_v42 = vmul.f32 %v8799_v4, %v2698_v51  ;;  %v2962_v15 = vmax.f32 %v2898_v43, 0.0 }
 0x1fd   : > { %3225 = vmatmul.mubr.bf16.gmra.mxu1 %v3008_v58  ;;  %v7342_v58 = vld [vmem:[%s10879_s10 + $0x18] sm:$0xff]  }
 0x1fe   : > { %v2825_v34 = vmul.f32 %v8754_v57, %v2700_v32  ;;  %6873 = vmatprep.mubr.msk.bf16.mxu1 %vm3098_vm3, %v3011_v63  ;;  %v2963_v30 = vmax.f32 %v2899_v48, 0.0  ;;  %v2900_v54 = vadd.f32 %v8817_v28, %v2824_v42  ;;  %7046 = vmatprep.subr.bf16.mxu0 %v7342_v58 }
 0x1ff   : > { %7047 = vmatpush3.bf16.msra.mxu0 %v7342_v58 }
 0x200   : > { %v2901_v36 = vadd.f32 %v8778_v9, %v2825_v34  ;;  %v2964_v22 = vmax.f32 %v2900_v54, 0.0  ;;  %v7343_v34 = vld [vmem:[%s10879_s10 + $0x10] sm:$0xff]  }
 0x201   : > { %7048 = vmatprep.subr.bf16.mxu0 %v7343_v34 }
 0x202   : > { %v2965_v18 = vmax.f32 %v2901_v36, 0.0  ;;  %v3012_v62 = vpack.c.bf16 %v2964_v22, %v2962_v15  ;;  %v7345_v22 = vld [vmem:[%s10879_s10] sm:$0xff]  }
 0x203   : > { %7049 = vmatpush3.bf16.msra.mxu0 %v7343_v34 }
 0x204   : > { %v3013_v38 = vpack.c.bf16 %v2965_v18, %v2963_v30 }
 0x205   : > { %3233 = vmatmul.mubr.bf16.gmra.mxu1 %v3010_v24  ;;  %v7344_v24 = vld [vmem:[%s10879_s10 + $0x8] sm:$0xff]  }
 0x206   : > { %6874 = vmatprep.mubr.msk.bf16.mxu1 %vm3098_vm3, %v3013_v38  ;;  %7050 = vmatprep.subr.bf16.mxu0 %v7344_v24 }
 0x207   : > { %7051 = vmatpush3.bf16.msra.mxu0 %v7344_v24 }
 0x208   : > { %v2703_v25 = vpop.f32.mrf.mxu1  ;;  %v2510_v41 = vpop.f32.mrf.mxu0  ;;  %7052 = vmatprep.subr.bf16.mxu0 %v7345_v22 }
 0x209   : > { %v2704_v45 = vadd.f32 %v2703_v25, %v2510_v41 }
 0x20a   : > { %v2705_v13 = vpop.f32.mrf.mxu1  ;;  %v2512_v8 = vpop.f32.mrf.mxu0 }
 0x20b   : > { %v2706_v33 = vadd.f32 %v2705_v13, %v2512_v8  ;;  %v2826_v50 = vmul.f32 %v8799_v4, %v2704_v45  ;;  %7053 = vmatpush3.bf16.msra.mxu0 %v7345_v22 }
 0x20c   : > { %v2707_v44 = vpop.f32.mrf.mxu1  ;;  %v2514_v19 = vpop.f32.mrf.mxu0 }
 0x20d   : > { %v2827_v46 = vmul.f32 %v8754_v57, %v2706_v33  ;;  %v2708_v14 = vadd.f32 %v2707_v44, %v2514_v19  ;;  %3241 = vmatmul.mubr.bf16.gmra.mxu1 %v3012_v62  ;;  %v2902_v26 = vadd.f32 %v8817_v28, %v2826_v50 }
 0x20e   : > { %v2709_v17 = vpop.f32.mrf.mxu1  ;;  %v2516_v10 = vpop.f32.mrf.mxu0 }
 0x20f   : > { %v2828_v2 = vmul.f32 %v8799_v4, %v2708_v14  ;;  %v2710_v35 = vadd.f32 %v2709_v17, %v2516_v10  ;;  %v2903_v7 = vadd.f32 %v8778_v9, %v2827_v46  ;;  %v2966_v60 = vmax.f32 %v2902_v26, 0.0 }
 0x211   : > { %v2904_v23 = vadd.f32 %v8817_v28, %v2828_v2  ;;  %v2829_v40 = vmul.f32 %v8754_v57, %v2710_v35  ;;  %v2967_v29 = vmax.f32 %v2903_v7, 0.0 }
 0x213   : > { %v2905_v39 = vadd.f32 %v8778_v9, %v2829_v40  ;;  %v2968_v11 = vmax.f32 %v2904_v23, 0.0 }
 0x215   : > { %v2969_v31 = vmax.f32 %v2905_v39, 0.0  ;;  %v3014_v52 = vpack.c.bf16 %v2968_v11, %v2966_v60 }
 0x217   : > { %v3015_v53 = vpack.c.bf16 %v2969_v31, %v2967_v29 }
 0x219   : > { %6875 = vmatprep.mubr.msk.bf16.mxu1 %vm3098_vm3, %v3015_v53 }
 0x21a   : > { %3249 = vmatmul.mubr.bf16.gmra.mxu1 %v3014_v52  ;;  %v2713_v61 = vpop.f32.mrf.mxu1 }
 0x21b   : > { %v2520_v49 = vpop.f32.mrf.mxu0 }
 0x21c   : > { %v2715_v5 = vpop.f32.mrf.mxu1  ;;  %v2714_v59 = vadd.f32 %v2713_v61, %v2520_v49 }
 0x21d   : > { %v2522_v27 = vpop.f32.mrf.mxu0 }
 0x21e   : > { %v2716_v55 = vadd.f32 %v2715_v5, %v2522_v27  ;;  %v2717_v47 = vpop.f32.mrf.mxu1  ;;  %v2830_v63 = vmul.f32 %v8799_v4, %v2714_v59 }
 0x21f   : > { %v2524_v56 = vpop.f32.mrf.mxu0 }
 0x220   : > { %v2831_v21 = vmul.f32 %v8754_v57, %v2716_v55  ;;  %v2718_v51 = vadd.f32 %v2717_v47, %v2524_v56  ;;  %v2719_v32 = vpop.f32.mrf.mxu1  ;;  %v2906_v3 = vadd.f32 %v8817_v28, %v2830_v63 }
 0x221   : > { %v2526_v0 = vpop.f32.mrf.mxu0 }
 0x222   : > { %v2832_v6 = vmul.f32 %v8799_v4, %v2718_v51  ;;  %v2720_v48 = vadd.f32 %v2719_v32, %v2526_v0  ;;  %v2907_v1 = vadd.f32 %v8778_v9, %v2831_v21  ;;  %v2970_v38 = vmax.f32 %v2906_v3, 0.0 }
 0x224   : > { %v2908_v42 = vadd.f32 %v8817_v28, %v2832_v6  ;;  %v2833_v36 = vmul.f32 %v8754_v57, %v2720_v48  ;;  %v2971_v18 = vmax.f32 %v2907_v1, 0.0 }
 0x226   : > { %v2909_v37 = vadd.f32 %v8778_v9, %v2833_v36  ;;  %v2972_v30 = vmax.f32 %v2908_v42, 0.0 }
 0x228   : > { %v2973_v54 = vmax.f32 %v2909_v37, 0.0  ;;  %v3016_v25 = vpack.c.bf16 %v2972_v30, %v2970_v38 }
 0x22a   : > { %v3017_v43 = vpack.c.bf16 %v2973_v54, %v2971_v18 }
 0x22c   : > { %6876 = vmatprep.mubr.msk.bf16.mxu1 %vm3098_vm3, %v3017_v43 }
 0x22d   : > { %3257 = vmatmul.mubr.bf16.gmra.mxu1 %v3016_v25 }
 0x22f   : > { %v2723_v41 = vpop.f32.mrf.mxu1  ;;  %v2530_v15 = vpop.f32.mrf.mxu0 }
 0x230   : > { %v2724_v45 = vadd.f32 %v2723_v41, %v2530_v15 }
 0x231   : > { %v2725_v13 = vpop.f32.mrf.mxu1  ;;  %v2532_v8 = vpop.f32.mrf.mxu0 }
 0x232   : > { %v2726_v33 = vadd.f32 %v2725_v13, %v2532_v8  ;;  %v2834_v14 = vmul.f32 %v8799_v4, %v2724_v45 }
 0x233   : > { %v2727_v44 = vpop.f32.mrf.mxu1  ;;  %v2534_v19 = vpop.f32.mrf.mxu0 }
 0x234   : > { %v2835_v62 = vmul.f32 %v8754_v57, %v2726_v33  ;;  %v2728_v46 = vadd.f32 %v2727_v44, %v2534_v19  ;;  %v2910_v40 = vadd.f32 %v8817_v28, %v2834_v14 }
 0x235   : > { %v2729_v50 = vpop.f32.mrf.mxu1  ;;  %v2536_v17 = vpop.f32.mrf.mxu0 }
 0x236   : > { %v2836_v10 = vmul.f32 %v8799_v4, %v2728_v46  ;;  %v2730_v2 = vadd.f32 %v2729_v50, %v2536_v17  ;;  %v2911_v35 = vadd.f32 %v8778_v9, %v2835_v62  ;;  %v2974_v31 = vmax.f32 %v2910_v40, 0.0 }
 0x238   : > { %v2912_v7 = vadd.f32 %v8817_v28, %v2836_v10  ;;  %v2837_v23 = vmul.f32 %v8754_v57, %v2730_v2  ;;  %v2975_v11 = vmax.f32 %v2911_v35, 0.0 }
 0x23a   : > { %v2913_v26 = vadd.f32 %v8778_v9, %v2837_v23  ;;  %v2976_v39 = vmax.f32 %v2912_v7, 0.0 }
 0x23c   : > { %v2977_v29 = vmax.f32 %v2913_v26, 0.0  ;;  %v3018_v53 = vpack.c.bf16 %v2976_v39, %v2974_v31 }
 0x23e   : > { %v3019_v60 = vpack.c.bf16 %v2977_v29, %v2975_v11 }
 0x240   : > { %6877 = vmatprep.mubr.msk.bf16.mxu1 %vm3098_vm3, %v3019_v60 }
 0x241   : > { %3265 = vmatmul.mubr.bf16.gmra.mxu1 %v3018_v53 }
 0x242   : > { %v2733_v52 = vpop.f32.mrf.mxu1  ;;  %v2540_v61 = vpop.f32.mrf.mxu0 }
 0x243   : > { %v2734_v49 = vadd.f32 %v2733_v52, %v2540_v61 }
 0x244   : > { %v2735_v5 = vpop.f32.mrf.mxu1  ;;  %v2542_v59 = vpop.f32.mrf.mxu0 }
 0x245   : > { %v2736_v27 = vadd.f32 %v2735_v5, %v2542_v59  ;;  %v2838_v51 = vmul.f32 %v8799_v4, %v2734_v49 }
 0x246   : > { %v2737_v55 = vpop.f32.mrf.mxu1  ;;  %v2544_v47 = vpop.f32.mrf.mxu0 }
 0x247   : > { %v2839_v56 = vmul.f32 %v8754_v57, %v2736_v27  ;;  %v2738_v21 = vadd.f32 %v2737_v55, %v2544_v47  ;;  %v2914_v1 = vadd.f32 %v8817_v28, %v2838_v51 }
 0x248   : > { %v2739_v32 = vpop.f32.mrf.mxu1  ;;  %v2546_v58 = vpop.f32.mrf.mxu0 }
 0x249   : > { %v2840_v63 = vmul.f32 %v8799_v4, %v2738_v21  ;;  %v2740_v0 = vadd.f32 %v2739_v32, %v2546_v58  ;;  %v2915_v6 = vadd.f32 %v8778_v9, %v2839_v56  ;;  %v2978_v30 = vmax.f32 %v2914_v1, 0.0 }
 0x24b   : > { %v2916_v48 = vadd.f32 %v8817_v28, %v2840_v63  ;;  %v2841_v34 = vmul.f32 %v8754_v57, %v2740_v0  ;;  %v2979_v3 = vmax.f32 %v2915_v6, 0.0 }
 0x24d   : > { %v2917_v42 = vadd.f32 %v8778_v9, %v2841_v34  ;;  %v2980_v36 = vmax.f32 %v2916_v48, 0.0 }
 0x24f   : > { %v2981_v37 = vmax.f32 %v2917_v42, 0.0  ;;  %v3020_v54 = vpack.c.bf16 %v2980_v36, %v2978_v30 }
 0x251   : > { %v3021_v18 = vpack.c.bf16 %v2981_v37, %v2979_v3 }
 0x253   : > { %6878 = vmatprep.mubr.msk.bf16.mxu1 %vm3098_vm3, %v3021_v18 }
 0x254   : > { %3273 = vmatmul.mubr.bf16.gmra.mxu1 %v3020_v54  ;;  %v2743_v24 = vpop.f32.mrf.mxu1 }
 0x256   : > { %v2745_v38 = vpop.f32.mrf.mxu1  ;;  %v2550_v43 = vpop.f32.mrf.mxu0 }
 0x257   : > { %v2744_v25 = vadd.f32 %v2743_v24, %v2550_v43 }
 0x258   : > { %v2747_v22 = vpop.f32.mrf.mxu1  ;;  %v2552_v41 = vpop.f32.mrf.mxu0 }
 0x259   : > { %v2746_v15 = vadd.f32 %v2745_v38, %v2552_v41  ;;  %v2842_v44 = vmul.f32 %v8799_v4, %v2744_v25 }
 0x25a   : > { %v2554_v45 = vpop.f32.mrf.mxu0  ;;  %v2749_v13 = vpop.f32.mrf.mxu1 }
 0x25b   : > { %v2843_v8 = vmul.f32 %v8754_v57, %v2746_v15  ;;  %v2748_v33 = vadd.f32 %v2747_v22, %v2554_v45  ;;  %v2918_v10 = vadd.f32 %v8817_v28, %v2842_v44 }
 0x25c   : > { %v2556_v19 = vpop.f32.mrf.mxu0 }
 0x25d   : > { %v2844_v62 = vmul.f32 %v8799_v4, %v2748_v33  ;;  %v2750_v46 = vadd.f32 %v2749_v13, %v2556_v19  ;;  %v2919_v14 = vadd.f32 %v8778_v9, %v2843_v8  ;;  %v2982_v40 = vmax.f32 %v2918_v10, 0.0 }
 0x25f   : > { %v2920_v50 = vadd.f32 %v8817_v28, %v2844_v62  ;;  %v2845_v17 = vmul.f32 %v8754_v57, %v2750_v46  ;;  %v2983_v7 = vmax.f32 %v2919_v14, 0.0 }
 0x261   : > { %v2921_v2 = vadd.f32 %v8778_v9, %v2845_v17  ;;  %v2984_v35 = vmax.f32 %v2920_v50, 0.0 }
 0x263   : > { %v2985_v23 = vmax.f32 %v2921_v2, 0.0  ;;  %v3022_v39 = vpack.c.bf16 %v2984_v35, %v2982_v40 }
 0x265   : > { %v3023_v26 = vpack.c.bf16 %v2985_v23, %v2983_v7 }
 0x267   : > { %6879 = vmatprep.mubr.msk.bf16.mxu1 %vm3098_vm3, %v3023_v26 }
 0x268   : > { %v2753_v11 = vpop.f32.mrf.mxu1  ;;  %v2560_v29 = vpop.f32.mrf.mxu0  ;;  %3281 = vmatmul.mubr.bf16.gmra.mxu1 %v3022_v39 }
 0x269   : > { %v2754_v31 = vadd.f32 %v2753_v11, %v2560_v29 }
 0x26a   : > { %v2755_v60 = vpop.f32.mrf.mxu1  ;;  %v2562_v53 = vpop.f32.mrf.mxu0 }
 0x26b   : > { %v2756_v52 = vadd.f32 %v2755_v60, %v2562_v53  ;;  %v2846_v27 = vmul.f32 %v8799_v4, %v2754_v31 }
 0x26c   : > { %v2757_v61 = vpop.f32.mrf.mxu1  ;;  %v2564_v49 = vpop.f32.mrf.mxu0 }
 0x26d   : > { %v2847_v5 = vmul.f32 %v8754_v57, %v2756_v52  ;;  %v2758_v59 = vadd.f32 %v2757_v61, %v2564_v49  ;;  %v2922_v63 = vadd.f32 %v8817_v28, %v2846_v27 }
 0x26e   : > { %v2759_v55 = vpop.f32.mrf.mxu1  ;;  %v2566_v47 = vpop.f32.mrf.mxu0 }
 0x26f   : > { %v2848_v56 = vmul.f32 %v8799_v4, %v2758_v59  ;;  %v2760_v21 = vadd.f32 %v2759_v55, %v2566_v47  ;;  %v2923_v51 = vadd.f32 %v8778_v9, %v2847_v5  ;;  %v2986_v1 = vmax.f32 %v2922_v63, 0.0  ;;  %v9005_v5 = vld [vmem:[%s10970_s4] ss:$0 sm:$0xff] }
 0x271   : > { %v2924_v32 = vadd.f32 %v8817_v28, %v2848_v56  ;;  %v2849_v58 = vmul.f32 %v8754_v57, %v2760_v21  ;;  %v2987_v48 = vmax.f32 %v2923_v51, 0.0 }
 0x273   : > { %v2925_v0 = vadd.f32 %v8778_v9, %v2849_v58  ;;  %v2988_v6 = vmax.f32 %v2924_v32, 0.0  ;;  %v9016_v58 = vld [vmem:[%s10878_s9] ss:$0 sm:$0xff] }
 0x275   : > { %v2989_v34 = vmax.f32 %v2925_v0, 0.0  ;;  %v3024_v36 = vpack.c.bf16 %v2988_v6, %v2986_v1 }
 0x277   : > { %v3025_v42 = vpack.c.bf16 %v2989_v34, %v2987_v48 }
 0x279   : > { %6880 = vmatprep.mubr.msk.bf16.mxu1 %vm3098_vm3, %v3025_v42 }
 0x27a   : > { %3289 = vmatmul.mubr.bf16.gmra.mxu1 %v3024_v36 }
 0x27b   : > { %v2763_v3 = vpop.f32.mrf.mxu1  ;;  %v2570_v37 = vpop.f32.mrf.mxu0 }
 0x27c   : > { %v2764_v30 = vadd.f32 %v2763_v3, %v2570_v37 }
 0x27d   : > { %v2765_v18 = vpop.f32.mrf.mxu1  ;;  %v2572_v54 = vpop.f32.mrf.mxu0 }
 0x27e   : > { %v2766_v24 = vadd.f32 %v2765_v18, %v2572_v54  ;;  %v2850_v41 = vmul.f32 %v8799_v4, %v2764_v30 }
 0x27f   : > { %v2767_v38 = vpop.f32.mrf.mxu1  ;;  %v2574_v43 = vpop.f32.mrf.mxu0 }
 0x280   : > { %v2851_v22 = vmul.f32 %v8754_v57, %v2766_v24  ;;  %v2768_v25 = vadd.f32 %v2767_v38, %v2574_v43  ;;  %v2926_v62 = vadd.f32 %v8817_v28, %v2850_v41 }
 0x281   : > { %v2769_v15 = vpop.f32.mrf.mxu1  ;;  %v2576_v45 = vpop.f32.mrf.mxu0 }
 0x282   : > { %v2852_v13 = vmul.f32 %v8799_v4, %v2768_v25  ;;  %v2770_v8 = vadd.f32 %v2769_v15, %v2576_v45  ;;  %v2927_v33 = vadd.f32 %v8778_v9, %v2851_v22  ;;  %v2990_v10 = vmax.f32 %v2926_v62, 0.0 }
 0x284   : > { %v2928_v44 = vadd.f32 %v8817_v28, %v2852_v13  ;;  %v2853_v19 = vmul.f32 %v8754_v57, %v2770_v8  ;;  %v2991_v50 = vmax.f32 %v2927_v33, 0.0 }
 0x286   : > { %v2929_v46 = vadd.f32 %v8778_v9, %v2853_v19  ;;  %v2992_v14 = vmax.f32 %v2928_v44, 0.0 }
 0x288   : > { %v2993_v17 = vmax.f32 %v2929_v46, 0.0  ;;  %v3026_v35 = vpack.c.bf16 %v2992_v14, %v2990_v10 }
 0x28a   : > { %v3027_v2 = vpack.c.bf16 %v2993_v17, %v2991_v50 }
 0x28c   : > { %6881 = vmatprep.mubr.msk.bf16.mxu1 %vm3098_vm3, %v3027_v2 }
 0x28d   : > { %3297 = vmatmul.mubr.bf16.gmra.mxu1 %v3026_v35  ;;  %v2773_v7 = vpop.f32.mrf.mxu1 }
 0x28e   : > { %v2580_v23 = vpop.f32.mrf.mxu0 }
 0x28f   : > { %v2774_v40 = vadd.f32 %v2773_v7, %v2580_v23  ;;  %v2775_v26 = vpop.f32.mrf.mxu1 }
 0x290   : > { %v2582_v39 = vpop.f32.mrf.mxu0 }
 0x291   : > { %v2776_v11 = vadd.f32 %v2775_v26, %v2582_v39  ;;  %v2777_v29 = vpop.f32.mrf.mxu1  ;;  %v2854_v52 = vmul.f32 %v8799_v4, %v2774_v40 }
 0x292   : > { %v2584_v31 = vpop.f32.mrf.mxu0 }
 0x293   : > { %v2855_v60 = vmul.f32 %v8754_v57, %v2776_v11  ;;  %v2778_v53 = vadd.f32 %v2777_v29, %v2584_v31  ;;  %v2779_v61 = vpop.f32.mrf.mxu1  ;;  %v2930_v32 = vadd.f32 %v8817_v28, %v2854_v52 }
 0x294   : > { %v2586_v49 = vpop.f32.mrf.mxu0 }
 0x295   : > { %v2856_v59 = vmul.f32 %v8799_v4, %v2778_v53  ;;  %v2780_v27 = vadd.f32 %v2779_v61, %v2586_v49  ;;  %v3186_v55 = vpop.f32.mrf.mxu1  ;;  %v2931_v47 = vadd.f32 %v8778_v9, %v2855_v60  ;;  %v2994_v42 = vmax.f32 %v2930_v32, 0.0 }
 0x296   : > { %v3320_v51 = vmul.f32 %v9005_v5, %v3186_v55 }
 0x297   : > { %v2932_v56 = vadd.f32 %v8817_v28, %v2856_v59  ;;  %v2857_v21 = vmul.f32 %v8754_v57, %v2780_v27  ;;  %v3188_v63 = vpop.f32.mrf.mxu1  ;;  %v2995_v48 = vmax.f32 %v2931_v47, 0.0 }
 0x298   : > { %v3359_v1 = vadd.f32 %v9016_v58, %v3320_v51 }
 0x299   : > { %v2933_v4 = vadd.f32 %v8778_v9, %v2857_v21  ;;  %v2996_v0 = vmax.f32 %v2932_v56, 0.0  ;;  %v3189_v6 = vpop.f32.mrf.mxu1 }
 0x29a   : > { %v3321_v57 = vmul.f32 %v9005_v5, %v3189_v6  ;;  %v3391_v18 = vmax.f32 %v3359_v1, 0.0 }
 0x29b   : > { %v2997_v34 = vmax.f32 %v2933_v4, 0.0  ;;  %v3191_v36 = vpop.f32.mrf.mxu1  ;;  %v3028_v37 = vpack.c.bf16 %v2996_v0, %v2994_v42 }
 0x29c   : > { %v3360_v28 = vadd.f32 %v9016_v58, %v3321_v57 }
 0x29d   : > { %v3029_v3 = vpack.c.bf16 %v2997_v34, %v2995_v48  ;;  %v3194_v30 = vpop.f32.mrf.mxu1 }
 0x29e   : > { %v3392_v54 = vmax.f32 %v3360_v28, 0.0  ;;  %v3322_v24 = vmul.f32 %v9005_v5, %v3194_v30 }
 0x29f   : > { %6882 = vmatprep.mubr.msk.bf16.mxu1 %vm3098_vm3, %v3029_v3  ;;  %v3196_v9 = vpop.f32.mrf.mxu1 }
 0x2a0   : > { %3305 = vmatmul.mubr.bf16.gmra.mxu1 %v3028_v37  ;;  %v3423_v38 = vpack.c.bf16 %v3392_v54, %v3391_v18  ;;  %v3361_v22 = vadd.f32 %v9016_v58, %v3322_v24 }
 0x2a1   : > { %v3197_v43 = vpop.f32.mrf.mxu1 }
 0x2a2   : > { %v3323_v25 = vmul.f32 %v9005_v5, %v3197_v43  ;;  %7054 = vmatprep.mubr.msk.bf16.mxu0 %vm3478_vm4, %v3423_v38  ;;  %v3393_v13 = vmax.f32 %v3361_v22, 0.0 }
 0x2a3   : > { %v3199_v41 = vpop.f32.mrf.mxu1 }
 0x2a4   : > { %v3362_v15 = vadd.f32 %v9016_v58, %v3323_v25 }
 0x2a5   : > { %v3202_v45 = vpop.f32.mrf.mxu1 }
 0x2a6   : > { %v3394_v8 = vmax.f32 %v3362_v15, 0.0  ;;  %v3324_v33 = vmul.f32 %v9005_v5, %v3202_v45 }
 0x2a7   : > { %v3204_v44 = vpop.f32.mrf.mxu1 }
 0x2a8   : > { %v3424_v19 = vpack.c.bf16 %v3394_v8, %v3393_v13  ;;  %v3363_v46 = vadd.f32 %v9016_v58, %v3324_v33 }
 0x2a9   : > { %v3205_v62 = vpop.f32.mrf.mxu1 }
 0x2aa   : > { %v3325_v14 = vmul.f32 %v9005_v5, %v3205_v62  ;;  %7055 = vmatmul.mubr.msk.bf16.vlgmr.msra.gmra.mxu0 %vm3478_vm4, %v3424_v19  ;;  %v3395_v2 = vmax.f32 %v3363_v46, 0.0 }
 0x2ab   : > { %v3207_v50 = vpop.f32.mrf.mxu1 }
 0x2ac   : > { %v3364_v17 = vadd.f32 %v9016_v58, %v3325_v14 }
 0x2ad   : > { %v3210_v10 = vpop.f32.mrf.mxu1 }
 0x2ae   : > { %v3396_v35 = vmax.f32 %v3364_v17, 0.0  ;;  %v3326_v7 = vmul.f32 %v9005_v5, %v3210_v10 }
 0x2af   : > { %v3212_v23 = vpop.f32.mrf.mxu1 }
 0x2b0   : > { %v3425_v40 = vpack.c.bf16 %v3396_v35, %v3395_v2  ;;  %v3365_v39 = vadd.f32 %v9016_v58, %v3326_v7 }
 0x2b1   : > { %v3213_v26 = vpop.f32.mrf.mxu1 }
 0x2b2   : > { %v3327_v11 = vmul.f32 %v9005_v5, %v3213_v26  ;;  %7058 = vmatprep.mubr.msk.bf16.mxu0 %vm3478_vm4, %v3425_v40  ;;  %v3397_v53 = vmax.f32 %v3365_v39, 0.0 }
 0x2b3   : > { %v3215_v29 = vpop.f32.mrf.mxu1 }
 0x2b4   : > { %v3366_v31 = vadd.f32 %v9016_v58, %v3327_v11 }
 0x2b5   : > { %v3218_v60 = vpop.f32.mrf.mxu1 }
 0x2b6   : > { %v3398_v52 = vmax.f32 %v3366_v31, 0.0  ;;  %v3328_v61 = vmul.f32 %v9005_v5, %v3218_v60 }
 0x2b7   : > { %v3220_v49 = vpop.f32.mrf.mxu1 }
 0x2b8   : > { %v3426_v59 = vpack.c.bf16 %v3398_v52, %v3397_v53  ;;  %v3367_v55 = vadd.f32 %v9016_v58, %v3328_v61 }
 0x2b9   : > { %v3221_v27 = vpop.f32.mrf.mxu1 }
 0x2ba   : > { %v3329_v47 = vmul.f32 %v9005_v5, %v3221_v27  ;;  %7059 = vmatmul.mubr.msk.bf16.gmra.mxu0 %vm3478_vm4, %v3426_v59  ;;  %v3399_v32 = vmax.f32 %v3367_v55, 0.0 }
 0x2bb   : > { %v3223_v56 = vpop.f32.mrf.mxu1 }
 0x2bc   : > { %v3368_v21 = vadd.f32 %v9016_v58, %v3329_v47 }
 0x2bd   : > { %v3226_v51 = vpop.f32.mrf.mxu1 }
 0x2be   : > { %v3400_v63 = vmax.f32 %v3368_v21, 0.0  ;;  %v3330_v4 = vmul.f32 %v9005_v5, %v3226_v51 }
 0x2bf   : > { %v3228_v0 = vpop.f32.mrf.mxu1 }
 0x2c0   : > { %v3427_v6 = vpack.c.bf16 %v3400_v63, %v3399_v32  ;;  %v3369_v34 = vadd.f32 %v9016_v58, %v3330_v4 }
 0x2c1   : > { %v3229_v48 = vpop.f32.mrf.mxu1 }
 0x2c2   : > { %v3331_v1 = vmul.f32 %v9005_v5, %v3229_v48  ;;  %7062 = vmatprep.mubr.msk.bf16.mxu0 %vm3478_vm4, %v3427_v6  ;;  %v3401_v28 = vmax.f32 %v3369_v34, 0.0 }
 0x2c3   : > { %v3231_v57 = vpop.f32.mrf.mxu1 }
 0x2c4   : > { %v3370_v42 = vadd.f32 %v9016_v58, %v3331_v1 }
 0x2c5   : > { %v3234_v36 = vpop.f32.mrf.mxu1 }
 0x2c6   : > { %v3402_v3 = vmax.f32 %v3370_v42, 0.0  ;;  %v3332_v37 = vmul.f32 %v9005_v5, %v3234_v36 }
 0x2c7   : > { %v3236_v30 = vpop.f32.mrf.mxu1 }
 0x2c8   : > { %v3428_v18 = vpack.c.bf16 %v3402_v3, %v3401_v28  ;;  %v3371_v24 = vadd.f32 %v9016_v58, %v3332_v37 }
 0x2c9   : > { %v3237_v54 = vpop.f32.mrf.mxu1 }
 0x2ca   : > { %v3333_v9 = vmul.f32 %v9005_v5, %v3237_v54  ;;  %7063 = vmatmul.mubr.msk.bf16.gmra.mxu0 %vm3478_vm4, %v3428_v18  ;;  %v3403_v25 = vmax.f32 %v3371_v24, 0.0 }
 0x2cb   : > { %v3239_v38 = vpop.f32.mrf.mxu1 }
 0x2cc   : > { %v3372_v43 = vadd.f32 %v9016_v58, %v3333_v9 }
 0x2cd   : > { %v3242_v22 = vpop.f32.mrf.mxu1 }
 0x2ce   : > { %v3404_v41 = vmax.f32 %v3372_v43, 0.0  ;;  %v3334_v15 = vmul.f32 %v9005_v5, %v3242_v22 }
 0x2cf   : > { %v3244_v45 = vpop.f32.mrf.mxu1 }
 0x2d0   : > { %v3429_v13 = vpack.c.bf16 %v3404_v41, %v3403_v25  ;;  %v3373_v33 = vadd.f32 %v9016_v58, %v3334_v15 }
 0x2d1   : > { %v3245_v8 = vpop.f32.mrf.mxu1 }
 0x2d2   : > { %v3335_v44 = vmul.f32 %v9005_v5, %v3245_v8  ;;  %7066 = vmatprep.mubr.msk.bf16.mxu0 %vm3478_vm4, %v3429_v13  ;;  %v3405_v46 = vmax.f32 %v3373_v33, 0.0 }
 0x2d3   : > { %v3247_v19 = vpop.f32.mrf.mxu1 }
 0x2d4   : > { %v3374_v62 = vadd.f32 %v9016_v58, %v3335_v44 }
 0x2d6   : > { %v3406_v14 = vmax.f32 %v3374_v62, 0.0 }
 0x2d8   : > { %v3430_v50 = vpack.c.bf16 %v3406_v14, %v3405_v46 }
 0x2da   : > { %v3250_v17 = vpop.f32.mrf.mxu1  ;;  %7067 = vmatmul.mubr.msk.bf16.gmra.mxu0 %vm3478_vm4, %v3430_v50 }
 0x2db   : > { %v3336_v10 = vmul.f32 %v9005_v5, %v3250_v17 }
 0x2dc   : > { %v3252_v2 = vpop.f32.mrf.mxu1 }
 0x2dd   : > { %v3375_v7 = vadd.f32 %v9016_v58, %v3336_v10 }
 0x2de   : > { %v3253_v35 = vpop.f32.mrf.mxu1 }
 0x2df   : > { %v3337_v23 = vmul.f32 %v9005_v5, %v3253_v35  ;;  %v3407_v39 = vmax.f32 %v3375_v7, 0.0 }
 0x2e0   : > { %v3255_v40 = vpop.f32.mrf.mxu1 }
 0x2e1   : > { %v3376_v26 = vadd.f32 %v9016_v58, %v3337_v23 }
 0x2e3   : > { %v3408_v11 = vmax.f32 %v3376_v26, 0.0 }
 0x2e5   : > { %v3431_v29 = vpack.c.bf16 %v3408_v11, %v3407_v39 }
 0x2e7   : > { %7070 = vmatprep.mubr.msk.bf16.mxu0 %vm3478_vm4, %v3431_v29 }
 0x2ed   : > { %v3258_v31 = vpop.f32.mrf.mxu1 }
 0x2ee   : > { %v3338_v60 = vmul.f32 %v9005_v5, %v3258_v31 }
 0x2ef   : > { %v3260_v53 = vpop.f32.mrf.mxu1 }
 0x2f0   : > { %v3377_v61 = vadd.f32 %v9016_v58, %v3338_v60 }
 0x2f1   : > { %v3261_v52 = vpop.f32.mrf.mxu1 }
 0x2f2   : > { %v3339_v49 = vmul.f32 %v9005_v5, %v3261_v52  ;;  %v3409_v55 = vmax.f32 %v3377_v61, 0.0 }
 0x2f3   : > { %v3263_v59 = vpop.f32.mrf.mxu1 }
 0x2f4   : > { %v3378_v27 = vadd.f32 %v9016_v58, %v3339_v49 }
 0x2f6   : > { %v3410_v47 = vmax.f32 %v3378_v27, 0.0 }
 0x2f8   : > { %v3432_v56 = vpack.c.bf16 %v3410_v47, %v3409_v55 }
 0x2fa   : > { %7071 = vmatmul.mubr.msk.bf16.gmra.mxu0 %vm3478_vm4, %v3432_v56 }
 0x301   : > { %v3266_v21 = vpop.f32.mrf.mxu1 }
 0x302   : > { %v3340_v51 = vmul.f32 %v9005_v5, %v3266_v21 }
 0x303   : > { %v3268_v32 = vpop.f32.mrf.mxu1 }
 0x304   : > { %v3379_v4 = vadd.f32 %v9016_v58, %v3340_v51 }
 0x305   : > { %v3269_v63 = vpop.f32.mrf.mxu1 }
 0x306   : > { %v3341_v0 = vmul.f32 %v9005_v5, %v3269_v63  ;;  %v3411_v34 = vmax.f32 %v3379_v4, 0.0 }
 0x307   : > { %v3271_v6 = vpop.f32.mrf.mxu1 }
 0x308   : > { %v3380_v48 = vadd.f32 %v9016_v58, %v3341_v0  ;;  %v9101_v6 = vld [vmem:[%s10880_s11] ss:$0 sm:$0xff] }
 0x30a   : > { %v3412_v1 = vmax.f32 %v3380_v48, 0.0 }
 0x30c   : > { %v3433_v57 = vpack.c.bf16 %v3412_v1, %v3411_v34 }
 0x30e   : > { %7074 = vmatprep.mubr.msk.bf16.mxu0 %vm3478_vm4, %v3433_v57 }
 0x314   : > { %v3274_v42 = vpop.f32.mrf.mxu1 }
 0x315   : > { %v3342_v36 = vmul.f32 %v9005_v5, %v3274_v42 }
 0x316   : > { %v3276_v28 = vpop.f32.mrf.mxu1 }
 0x317   : > { %v3381_v37 = vadd.f32 %v9016_v58, %v3342_v36 }
 0x318   : > { %v3277_v3 = vpop.f32.mrf.mxu1 }
 0x319   : > { %v3343_v30 = vmul.f32 %v9005_v5, %v3277_v3  ;;  %v3413_v24 = vmax.f32 %v3381_v37, 0.0 }
 0x31a   : > { %v3279_v18 = vpop.f32.mrf.mxu1 }
 0x31b   : > { %v3382_v54 = vadd.f32 %v9016_v58, %v3343_v30 }
 0x31d   : > { %v3414_v9 = vmax.f32 %v3382_v54, 0.0 }
 0x31f   : > { %v3434_v38 = vpack.c.bf16 %v3414_v9, %v3413_v24 }
 0x321   : > { %7075 = vmatmul.mubr.msk.bf16.gmra.mxu0 %vm3478_vm4, %v3434_v38 }
 0x328   : > { %v3282_v43 = vpop.f32.mrf.mxu1 }
 0x329   : > { %v3344_v22 = vmul.f32 %v9005_v5, %v3282_v43 }
 0x32a   : > { %v3284_v25 = vpop.f32.mrf.mxu1 }
 0x32b   : > { %v3383_v15 = vadd.f32 %v9016_v58, %v3344_v22  ;;  %v10971_v22 = vmov 1  }
 0x32c   : > { %v3285_v41 = vpop.f32.mrf.mxu1 }
 0x32d   : > { %v3345_v45 = vmul.f32 %v9005_v5, %v3285_v41  ;;  %v3415_v33 = vmax.f32 %v3383_v15, 0.0 }
 0x32e   : > { %v3287_v13 = vpop.f32.mrf.mxu1 }
 0x32f   : > { %v3384_v8 = vadd.f32 %v9016_v58, %v3345_v45  ;;  %v10972_v45 = vmov 2  }
 0x331   : > { %v3416_v44 = vmax.f32 %v3384_v8, 0.0 }
 0x333   : > { %v3435_v19 = vpack.c.bf16 %v3416_v44, %v3415_v33 }
 0x335   : > { %7078 = vmatprep.mubr.msk.bf16.mxu0 %vm3478_vm4, %v3435_v19 }
 0x33a   : > { %v3290_v62 = vpop.f32.mrf.mxu1 }
 0x33b   : > { %v3346_v46 = vmul.f32 %v9005_v5, %v3290_v62 }
 0x33c   : > { %v3292_v14 = vpop.f32.mrf.mxu1 }
 0x33d   : > { %v3385_v17 = vadd.f32 %v9016_v58, %v3346_v46 }
 0x33e   : > { %v3293_v50 = vpop.f32.mrf.mxu1 }
 0x33f   : > { %v3347_v10 = vmul.f32 %v9005_v5, %v3293_v50  ;;  %v3417_v7 = vmax.f32 %v3385_v17, 0.0 }
 0x340   : > { %v3295_v2 = vpop.f32.mrf.mxu1 }
 0x341   : > { %v3386_v35 = vadd.f32 %v9016_v58, %v3347_v10 }
 0x343   : > { %v3418_v23 = vmax.f32 %v3386_v35, 0.0 }
 0x345   : > { %v3436_v40 = vpack.c.bf16 %v3418_v23, %v3417_v7 }
 0x347   : > { %7079 = vmatmul.mubr.msk.bf16.gmra.mxu0 %vm3478_vm4, %v3436_v40 }
 0x34d   : > { %v3298_v26 = vpop.f32.mrf.mxu1 }
 0x34e   : > { %v3348_v39 = vmul.f32 %v9005_v5, %v3298_v26 }
 0x34f   : > { %v3300_v11 = vpop.f32.mrf.mxu1 }
 0x350   : > { %v3387_v31 = vadd.f32 %v9016_v58, %v3348_v39 }
 0x351   : > { %v3301_v29 = vpop.f32.mrf.mxu1 }
 0x352   : > { %v3349_v60 = vmul.f32 %v9005_v5, %v3301_v29  ;;  %v3419_v61 = vmax.f32 %v3387_v31, 0.0 }
 0x353   : > { %v3303_v53 = vpop.f32.mrf.mxu1 }
 0x354   : > { %v3388_v52 = vadd.f32 %v9016_v58, %v3349_v60 }
 0x356   : > { %v3420_v49 = vmax.f32 %v3388_v52, 0.0 }
 0x358   : > { %v3437_v59 = vpack.c.bf16 %v3420_v49, %v3419_v61 }
 0x35a   : > { %7082 = vmatprep.mubr.msk.bf16.mxu0 %vm3478_vm4, %v3437_v59 }
 0x360   : > { %v3306_v27 = vpop.f32.mrf.mxu1 }
 0x361   : > { %v3350_v55 = vmul.f32 %v9005_v5, %v3306_v27 }
 0x362   : > { %v3308_v47 = vpop.f32.mrf.mxu1 }
 0x363   : > { %v3389_v21 = vadd.f32 %v9016_v58, %v3350_v55 }
 0x364   : > { %v3309_v56 = vpop.f32.mrf.mxu1 }
 0x365   : > { %v3351_v51 = vmul.f32 %v9005_v5, %v3309_v56  ;;  %v3421_v4 = vmax.f32 %v3389_v21, 0.0 }
 0x366   : > { %v3311_v32 = vpop.f32.mrf.mxu1 }
 0x367   : > { %v3390_v63 = vadd.f32 %v9016_v58, %v3351_v51 }
 0x369   : > { %v3422_v0 = vmax.f32 %v3390_v63, 0.0 }
 0x36a   : > { %v7056_v34 = vpop.f32.mrf.mxu0 }
 0x36b   : > { %v3438_v48 = vpack.c.bf16 %v3422_v0, %v3421_v4  ;;  %v3570_v1 = vadd.f32 %v7056_v34, %v9101_v6 }
 0x36c   : > { %v3561_v57 = vpop.f32.mrf.mxu0 }
 0x36d   : > { %7083 = vmatmul.mubr.msk.bf16.gmra.mxu0 %vm3478_vm4, %v3438_v48  ;;  %7409 = vtanh.f32 %v3570_v1  ;;  %v3562_v5 = vadd.f32 %v9101_v6, %v3561_v57 }
 0x36e   : > { %v7057_v42 = vpop.f32.mrf.mxu0 }
 0x36f   : > { %7411 = vtanh.f32 %v3562_v5  ;;  %v3573_v58 = vadd.f32 %v7057_v42, %v9101_v6 }
 0x370   : > { %v3564_v36 = vpop.f32.mrf.mxu0 }
 0x371   : > { %7413 = vtanh.f32 %v3573_v58  ;;  %v3565_v28 = vadd.f32 %v9101_v6, %v3564_v36 }
 0x373   : > { %7415 = vtanh.f32 %v3565_v28 }
 0x37a   : > { %v9114_v3 = vpop.eup %7409  ;;  %v7060_v37 = vpop.f32.mrf.mxu0 }
 0x37b   : > { %3722 = vst [vmem:[%s9112_s7 + $0x10] sm:$0xff] %v9114_v3  ;;  %v3586_v30 = vadd.f32 %v7060_v37, %v9101_v6  ;;  %3766 = vperm.xlu1 %7224, %v9114_v3  }
 0x37c   : > { %v9120_v18 = vpop.eup %7411  ;;  %v3577_v54 = vpop.f32.mrf.mxu0 }
 0x37d   : > { %3720 = vst [vmem:[%s9112_s7] sm:$0xff] %v9120_v18  ;;  %7417 = vtanh.f32 %v3586_v30  ;;  %v3578_v24 = vadd.f32 %v9101_v6, %v3577_v54  ;;  %v7346_v54 = vld [vmem:[%s10884_s15 + $0x70] ss:$8 sps:$4 sm:$0xff]  }
 0x37e   : > { %v7414_v9 = vpop.eup %7413  ;;  %v7061_v38 = vpop.f32.mrf.mxu0 }
 0x37f   : > { %3723 = vst [vmem:[%s9112_s7 + $0x18] sm:$0xff] %v7414_v9  ;;  %7419 = vtanh.f32 %v3578_v24  ;;  %v3589_v43 = vadd.f32 %v7061_v38, %v9101_v6  ;;  %7225 = vset.pattern.permute.xlu1 %v10971_v22  ;;  %3771 = vperm.xlu0 %7228, %v7414_v9   ;;  %v7348_v24 = vld [vmem:[%s10884_s15 + $0x74] ss:$8 sps:$4 sm:$0xff]   ;;  %v7349_v38 = vld [vmem:[%s10884_s15 + $0x60] ss:$8 sps:$4 sm:$0xff]  }
 0x380   : > { %v7416_v25 = vpop.eup %7415  ;;  %4048 = vperm.xlu1 %7225, %v9114_v3   ;;  %v3580_v41 = vpop.f32.mrf.mxu0  ;;  %7126 = vmatprep.subr.bf16.mxu1 %v7348_v24 }
 0x381   : > { %3721 = vst [vmem:[%s9112_s7 + $0x8] sm:$0xff] %v7416_v25  ;;  %7421 = vtanh.f32 %v3589_v43  ;;  %v3581_v15 = vadd.f32 %v9101_v6, %v3580_v41  ;;  %5355 = vmatprep.subr.bf16.mxu0 %v7348_v24  ;;  %7142 = vmatpush1.bf16.msra.mxu1 %v7346_v54  ;;  %v7351_v43 = vld [vmem:[%s10884_s15 + $0x64] ss:$8 sps:$4 sm:$0xff]   ;;  %v7382_v24 = vld [vmem:[%s10884_s15 + $0xb0] ss:$8 sps:$4 sm:$0xff]  }
 0x382   : > { %5356 = vmatpush1.bf16.msra.mxu0 %v7346_v54  ;;  %7127 = vmatprep.subr.bf16.mxu1 %v7351_v43  ;;  %v7384_v54 = vld [vmem:[%s10884_s15 + $0xb4] ss:$8 sps:$4 sm:$0xff]  }
 0x383   : > { %7423 = vtanh.f32 %v3581_v15  ;;  %3761 = vperm.xlu0 %7228, %v7416_v25   ;;  %5357 = vmatprep.subr.bf16.mxu0 %v7351_v43  ;;  %v7352_v15 = vld [vmem:[%s10884_s15 + $0x50] ss:$8 sps:$4 sm:$0xff]   ;;  %v7385_v43 = vld [vmem:[%s10884_s15 + $0xa0] ss:$8 sps:$4 sm:$0xff]  }
 0x384   : > { %7226 = vset.pattern.permute.xlu1 %v10947_v16 }
 0x385   : > { %3756 = vperm.xlu1 %7226, %v9120_v18   ;;  %7143 = vmatpush1.bf16.msra.mxu1 %v7349_v38 }
 0x386   : > { %5358 = vmatpush1.bf16.msra.mxu0 %v7349_v38  ;;  %v7387_v38 = vld [vmem:[%s10884_s15 + $0xa4] ss:$8 sps:$4 sm:$0xff]  }
 0x387   : > { %7234 = vset.pattern.permute.xlu0 %v10972_v45 }
 0x389   : > { %7227 = vset.pattern.permute.xlu1 %v10971_v22 }
 0x38a   : > { %v9135_v13 = vpop.eup %7417  ;;  %v7064_v8 = vpop.f32.mrf.mxu0  ;;  %4040 = vperm.xlu1 %7227, %v9120_v18  }
 0x38b   : > { %3726 = vst [vmem:[%s9112_s7 + $0x30] sm:$0xff] %v9135_v13  ;;  %v3602_v33 = vadd.f32 %v7064_v8, %v9101_v6  ;;  %v7354_v8 = vld [vmem:[%s10884_s15 + $0x54] ss:$8 sps:$4 sm:$0xff]  }
 0x38c   : > { %v9141_v44 = vpop.eup %7419  ;;  %v3593_v19 = vpop.f32.mrf.mxu0  ;;  %7128 = vmatprep.subr.bf16.mxu1 %v7354_v8  ;;  %5359 = vmatprep.subr.bf16.mxu0 %v7354_v8 }
 0x38d   : > { %3724 = vst [vmem:[%s9112_s7 + $0x20] sm:$0xff] %v9141_v44  ;;  %7425 = vtanh.f32 %v3602_v33  ;;  %v3594_v62 = vadd.f32 %v9101_v6, %v3593_v19  ;;  %v7357_v19 = vld [vmem:[%s10884_s15 + $0x44] ss:$8 sps:$4 sm:$0xff]   ;;  %7144 = vmatpush1.bf16.msra.mxu1 %v7352_v15  ;;  %5360 = vmatpush1.bf16.msra.mxu0 %v7352_v15  ;;  %v7390_v15 = vld [vmem:[%s10884_s15 + $0x94] ss:$8 sps:$4 sm:$0xff]  }
 0x38e   : > { %v9146_v46 = vpop.eup %7421  ;;  %v7065_v14 = vpop.f32.mrf.mxu0  ;;  %4052 = vperm.xlu1 %7227, %v7414_v9   ;;  %7129 = vmatprep.subr.bf16.mxu1 %v7357_v19 }
 0x38f   : > { %3727 = vst [vmem:[%s9112_s7 + $0x38] sm:$0xff] %v9146_v46  ;;  %7427 = vtanh.f32 %v3594_v62  ;;  %v3605_v50 = vadd.f32 %v7065_v14, %v9101_v6  ;;  %v7355_v62 = vld [vmem:[%s10884_s15 + $0x40] ss:$8 sps:$4 sm:$0xff]   ;;  %5361 = vmatprep.subr.bf16.mxu0 %v7357_v19  ;;  %v7358_v14 = vld [vmem:[%s10884_s15 + $0x30] ss:$8 sps:$4 sm:$0xff]  }
 0x390   : > { %v9151_v17 = vpop.eup %7423  ;;  %v3596_v10 = vpop.f32.mrf.mxu0  ;;  %v7388_v19 = vld [vmem:[%s10884_s15 + $0x90] ss:$8 sps:$4 sm:$0xff]  }
 0x391   : > { %3725 = vst [vmem:[%s9112_s7 + $0x28] sm:$0xff] %v9151_v17  ;;  %7429 = vtanh.f32 %v3605_v50  ;;  %v3597_v2 = vadd.f32 %v9101_v6, %v3596_v10  ;;  %7145 = vmatpush1.bf16.msra.mxu1 %v7355_v62  ;;  %v7360_v50 = vld [vmem:[%s10884_s15 + $0x34] ss:$8 sps:$4 sm:$0xff]   ;;  %5362 = vmatpush1.bf16.msra.mxu0 %v7355_v62  ;;  %v7361_v10 = vld [vmem:[%s10884_s15 + $0x20] ss:$8 sps:$4 sm:$0xff]  }
 0x392   : > { %7229 = vset.pattern.permute.xlu1 %v10972_v45  ;;  %7130 = vmatprep.subr.bf16.mxu1 %v7360_v50 }
 0x393   : > { %7431 = vtanh.f32 %v3597_v2  ;;  %4399 = vperm.xlu1 %7229, %v7414_v9   ;;  %5363 = vmatprep.subr.bf16.mxu0 %v7360_v50  ;;  %v7363_v2 = vld [vmem:[%s10884_s15 + $0x24] ss:$8 sps:$4 sm:$0xff]  }
 0x395   : > { %7146 = vmatpush1.bf16.msra.mxu1 %v7358_v14  ;;  %5364 = vmatpush1.bf16.msra.mxu0 %v7358_v14  ;;  %v7393_v14 = vld [vmem:[%s10884_s15 + $0x84] ss:$8 sps:$4 sm:$0xff]  }
 0x396   : > { %7131 = vmatprep.subr.bf16.mxu1 %v7363_v2  ;;  %5365 = vmatprep.subr.bf16.mxu0 %v7363_v2 }
 0x397   : > { %7230 = vset.pattern.permute.xlu1 %v10971_v22 }
 0x398   : > { %4044 = vperm.xlu1 %7230, %v7416_v25  }
 0x399   : > { %7147 = vmatpush1.bf16.msra.mxu1 %v7361_v10  ;;  %5366 = vmatpush1.bf16.msra.mxu0 %v7361_v10 }
 0x39a   : > { %v9158_v35 = vpop.eup %7425  ;;  %v7068_v7 = vpop.f32.mrf.mxu0 }
 0x39b   : > { %3730 = vst [vmem:[%s9112_s7 + $0x50] sm:$0xff] %v9158_v35  ;;  %v3618_v23 = vadd.f32 %v7068_v7, %v9101_v6  ;;  %v7364_v7 = vld [vmem:[%s10884_s15 + $0x10] ss:$8 sps:$4 sm:$0xff]  }
 0x39c   : > { %v9163_v40 = vpop.eup %7427  ;;  %v3609_v26 = vpop.f32.mrf.mxu0  ;;  %7231 = vset.pattern.permute.xlu1 %v10972_v45 }
 0x39d   : > { %3728 = vst [vmem:[%s9112_s7 + $0x40] sm:$0xff] %v9163_v40  ;;  %7433 = vtanh.f32 %v3618_v23  ;;  %v3610_v39 = vadd.f32 %v9101_v6, %v3609_v26  ;;  %4391 = vperm.xlu1 %7231, %v7416_v25   ;;  %v7366_v23 = vld [vmem:[%s10884_s15 + $0x14] ss:$8 sps:$4 sm:$0xff]  }
 0x39e   : > { %v9169_v11 = vpop.eup %7429  ;;  %v7069_v29 = vpop.f32.mrf.mxu0  ;;  %7132 = vmatprep.subr.bf16.mxu1 %v7366_v23  ;;  %5367 = vmatprep.subr.bf16.mxu0 %v7366_v23 }
 0x39f   : > { %3731 = vst [vmem:[%s9112_s7 + $0x58] sm:$0xff] %v9169_v11  ;;  %7435 = vtanh.f32 %v3610_v39  ;;  %v3621_v31 = vadd.f32 %v7069_v29, %v9101_v6  ;;  %7148 = vmatpush1.bf16.msra.mxu1 %v7364_v7  ;;  %5368 = vmatpush1.bf16.msra.mxu0 %v7364_v7  ;;  %v7391_v7 = vld [vmem:[%s10884_s15 + $0x80] ss:$8 sps:$4 sm:$0xff]  }
 0x3a0   : > { %v9174_v60 = vpop.eup %7431  ;;  %v3612_v53 = vpop.f32.mrf.mxu0 }
 0x3a1   : > { %3729 = vst [vmem:[%s9112_s7 + $0x48] sm:$0xff] %v9174_v60  ;;  %7437 = vtanh.f32 %v3621_v31  ;;  %v3613_v52 = vadd.f32 %v9101_v6, %v3612_v53  ;;  %7232 = vset.pattern.permute.xlu1 %v10947_v16  ;;  %v7367_v53 = vld [vmem:[%s10884_s15] ss:$8 sps:$4 sm:$0xff]  }
 0x3a2   : > { %3776 = vperm.xlu1 %7232, %v9141_v44  }
 0x3a3   : > { %7439 = vtanh.f32 %v3613_v52  ;;  %v7369_v52 = vld [vmem:[%s10884_s15 + $0x4] ss:$8 sps:$4 sm:$0xff]  }
 0x3a4   : > { %7133 = vmatprep.subr.bf16.mxu1 %v7369_v52  ;;  %5369 = vmatprep.subr.bf16.mxu0 %v7369_v52 }
 0x3a5   : > { %7149 = vmatpush1.bf16.msra.mxu1 %v7367_v53  ;;  %5370 = vmatpush1.bf16.msra.mxu0 %v7367_v53 }
 0x3aa   : > { %v9181_v61 = vpop.eup %7433 }
 0x3ab   : > { %3734 = vst [vmem:[%s9112_s7 + $0x70] sm:$0xff] %v9181_v61 }
 0x3ac   : > { %v9185_v49 = vpop.eup %7435 }
 0x3ad   : > { %3732 = vst [vmem:[%s9112_s7 + $0x60] sm:$0xff] %v9185_v49 }
 0x3ae   : > { %v9189_v59 = vpop.eup %7437 }
 0x3af   : > { %3735 = vst [vmem:[%s9112_s7 + $0x78] sm:$0xff] %v9189_v59 }
 0x3b0   : > { %v9193_v27 = vpop.eup %7439 }
 0x3b1   : > { %3733 = vst [vmem:[%s9112_s7 + $0x68] sm:$0xff] %v9193_v27 }
 0x3ba   : > { %v7072_v55 = vpop.f32.mrf.mxu0 }
 0x3bb   : > { %v3634_v47 = vadd.f32 %v7072_v55, %v9101_v6 }
 0x3bc   : > { %v3625_v56 = vpop.f32.mrf.mxu0 }
 0x3bd   : > { %7441 = vtanh.f32 %v3634_v47  ;;  %v3626_v21 = vadd.f32 %v9101_v6, %v3625_v56 }
 0x3be   : > { %v7073_v51 = vpop.f32.mrf.mxu0 }
 0x3bf   : > { %7443 = vtanh.f32 %v3626_v21  ;;  %v3637_v32 = vadd.f32 %v7073_v51, %v9101_v6  ;;  %v7370_v51 = vld [vmem:[%s10884_s15 + $0xf0] ss:$8 sps:$4 sm:$0xff]  }
 0x3c0   : > { %v3628_v63 = vpop.f32.mrf.mxu0 }
 0x3c1   : > { %7445 = vtanh.f32 %v3637_v32  ;;  %v3629_v4 = vadd.f32 %v9101_v6, %v3628_v63  ;;  %v7372_v32 = vld [vmem:[%s10884_s15 + $0xf4] ss:$8 sps:$4 sm:$0xff]   ;;  %v7373_v63 = vld [vmem:[%s10884_s15 + $0xe0] ss:$8 sps:$4 sm:$0xff]  }
 0x3c2   : > { %7134 = vmatprep.subr.bf16.mxu1 %v7372_v32  ;;  %5371 = vmatprep.subr.bf16.mxu0 %v7372_v32 }
 0x3c3   : > { %7447 = vtanh.f32 %v3629_v4  ;;  %7150 = vmatpush2.bf16.msra.mxu1 %v7370_v51  ;;  %v7375_v4 = vld [vmem:[%s10884_s15 + $0xe4] ss:$8 sps:$4 sm:$0xff]   ;;  %5372 = vmatpush2.bf16.msra.mxu0 %v7370_v51 }
 0x3c4   : > { %7135 = vmatprep.subr.bf16.mxu1 %v7375_v4  ;;  %5373 = vmatprep.subr.bf16.mxu0 %v7375_v4  ;;  %v10980_v51 = vld [vmem:[#allocation3_spill] sm:$0xff] }
 0x3c5   : > { %v10981_v32 = vsub.s32 4, %v10980_v51 }
 0x3c7   : > { %7151 = vmatpush2.bf16.msra.mxu1 %v7373_v63  ;;  %5374 = vmatpush2.bf16.msra.mxu0 %v7373_v63 }
 0x3ca   : > { %v9201_v0 = vpop.eup %7441 }
 0x3cb   : > { %3738 = vst [vmem:[%s9112_s7 + $0x90] sm:$0xff] %v9201_v0 }
 0x3cc   : > { %v9205_v48 = vpop.eup %7443 }
 0x3cd   : > { %3736 = vst [vmem:[%s9112_s7 + $0x80] sm:$0xff] %v9205_v48 }
 0x3ce   : > { %v9209_v34 = vpop.eup %7445 }
 0x3cf   : > { %3739 = vst [vmem:[%s9112_s7 + $0x98] sm:$0xff] %v9209_v34 }
 0x3d0   : > { %v9213_v1 = vpop.eup %7447 }
 0x3d1   : > { %10973 = vst [vmem:[#allocation11_spill] sm:$0xff] %v9213_v1  ;;  %3737 = vst [vmem:[%s9112_s7 + $0x88] sm:$0xff] %v9213_v1 }
 0x3e1   : > { %v7076_v57 = vpop.f32.mrf.mxu0 }
 0x3e2   : > { %v3650_v5 = vadd.f32 %v7076_v57, %v9101_v6  ;;  %v7376_v57 = vld [vmem:[%s10884_s15 + $0xd0] ss:$8 sps:$4 sm:$0xff]  }
 0x3e3   : > { %v3641_v42 = vpop.f32.mrf.mxu0 }
 0x3e4   : > { %7449 = vtanh.f32 %v3650_v5  ;;  %v3642_v58 = vadd.f32 %v9101_v6, %v3641_v42  ;;  %v7378_v5 = vld [vmem:[%s10884_s15 + $0xd4] ss:$8 sps:$4 sm:$0xff]  }
 0x3e5   : > { %v7077_v36 = vpop.f32.mrf.mxu0  ;;  %7136 = vmatprep.subr.bf16.mxu1 %v7378_v5  ;;  %5375 = vmatprep.subr.bf16.mxu0 %v7378_v5 }
 0x3e6   : > { %7451 = vtanh.f32 %v3642_v58  ;;  %v3653_v28 = vadd.f32 %v7077_v36, %v9101_v6  ;;  %7152 = vmatpush2.bf16.msra.mxu1 %v7376_v57  ;;  %5376 = vmatpush2.bf16.msra.mxu0 %v7376_v57 }
 0x3e7   : > { %v3644_v37 = vpop.f32.mrf.mxu0 }
 0x3e8   : > { %7453 = vtanh.f32 %v3653_v28  ;;  %v3645_v30 = vadd.f32 %v9101_v6, %v3644_v37  ;;  %v7381_v37 = vld [vmem:[%s10884_s15 + $0xc4] ss:$8 sps:$4 sm:$0xff]  }
 0x3e9   : > { %7137 = vmatprep.subr.bf16.mxu1 %v7381_v37  ;;  %5377 = vmatprep.subr.bf16.mxu0 %v7381_v37 }
 0x3ea   : > { %7455 = vtanh.f32 %v3645_v30  ;;  %v7379_v30 = vld [vmem:[%s10884_s15 + $0xc0] ss:$8 sps:$4 sm:$0xff]  }
 0x3eb   : > { %7153 = vmatpush2.bf16.msra.mxu1 %v7379_v30  ;;  %5378 = vmatpush2.bf16.msra.mxu0 %v7379_v30 }
 0x3ec   : > { %7138 = vmatprep.subr.bf16.mxu1 %v7384_v54  ;;  %5379 = vmatprep.subr.bf16.mxu0 %v7384_v54  ;;  %v10984_v54 = vsub.s32 6, %v10980_v51 }
 0x3ef   : > { %7154 = vmatpush2.bf16.msra.mxu1 %v7382_v24  ;;  %5380 = vmatpush2.bf16.msra.mxu0 %v7382_v24 }
 0x3f0   : > { %7139 = vmatprep.subr.bf16.mxu1 %v7387_v38  ;;  %5381 = vmatprep.subr.bf16.mxu0 %v7387_v38 }
 0x3f1   : > { %v9227_v9 = vpop.eup %7449 }
 0x3f2   : > { %3742 = vst [vmem:[%s9112_s7 + $0xb0] sm:$0xff] %v9227_v9 }
 0x3f3   : > { %v9237_v25 = vpop.eup %7451  ;;  %7155 = vmatpush2.bf16.msra.mxu1 %v7385_v43  ;;  %5382 = vmatpush2.bf16.msra.mxu0 %v7385_v43 }
 0x3f4   : > { %3740 = vst [vmem:[%s9112_s7 + $0xa0] sm:$0xff] %v9237_v25  ;;  %7140 = vmatprep.subr.bf16.mxu1 %v7390_v15  ;;  %5383 = vmatprep.subr.bf16.mxu0 %v7390_v15 }
 0x3f5   : > { %v9241_v41 = vpop.eup %7453 }
 0x3f6   : > { %3743 = vst [vmem:[%s9112_s7 + $0xb8] sm:$0xff] %v9241_v41 }
 0x3f7   : > { %v9251_v33 = vpop.eup %7455  ;;  %7156 = vmatpush2.bf16.msra.mxu1 %v7388_v19  ;;  %5384 = vmatpush2.bf16.msra.mxu0 %v7388_v19 }
 0x3f8   : > { %3741 = vst [vmem:[%s9112_s7 + $0xa8] sm:$0xff] %v9251_v33  ;;  %7141 = vmatprep.subr.bf16.mxu1 %v7393_v14  ;;  %5385 = vmatprep.subr.bf16.mxu0 %v7393_v14 }
 0x3fb   : > { %7157 = vmatpush2.bf16.msra.mxu1 %v7391_v7  ;;  %5386 = vmatpush2.bf16.msra.mxu0 %v7391_v7 }
 0x3fc   : > { %6108 = vmatprep.subr.bf16.mxu0 %v10947_v16 }
 0x407   : > { %v7080_v26 = vpop.f32.mrf.mxu0 }
 0x408   : > { %v3666_v39 = vadd.f32 %v7080_v26, %v9101_v6 }
 0x409   : > { %v3657_v29 = vpop.f32.mrf.mxu0 }
 0x40a   : > { %7457 = vtanh.f32 %v3666_v39  ;;  %v3658_v31 = vadd.f32 %v9101_v6, %v3657_v29 }
 0x40b   : > { %v7081_v55 = vpop.f32.mrf.mxu0 }
 0x40c   : > { %7459 = vtanh.f32 %v3658_v31  ;;  %v3669_v47 = vadd.f32 %v7081_v55, %v9101_v6 }
 0x40d   : > { %v3660_v56 = vpop.f32.mrf.mxu0 }
 0x40e   : > { %7461 = vtanh.f32 %v3669_v47  ;;  %v3661_v21 = vadd.f32 %v9101_v6, %v3660_v56  ;;  %v9422_v47 = vpop.permute.xlu0 %3771  ;;  %v3752_v56 = vld [vmem:[%s10881_s12] sm:$0x77] }
 0x40f   : > { %v3923_v63 = vrot.slane %v3752_v56, %v10981_v32  ;;  %v4170_v4 = vrot.slane %v3752_v56, %v7927_v12  ;;  %v4521_v24 = vrot.slane %v3752_v56, %v10984_v54 }
 0x410   : > { %7463 = vtanh.f32 %v3661_v21  ;;  %v3753_v21 = vld [vmem:[%s10881_s12 + $0x8] sm:$0x7] }
 0x411   : > { %v3927_v5 = vrot.slane %v3753_v21, %v7941_v20  ;;  %v4178_v37 = vrot.slane %v3753_v21, %v7927_v12  ;;  %v9461_v19 = vrot.slane %v4170_v4, %v7927_v12 }
 0x413   : > { %v9470_v14 = vrot.slane %v4178_v37, %v7927_v12 }
 0x417   : > { %v7458_v42 = vpop.eup %7457 }
 0x418   : > { %3746 = vst [vmem:[%s9112_s7 + $0xd0] sm:$0xff] %v7458_v42  ;;  %4491 = vperm.xlu0 %7234, %v7458_v42   ;;  %3886 = vperm.xlu1 %7232, %v7458_v42  }
 0x419   : > { %v9308_v58 = vpop.eup %7459 }
 0x41a   : > { %3744 = vst [vmem:[%s9112_s7 + $0xc0] sm:$0xff] %v9308_v58 }
 0x41b   : > { %v7462_v36 = vpop.eup %7461 }
 0x41c   : > { %3747 = vst [vmem:[%s9112_s7 + $0xd8] sm:$0xff] %v7462_v36  ;;  %7235 = vset.pattern.permute.xlu0 %v10947_v16  ;;  %7233 = vset.pattern.permute.xlu1 %v10971_v22 }
 0x41d   : > { %v9315_v28 = vpop.eup %7463  ;;  %3891 = vperm.xlu0 %7235, %v7462_v36   ;;  %4144 = vperm.xlu1 %7233, %v7458_v42   ;;  %v10982_v42 = vsub.s32 5, %v10980_v51 }
 0x41e   : > { %3745 = vst [vmem:[%s9112_s7 + $0xc8] sm:$0xff] %v9315_v28 }
 0x421   : > { %4148 = vperm.xlu1 %7233, %v7462_v36   ;;  %7239 = vset.pattern.permute.xlu0 %v10972_v45 }
 0x425   : > { %7236 = vset.pattern.permute.xlu1 %v10972_v45 }
 0x426   : > { %4495 = vperm.xlu1 %7236, %v7462_v36   ;;  %v4174_v36 = vrot.slane %v3752_v56, %v10982_v42 }
 0x42a   : > { %7237 = vset.pattern.permute.xlu1 %v10947_v16 }
 0x42d   : > { %v7084_v8 = vpop.f32.mrf.mxu0 }
 0x42e   : > { %v3682_v62 = vadd.f32 %v7084_v8, %v9101_v6  ;;  %v9458_v8 = vrot.slane %v3923_v63, %v7941_v20 }
 0x42f   : > { %v3673_v50 = vpop.f32.mrf.mxu0 }
 0x430   : > { %7465 = vtanh.f32 %v3682_v62  ;;  %v3674_v10 = vadd.f32 %v9101_v6, %v3673_v50  ;;  %v9467_v62 = vrot.slane %v4174_v36, %v7927_v12 }
 0x431   : > { %v7085_v2 = vpop.f32.mrf.mxu0 }
 0x432   : > { %7467 = vtanh.f32 %v3674_v10  ;;  %v3685_v23 = vadd.f32 %v7085_v2, %v9101_v6 }
 0x433   : > { %v3676_v26 = vpop.f32.mrf.mxu0 }
 0x434   : > { %7469 = vtanh.f32 %v3685_v23  ;;  %v3677_v39 = vadd.f32 %v9101_v6, %v3676_v26  ;;  %v9377_v6 = vpop.permute.xlu1 %3766 }
 0x436   : > { %7471 = vtanh.f32 %v3677_v39 }
 0x438   : > { %v9384_v55 = vpop.permute.xlu1 %4048 }
 0x43d   : > { %v7466_v29 = vpop.eup %7465 }
 0x43e   : > { %3750 = vst [vmem:[%s9112_s7 + $0xf0] sm:$0xff] %v7466_v29  ;;  %4507 = vperm.xlu0 %7239, %v7466_v29   ;;  %3906 = vperm.xlu1 %7237, %v7466_v29  }
 0x43f   : > { %v7468_v31 = vpop.eup %7467 }
 0x440   : > { %3748 = vst [vmem:[%s9112_s7 + $0xe0] sm:$0xff] %v7468_v31 }
 0x441   : > { %v7470_v53 = vpop.eup %7469 }
 0x442   : > { %3751 = vst [vmem:[%s9112_s7 + $0xf8] sm:$0xff] %v7470_v53  ;;  %7238 = vset.pattern.permute.xlu1 %v10971_v22  ;;  %4499 = vperm.xlu0 %7239, %v7468_v31  }
 0x443   : > { %v9361_v52 = vpop.eup %7471  ;;  %4160 = vperm.xlu1 %7238, %v7466_v29  }
 0x444   : > { %3749 = vst [vmem:[%s9112_s7 + $0xe8] sm:$0xff] %v9361_v52 }
 0x446   : > { %7242 = vset.pattern.permute.xlu0 %v10947_v16 }
 0x447   : > { %7240 = vset.pattern.permute.xlu1 %v10947_v16  ;;  %3911 = vperm.xlu0 %7242, %v7470_v53  }
 0x448   : > { %3896 = vperm.xlu1 %7240, %v7468_v31  }
 0x44b   : > { %3901 = vperm.xlu0 %7242, %v9361_v52  }
 0x44c   : > { %7241 = vset.pattern.permute.xlu1 %v10971_v22 }
 0x44d   : > { %4152 = vperm.xlu1 %7241, %v7468_v31  }
 0x44f   : > { %3781 = vperm.xlu0 %7242, %v9151_v17  }
 0x451   : > { %4164 = vperm.xlu1 %7241, %v7470_v53  }
 0x453   : > { %3791 = vperm.xlu0 %7242, %v9146_v46  }
 0x455   : > { %7243 = vset.pattern.permute.xlu1 %v10972_v45 }
 0x456   : > { %4511 = vperm.xlu1 %7243, %v7470_v53  }
 0x457   : > { %3801 = vperm.xlu0 %7242, %v9174_v60  }
 0x45a   : > { %7244 = vset.pattern.permute.xlu1 %v10971_v22 }
 0x45b   : > { %7250 = vset.pattern.permute.xlu0 %v10972_v45  ;;  %4056 = vperm.xlu1 %7244, %v9141_v44  }
 0x45c   : > { %4387 = vperm.xlu0 %7250, %v9120_v18   ;;  %v9389_v18 = vpop.permute.xlu1 %3756 }
 0x45d   : > { %10974 = vst [vmem:[#allocation10_spill] sm:$0xff] %v9389_v18 }
 0x45f   : > { %4060 = vperm.xlu1 %7244, %v9151_v17  }
 0x460   : > { %4395 = vperm.xlu0 %7250, %v9114_v3   ;;  %v9395_v3 = vpop.permute.xlu1 %4040 }
 0x461   : > { %10975 = vst [vmem:[#allocation13_spill] sm:$0xff] %v9395_v3 }
 0x463   : > { %7245 = vset.pattern.permute.xlu1 %v10972_v45 }
 0x464   : > { %4403 = vperm.xlu0 %7250, %v9141_v44   ;;  %4407 = vperm.xlu1 %7245, %v9151_v17   ;;  %v9400_v44 = vpop.permute.xlu1 %4052 }
 0x468   : > { %4411 = vperm.xlu0 %7250, %v9135_v13   ;;  %7246 = vset.pattern.permute.xlu1 %v10947_v16 }
 0x469   : > { %3786 = vperm.xlu1 %7246, %v9135_v13  }
 0x46c   : > { %4419 = vperm.xlu0 %7250, %v9163_v40  }
 0x46d   : > { %7247 = vset.pattern.permute.xlu1 %v10971_v22 }
 0x46e   : > { %4064 = vperm.xlu1 %7247, %v9135_v13   ;;  %v9407_v13 = vpop.permute.xlu1 %4399 }
 0x470   : > { %4427 = vperm.xlu0 %7250, %v9158_v35  }
 0x472   : > { %4068 = vperm.xlu1 %7247, %v9146_v46   ;;  %v9413_v17 = vpop.permute.xlu1 %4044 }
 0x473   : > { %10976 = vst [vmem:[#allocation12_spill] sm:$0xff] %v9413_v17 }
 0x474   : > { %4435 = vperm.xlu0 %7250, %v9185_v49  }
 0x476   : > { %7248 = vset.pattern.permute.xlu1 %v10972_v45 }
 0x477   : > { %4415 = vperm.xlu1 %7248, %v9146_v46   ;;  %v9417_v46 = vpop.permute.xlu1 %4391 }
 0x478   : > { %4443 = vperm.xlu0 %7250, %v9181_v61   ;;  %10977 = vst [vmem:[#allocation9_spill] sm:$0xff] %v9417_v46 }
 0x47b   : > { %7249 = vset.pattern.permute.xlu1 %v10947_v16 }
 0x47c   : > { %7263 = vset.pattern.permute.xlu0 %v10947_v16  ;;  %3796 = vperm.xlu1 %7249, %v9163_v40  }
 0x47d   : > { %3811 = vperm.xlu0 %7263, %v9169_v11  }
 0x480   : > { %7251 = vset.pattern.permute.xlu1 %v10971_v22 }
 0x481   : > { %3821 = vperm.xlu0 %7263, %v9193_v27   ;;  %4072 = vperm.xlu1 %7251, %v9163_v40   ;;  %v9426_v40 = vpop.permute.xlu1 %3776 }
 0x482   : > { %10978 = vst [vmem:[#allocation8_spill] sm:$0xff] %v9426_v40 }
 0x485   : > { %3831 = vperm.xlu0 %7263, %v9189_v59   ;;  %4076 = vperm.xlu1 %7251, %v9174_v60  }
 0x489   : > { %3841 = vperm.xlu0 %7263, %v9213_v1   ;;  %7252 = vset.pattern.permute.xlu1 %v10972_v45 }
 0x48a   : > { %4423 = vperm.xlu1 %7252, %v9174_v60   ;;  %v9436_v60 = vpop.permute.xlu0 %3761 }
 0x48b   : > { %10979 = vst [vmem:[#allocation15_spill] sm:$0xff] %v9436_v60 }
 0x48d   : > { %3851 = vperm.xlu0 %7263, %v9209_v34   ;;  %v3919_v34 = vrot.slane %v3752_v56, %v7941_v20 }
 0x48e   : > { %7253 = vset.pattern.permute.xlu1 %v10947_v16 }
 0x48f   : > { %3806 = vperm.xlu1 %7253, %v9158_v35   ;;  %v9455_v15 = vrot.slane %v3919_v34, %v7941_v20 }
 0x491   : > { %3861 = vperm.xlu0 %7263, %v9251_v33   ;;  %v10983_v33 = vld [vmem:[#allocation5_spill] sm:$0xff] }
 0x492   : > { %v4517_v30 = vrot.slane %v3752_v56, %v10983_v33  ;;  %v4525_v38 = vrot.slane %v3753_v21, %v10983_v33  ;;  %v9477_v2 = vrot.slane %v4521_v24, %v10983_v33  ;;  %v4733_v56 = vld [vmem:[%s10882_s13] sm:$0x7] }
 0x493   : > { %v3887_v57 = vpop.permute.xlu1 %3886  ;;  %7254 = vset.pattern.permute.xlu1 %v10971_v22  ;;  %v4492_v43 = vpop.permute.xlu0 %4491 }
 0x494   : > { %4080 = vperm.xlu1 %7254, %v9158_v35   ;;  %v9464_v35 = vrot.slane %v3927_v5, %v7941_v20  ;;  %v9473_v50 = vrot.slane %v4517_v30, %v10983_v33  ;;  %v9480_v7 = vrot.slane %v4525_v38, %v10983_v33  ;;  %v4021_v23 = vmul.f32 %v9455_v15, %v3887_v57 }
 0x495   : > { %7272 = vset.pattern.permute.xlu0 %v10972_v45  ;;  %v4022_v39 = vmul.f32 %v9458_v8, %v3887_v57  ;;  %v4620_v51 = vmul.f32 %v9477_v2, %v4492_v43  ;;  %v9501_v30 = vrot.slane %v4733_v56, %v7941_v20  ;;  %v9505_v38 = vrot.slane %v4733_v56, %v10983_v33 }
 0x496   : > { %4451 = vperm.xlu0 %7272, %v9205_v48   ;;  %v4023_v29 = vmul.f32 %v9464_v35, %v3887_v57  ;;  %v4619_v21 = vmul.f32 %v9473_v50, %v4492_v43  ;;  %v4621_v32 = vmul.f32 %v9480_v7, %v4492_v43 }
 0x498   : > { %v4145_v10 = vpop.permute.xlu1 %4144  ;;  %4084 = vperm.xlu1 %7254, %v9169_v11   ;;  %v3892_v63 = vpop.permute.xlu0 %3891 }
 0x499   : > { %v4272_v26 = vmul.f32 %v9461_v19, %v4145_v10  ;;  %v4273_v31 = vmul.f32 %v9467_v62, %v4145_v10  ;;  %v4274_v53 = vmul.f32 %v9470_v14, %v4145_v10  ;;  %v4024_v43 = vmul.f32 %v9455_v15, %v3892_v63 }
 0x49a   : > { %4459 = vperm.xlu0 %7272, %v9201_v0   ;;  %v4025_v10 = vmul.f32 %v9458_v8, %v3892_v63 }
 0x49b   : > { %v4368_v34 = vadd.f32 %v4272_v26, %v4021_v23  ;;  %v4369_v4 = vadd.f32 %v4273_v31, %v4022_v39  ;;  %v4370_v57 = vadd.f32 %v4274_v53, %v4023_v29  ;;  %v4026_v23 = vmul.f32 %v9464_v35, %v3892_v63 }
 0x49c   : > { %v4149_v5 = vpop.permute.xlu1 %4148  ;;  %7255 = vset.pattern.permute.xlu1 %v10972_v45  ;;  %v9515_v39 = vrot.slane %v4733_v56, %v7927_v12 }
 0x49d   : > { %v4715_v42 = vadd.f32 %v4619_v21, %v4368_v34  ;;  %v4275_v0 = vmul.f32 %v9461_v19, %v4149_v5  ;;  %v4276_v36 = vmul.f32 %v9467_v62, %v4149_v5  ;;  %v4277_v37 = vmul.f32 %v9470_v14, %v4149_v5  ;;  %4431 = vperm.xlu1 %7255, %v9169_v11   ;;  %v4846_v11 = vld [vmem:[%s10883_s14] sm:$0x7] }
 0x49e   : > { %v4716_v54 = vadd.f32 %v4620_v51, %v4369_v4  ;;  %v4717_v24 = vadd.f32 %v4621_v32, %v4370_v57  ;;  %4467 = vperm.xlu0 %7272, %v9237_v25   ;;  %v9525_v56 = vrot.slane %v4846_v11, %v10983_v33  ;;  %v9528_v4 = vrot.slane %v4846_v11, %v7941_v20 }
 0x49f   : > { %v4828_v26 = vmul.f32 %v9501_v30, %v4715_v42  ;;  %v4371_v29 = vadd.f32 %v4275_v0, %v4024_v43  ;;  %v4372_v31 = vadd.f32 %v4276_v36, %v4025_v10  ;;  %v4373_v53 = vadd.f32 %v4277_v37, %v4026_v23 }
 0x4a0   : > { %v4830_v25 = vmul.f32 %v9505_v38, %v4717_v24  ;;  %v4829_v63 = vmul.f32 %v9515_v39, %v4716_v54  ;;  %v9532_v0 = vrot.slane %v4846_v11, %v7927_v12 }
 0x4a1   : > { %v4496_v21 = vpop.permute.xlu1 %4495  ;;  %7256 = vset.pattern.permute.xlu1 %v10971_v22  ;;  %v4941_v36 = vadd.f32 %v9528_v4, %v4828_v26 }
 0x4a2   : > { %v4622_v34 = vmul.f32 %v9473_v50, %v4496_v21  ;;  %v4623_v51 = vmul.f32 %v9477_v2, %v4496_v21  ;;  %v4624_v32 = vmul.f32 %v9480_v7, %v4496_v21  ;;  %4475 = vperm.xlu0 %7272, %v9227_v9   ;;  %4156 = vperm.xlu1 %7256, %v9361_v52  }
 0x4a3   : > { %v4943_v9 = vadd.f32 %v9525_v56, %v4830_v25  ;;  %v4942_v24 = vadd.f32 %v9532_v0, %v4829_v63  ;;  %v5037_v11 = vmax.f32 %v4941_v36, 0.0  ;;  %v3953_v63 = vmul.f32 %v9458_v8, %v9422_v47 }
 0x4a4   : > { %v4718_v57 = vadd.f32 %v4622_v34, %v4371_v29  ;;  %v4719_v5 = vadd.f32 %v4623_v51, %v4372_v31  ;;  %v4720_v42 = vadd.f32 %v4624_v32, %v4373_v53  ;;  %v9565_v32 = vmul.f32 %v9455_v15, %v9377_v6 }
 0x4a5   : > { %v5039_v26 = vmax.f32 %v4943_v9, 0.0  ;;  %v5038_v31 = vmax.f32 %v4942_v24, 0.0  ;;  %v4205_v36 = vmul.f32 %v9470_v14, %v9400_v44  ;;  %v5135_v9 = vld [vmem:[%s10884_s15 + $0x100] sm:$0x33]  ;;  %v3946_v24 = vmul.f32 %v9455_v15, %v9436_v60 }
 0x4a6   : > { %v4831_v37 = vmul.f32 %v9501_v30, %v4718_v57  ;;  %v4833_v33 = vmul.f32 %v9505_v38, %v4720_v42  ;;  %7277 = vset.pattern.permute.xlu0 %v10947_v16  ;;  %v4832_v54 = vmul.f32 %v9515_v39, %v4719_v5  ;;  %7257 = vset.pattern.permute.xlu1 %v10972_v45 }
 0x4a7   : > { %3871 = vperm.xlu0 %7277, %v9241_v41   ;;  %4503 = vperm.xlu1 %7257, %v9361_v52   ;;  %v4203_v5 = vmul.f32 %v9461_v19, %v9400_v44  ;;  %v4204_v42 = vmul.f32 %v9467_v62, %v9400_v44  ;;  %v3947_v44 = vmul.f32 %v9458_v8, %v9436_v60 }
 0x4a8   : > { %v4944_v43 = vadd.f32 %v9528_v4, %v4831_v37  ;;  %v4946_v10 = vadd.f32 %v9525_v56, %v4833_v33  ;;  %v4945_v23 = vadd.f32 %v9532_v0, %v4832_v54  ;;  %v4197_v37 = vmul.f32 %v9461_v19, %v9413_v17 }
 0x4a9   : > { %v6938_v33 = vcombine.low %v5135_v9, %v5135_v9  ;;  %v6939_v54 = vcombine.high %v5135_v9, %v5135_v9 }
 0x4aa   : > { %v5040_v25 = vmax.f32 %v4944_v43, 0.0  ;;  %v5042_v29 = vmax.f32 %v4946_v10, 0.0  ;;  %v5041_v53 = vmax.f32 %v4945_v23, 0.0  ;;  %v4550_v43 = vmul.f32 %v9473_v50, %v9407_v13 }
 0x4ab   : > { %3881 = vperm.xlu0 %7277, %v9315_v28   ;;  %7258 = vset.pattern.permute.xlu1 %v10947_v16  ;;  %v4551_v10 = vmul.f32 %v9477_v2, %v9407_v13  ;;  %v4552_v23 = vmul.f32 %v9480_v7, %v9407_v13  ;;  %v9614_v13 = vmul.f32 %v9461_v19, %v9384_v55 }
 0x4ac   : > { %v5094_v21 = vpack.c.bf16 %v5040_v25, %v5037_v11  ;;  %v5095_v41 = vpack.c.bf16 %v5041_v53, %v5038_v31  ;;  %v9549_v34 = vpack.c.bf16 %v5042_v29, %v5039_v26  ;;  %3816 = vperm.xlu1 %7258, %v9185_v49   ;;  %v4544_v11 = vmul.f32 %v9473_v50, %v9417_v46  ;;  %v10986_v29 = vld [vmem:[#allocation2_spill] sm:$0xff] }
 0x4ad   : > { %v4545_v26 = vmul.f32 %v9477_v2, %v9417_v46  ;;  %v5353_v31 = vand.u32 %v6939_v54, %v10986_v29  ;;  %v9609_v53 = vmul.f32 %v9464_v35, %v9377_v6  ;;  %v5350_v20 = vand.u32 %v6938_v33, %v10986_v29 }
 0x4ae   : > { %10985 = vst [vmem:[#allocation14_spill] sm:$0xff] %v9549_v34  ;;  %5517 = vmatprep.mubr.bf16.mxu1 %v5095_v41  ;;  %v4300_v41 = vadd.f32 %v4204_v42, %v3953_v63  ;;  %v4293_v34 = vadd.f32 %v4197_v37, %v3946_v24  ;;  %v9619_v54 = vmul.f32 %v9467_v62, %v9384_v55 }
 0x4af   : > { %5518 = vmatmul.mubr.bf16.vlgmr.msra.gmra.mxu1 %v5094_v21  ;;  %7281 = vset.pattern.permute.xlu0 %v10972_v45 }
 0x4b0   : > { %4483 = vperm.xlu0 %7281, %v9308_v58   ;;  %7259 = vset.pattern.permute.xlu1 %v10971_v22  ;;  %v9569_v58 = vmul.f32 %v9458_v8, %v9377_v6  ;;  %v9623_v6 = vmul.f32 %v9470_v14, %v9384_v55  ;;  %v4647_v63 = vadd.f32 %v4551_v10, %v4300_v41 }
 0x4b1   : > { %4088 = vperm.xlu1 %7259, %v9185_v49   ;;  %v3952_v49 = vmul.f32 %v9455_v15, %v9422_v47  ;;  %v4640_v42 = vadd.f32 %v4544_v11, %v4293_v34  ;;  %5562 = vmatprep.subr.bf16.mxu1 %v5353_v31 }
 0x4b2   : > { %5563 = vmatpush1.bf16.msra.mxu1 %v5350_v20 }
 0x4b3   : > { %v4299_v21 = vadd.f32 %v4203_v5, %v3952_v49 }
 0x4b5   : > { %4092 = vperm.xlu1 %7259, %v9193_v27   ;;  %v4646_v49 = vadd.f32 %v4550_v43, %v4299_v21 }
 0x4b9   : > { %v9557_v28 = vpop.permute.xlu0 %4507  ;;  %v3907_v52 = vpop.permute.xlu1 %3906  ;;  %7260 = vset.pattern.permute.xlu1 %v10972_v45 }
 0x4ba   : > { %4439 = vperm.xlu1 %7260, %v9193_v27   ;;  %v3954_v27 = vmul.f32 %v9464_v35, %v9422_v47  ;;  %v4198_v47 = vmul.f32 %v9467_v62, %v9413_v17  ;;  %v4631_v37 = vmul.f32 %v9473_v50, %v9557_v28  ;;  %v4034_v55 = vmul.f32 %v9458_v8, %v3907_v52 }
 0x4bb   : > { %v4632_v46 = vmul.f32 %v9477_v2, %v9557_v28 }
 0x4bc   : > { %v4301_v12 = vadd.f32 %v4205_v36, %v3954_v27  ;;  %v4294_v17 = vadd.f32 %v4198_v47, %v3947_v44  ;;  %v4033_v47 = vmul.f32 %v9455_v15, %v3907_v52 }
 0x4bd   : > { %v9561_v51 = vpop.permute.xlu0 %4499 }
 0x4be   : > { %v4161_v57 = vpop.permute.xlu1 %4160  ;;  %7261 = vset.pattern.permute.xlu1 %v10947_v16  ;;  %v4648_v5 = vadd.f32 %v4552_v23, %v4301_v12  ;;  %v4641_v33 = vadd.f32 %v4545_v26, %v4294_v17  ;;  %v4625_v20 = vmul.f32 %v9473_v50, %v9561_v51 }
 0x4bf   : > { %3826 = vperm.xlu1 %7261, %v9181_v61   ;;  %v4284_v27 = vmul.f32 %v9461_v19, %v4161_v57  ;;  %v4286_v24 = vmul.f32 %v9470_v14, %v4161_v57  ;;  %v4285_v12 = vmul.f32 %v9467_v62, %v4161_v57  ;;  %v4627_v57 = vmul.f32 %v9480_v7, %v9561_v51 }
 0x4c1   : > { %v4380_v26 = vadd.f32 %v4284_v27, %v4033_v47  ;;  %v4381_v60 = vadd.f32 %v4285_v12, %v4034_v55 }
 0x4c2   : > { %v3912_v25 = vpop.permute.xlu0 %3911 }
 0x4c3   : > { %v3897_v9 = vpop.permute.xlu1 %3896  ;;  %7262 = vset.pattern.permute.xlu1 %v10971_v22 }
 0x4c4   : > { %4096 = vperm.xlu1 %7262, %v9181_v61   ;;  %v4035_v61 = vmul.f32 %v9464_v35, %v3907_v52  ;;  %v4027_v17 = vmul.f32 %v9455_v15, %v3897_v9  ;;  %v4028_v34 = vmul.f32 %v9458_v8, %v3897_v9  ;;  %v4029_v43 = vmul.f32 %v9464_v35, %v3897_v9 }
 0x4c5   : > { %v4626_v52 = vmul.f32 %v9477_v2, %v9561_v51 }
 0x4c6   : > { %v9627_v36 = vpop.permute.xlu0 %3901  ;;  %v4382_v31 = vadd.f32 %v4286_v24, %v4035_v61  ;;  %v4037_v24 = vmul.f32 %v9458_v8, %v3912_v25  ;;  %v4038_v61 = vmul.f32 %v9464_v35, %v3912_v25 }
 0x4c7   : > { %10987 = vst [vmem:[#allocation3_spill] sm:$0xff] %v9627_v36  ;;  %v4036_v36 = vmul.f32 %v9455_v15, %v3912_v25  ;;  %v4194_v25 = vmul.f32 %v9461_v19, %v9395_v3 }
 0x4c8   : > { %v4153_v44 = vpop.permute.xlu1 %4152  ;;  %4100 = vperm.xlu1 %7262, %v9189_v59  }
 0x4c9   : > { %v4278_v10 = vmul.f32 %v9461_v19, %v4153_v44  ;;  %v4279_v23 = vmul.f32 %v9467_v62, %v4153_v44  ;;  %v4280_v11 = vmul.f32 %v9470_v14, %v4153_v44  ;;  %v4633_v44 = vmul.f32 %v9480_v7, %v9557_v28 }
 0x4ca   : > { %v9649_v29 = vpop.permute.xlu0 %3781 }
 0x4cb   : > { %v4374_v21 = vadd.f32 %v4278_v10, %v4027_v17  ;;  %v4375_v41 = vadd.f32 %v4279_v23, %v4028_v34  ;;  %v4376_v9 = vadd.f32 %v4280_v11, %v4029_v43  ;;  %v4761_v17 = vmul.f32 %v9505_v38, %v4648_v5 }
 0x4cc   : > { %v4165_v1 = vpop.permute.xlu1 %4164  ;;  %7264 = vset.pattern.permute.xlu1 %v10972_v45  ;;  %v4727_v34 = vadd.f32 %v4631_v37, %v4380_v26  ;;  %v4729_v43 = vadd.f32 %v4633_v44, %v4382_v31  ;;  %v4728_v23 = vadd.f32 %v4632_v46, %v4381_v60  ;;  %v4759_v5 = vmul.f32 %v9501_v30, %v4646_v49 }
 0x4cd   : > { %v9656_v40 = vadd.f32 %v4625_v20, %v4374_v21  ;;  %v9658_v51 = vadd.f32 %v4626_v52, %v4375_v41  ;;  %v9660_v27 = vadd.f32 %v4627_v57, %v4376_v9  ;;  %v4287_v47 = vmul.f32 %v9461_v19, %v4165_v1  ;;  %4447 = vperm.xlu1 %7264, %v9189_v59  }
 0x4ce   : > { %v4288_v28 = vmul.f32 %v9467_v62, %v4165_v1  ;;  %v4289_v55 = vmul.f32 %v9470_v14, %v4165_v1  ;;  %v9669_v12 = vpop.permute.xlu0 %3791  ;;  %v9674_v52 = vadd.f32 %v9614_v13, %v9565_v32  ;;  %v4753_v1 = vmul.f32 %v9501_v30, %v4640_v42 }
 0x4cf   : > { %10988 = vst [vmem:[#allocation5_spill] sm:$0xff] %v9656_v40  ;;  %10989 = vst [vmem:[#allocation2_spill] sm:$0xff] %v9658_v51  ;;  %v4383_v10 = vadd.f32 %v4287_v47, %v4036_v36  ;;  %v4760_v57 = vmul.f32 %v9515_v39, %v4647_v63  ;;  %v4754_v13 = vmul.f32 %v9515_v39, %v4641_v33 }
 0x4d0   : > { %10990 = vst [vmem:[#allocation16_spill] sm:$0xff] %v9660_v27  ;;  %v4384_v11 = vadd.f32 %v4288_v28, %v4037_v24  ;;  %v4385_v20 = vadd.f32 %v4289_v55, %v4038_v61  ;;  %v4195_v42 = vmul.f32 %v9467_v62, %v9395_v3  ;;  %v9691_v37 = vadd.f32 %v9525_v56, %v4761_v17 }
 0x4d1   : > { %v4512_v59 = vpop.permute.xlu1 %4511  ;;  %7265 = vset.pattern.permute.xlu1 %v10947_v16  ;;  %v4840_v49 = vmul.f32 %v9501_v30, %v4727_v34  ;;  %v4842_v63 = vmul.f32 %v9505_v38, %v4729_v43  ;;  %v4841_v41 = vmul.f32 %v9515_v39, %v4728_v23  ;;  %v3943_v33 = vmul.f32 %v9455_v15, %v9389_v18  ;;  %v10993_v34 = vld [vmem:[#allocation11_spill] sm:$0xff] }
 0x4d2   : > { %v4634_v46 = vmul.f32 %v9473_v50, %v4512_v59  ;;  %v4635_v60 = vmul.f32 %v9477_v2, %v4512_v59  ;;  %v4636_v36 = vmul.f32 %v9480_v7, %v4512_v59  ;;  %v9685_v32 = vpop.permute.xlu0 %3801  ;;  %3836 = vperm.xlu1 %7265, %v9205_v48   ;;  %v3944_v9 = vmul.f32 %v9458_v8, %v9389_v18 }
 0x4d3   : > { %v9702_v44 = vadd.f32 %v9532_v0, %v4760_v57  ;;  %v9705_v47 = vadd.f32 %v9528_v4, %v4759_v5  ;;  %v9708_v24 = vadd.f32 %v9528_v4, %v4753_v1  ;;  %v4297_v28 = vadd.f32 %v9619_v54, %v9569_v58 }
 0x4d4   : > { %v4730_v26 = vadd.f32 %v4634_v46, %v4383_v10  ;;  %v4731_v31 = vadd.f32 %v4635_v60, %v4384_v11  ;;  %v4732_v21 = vadd.f32 %v4636_v36, %v4385_v20  ;;  %v4298_v55 = vadd.f32 %v9623_v6, %v9609_v53  ;;  %v10992_v20 = vld [vmem:[#allocation8_spill] sm:$0xff] }
 0x4d5   : > { %v9715_v17 = vadd.f32 %v9532_v0, %v4754_v13  ;;  %v9719_v43 = vadd.f32 %v9525_v56, %v4842_v63  ;;  %v4290_v10 = vadd.f32 %v4194_v25, %v3943_v33  ;;  %v4291_v23 = vadd.f32 %v4195_v42, %v3944_v9 }
 0x4d6   : > { %v4057_v61 = vpop.permute.xlu1 %4056  ;;  %7266 = vset.pattern.permute.xlu1 %v10971_v22  ;;  %v9730_v54 = vadd.f32 %v9532_v0, %v4841_v41  ;;  %v9733_v6 = vadd.f32 %v9528_v4, %v4840_v49  ;;  %v3955_v25 = vmul.f32 %v9455_v15, %v10992_v20  ;;  %v3956_v1 = vmul.f32 %v9458_v8, %v10992_v20 }
 0x4d7   : > { %v9722_v11 = vpop.permute.xlu0 %4387  ;;  %4104 = vperm.xlu1 %7266, %v9205_v48   ;;  %v3957_v48 = vmul.f32 %v9464_v35, %v10992_v20  ;;  %v3960_v13 = vmul.f32 %v9464_v35, %v9649_v29  ;;  %v3958_v33 = vmul.f32 %v9455_v15, %v9649_v29  ;;  %v4206_v9 = vmul.f32 %v9461_v19, %v4057_v61 }
 0x4d8   : > { %10991 = vst [vmem:[#allocation17_spill] sm:$0xff] %v9722_v11  ;;  %v4541_v58 = vmul.f32 %v9473_v50, %v9722_v11  ;;  %v4542_v53 = vmul.f32 %v9477_v2, %v9722_v11  ;;  %v3959_v20 = vmul.f32 %v9458_v8, %v9649_v29  ;;  %v9761_v41 = vmul.f32 %v9455_v15, %v9669_v12 }
 0x4d9   : > { %v4844_v59 = vmul.f32 %v9515_v39, %v4731_v31  ;;  %v4843_v29 = vmul.f32 %v9501_v30, %v4730_v26  ;;  %v4845_v36 = vmul.f32 %v9505_v38, %v4732_v21  ;;  %v4207_v31 = vmul.f32 %v9467_v62, %v4057_v61 }
 0x4da   : > { %v4637_v46 = vadd.f32 %v4541_v58, %v4290_v10  ;;  %v4061_v60 = vpop.permute.xlu1 %4060  ;;  %v4638_v42 = vadd.f32 %v4542_v53, %v4291_v23  ;;  %v4208_v23 = vmul.f32 %v9470_v14, %v4057_v61  ;;  %v9768_v58 = vmul.f32 %v9458_v8, %v9669_v12 }
 0x4db   : > { %v4211_v49 = vmul.f32 %v9470_v14, %v4061_v60  ;;  %v4396_v63 = vpop.permute.xlu0 %4395  ;;  %4108 = vperm.xlu1 %7266, %v10993_v34   ;;  %v4302_v11 = vadd.f32 %v4206_v9, %v3955_v25  ;;  %v9783_v61 = vadd.f32 %v9532_v0, %v4844_v59  ;;  %v3966_v59 = vmul.f32 %v9464_v35, %v9669_v12 }
 0x4dc   : > { %v4750_v53 = vmul.f32 %v9501_v30, %v4637_v46  ;;  %v4548_v34 = vmul.f32 %v9477_v2, %v4396_v63  ;;  %v4549_v10 = vmul.f32 %v9480_v7, %v4396_v63  ;;  %v4751_v46 = vmul.f32 %v9515_v39, %v4638_v42  ;;  %v7539_v42 = vld [vmem:[%s9112_s7 + $0x88] sm:$0xff] }
 0x4dd   : > { %v4307_v57 = vadd.f32 %v4211_v49, %v3960_v13  ;;  %v4547_v13 = vmul.f32 %v9473_v50, %v4396_v63  ;;  %v4304_v3 = vadd.f32 %v4208_v23, %v3957_v48  ;;  %v4210_v63 = vmul.f32 %v9467_v62, %v4061_v60 }
 0x4de   : > { %v4645_v18 = vadd.f32 %v4549_v10, %v4298_v55  ;;  %v4863_v51 = vadd.f32 %v9528_v4, %v4750_v53  ;;  %v4644_v40 = vadd.f32 %v4548_v34, %v4297_v28  ;;  %v4209_v55 = vmul.f32 %v9461_v19, %v4061_v60 }
 0x4df   : > { %v4404_v49 = vpop.permute.xlu0 %4403  ;;  %v4408_v5 = vpop.permute.xlu1 %4407  ;;  %7267 = vset.pattern.permute.xlu1 %v10972_v45  ;;  %v4643_v25 = vadd.f32 %v4547_v13, %v9674_v52  ;;  %v4864_v9 = vadd.f32 %v9532_v0, %v4751_v46  ;;  %v4303_v46 = vadd.f32 %v4207_v31, %v3956_v1  ;;  %v10994_v31 = vmax.f32 %v9715_v17, 0.0 }
 0x4e0   : > { %v4553_v27 = vmul.f32 %v9473_v50, %v4404_v49  ;;  %v4555_v26 = vmul.f32 %v9480_v7, %v4404_v49  ;;  %4455 = vperm.xlu1 %7267, %v7539_v42   ;;  %v4558_v21 = vmul.f32 %v9480_v7, %v4408_v5  ;;  %v4758_v10 = vmul.f32 %v9505_v38, %v4645_v18 }
 0x4e1   : > { %v4554_v23 = vmul.f32 %v9477_v2, %v4404_v49  ;;  %v4557_v28 = vmul.f32 %v9477_v2, %v4408_v5  ;;  %v4959_v42 = vmax.f32 %v4863_v51, 0.0  ;;  %v4556_v52 = vmul.f32 %v9473_v50, %v4408_v5  ;;  %v7540_v49 = vld [vmem:[%s9112_s7 + $0x90] sm:$0xff] }
 0x4e2   : > { %v9787_v48 = vadd.f32 %v4555_v26, %v4304_v3  ;;  %v4654_v53 = vadd.f32 %v4558_v21, %v4307_v57  ;;  %v4649_v60 = vadd.f32 %v4553_v27, %v4302_v11  ;;  %v9798_v3 = vadd.f32 %v9528_v4, %v4843_v29 }
 0x4e3   : > { %v4306_v18 = vadd.f32 %v4210_v63, %v3959_v20  ;;  %v4757_v13 = vmul.f32 %v9515_v39, %v4644_v40  ;;  %v9803_v57 = vadd.f32 %v9525_v56, %v4845_v36  ;;  %v4305_v26 = vadd.f32 %v4209_v55, %v3958_v33  ;;  %v4412_v40 = vpop.permute.xlu0 %4411 }
 0x4e4   : > { %v3787_v34 = vpop.permute.xlu1 %3786  ;;  %7268 = vset.pattern.permute.xlu1 %v10947_v16  ;;  %v4960_v12 = vmax.f32 %v4864_v9, 0.0  ;;  %v5053_v51 = vmax.f32 %v9783_v61, 0.0  ;;  %v4756_v27 = vmul.f32 %v9501_v30, %v4643_v25  ;;  %v9808_v11 = vadd.f32 %v9525_v56, %v4758_v10 }
 0x4e5   : > { %3846 = vperm.xlu1 %7268, %v7540_v49   ;;  %v4650_v5 = vadd.f32 %v4554_v23, %v4303_v46  ;;  %v4653_v29 = vadd.f32 %v4557_v28, %v4306_v18  ;;  %v4762_v1 = vmul.f32 %v9501_v30, %v4649_v60  ;;  %v4652_v20 = vadd.f32 %v4556_v52, %v4305_v26 }
 0x4e6   : > { %v5056_v63 = vpack.c.bf16 %v10994_v31, %v4960_v12  ;;  %v10995_v36 = vmax.f32 %v9708_v24, 0.0  ;;  %v3961_v55 = vmul.f32 %v9455_v15, %v3787_v34  ;;  %v3962_v25 = vmul.f32 %v9458_v8, %v3787_v34 }
 0x4e7   : > { %v3963_v9 = vmul.f32 %v9464_v35, %v3787_v34  ;;  %v4870_v10 = vadd.f32 %v9532_v0, %v4757_v13  ;;  %v5052_v24 = vmax.f32 %v9798_v3, 0.0  ;;  %v4766_v60 = vmul.f32 %v9515_v39, %v4653_v29 }
 0x4e8   : > { %v5055_v33 = vpack.c.bf16 %v10995_v36, %v4959_v42  ;;  %5387 = vmatprep.mubr.bf16.mxu0 %v5056_v63  ;;  %v4763_v42 = vmul.f32 %v9515_v39, %v4650_v5  ;;  %v4561_v34 = vmul.f32 %v9480_v7, %v4412_v40  ;;  %v4869_v26 = vadd.f32 %v9528_v4, %v4756_v27 }
 0x4e9   : > { %v4065_v21 = vpop.permute.xlu1 %4064  ;;  %7269 = vset.pattern.permute.xlu1 %v10971_v22  ;;  %v4966_v52 = vmax.f32 %v4870_v10, 0.0  ;;  %v4559_v31 = vmul.f32 %v9473_v50, %v4412_v40  ;;  %v4560_v36 = vmul.f32 %v9477_v2, %v4412_v40  ;;  %v4764_v27 = vmul.f32 %v9505_v38, %v9787_v48 }
 0x4ea   : > { %v4212_v23 = vmul.f32 %v9461_v19, %v4065_v21  ;;  %v4213_v17 = vmul.f32 %v9467_v62, %v4065_v21  ;;  %v4214_v28 = vmul.f32 %v9470_v14, %v4065_v21  ;;  %4112 = vperm.xlu1 %7269, %v7540_v49   ;;  %5388 = vmatmul.mubr.bf16.vlgmr.msra.gmra.mxu0 %v5055_v33  ;;  %v10996_v49 = vmax.f32 %v9702_v44, 0.0 }
 0x4eb   : > { %v4965_v33 = vmax.f32 %v4869_v26, 0.0  ;;  %v4876_v10 = vadd.f32 %v9532_v0, %v4763_v42  ;;  %v4879_v40 = vadd.f32 %v9532_v0, %v4766_v60  ;;  %v4875_v48 = vadd.f32 %v9528_v4, %v4762_v1 }
 0x4ec   : > { %v4308_v46 = vadd.f32 %v4212_v23, %v3961_v55  ;;  %v4309_v18 = vadd.f32 %v4213_v17, %v3962_v25  ;;  %v4310_v13 = vadd.f32 %v4214_v28, %v3963_v9  ;;  %v5059_v63 = vpack.c.bf16 %v10996_v49, %v4966_v52  ;;  %v7541_v25 = vld [vmem:[%s9112_s7 + $0x98] sm:$0xff]  ;;  %v4420_v49 = vpop.permute.xlu0 %4419 }
 0x4ed   : > { %v4069_v12 = vpop.permute.xlu1 %4068  ;;  %v4767_v9 = vmul.f32 %v9505_v38, %v4654_v53  ;;  %v4765_v23 = vmul.f32 %v9501_v30, %v4652_v20  ;;  %v4972_v26 = vmax.f32 %v4876_v10, 0.0  ;;  %v4967_v60 = vmax.f32 %v9808_v11, 0.0 }
 0x4ee   : > { %v4215_v5 = vmul.f32 %v9461_v19, %v4069_v12  ;;  %v4217_v29 = vmul.f32 %v9470_v14, %v4069_v12  ;;  %v4657_v21 = vadd.f32 %v4561_v34, %v4310_v13  ;;  %v4216_v55 = vmul.f32 %v9467_v62, %v4069_v12  ;;  %4116 = vperm.xlu1 %7269, %v7541_v25  }
 0x4ef   : > { %5397 = vmatprep.mubr.bf16.mxu0 %v5059_v63  ;;  %v4655_v17 = vadd.f32 %v4559_v31, %v4308_v46  ;;  %v4656_v28 = vadd.f32 %v4560_v36, %v4309_v18  ;;  %v10997_v34 = vmax.f32 %v9705_v47, 0.0  ;;  %v4877_v47 = vadd.f32 %v9525_v56, %v4764_v27 }
 0x4f0   : > { %v4313_v44 = vadd.f32 %v4217_v29, %v3966_v59  ;;  %v4311_v13 = vadd.f32 %v4215_v5, %v9761_v41  ;;  %v4312_v53 = vadd.f32 %v4216_v55, %v9768_v58  ;;  %v4975_v59 = vmax.f32 %v4879_v40, 0.0 }
 0x4f1   : > { %v5058_v52 = vpack.c.bf16 %v10997_v34, %v4965_v33  ;;  %v4880_v46 = vadd.f32 %v9525_v56, %v4767_v9  ;;  %v4770_v1 = vmul.f32 %v9505_v38, %v4657_v21  ;;  %v4878_v5 = vadd.f32 %v9528_v4, %v4765_v23 }
 0x4f2   : > { %v4416_v12 = vpop.permute.xlu1 %4415  ;;  %7270 = vset.pattern.permute.xlu1 %v10972_v45  ;;  %v5062_v18 = vpack.c.bf16 %v4975_v59, %v4972_v26  ;;  %v4971_v29 = vmax.f32 %v4875_v48, 0.0  ;;  %v4769_v11 = vmul.f32 %v9515_v39, %v4656_v28  ;;  %v4768_v21 = vmul.f32 %v9501_v30, %v4655_v17 }
 0x4f3   : > { %v4562_v20 = vmul.f32 %v9473_v50, %v4416_v12  ;;  %v4563_v42 = vmul.f32 %v9477_v2, %v4416_v12  ;;  %5398 = vmatmul.mubr.bf16.gmra.mxu0 %v5058_v52  ;;  %v4564_v41 = vmul.f32 %v9480_v7, %v4416_v12  ;;  %4463 = vperm.xlu1 %7270, %v7541_v25   ;;  %v10998_v27 = vmax.f32 %v9730_v54, 0.0 }
 0x4f4   : > { %5407 = vmatprep.mubr.bf16.mxu0 %v5062_v18  ;;  %v4973_v9 = vmax.f32 %v4877_v47, 0.0  ;;  %v4974_v23 = vmax.f32 %v4878_v5, 0.0  ;;  %v5054_v28 = vmax.f32 %v9803_v57, 0.0  ;;  %v4565_v40 = vmul.f32 %v9473_v50, %v4420_v49 }
 0x4f5   : > { %v4658_v58 = vadd.f32 %v4562_v20, %v4311_v13  ;;  %v4659_v31 = vadd.f32 %v4563_v42, %v4312_v53  ;;  %v4660_v63 = vadd.f32 %v4564_v41, %v4313_v44  ;;  %v9864_v25 = vpack.c.bf16 %v5053_v51, %v10998_v27  ;;  %v7542_v51 = vld [vmem:[%s9112_s7 + $0xa0] sm:$0xff] }
 0x4f6   : > { %v4976_v44 = vmax.f32 %v4880_v46, 0.0  ;;  %v4566_v34 = vmul.f32 %v9477_v2, %v4420_v49  ;;  %v4883_v52 = vadd.f32 %v9525_v56, %v4770_v1  ;;  %v5061_v61 = vpack.c.bf16 %v4974_v23, %v4971_v29 }
 0x4f7   : > { %v4771_v36 = vmul.f32 %v9501_v30, %v4658_v58  ;;  %v4772_v33 = vmul.f32 %v9515_v39, %v4659_v31  ;;  %v3797_v55 = vpop.permute.xlu1 %3796  ;;  %v4773_v10 = vmul.f32 %v9505_v38, %v4660_v63  ;;  %7271 = vset.pattern.permute.xlu1 %v10947_v16  ;;  %v4882_v17 = vadd.f32 %v9532_v0, %v4769_v11 }
 0x4f8   : > { %3856 = vperm.xlu1 %7271, %v7542_v51   ;;  %v4881_v26 = vadd.f32 %v9528_v4, %v4768_v21  ;;  %v10999_v12 = vmax.f32 %v9733_v6, 0.0  ;;  %v11000_v53 = vmax.f32 %v9691_v37, 0.0  ;;  %v9888_v41 = vpack.c.bf16 %v4976_v44, %v4973_v9 }
 0x4f9   : > { %v4886_v54 = vadd.f32 %v9525_v56, %v4773_v10  ;;  %v4885_v13 = vadd.f32 %v9532_v0, %v4772_v33  ;;  %v4884_v57 = vadd.f32 %v9528_v4, %v4771_v36  ;;  %v4978_v47 = vmax.f32 %v4882_v17, 0.0  ;;  %v9904_v33 = vpop.permute.xlu0 %4427 }
 0x4fa   : > { %v9882_v48 = vpack.c.bf16 %v5052_v24, %v10999_v12  ;;  %v9886_v59 = vpack.c.bf16 %v11000_v53, %v4967_v60  ;;  %v4979_v1 = vmax.f32 %v4883_v52, 0.0  ;;  %v3967_v18 = vmul.f32 %v9455_v15, %v3797_v55 }
 0x4fb   : > { %v4982_v20 = vmax.f32 %v4886_v54, 0.0  ;;  %5408 = vmatmul.mubr.bf16.gmra.mxu0 %v5061_v61  ;;  %v4981_v46 = vmax.f32 %v4885_v13, 0.0  ;;  %v3968_v6 = vmul.f32 %v9458_v8, %v3797_v55  ;;  %v3969_v24 = vmul.f32 %v9464_v35, %v3797_v55 }
 0x4fc   : > { %v4073_v42 = vpop.permute.xlu1 %4072  ;;  %7273 = vset.pattern.permute.xlu1 %v10971_v22  ;;  %v4980_v63 = vmax.f32 %v4884_v57, 0.0  ;;  %v11001_v29 = vmax.f32 %v9719_v43, 0.0  ;;  %v4567_v36 = vmul.f32 %v9480_v7, %v4420_v49  ;;  %v4977_v27 = vmax.f32 %v4881_v26, 0.0 }
 0x4fd   : > { %v4218_v3 = vmul.f32 %v9461_v19, %v4073_v42  ;;  %v4219_v37 = vmul.f32 %v9467_v62, %v4073_v42  ;;  %v4220_v60 = vmul.f32 %v9470_v14, %v4073_v42  ;;  %v5065_v58 = vpack.c.bf16 %v4981_v46, %v4978_v47  ;;  %4120 = vperm.xlu1 %7273, %v7542_v51   ;;  %v7543_v51 = vld [vmem:[%s9112_s7 + $0xa8] sm:$0xff]  ;;  %v9918_v12 = vpop.permute.xlu0 %4435 }
 0x4fe   : > { %v9897_v5 = vpack.c.bf16 %v4982_v20, %v4979_v1  ;;  %v9901_v11 = vpack.c.bf16 %v5054_v28, %v11001_v29  ;;  %v5064_v52 = vpack.c.bf16 %v4980_v63, %v4977_v27  ;;  %v3970_v43 = vmul.f32 %v9455_v15, %v9685_v32  ;;  %v7544_v27 = vld [vmem:[%s9112_s7 + $0xb0] sm:$0xff] }
 0x4ff   : > { %v4314_v31 = vadd.f32 %v4218_v3, %v3967_v18  ;;  %v4315_v55 = vadd.f32 %v4219_v37, %v3968_v6  ;;  %v4316_v21 = vadd.f32 %v4220_v60, %v3969_v24  ;;  %5417 = vmatprep.mubr.bf16.mxu0 %v5065_v58  ;;  %v3972_v49 = vmul.f32 %v9464_v35, %v9685_v32 }
 0x500   : > { %v4077_v9 = vpop.permute.xlu1 %4076 }
 0x501   : > { %v4661_v44 = vadd.f32 %v4565_v40, %v4314_v31  ;;  %v4662_v10 = vadd.f32 %v4566_v34, %v4315_v55  ;;  %v4663_v23 = vadd.f32 %v4567_v36, %v4316_v21  ;;  %v4221_v54 = vmul.f32 %v9461_v19, %v4077_v9  ;;  %4124 = vperm.xlu1 %7273, %v7543_v51   ;;  %v9931_v63 = vpop.permute.xlu0 %4443 }
 0x502   : > { %v4222_v28 = vmul.f32 %v9467_v62, %v4077_v9  ;;  %v4223_v61 = vmul.f32 %v9470_v14, %v4077_v9  ;;  %v3971_v40 = vmul.f32 %v9458_v8, %v9685_v32 }
 0x503   : > { %5418 = vmatmul.mubr.bf16.gmra.mxu0 %v5064_v52  ;;  %v4774_v34 = vmul.f32 %v9501_v30, %v4661_v44  ;;  %v4776_v17 = vmul.f32 %v9505_v38, %v4663_v23  ;;  %v4317_v13 = vadd.f32 %v4221_v54, %v3970_v43  ;;  %v4775_v47 = vmul.f32 %v9515_v39, %v4662_v10 }
 0x504   : > { %v4319_v26 = vadd.f32 %v4223_v61, %v3972_v49  ;;  %v4318_v53 = vadd.f32 %v4222_v28, %v3971_v40 }
 0x505   : > { %v4424_v57 = vpop.permute.xlu1 %4423  ;;  %7274 = vset.pattern.permute.xlu1 %v10972_v45  ;;  %v4889_v18 = vadd.f32 %v9525_v56, %v4776_v17  ;;  %v4888_v60 = vadd.f32 %v9532_v0, %v4775_v47  ;;  %v4887_v58 = vadd.f32 %v9528_v4, %v4774_v34  ;;  %v4571_v17 = vmul.f32 %v9473_v50, %v9904_v33 }
 0x506   : > { %v4568_v20 = vmul.f32 %v9473_v50, %v4424_v57  ;;  %v4569_v42 = vmul.f32 %v9477_v2, %v4424_v57  ;;  %v4570_v32 = vmul.f32 %v9480_v7, %v4424_v57  ;;  %4471 = vperm.xlu1 %7274, %v7543_v51   ;;  %v4573_v57 = vmul.f32 %v9480_v7, %v9904_v33 }
 0x507   : > { %v4985_v55 = vmax.f32 %v4889_v18, 0.0  ;;  %v4984_v9 = vmax.f32 %v4888_v60, 0.0  ;;  %v4983_v10 = vmax.f32 %v4887_v58, 0.0 }
 0x508   : > { %v4664_v46 = vadd.f32 %v4568_v20, %v4317_v13  ;;  %v4665_v1 = vadd.f32 %v4569_v42, %v4318_v53  ;;  %v4666_v6 = vadd.f32 %v4570_v32, %v4319_v26  ;;  %v3812_v53 = vpop.permute.xlu0 %3811 }
 0x509   : > { %v3976_v60 = vmul.f32 %v9455_v15, %v3812_v53 }
 0x50a   : > { %v4777_v3 = vmul.f32 %v9501_v30, %v4664_v46  ;;  %v4778_v24 = vmul.f32 %v9515_v39, %v4665_v1  ;;  %v3807_v37 = vpop.permute.xlu1 %3806  ;;  %v4779_v31 = vmul.f32 %v9505_v38, %v4666_v6  ;;  %7275 = vset.pattern.permute.xlu1 %v10947_v16  ;;  %v4572_v46 = vmul.f32 %v9477_v2, %v9904_v33 }
 0x50b   : > { %3866 = vperm.xlu1 %7275, %v7544_v27   ;;  %v3973_v54 = vmul.f32 %v9455_v15, %v3807_v37  ;;  %v3974_v43 = vmul.f32 %v9458_v8, %v3807_v37  ;;  %v3975_v49 = vmul.f32 %v9464_v35, %v3807_v37 }
 0x50c   : > { %v4890_v29 = vadd.f32 %v9528_v4, %v4777_v3  ;;  %v4891_v36 = vadd.f32 %v9532_v0, %v4778_v24  ;;  %v4892_v21 = vadd.f32 %v9525_v56, %v4779_v31  ;;  %v3978_v3 = vmul.f32 %v9464_v35, %v3812_v53  ;;  %v7545_v31 = vld [vmem:[%s9112_s7 + $0xb8] sm:$0xff] }
 0x50e   : > { %v4987_v44 = vmax.f32 %v4891_v36, 0.0  ;;  %v4986_v23 = vmax.f32 %v4890_v29, 0.0  ;;  %v4988_v52 = vmax.f32 %v4892_v21, 0.0  ;;  %v3977_v29 = vmul.f32 %v9458_v8, %v3812_v53 }
 0x50f   : > { %v4081_v28 = vpop.permute.xlu1 %4080  ;;  %7276 = vset.pattern.permute.xlu1 %v10971_v22 }
 0x510   : > { %v4224_v61 = vmul.f32 %v9461_v19, %v4081_v28  ;;  %v4225_v51 = vmul.f32 %v9467_v62, %v4081_v28  ;;  %v4226_v40 = vmul.f32 %v9470_v14, %v4081_v28  ;;  %v5068_v34 = vpack.c.bf16 %v4987_v44, %v4984_v9  ;;  %4128 = vperm.xlu1 %7276, %v7544_v27  }
 0x511   : > { %v5067_v13 = vpack.c.bf16 %v4986_v23, %v4983_v10  ;;  %v9947_v26 = vpack.c.bf16 %v4988_v52, %v4985_v55 }
 0x512   : > { %v4320_v20 = vadd.f32 %v4224_v61, %v3973_v54  ;;  %v4321_v42 = vadd.f32 %v4225_v51, %v3974_v43  ;;  %v4322_v47 = vadd.f32 %v4226_v40, %v3975_v49  ;;  %5427 = vmatprep.mubr.bf16.mxu0 %v5068_v34  ;;  %v11002_v34 = vld [vmem:[#allocation3_spill] sm:$0xff] }
 0x513   : > { %v4085_v32 = vpop.permute.xlu1 %4084  ;;  %5428 = vmatmul.mubr.bf16.gmra.mxu0 %v5067_v13 }
 0x514   : > { %v4667_v1 = vadd.f32 %v4571_v17, %v4320_v20  ;;  %v4669_v18 = vadd.f32 %v4573_v57, %v4322_v47  ;;  %v4227_v6 = vmul.f32 %v9461_v19, %v4085_v32  ;;  %v4228_v24 = vmul.f32 %v9467_v62, %v4085_v32  ;;  %4132 = vperm.xlu1 %7276, %v7545_v31  }
 0x515   : > { %v4229_v37 = vmul.f32 %v9470_v14, %v4085_v32  ;;  %v4668_v58 = vadd.f32 %v4572_v46, %v4321_v42  ;;  %v4030_v17 = vmul.f32 %v9455_v15, %v11002_v34  ;;  %v4031_v46 = vmul.f32 %v9458_v8, %v11002_v34 }
 0x516   : > { %v4780_v33 = vmul.f32 %v9501_v30, %v4667_v1  ;;  %v4323_v55 = vadd.f32 %v4227_v6, %v3976_v60  ;;  %v4324_v27 = vadd.f32 %v4228_v24, %v3977_v29  ;;  %v4782_v23 = vmul.f32 %v9505_v38, %v4669_v18  ;;  %v7546_v6 = vld [vmem:[%s9112_s7 + $0xc0] sm:$0xff]  ;;  %v11003_v24 = vld [vmem:[#allocation5_spill] sm:$0xff]  ;;  %v11004_v29 = vld [vmem:[#allocation16_spill] sm:$0xff] }
 0x517   : > { %v4325_v36 = vadd.f32 %v4229_v37, %v3978_v3  ;;  %v4781_v52 = vmul.f32 %v9515_v39, %v4668_v58  ;;  %v4032_v1 = vmul.f32 %v9464_v35, %v11002_v34  ;;  %v4834_v37 = vmul.f32 %v9501_v30, %v11003_v24 }
 0x518   : > { %v4432_v21 = vpop.permute.xlu1 %4431  ;;  %7278 = vset.pattern.permute.xlu1 %v10972_v45  ;;  %v4893_v40 = vadd.f32 %v9528_v4, %v4780_v33  ;;  %v4895_v13 = vadd.f32 %v9525_v56, %v4782_v23 }
 0x519   : > { %v4574_v9 = vmul.f32 %v9473_v50, %v4432_v21  ;;  %v4575_v44 = vmul.f32 %v9477_v2, %v4432_v21  ;;  %v4576_v10 = vmul.f32 %v9480_v7, %v4432_v21  ;;  %4479 = vperm.xlu1 %7278, %v7545_v31   ;;  %v4894_v53 = vadd.f32 %v9532_v0, %v4781_v52 }
 0x51a   : > { %v4989_v58 = vmax.f32 %v4893_v40, 0.0 }
 0x51b   : > { %v4670_v54 = vadd.f32 %v4574_v9, %v4323_v55  ;;  %v4671_v43 = vadd.f32 %v4575_v44, %v4324_v27  ;;  %v4672_v49 = vadd.f32 %v4576_v10, %v4325_v36  ;;  %v4836_v36 = vmul.f32 %v9505_v38, %v11004_v29  ;;  %v11009_v29 = vld [vmem:[#allocation12_spill] sm:$0xff] }
 0x51c   : > { %v4990_v55 = vmax.f32 %v4894_v53, 0.0  ;;  %v4991_v27 = vmax.f32 %v4895_v13, 0.0  ;;  %v11006_v13 = vld [vmem:[#allocation13_spill] sm:$0xff] }
 0x51d   : > { %v4783_v28 = vmul.f32 %v9501_v30, %v4670_v54  ;;  %v4784_v61 = vmul.f32 %v9515_v39, %v4671_v43  ;;  %v4785_v51 = vmul.f32 %v9505_v38, %v4672_v49  ;;  %v4157_v57 = vpop.permute.xlu1 %4156  ;;  %7279 = vset.pattern.permute.xlu1 %v10947_v16 }
 0x51e   : > { %v4281_v47 = vmul.f32 %v9461_v19, %v4157_v57  ;;  %v4282_v32 = vmul.f32 %v9467_v62, %v4157_v57  ;;  %v4283_v18 = vmul.f32 %v9470_v14, %v4157_v57  ;;  %3876 = vperm.xlu1 %7279, %v7546_v6   ;;  %v4949_v57 = vadd.f32 %v9525_v56, %v4836_v36 }
 0x51f   : > { %v4896_v20 = vadd.f32 %v9528_v4, %v4783_v28  ;;  %v4898_v42 = vadd.f32 %v9525_v56, %v4785_v51  ;;  %v4897_v3 = vadd.f32 %v9532_v0, %v4784_v61  ;;  %v11005_v28 = vld [vmem:[#allocation2_spill] sm:$0xff]  ;;  %v4199_v36 = vmul.f32 %v9470_v14, %v11009_v29 }
 0x520   : > { %v4379_v33 = vadd.f32 %v4283_v18, %v4032_v1  ;;  %v4377_v9 = vadd.f32 %v4281_v47, %v4030_v17  ;;  %v4378_v44 = vadd.f32 %v4282_v32, %v4031_v46  ;;  %v4835_v61 = vmul.f32 %v9515_v39, %v11005_v28  ;;  %v11007_v46 = vld [vmem:[#allocation10_spill] sm:$0xff]  ;;  %v7547_v18 = vld [vmem:[%s9112_s7 + $0xc8] sm:$0xff] }
 0x521   : > { %v4994_v60 = vmax.f32 %v4898_v42, 0.0  ;;  %v4992_v31 = vmax.f32 %v4896_v20, 0.0  ;;  %v4993_v21 = vmax.f32 %v4897_v3, 0.0  ;;  %v4947_v32 = vadd.f32 %v9528_v4, %v4834_v37  ;;  %v11010_v37 = vld [vmem:[#allocation9_spill] sm:$0xff] }
 0x522   : > { %v4504_v10 = vpop.permute.xlu1 %4503  ;;  %7280 = vset.pattern.permute.xlu1 %v10971_v22  ;;  %v4196_v22 = vmul.f32 %v9470_v14, %v11006_v13  ;;  %v3945_v1 = vmul.f32 %v9464_v35, %v11007_v46 }
 0x523   : > { %v5070_v23 = vpack.c.bf16 %v4992_v31, %v4989_v58  ;;  %v4628_v52 = vmul.f32 %v9473_v50, %v4504_v10  ;;  %v4629_v54 = vmul.f32 %v9477_v2, %v4504_v10  ;;  %v4630_v43 = vmul.f32 %v9480_v7, %v4504_v10  ;;  %4136 = vperm.xlu1 %7280, %v7546_v6   ;;  %v11008_v58 = vld [vmem:[#allocation15_spill] sm:$0xff] }
 0x524   : > { %v5071_v49 = vpack.c.bf16 %v4993_v21, %v4990_v55  ;;  %v9997_v51 = vpack.c.bf16 %v4994_v60, %v4991_v27  ;;  %v4948_v6 = vadd.f32 %v9532_v0, %v4835_v61  ;;  %v3948_v31 = vmul.f32 %v9464_v35, %v11008_v58  ;;  %v11011_v27 = vld [vmem:[#allocation17_spill] sm:$0xff] }
 0x525   : > { %v4724_v40 = vadd.f32 %v4628_v52, %v4377_v9  ;;  %v4725_v34 = vadd.f32 %v4629_v54, %v4378_v44  ;;  %v4726_v17 = vadd.f32 %v4630_v43, %v4379_v33  ;;  %v4546_v33 = vmul.f32 %v9480_v7, %v11010_v37 }
 0x526   : > { %5437 = vmatprep.mubr.bf16.mxu0 %v5071_v49  ;;  %v4292_v55 = vadd.f32 %v4196_v22, %v3945_v1  ;;  %v5045_v21 = vmax.f32 %v4949_v57, 0.0  ;;  %v4543_v9 = vmul.f32 %v9480_v7, %v11011_v27  ;;  %v5043_v10 = vmax.f32 %v4947_v32, 0.0 }
 0x527   : > { %5438 = vmatmul.mubr.bf16.gmra.mxu0 %v5070_v23  ;;  %v4837_v53 = vmul.f32 %v9501_v30, %v4724_v40  ;;  %v4838_v20 = vmul.f32 %v9515_v39, %v4725_v34  ;;  %v4839_v42 = vmul.f32 %v9505_v38, %v4726_v17  ;;  %v10005_v47 = vpop.permute.xlu1 %3816  ;;  %4140 = vperm.xlu1 %7280, %v7547_v18   ;;  %v5044_v54 = vmax.f32 %v4948_v6, 0.0 }
 0x528   : > { %v3979_v23 = vmul.f32 %v9455_v15, %v10005_v47  ;;  %v3980_v28 = vmul.f32 %v9458_v8, %v10005_v47  ;;  %v4639_v22 = vadd.f32 %v4543_v9, %v4292_v55  ;;  %v4577_v1 = vmul.f32 %v9473_v50, %v9918_v12 }
 0x529   : > { %v4950_v3 = vadd.f32 %v9528_v4, %v4837_v53  ;;  %v4952_v24 = vadd.f32 %v9525_v56, %v4839_v42  ;;  %v4951_v60 = vadd.f32 %v9532_v0, %v4838_v20  ;;  %v4578_v20 = vmul.f32 %v9477_v2, %v9918_v12  ;;  %v10038_v42 = vpop.permute.xlu0 %3821 }
 0x52b   : > { %v5048_v44 = vmax.f32 %v4952_v24, 0.0  ;;  %7282 = vset.pattern.permute.xlu1 %v10972_v45  ;;  %v5047_v43 = vmax.f32 %v4951_v60, 0.0  ;;  %v5046_v49 = vmax.f32 %v4950_v3, 0.0  ;;  %v4295_v45 = vadd.f32 %v4199_v36, %v3948_v31 }
 0x52c   : > { %v10026_v52 = vpop.permute.xlu1 %4088  ;;  %4487 = vperm.xlu1 %7282, %v7547_v18   ;;  %v4752_v24 = vmul.f32 %v9505_v38, %v4639_v22  ;;  %v3982_v60 = vmul.f32 %v9455_v15, %v10038_v42  ;;  %v3983_v31 = vmul.f32 %v9458_v8, %v10038_v42 }
 0x52d   : > { %v4230_v61 = vmul.f32 %v9461_v19, %v10026_v52  ;;  %v4231_v40 = vmul.f32 %v9467_v62, %v10026_v52  ;;  %v10034_v34 = vpack.c.bf16 %v5048_v44, %v5045_v21  ;;  %v5098_v17 = vpack.c.bf16 %v5047_v43, %v5044_v54 }
 0x52e   : > { %v5097_v13 = vpack.c.bf16 %v5046_v49, %v5043_v10  ;;  %v4642_v46 = vadd.f32 %v4546_v33, %v4295_v45  ;;  %v4865_v27 = vadd.f32 %v9525_v56, %v4752_v24 }
 0x52f   : > { %v4326_v57 = vadd.f32 %v4230_v61, %v3979_v23  ;;  %v4327_v53 = vadd.f32 %v4231_v40, %v3980_v28  ;;  %5527 = vmatprep.mubr.bf16.mxu1 %v5098_v17  ;;  %v10072_v40 = vpop.permute.xlu0 %3831 }
 0x530   : > { %v10040_v32 = vpop.permute.xlu1 %4092  ;;  %5528 = vmatmul.mubr.bf16.gmra.mxu1 %v5097_v13  ;;  %v4755_v29 = vmul.f32 %v9505_v38, %v4642_v46  ;;  %v4961_v61 = vmax.f32 %v4865_v27, 0.0 }
 0x531   : > { %v4233_v18 = vmul.f32 %v9461_v19, %v10040_v32  ;;  %v4674_v6 = vadd.f32 %v4578_v20, %v4327_v53  ;;  %v4234_v3 = vmul.f32 %v9467_v62, %v10040_v32  ;;  %5537 = vmatprep.mubr.bf16.mxu1 %v9864_v25  ;;  %v4673_v58 = vadd.f32 %v4577_v1, %v4326_v57 }
 0x532   : > { %v4868_v23 = vadd.f32 %v9525_v56, %v4755_v29  ;;  %v7396_v29 = vld [vmem:[%s10887_s18 + $0x38] sm:$0xff]  }
 0x533   : > { %v4329_v36 = vadd.f32 %v4233_v18, %v3982_v60  ;;  %v4330_v33 = vadd.f32 %v4234_v3, %v3983_v31  ;;  %v4787_v21 = vmul.f32 %v9515_v39, %v4674_v6  ;;  %v4786_v9 = vmul.f32 %v9501_v30, %v4673_v58  ;;  %v10087_v58 = vpop.permute.xlu0 %3841  ;;  %6109 = vmatpush1.bf16.msra.mxu0 %v7396_v29 }
 0x534   : > { %6110 = vmatprep.subr.bf16.mxu0 %v10947_v16 }
 0x535   : > { %v10055_v37 = vpop.permute.xlu1 %4439  ;;  %v4900_v28 = vadd.f32 %v9532_v0, %v4787_v21  ;;  %v4899_v17 = vadd.f32 %v9528_v4, %v4786_v9  ;;  %v4583_v21 = vmul.f32 %v9473_v50, %v9931_v63 }
 0x536   : > { %v4580_v55 = vmul.f32 %v9473_v50, %v10055_v37  ;;  %v4581_v25 = vmul.f32 %v9477_v2, %v10055_v37 }
 0x537   : > { %v4996_v22 = vmax.f32 %v4900_v28, 0.0  ;;  %v4995_v18 = vmax.f32 %v4899_v17, 0.0 }
 0x538   : > { %v4676_v44 = vadd.f32 %v4580_v55, %v4329_v36  ;;  %v4677_v10 = vadd.f32 %v4581_v25, %v4330_v33  ;;  %5538 = vmatmul.mubr.bf16.gmra.mxu1 %v9882_v48  ;;  %v4964_v48 = vmax.f32 %v4868_v23, 0.0  ;;  %v4584_v55 = vmul.f32 %v9477_v2, %v9931_v63 }
 0x539   : > { %5580 = vmatprep.mubr.bf16.mxu1 %v10947_v16 }
 0x53a   : > { %v4789_v54 = vmul.f32 %v9501_v30, %v4676_v44  ;;  %v4790_v43 = vmul.f32 %v9515_v39, %v4677_v10  ;;  %v10068_v49 = vpop.permute.xlu1 %3826  ;;  %v5057_v20 = vpack.c.bf16 %v4964_v48, %v4961_v61  ;;  %v3988_v10 = vmul.f32 %v9455_v15, %v10072_v40 }
 0x53b   : > { %v3985_v46 = vmul.f32 %v9455_v15, %v10068_v49  ;;  %v3986_v6 = vmul.f32 %v9458_v8, %v10068_v49 }
 0x53c   : > { %v4902_v13 = vadd.f32 %v9528_v4, %v4789_v54  ;;  %v4903_v45 = vadd.f32 %v9532_v0, %v4790_v43  ;;  %v3989_v54 = vmul.f32 %v9458_v8, %v10072_v40  ;;  %v10109_v43 = vpop.permute.xlu0 %3851 }
 0x53e   : > { %v4999_v57 = vmax.f32 %v4903_v45, 0.0  ;;  %v4998_v53 = vmax.f32 %v4902_v13, 0.0 }
 0x53f   : > { %v10079_v1 = vpop.permute.xlu1 %4096 }
 0x540   : > { %v4236_v3 = vmul.f32 %v9461_v19, %v10079_v1  ;;  %v4237_v24 = vmul.f32 %v9467_v62, %v10079_v1  ;;  %v5074_v60 = vpack.c.bf16 %v4999_v57, %v4996_v22  ;;  %6940 = vmatmul.mubr.msk.bf16.vlgmr.msra.gmra.mxu1 %vm2337_vm2, %v5057_v20  ;;  %v5073_v31 = vpack.c.bf16 %v4998_v53, %v4995_v18  ;;  %v7397_v22 = vld [vmem:[%s10887_s18 + $0x30] sm:$0xff]  }
 0x541   : > { %5590 = vmatprep.mubr.bf16.mxu1 %v10947_v16  ;;  %6111 = vmatpush1.bf16.msra.mxu0 %v7397_v22 }
 0x542   : > { %v4332_v36 = vadd.f32 %v4236_v3, %v3985_v46  ;;  %v4333_v33 = vadd.f32 %v4237_v24, %v3986_v6  ;;  %5447 = vmatprep.mubr.bf16.mxu0 %v5074_v60  ;;  %6112 = vmatprep.subr.bf16.mxu0 %v10947_v16 }
 0x543   : > { %5448 = vmatmul.mubr.bf16.gmra.mxu0 %v5073_v31  ;;  %v10096_v25 = vpop.permute.xlu1 %4100 }
 0x544   : > { %v4239_v27 = vmul.f32 %v9461_v19, %v10096_v25  ;;  %v4680_v9 = vadd.f32 %v4584_v55, %v4333_v33  ;;  %v4240_v44 = vmul.f32 %v9467_v62, %v10096_v25  ;;  %v4679_v23 = vadd.f32 %v4583_v21, %v4332_v36 }
 0x546   : > { %v4335_v28 = vadd.f32 %v4239_v27, %v3988_v10  ;;  %v4336_v17 = vadd.f32 %v4240_v44, %v3989_v54  ;;  %v4793_v48 = vmul.f32 %v9515_v39, %v4680_v9  ;;  %v4792_v57 = vmul.f32 %v9501_v30, %v4679_v23 }
 0x548   : > { %v10111_v61 = vpop.permute.xlu1 %4447  ;;  %6941 = vmatmul.mubr.msk.bf16.gmra.mxu1 %vm2337_vm2, %v9886_v59  ;;  %v10126_v59 = vpop.permute.xlu0 %3861  ;;  %v4906_v3 = vadd.f32 %v9532_v0, %v4793_v48  ;;  %v4905_v24 = vadd.f32 %v9528_v4, %v4792_v57 }
 0x549   : > { %v4586_v13 = vmul.f32 %v9473_v50, %v10111_v61  ;;  %v4587_v45 = vmul.f32 %v9477_v2, %v10111_v61  ;;  %5600 = vmatprep.mubr.bf16.mxu1 %v10947_v16 }
 0x54a   : > { %v5002_v29 = vmax.f32 %v4906_v3, 0.0  ;;  %v5001_v27 = vmax.f32 %v4905_v24, 0.0  ;;  %v3994_v3 = vmul.f32 %v9455_v15, %v10087_v58 }
 0x54b   : > { %v4682_v53 = vadd.f32 %v4586_v13, %v4335_v28  ;;  %v4683_v20 = vadd.f32 %v4587_v45, %v4336_v17  ;;  %v4235_v28 = vmul.f32 %v9470_v14, %v10040_v32  ;;  %v3984_v45 = vmul.f32 %v9464_v35, %v10038_v42  ;;  %v7398_v42 = vld [vmem:[%s10887_s18 + $0x28] sm:$0xff]  }
 0x54c   : > { %v10143_v9 = vpop.permute.xlu0 %4451  ;;  %v4582_v32 = vmul.f32 %v9480_v7, %v10055_v37  ;;  %v3995_v37 = vmul.f32 %v9458_v8, %v10087_v58  ;;  %6113 = vmatpush1.bf16.msra.mxu0 %v7398_v42 }
 0x54d   : > { %v4795_v46 = vmul.f32 %v9501_v30, %v4682_v53  ;;  %v4796_v18 = vmul.f32 %v9515_v39, %v4683_v20  ;;  %v10130_v6 = vpop.permute.xlu1 %3836  ;;  %v4590_v48 = vmul.f32 %v9477_v2, %v10143_v9  ;;  %v4589_v57 = vmul.f32 %v9473_v50, %v10143_v9  ;;  %6114 = vmatprep.subr.bf16.mxu0 %v10947_v16 }
 0x54e   : > { %v3991_v55 = vmul.f32 %v9455_v15, %v10130_v6  ;;  %v3992_v44 = vmul.f32 %v9458_v8, %v10130_v6  ;;  %v4232_v53 = vmul.f32 %v9470_v14, %v10026_v52  ;;  %v3981_v52 = vmul.f32 %v9464_v35, %v10005_v47 }
 0x54f   : > { %v4908_v60 = vadd.f32 %v9528_v4, %v4795_v46  ;;  %v4909_v31 = vadd.f32 %v9532_v0, %v4796_v18  ;;  %v4331_v24 = vadd.f32 %v4235_v28, %v3984_v45  ;;  %v4238_v45 = vmul.f32 %v9470_v14, %v10079_v1 }
 0x550   : > { %6942 = vmatmul.mubr.msk.bf16.gmra.mxu1 %vm2337_vm2, %v9888_v41  ;;  %v3987_v1 = vmul.f32 %v9464_v35, %v10068_v49 }
 0x551   : > { %v5005_v36 = vmax.f32 %v4909_v31, 0.0  ;;  %v5004_v33 = vmax.f32 %v4908_v60, 0.0  ;;  %5610 = vmatprep.mubr.bf16.mxu1 %v10947_v16  ;;  %v7399_v31 = vld [vmem:[%s10887_s18 + $0x20] sm:$0xff]  }
 0x552   : > { %v10140_v21 = vpop.permute.xlu1 %4104  ;;  %6115 = vmatpush1.bf16.msra.mxu0 %v7399_v31 }
 0x553   : > { %v4242_v10 = vmul.f32 %v9461_v19, %v10140_v21  ;;  %v4243_v41 = vmul.f32 %v9467_v62, %v10140_v21  ;;  %v5077_v23 = vpack.c.bf16 %v5005_v36, %v5002_v29  ;;  %v5076_v54 = vpack.c.bf16 %v5004_v33, %v5001_v27  ;;  %6116 = vmatprep.subr.bf16.mxu0 %v10947_v16 }
 0x554   : > { %v4328_v29 = vadd.f32 %v4232_v53, %v3981_v52  ;;  %v4678_v36 = vadd.f32 %v4582_v32, %v4331_v24  ;;  %v3990_v32 = vmul.f32 %v9464_v35, %v10072_v40 }
 0x555   : > { %v4338_v17 = vadd.f32 %v4242_v10, %v3991_v55  ;;  %v4339_v13 = vadd.f32 %v4243_v41, %v3992_v44  ;;  %5457 = vmatprep.mubr.bf16.mxu0 %v5077_v23  ;;  %v4579_v10 = vmul.f32 %v9480_v7, %v9918_v12 }
 0x556   : > { %5458 = vmatmul.mubr.bf16.gmra.mxu0 %v5076_v54  ;;  %v10157_v22 = vpop.permute.xlu1 %4108 }
 0x557   : > { %v4245_v20 = vmul.f32 %v9461_v19, %v10157_v22  ;;  %v4686_v46 = vadd.f32 %v4590_v48, %v4339_v13  ;;  %v4246_v18 = vmul.f32 %v9467_v62, %v10157_v22  ;;  %v4685_v60 = vadd.f32 %v4589_v57, %v4338_v17 }
 0x558   : > { %6943 = vmatmul.mubr.msk.bf16.gmra.mxu1 %vm2337_vm2, %v9897_v5  ;;  %v4675_v28 = vadd.f32 %v4579_v10, %v4328_v29  ;;  %v4791_v17 = vmul.f32 %v9505_v38, %v4678_v36  ;;  %v4241_v13 = vmul.f32 %v9470_v14, %v10096_v25  ;;  %v10224_v36 = vpop.permute.xlu0 %4459 }
 0x559   : > { %5620 = vmatprep.mubr.bf16.mxu1 %v10947_v16  ;;  %v4341_v33 = vadd.f32 %v4245_v20, %v3994_v3  ;;  %v4342_v47 = vadd.f32 %v4246_v18, %v3995_v37  ;;  %v4799_v44 = vmul.f32 %v9515_v39, %v4686_v46  ;;  %v4798_v41 = vmul.f32 %v9501_v30, %v4685_v60 }
 0x55a   : > { %v4588_v20 = vmul.f32 %v9480_v7, %v10111_v61  ;;  %v4788_v18 = vmul.f32 %v9505_v38, %v4675_v28  ;;  %v4904_v40 = vadd.f32 %v9525_v56, %v4791_v17  ;;  %v4337_v3 = vadd.f32 %v4241_v13, %v3990_v32 }
 0x55b   : > { %v10184_v55 = vpop.permute.xlu1 %4455  ;;  %v4912_v53 = vadd.f32 %v9532_v0, %v4799_v44  ;;  %v4911_v25 = vadd.f32 %v9528_v4, %v4798_v41  ;;  %v4334_v61 = vadd.f32 %v4238_v45, %v3987_v1  ;;  %v4244_v37 = vmul.f32 %v9470_v14, %v10140_v21 }
 0x55c   : > { %v4592_v5 = vmul.f32 %v9473_v50, %v10184_v55  ;;  %v4593_v27 = vmul.f32 %v9477_v2, %v10184_v55  ;;  %v4684_v60 = vadd.f32 %v4588_v20, %v4337_v3  ;;  %v4585_v44 = vmul.f32 %v9480_v7, %v9931_v63 }
 0x55d   : > { %v5008_v52 = vmax.f32 %v4912_v53, 0.0  ;;  %v5007_v29 = vmax.f32 %v4911_v25, 0.0  ;;  %v3996_v21 = vmul.f32 %v9464_v35, %v10087_v58  ;;  %v4901_v10 = vadd.f32 %v9525_v56, %v4788_v18 }
 0x55e   : > { %v4688_v23 = vadd.f32 %v4592_v5, %v4341_v33  ;;  %v4689_v54 = vadd.f32 %v4593_v27, %v4342_v47  ;;  %v4595_v13 = vmul.f32 %v9473_v50, %v10224_v36  ;;  %v4596_v63 = vmul.f32 %v9477_v2, %v10224_v36 }
 0x55f   : > { %v4681_v45 = vadd.f32 %v4585_v44, %v4334_v61  ;;  %v4591_v53 = vmul.f32 %v9480_v7, %v10143_v9  ;;  %v4997_v25 = vmax.f32 %v4901_v10, 0.0  ;;  %v4001_v18 = vmul.f32 %v9458_v8, %v10109_v43 }
 0x560   : > { %v4801_v48 = vmul.f32 %v9501_v30, %v4688_v23  ;;  %v4802_v12 = vmul.f32 %v9515_v39, %v4689_v54  ;;  %v10203_v57 = vpop.permute.xlu1 %3846  ;;  %6944 = vmatmul.mubr.msk.bf16.gmra.mxu1 %vm2337_vm2, %v9947_v26  ;;  %v3993_v23 = vmul.f32 %v9464_v35, %v10130_v6  ;;  %v4247_v54 = vmul.f32 %v9470_v14, %v10157_v22 }
 0x561   : > { %5630 = vmatprep.mubr.bf16.mxu1 %v10947_v16  ;;  %v3997_v49 = vmul.f32 %v9455_v15, %v10203_v57  ;;  %v3998_v33 = vmul.f32 %v9458_v8, %v10203_v57  ;;  %v4797_v6 = vmul.f32 %v9505_v38, %v4684_v60  ;;  %v4594_v22 = vmul.f32 %v9480_v7, %v10184_v55 }
 0x562   : > { %v4914_v42 = vadd.f32 %v9528_v4, %v4801_v48  ;;  %v4915_v46 = vadd.f32 %v9532_v0, %v4802_v12  ;;  %v5000_v48 = vmax.f32 %v4904_v40, 0.0  ;;  %v4340_v12 = vadd.f32 %v4244_v37, %v3993_v23 }
 0x563   : > { %v4343_v1 = vadd.f32 %v4247_v54, %v3996_v21  ;;  %v4000_v55 = vmul.f32 %v9455_v15, %v10109_v43  ;;  %v4794_v9 = vmul.f32 %v9505_v38, %v4681_v45  ;;  %v4910_v40 = vadd.f32 %v9525_v56, %v4797_v6  ;;  %v4468_v54 = vpop.permute.xlu0 %4467 }
 0x564   : > { %v5011_v24 = vmax.f32 %v4915_v46, 0.0  ;;  %v5010_v26 = vmax.f32 %v4914_v42, 0.0  ;;  %v7400_v46 = vld [vmem:[%s10887_s18 + $0x18] sm:$0xff]   ;;  %v4687_v3 = vadd.f32 %v4591_v53, %v4340_v12  ;;  %v3999_v44 = vmul.f32 %v9464_v35, %v10203_v57 }
 0x565   : > { %v4113_v31 = vpop.permute.xlu1 %4112  ;;  %v4690_v61 = vadd.f32 %v4594_v22, %v4343_v1  ;;  %6117 = vmatpush1.bf16.msra.mxu0 %v7400_v46  ;;  %v5006_v10 = vmax.f32 %v4910_v40, 0.0  ;;  %v4597_v6 = vmul.f32 %v9480_v7, %v10224_v36  ;;  %v4602_v53 = vmul.f32 %v9477_v2, %v4468_v54 }
 0x566   : > { %v4248_v47 = vmul.f32 %v9461_v19, %v4113_v31  ;;  %v4249_v5 = vmul.f32 %v9467_v62, %v4113_v31  ;;  %v5080_v27 = vpack.c.bf16 %v5011_v24, %v5008_v52  ;;  %v5079_v41 = vpack.c.bf16 %v5010_v26, %v5007_v29  ;;  %6118 = vmatprep.subr.bf16.mxu0 %v10947_v16 }
 0x567   : > { %v5075_v52 = vpack.c.bf16 %v5000_v48, %v4997_v25  ;;  %v4250_v24 = vmul.f32 %v9470_v14, %v4113_v31  ;;  %v4907_v31 = vadd.f32 %v9525_v56, %v4794_v9 }
 0x568   : > { %v4344_v28 = vadd.f32 %v4248_v47, %v3997_v49  ;;  %v4345_v17 = vadd.f32 %v4249_v5, %v3998_v33  ;;  %5467 = vmatprep.mubr.bf16.mxu0 %v5080_v27  ;;  %6945 = vmatmul.mubr.msk.bf16.gmra.mxu1 %vm2337_vm2, %v9997_v51  ;;  %v4002_v27 = vmul.f32 %v9464_v35, %v10109_v43 }
 0x569   : > { %5468 = vmatmul.mubr.bf16.gmra.mxu0 %v5079_v41  ;;  %v4117_v58 = vpop.permute.xlu1 %4116  ;;  %5640 = vmatprep.mubr.bf16.mxu1 %v10947_v16  ;;  %v4346_v43 = vadd.f32 %v4250_v24, %v3999_v44  ;;  %v5003_v12 = vmax.f32 %v4907_v31, 0.0  ;;  %v7401_v24 = vld [vmem:[%s10887_s18 + $0x10] sm:$0xff]  }
 0x56a   : > { %v4691_v32 = vadd.f32 %v4595_v13, %v4344_v28  ;;  %v4251_v20 = vmul.f32 %v9461_v19, %v4117_v58  ;;  %v4692_v51 = vadd.f32 %v4596_v63, %v4345_v17  ;;  %v4252_v42 = vmul.f32 %v9467_v62, %v4117_v58  ;;  %6119 = vmatpush1.bf16.msra.mxu0 %v7401_v24 }
 0x56b   : > { %v4253_v60 = vmul.f32 %v9470_v14, %v4117_v58  ;;  %v4800_v28 = vmul.f32 %v9505_v38, %v4687_v3  ;;  %v4803_v17 = vmul.f32 %v9505_v38, %v4690_v61  ;;  %6120 = vmatprep.subr.bf16.mxu0 %v10947_v16 }
 0x56c   : > { %v4804_v26 = vmul.f32 %v9501_v30, %v4691_v32  ;;  %v4347_v37 = vadd.f32 %v4251_v20, %v4000_v55  ;;  %v4348_v29 = vadd.f32 %v4252_v42, %v4001_v18  ;;  %v4805_v5 = vmul.f32 %v9515_v39, %v4692_v51 }
 0x56d   : > { %v4349_v13 = vadd.f32 %v4253_v60, %v4002_v27  ;;  %v4913_v25 = vadd.f32 %v9525_v56, %v4800_v28  ;;  %v4916_v1 = vadd.f32 %v9525_v56, %v4803_v17  ;;  %v4693_v51 = vadd.f32 %v4597_v6, %v4346_v43 }
 0x56e   : > { %v4464_v49 = vpop.permute.xlu1 %4463  ;;  %v4918_v58 = vadd.f32 %v9532_v0, %v4805_v5  ;;  %v4917_v48 = vadd.f32 %v9528_v4, %v4804_v26  ;;  %v5078_v42 = vpack.c.bf16 %v5006_v10, %v5003_v12 }
 0x56f   : > { %v4598_v33 = vmul.f32 %v9473_v50, %v4464_v49  ;;  %v4599_v47 = vmul.f32 %v9477_v2, %v4464_v49  ;;  %v4600_v21 = vmul.f32 %v9480_v7, %v4464_v49 }
 0x570   : > { %6946 = vmatmul.mubr.msk.bf16.gmra.mxu1 %vm2337_vm2, %v5075_v52  ;;  %v5014_v46 = vmax.f32 %v4918_v58, 0.0  ;;  %v5013_v18 = vmax.f32 %v4917_v48, 0.0  ;;  %v4007_v58 = vmul.f32 %v9458_v8, %v10126_v59 }
 0x571   : > { %v4694_v41 = vadd.f32 %v4598_v33, %v4347_v37  ;;  %v4695_v23 = vadd.f32 %v4599_v47, %v4348_v29  ;;  %5650 = vmatprep.mubr.bf16.mxu1 %v10947_v16  ;;  %v4696_v22 = vadd.f32 %v4600_v21, %v4349_v13  ;;  %v4603_v29 = vmul.f32 %v9480_v7, %v4468_v54 }
 0x572   : > { %v5012_v33 = vmax.f32 %v4916_v1, 0.0  ;;  %v4806_v47 = vmul.f32 %v9505_v38, %v4693_v51  ;;  %v5009_v21 = vmax.f32 %v4913_v25, 0.0 }
 0x573   : > { %v4807_v63 = vmul.f32 %v9501_v30, %v4694_v41  ;;  %v4808_v57 = vmul.f32 %v9515_v39, %v4695_v23  ;;  %v3857_v45 = vpop.permute.xlu1 %3856  ;;  %v4809_v36 = vmul.f32 %v9505_v38, %v4696_v22  ;;  %v4601_v23 = vmul.f32 %v9473_v50, %v4468_v54 }
 0x574   : > { %v4003_v40 = vmul.f32 %v9455_v15, %v3857_v45  ;;  %v4004_v3 = vmul.f32 %v9458_v8, %v3857_v45  ;;  %v4005_v61 = vmul.f32 %v9464_v35, %v3857_v45  ;;  %v4006_v45 = vmul.f32 %v9455_v15, %v10126_v59 }
 0x575   : > { %v4920_v32 = vadd.f32 %v9528_v4, %v4807_v63  ;;  %v4921_v20 = vadd.f32 %v9532_v0, %v4808_v57  ;;  %v4922_v10 = vadd.f32 %v9525_v56, %v4809_v36  ;;  %v5081_v57 = vpack.c.bf16 %v5012_v33, %v5009_v21 }
 0x576   : > { %v4919_v48 = vadd.f32 %v9525_v56, %v4806_v47  ;;  %v4008_v54 = vmul.f32 %v9464_v35, %v10126_v59  ;;  %v4476_v47 = vpop.permute.xlu0 %4475 }
 0x577   : > { %v5017_v55 = vmax.f32 %v4921_v20, 0.0  ;;  %v5016_v9 = vmax.f32 %v4920_v32, 0.0  ;;  %v5018_v12 = vmax.f32 %v4922_v10, 0.0 }
 0x578   : > { %6947 = vmatmul.mubr.msk.bf16.gmra.mxu1 %vm2337_vm2, %v5078_v42  ;;  %v4121_v52 = vpop.permute.xlu1 %4120  ;;  %v5015_v59 = vmax.f32 %v4919_v48, 0.0 }
 0x579   : > { %v4254_v26 = vmul.f32 %v9461_v19, %v4121_v52  ;;  %v4255_v60 = vmul.f32 %v9467_v62, %v4121_v52  ;;  %v4256_v37 = vmul.f32 %v9470_v14, %v4121_v52  ;;  %v5083_v49 = vpack.c.bf16 %v5017_v55, %v5014_v46  ;;  %5660 = vmatprep.mubr.bf16.mxu1 %v10947_v16 }
 0x57a   : > { %v5082_v5 = vpack.c.bf16 %v5016_v9, %v5013_v18 }
 0x57b   : > { %v4350_v27 = vadd.f32 %v4254_v26, %v4003_v40  ;;  %v4351_v31 = vadd.f32 %v4255_v60, %v4004_v3  ;;  %v4352_v44 = vadd.f32 %v4256_v37, %v4005_v61  ;;  %5477 = vmatprep.mubr.bf16.mxu0 %v5083_v49  ;;  %v5084_v3 = vpack.c.bf16 %v5018_v12, %v5015_v59 }
 0x57c   : > { %5478 = vmatmul.mubr.bf16.gmra.mxu0 %v5082_v5  ;;  %v4125_v41 = vpop.permute.xlu1 %4124 }
 0x57d   : > { %v4698_v28 = vadd.f32 %v4602_v53, %v4351_v31  ;;  %v4699_v17 = vadd.f32 %v4603_v29, %v4352_v44  ;;  %v4257_v43 = vmul.f32 %v9461_v19, %v4125_v41  ;;  %v4258_v13 = vmul.f32 %v9467_v62, %v4125_v41 }
 0x57e   : > { %v4259_v63 = vmul.f32 %v9470_v14, %v4125_v41  ;;  %v4697_v6 = vadd.f32 %v4601_v23, %v4350_v27 }
 0x57f   : > { %v4812_v22 = vmul.f32 %v9505_v38, %v4699_v17  ;;  %v4353_v53 = vadd.f32 %v4257_v43, %v4006_v45  ;;  %v4354_v32 = vadd.f32 %v4258_v13, %v4007_v58  ;;  %v4811_v25 = vmul.f32 %v9515_v39, %v4698_v28 }
 0x580   : > { %6948 = vmatmul.mubr.msk.bf16.gmra.mxu1 %vm2337_vm2, %v5081_v57  ;;  %v4355_v1 = vadd.f32 %v4259_v63, %v4008_v54  ;;  %v4810_v55 = vmul.f32 %v9501_v30, %v4697_v6  ;;  %v4608_v45 = vmul.f32 %v9477_v2, %v4476_v47  ;;  %v4609_v58 = vmul.f32 %v9480_v7, %v4476_v47  ;;  %v7402_v6 = vld [vmem:[%s10887_s18 + $0x8] sm:$0xff]  }
 0x581   : > { %v4472_v20 = vpop.permute.xlu1 %4471  ;;  %5670 = vmatprep.mubr.bf16.mxu1 %v10947_v16  ;;  %v4925_v40 = vadd.f32 %v9525_v56, %v4812_v22  ;;  %v4924_v60 = vadd.f32 %v9532_v0, %v4811_v25  ;;  %v4607_v25 = vmul.f32 %v9473_v50, %v4476_v47  ;;  %6121 = vmatpush1.bf16.msra.mxu0 %v7402_v6 }
 0x582   : > { %v4604_v51 = vmul.f32 %v9473_v50, %v4472_v20  ;;  %v4605_v42 = vmul.f32 %v9477_v2, %v4472_v20  ;;  %v4606_v46 = vmul.f32 %v9480_v7, %v4472_v20  ;;  %v4923_v37 = vadd.f32 %v9528_v4, %v4810_v55  ;;  %v7403_v55 = vld [vmem:[%s10887_s18] sm:$0xff]   ;;  %6122 = vmatprep.subr.bf16.mxu0 %v10947_v16 }
 0x583   : > { %v5021_v5 = vmax.f32 %v4925_v40, 0.0  ;;  %v5020_v31 = vmax.f32 %v4924_v60, 0.0 }
 0x584   : > { %v4700_v18 = vadd.f32 %v4604_v51, %v4353_v53  ;;  %v4701_v9 = vadd.f32 %v4605_v42, %v4354_v32  ;;  %v4702_v36 = vadd.f32 %v4606_v46, %v4355_v1  ;;  %v5019_v17 = vmax.f32 %v4923_v37, 0.0  ;;  %v3872_v32 = vpop.permute.xlu0 %3871 }
 0x585   : > { %v4014_v40 = vmul.f32 %v9464_v35, %v3872_v32  ;;  %6123 = vmatpush1.bf16.msra.mxu0 %v7403_v55 }
 0x586   : > { %v4813_v61 = vmul.f32 %v9501_v30, %v4700_v18  ;;  %v4814_v52 = vmul.f32 %v9515_v39, %v4701_v9  ;;  %v4815_v24 = vmul.f32 %v9505_v38, %v4702_v36  ;;  %v3867_v26 = vpop.permute.xlu1 %3866  ;;  %v4012_v18 = vmul.f32 %v9455_v15, %v3872_v32  ;;  %6138 = vmatprep.subr.bf16.mxu0 %v10947_v16 }
 0x587   : > { %v4009_v10 = vmul.f32 %v9455_v15, %v3867_v26  ;;  %v4010_v41 = vmul.f32 %v9458_v8, %v3867_v26  ;;  %v4011_v23 = vmul.f32 %v9464_v35, %v3867_v26  ;;  %v4013_v9 = vmul.f32 %v9458_v8, %v3872_v32 }
 0x588   : > { %v4926_v49 = vadd.f32 %v9528_v4, %v4813_v61  ;;  %v4928_v29 = vadd.f32 %v9525_v56, %v4815_v24  ;;  %6949 = vmatmul.mubr.msk.bf16.gmra.mxu1 %vm2337_vm2, %v5084_v3  ;;  %v4927_v33 = vadd.f32 %v9532_v0, %v4814_v52  ;;  %v3882_v47 = vpop.permute.xlu0 %3881 }
 0x589   : > { %5680 = vmatprep.mubr.bf16.mxu1 %v10947_v16 }
 0x58a   : > { %v5024_v27 = vmax.f32 %v4928_v29, 0.0  ;;  %v5023_v44 = vmax.f32 %v4927_v33, 0.0  ;;  %v5022_v21 = vmax.f32 %v4926_v49, 0.0 }
 0x58b   : > { %v4129_v28 = vpop.permute.xlu1 %4128 }
 0x58c   : > { %v4260_v43 = vmul.f32 %v9461_v19, %v4129_v28  ;;  %v4261_v13 = vmul.f32 %v9467_v62, %v4129_v28  ;;  %v4262_v63 = vmul.f32 %v9470_v14, %v4129_v28  ;;  %v5086_v57 = vpack.c.bf16 %v5023_v44, %v5020_v31  ;;  %v7404_v44 = vld [vmem:[%s10887_s18 + $0x40] ss:$0 sps:$4 sm:$0x11]   ;;  %v4484_v6 = vpop.permute.xlu0 %4483 }
 0x58d   : > { %v5085_v48 = vpack.c.bf16 %v5022_v21, %v5019_v17  ;;  %v5087_v53 = vpack.c.bf16 %v5024_v27, %v5021_v5 }
 0x58e   : > { %v4356_v54 = vadd.f32 %v4260_v43, %v4009_v10  ;;  %v4357_v12 = vadd.f32 %v4261_v13, %v4010_v41  ;;  %v4358_v22 = vadd.f32 %v4262_v63, %v4011_v23  ;;  %5487 = vmatprep.mubr.bf16.mxu0 %v5086_v57  ;;  %v11012_v43 = vld [vmem:[#allocation7_spill] sm:$0xff] }
 0x58f   : > { %5488 = vmatmul.mubr.bf16.gmra.mxu0 %v5085_v48  ;;  %v4133_v20 = vpop.permute.xlu1 %4132  ;;  %v6106_v13 = vand.u32 %v7404_v44, %v11012_v43  ;;  %v4020_v44 = vmul.f32 %v9464_v35, %v3882_v47 }
 0x590   : > { %v4704_v1 = vadd.f32 %v4608_v45, %v4357_v12  ;;  %v4705_v51 = vadd.f32 %v4609_v58, %v4358_v22  ;;  %v4263_v42 = vmul.f32 %v9461_v19, %v4133_v20  ;;  %6950 = vmatmul.mubr.msk.bf16.gmra.mxu1 %vm2337_vm2, %v5087_v53  ;;  %v4264_v46 = vmul.f32 %v9467_v62, %v4133_v20 }
 0x591   : > { %v4265_v59 = vmul.f32 %v9470_v14, %v4133_v20  ;;  %5690 = vmatprep.mubr.bf16.mxu1 %v10947_v16  ;;  %v4703_v36 = vadd.f32 %v4607_v25, %v4356_v54  ;;  %6139 = vmatpush2.bf16.msra.mxu0 %v6106_v13 }
 0x592   : > { %v4818_v3 = vmul.f32 %v9505_v38, %v4705_v51  ;;  %v4359_v61 = vadd.f32 %v4263_v42, %v4012_v18  ;;  %v4360_v52 = vadd.f32 %v4264_v46, %v4013_v9  ;;  %v4817_v26 = vmul.f32 %v9515_v39, %v4704_v1 }
 0x593   : > { %v4361_v60 = vadd.f32 %v4265_v59, %v4014_v40  ;;  %v4816_v33 = vmul.f32 %v9501_v30, %v4703_v36  ;;  %v4613_v18 = vmul.f32 %v9473_v50, %v4484_v6  ;;  %v4614_v9 = vmul.f32 %v9477_v2, %v4484_v6 }
 0x594   : > { %v4480_v24 = vpop.permute.xlu1 %4479  ;;  %v4931_v21 = vadd.f32 %v9525_v56, %v4818_v3  ;;  %v4930_v10 = vadd.f32 %v9532_v0, %v4817_v26  ;;  %v4615_v3 = vmul.f32 %v9480_v7, %v4484_v6 }
 0x595   : > { %v4610_v37 = vmul.f32 %v9473_v50, %v4480_v24  ;;  %v4611_v49 = vmul.f32 %v9477_v2, %v4480_v24  ;;  %v4612_v29 = vmul.f32 %v9480_v7, %v4480_v24  ;;  %v4929_v63 = vadd.f32 %v9528_v4, %v4816_v33 }
 0x596   : > { %v5027_v48 = vmax.f32 %v4931_v21, 0.0  ;;  %v5026_v12 = vmax.f32 %v4930_v10, 0.0 }
 0x597   : > { %v4706_v5 = vadd.f32 %v4610_v37, %v4359_v61  ;;  %v4707_v27 = vadd.f32 %v4611_v49, %v4360_v52  ;;  %v4708_v31 = vadd.f32 %v4612_v29, %v4361_v60  ;;  %v5025_v51 = vmax.f32 %v4929_v63, 0.0 }
 0x599   : > { %v4819_v41 = vmul.f32 %v9501_v30, %v4706_v5  ;;  %v4820_v23 = vmul.f32 %v9515_v39, %v4707_v27  ;;  %v4821_v28 = vmul.f32 %v9505_v38, %v4708_v31  ;;  %v3877_v17 = vpop.permute.xlu1 %3876  ;;  %v4018_v27 = vmul.f32 %v9455_v15, %v3882_v47 }
 0x59a   : > { %v4015_v32 = vmul.f32 %v9455_v15, %v3877_v17  ;;  %v4016_v20 = vmul.f32 %v9458_v8, %v3877_v17  ;;  %v4017_v25 = vmul.f32 %v9464_v35, %v3877_v17  ;;  %v4019_v31 = vmul.f32 %v9458_v8, %v3882_v47 }
 0x59b   : > { %v4932_v57 = vadd.f32 %v9528_v4, %v4819_v41  ;;  %v4934_v45 = vadd.f32 %v9525_v56, %v4821_v28  ;;  %v4933_v58 = vadd.f32 %v9532_v0, %v4820_v23 }
 0x59d   : > { %v5030_v54 = vmax.f32 %v4934_v45, 0.0  ;;  %v5029_v22 = vmax.f32 %v4933_v58, 0.0  ;;  %v5028_v53 = vmax.f32 %v4932_v57, 0.0 }
 0x59e   : > { %v4137_v1 = vpop.permute.xlu1 %4136 }
 0x59f   : > { %v4266_v42 = vmul.f32 %v9461_v19, %v4137_v1  ;;  %v4267_v46 = vmul.f32 %v9467_v62, %v4137_v1  ;;  %v4268_v59 = vmul.f32 %v9470_v14, %v4137_v1  ;;  %v5089_v55 = vpack.c.bf16 %v5029_v22, %v5026_v12 }
 0x5a0   : > { %v5090_v36 = vpack.c.bf16 %v5030_v54, %v5027_v48  ;;  %v5088_v40 = vpack.c.bf16 %v5028_v53, %v5025_v51 }
 0x5a1   : > { %v4362_v61 = vadd.f32 %v4266_v42, %v4015_v32  ;;  %v4363_v52 = vadd.f32 %v4267_v46, %v4016_v20  ;;  %v4364_v24 = vadd.f32 %v4268_v59, %v4017_v25  ;;  %5497 = vmatprep.mubr.bf16.mxu0 %v5089_v55  ;;  %v10426_v59 = vpop.f32.mrf.mxu1 }
 0x5a2   : > { %6951 = vmatmul.mubr.msk.bf16.gmra.mxu1 %vm2337_vm2, %v5090_v36  ;;  %5498 = vmatmul.mubr.bf16.gmra.mxu0 %v5088_v40  ;;  %v4141_v26 = vpop.permute.xlu1 %4140 }
 0x5a3   : > { %v4709_v60 = vadd.f32 %v4613_v18, %v4362_v61  ;;  %v4710_v37 = vadd.f32 %v4614_v9, %v4363_v52  ;;  %v4711_v49 = vadd.f32 %v4615_v3, %v4364_v24  ;;  %v4269_v29 = vmul.f32 %v9461_v19, %v4141_v26  ;;  %5700 = vmatprep.mubr.bf16.mxu1 %v10947_v16  ;;  %v10430_v18 = vpop.f32.mrf.mxu1 }
 0x5a4   : > { %v4270_v33 = vmul.f32 %v9467_v62, %v4141_v26  ;;  %v4271_v5 = vmul.f32 %v9470_v14, %v4141_v26 }
 0x5a5   : > { %v4822_v21 = vmul.f32 %v9501_v30, %v4709_v60  ;;  %v4824_v10 = vmul.f32 %v9505_v38, %v4711_v49  ;;  %v4365_v41 = vadd.f32 %v4269_v29, %v4018_v27  ;;  %v4823_v19 = vmul.f32 %v9515_v39, %v4710_v37 }
 0x5a6   : > { %v4366_v23 = vadd.f32 %v4270_v33, %v4019_v31  ;;  %v4367_v17 = vadd.f32 %v4271_v5, %v4020_v44  ;;  %v5741_v31 = vld [vmem:[%s10885_s16] sm:$0x3] }
 0x5a7   : > { %v4488_v28 = vpop.permute.xlu1 %4487  ;;  %v4937_v35 = vadd.f32 %v9525_v56, %v4824_v10  ;;  %v4936_v47 = vadd.f32 %v9532_v0, %v4823_v19  ;;  %v4935_v58 = vadd.f32 %v9528_v4, %v4822_v21  ;;  %v11014_v21 = vld [vmem:[#allocation4_spill] sm:$0xff] }
 0x5a8   : > { %v4616_v62 = vmul.f32 %v9473_v50, %v4488_v28  ;;  %v4617_v14 = vmul.f32 %v9477_v2, %v4488_v28  ;;  %v4618_v15 = vmul.f32 %v9480_v7, %v4488_v28  ;;  %v10472_v10 = vrot.slane %v5741_v31, %v11014_v21 }
 0x5a9   : > { %v5033_v48 = vmax.f32 %v4937_v35, 0.0  ;;  %v5032_v6 = vmax.f32 %v4936_v47, 0.0  ;;  %v5031_v53 = vmax.f32 %v4935_v58, 0.0 }
 0x5aa   : > { %v4712_v43 = vadd.f32 %v4616_v62, %v4365_v41  ;;  %v4713_v8 = vadd.f32 %v4617_v14, %v4366_v23  ;;  %v4714_v13 = vadd.f32 %v4618_v15, %v4367_v17  ;;  %v11015_v23 = vld [vmem:[#allocation6_spill] sm:$0xff] }
 0x5ab   : > { %v10475_v28 = vrot.slane %v5741_v31, %v11015_v23  ;;  %v5817_v62 = vld [vmem:[%s10886_s17] sm:$0x3] }
 0x5ac   : > { %v4825_v63 = vmul.f32 %v9501_v30, %v4712_v43  ;;  %v4826_v57 = vmul.f32 %v9515_v39, %v4713_v8  ;;  %v4827_v45 = vmul.f32 %v9505_v38, %v4714_v13  ;;  %v11013_v38 = vld [vmem:[#allocation14_spill] sm:$0xff]  ;;  %v5389_v39 = vpop.f32.mrf.mxu0  ;;  %v10484_v8 = vrot.slane %v5817_v62, %v11014_v21 }
 0x5ad   : > { %v10488_v47 = vrot.slane %v5817_v62, %v11015_v23 }
 0x5ae   : > { %v4938_v50 = vadd.f32 %v9528_v4, %v4825_v63  ;;  %v4940_v2 = vadd.f32 %v9525_v56, %v4827_v45  ;;  %v4939_v7 = vadd.f32 %v9532_v0, %v4826_v57  ;;  %v5391_v56 = vpop.f32.mrf.mxu0 }
 0x5b0   : > { %v5034_v54 = vmax.f32 %v4938_v50, 0.0  ;;  %v5036_v12 = vmax.f32 %v4940_v2, 0.0  ;;  %v5035_v22 = vmax.f32 %v4939_v7, 0.0  ;;  %v5393_v4 = vpop.f32.mrf.mxu0 }
 0x5b2   : > { %v5093_v32 = vpack.c.bf16 %v5036_v12, %v5033_v48  ;;  %v5092_v30 = vpack.c.bf16 %v5035_v22, %v5032_v6  ;;  %v5091_v20 = vpack.c.bf16 %v5034_v54, %v5031_v53  ;;  %v5395_v0 = vpop.f32.mrf.mxu0 }
 0x5b4   : > { %5507 = vmatprep.mubr.bf16.mxu0 %v5092_v30  ;;  %6952 = vmatmul.mubr.msk.bf16.gmra.mxu1 %vm2337_vm2, %v5093_v32  ;;  %v5399_v25 = vpop.f32.mrf.mxu0 }
 0x5b5   : > { %5508 = vmatmul.mubr.bf16.gmra.mxu0 %v5091_v20  ;;  %5710 = vmatprep.mubr.bf16.mxu1 %v10947_v16 }
 0x5b6   : > { %v5401_v1 = vpop.f32.mrf.mxu0 }
 0x5b8   : > { %v5403_v51 = vpop.f32.mrf.mxu0 }
 0x5ba   : > { %v10422_v42 = vpop.f32.mrf.mxu0 }
 0x5bc   : > { %6953 = vmatmul.mubr.msk.bf16.gmra.mxu1 %vm2337_vm2, %v11013_v38  ;;  %v10424_v46 = vpop.f32.mrf.mxu0 }
 0x5bd   : > { %5720 = vmatprep.mubr.bf16.mxu1 %v10947_v16 }
 0x5be   : > { %v10428_v55 = vpop.f32.mrf.mxu0 }
 0x5c4   : > { %6954 = vmatmul.mubr.msk.bf16.gmra.mxu1 %vm2337_vm2, %v10034_v34  ;;  %v10432_v34 = vpop.f32.mrf.mxu0 }
 0x5c5   : > { %5730 = vmatprep.mubr.bf16.mxu1 %v10947_v16  ;;  %v10434_v16 = vpop.f32.mrf.mxu1 }
 0x5c6   : > { %v10436_v9 = vpop.f32.mrf.mxu0 }
 0x5c7   : > { %v10440_v36 = vpop.f32.mrf.mxu1 }
 0x5cc   : > { %6955 = vmatmul.mubr.msk.bf16.gmra.mxu1 %vm2337_vm2, %v9901_v11  ;;  %v10438_v11 = vpop.f32.mrf.mxu0 }
 0x5ce   : > { %v10444_v3 = vpop.f32.mrf.mxu0 }
 0x5d0   : > { %v10450_v24 = vpop.f32.mrf.mxu0 }
 0x5d2   : > { %v10456_v37 = vpop.f32.mrf.mxu0 }
 0x5d4   : > { %v10460_v29 = vpop.f32.mrf.mxu0 }
 0x5d6   : > { %v10466_v27 = vpop.f32.mrf.mxu0 }
 0x5d8   : > { %v10477_v17 = vpop.f32.mrf.mxu0 }
 0x5da   : > { %v10490_v57 = vpop.f32.mrf.mxu0 }
 0x5e7   : > { %v10493_v2 = vpop.f32.mrf.mxu0 }
 0x5e9   : > { %v10500_v38 = vpop.f32.mrf.mxu0 }
 0x5eb   : > { %v10506_v62 = vpop.f32.mrf.mxu0 }
 0x5f0   : > { %v10442_v40 = vpop.f32.mrf.mxu1 }
 0x5f2   : > { %v10446_v61 = vpop.f32.mrf.mxu1 }
 0x5f4   : > { %v10448_v52 = vpop.f32.mrf.mxu1 }
 0x5f6   : > { %v10452_v26 = vpop.f32.mrf.mxu1 }
 0x5f8   : > { %v10454_v60 = vpop.f32.mrf.mxu1 }
 0x5fa   : > { %v10458_v49 = vpop.f32.mrf.mxu1 }
 0x5fc   : > { %v10462_v33 = vpop.f32.mrf.mxu1 }
 0x5fe   : > { %v10464_v5 = vpop.f32.mrf.mxu1 }
 0x600   : > { %v5582_v44 = vpop.f32.mrf.mxu1 }
 0x601   : > { %v5583_v41 = vadd.f32 %v5582_v44, %v5389_v39 }
 0x602   : > { %v5584_v19 = vpop.f32.mrf.mxu1 }
 0x603   : > { %v5585_v14 = vadd.f32 %v5584_v19, %v5391_v56  ;;  %v5753_v35 = vmul.f32 %v10475_v28, %v5583_v41 }
 0x604   : > { %v5586_v15 = vpop.f32.mrf.mxu1 }
 0x605   : > { %v5754_v43 = vmul.f32 %v10472_v10, %v5585_v14  ;;  %v5587_v13 = vadd.f32 %v5586_v15, %v5393_v4  ;;  %v5829_v54 = vadd.f32 %v10488_v47, %v5753_v35 }
 0x606   : > { %v5588_v63 = vpop.f32.mrf.mxu1 }
 0x607   : > { %v5755_v45 = vmul.f32 %v10475_v28, %v5587_v13  ;;  %v5589_v58 = vadd.f32 %v5588_v63, %v5395_v0  ;;  %v5830_v7 = vadd.f32 %v10484_v8, %v5754_v43  ;;  %v5893_v0 = vmax.f32 %v5829_v54, 0.0 }
 0x608   : > { %v5592_v50 = vpop.f32.mrf.mxu1 }
 0x609   : > { %v5831_v48 = vadd.f32 %v10488_v47, %v5755_v45  ;;  %v5756_v6 = vmul.f32 %v10472_v10, %v5589_v58  ;;  %v5593_v12 = vadd.f32 %v5592_v50, %v5399_v25  ;;  %v5894_v39 = vmax.f32 %v5830_v7, 0.0  ;;  %v10516_v50 = vpop.f32.mrf.mxu0 }
 0x60a   : > { %v5594_v22 = vpop.f32.mrf.mxu1 }
 0x60b   : > { %v5832_v53 = vadd.f32 %v10484_v8, %v5756_v6  ;;  %v5595_v32 = vadd.f32 %v5594_v22, %v5401_v1  ;;  %v5895_v30 = vmax.f32 %v5831_v48, 0.0  ;;  %v5757_v31 = vmul.f32 %v10475_v28, %v5593_v12 }
 0x60c   : > { %v5596_v20 = vpop.f32.mrf.mxu1 }
 0x60d   : > { %v5896_v56 = vmax.f32 %v5832_v53, 0.0  ;;  %v5758_v4 = vmul.f32 %v10472_v10, %v5595_v32  ;;  %v5597_v44 = vadd.f32 %v5596_v20, %v5403_v51  ;;  %v5957_v23 = vpack.c.bf16 %v5895_v30, %v5893_v0  ;;  %v10520_v53 = vpop.f32.mrf.mxu0 }
 0x60e   : > { %v5598_v21 = vpop.f32.mrf.mxu1  ;;  %v5833_v43 = vadd.f32 %v10488_v47, %v5757_v31 }
 0x60f   : > { %v5958_v41 = vpack.c.bf16 %v5896_v56, %v5894_v39  ;;  %v5599_v25 = vadd.f32 %v5598_v21, %v10422_v42  ;;  %v5759_v19 = vmul.f32 %v10475_v28, %v5597_v44  ;;  %v5834_v14 = vadd.f32 %v10484_v8, %v5758_v4  ;;  %v10529_v31 = vpop.f32.mrf.mxu0 }
 0x610   : > { %v5602_v1 = vpop.f32.mrf.mxu1  ;;  %v5897_v54 = vmax.f32 %v5833_v43, 0.0 }
 0x611   : > { %v5760_v15 = vmul.f32 %v10472_v10, %v5599_v25  ;;  %6965 = vmatprep.mubr.msk.bf16.mxu0 %vm3098_vm3, %v5958_v41  ;;  %v5835_v51 = vadd.f32 %v10488_v47, %v5759_v19  ;;  %v5603_v35 = vadd.f32 %v5602_v1, %v10424_v46  ;;  %v5898_v7 = vmax.f32 %v5834_v14, 0.0 }
 0x612   : > { %v5604_v13 = vpop.f32.mrf.mxu1  ;;  %6141 = vmatmul.mubr.bf16.vlgmr.msra.gmra.mxu0 %v5957_v23 }
 0x613   : > { %v5836_v42 = vadd.f32 %v10484_v8, %v5760_v15  ;;  %v5605_v63 = vadd.f32 %v5604_v13, %v10428_v55  ;;  %v5899_v45 = vmax.f32 %v5835_v51, 0.0  ;;  %v5761_v30 = vmul.f32 %v10475_v28, %v5603_v35  ;;  %v10537_v51 = vpop.f32.mrf.mxu0  ;;  %v7405_v35 = vld [vmem:[%s10890_s21 + $0x18] sm:$0xff]  }
 0x614   : > { %v5606_v58 = vpop.f32.mrf.mxu1  ;;  %7086 = vmatprep.subr.bf16.mxu1 %v7405_v35 }
 0x615   : > { %v5900_v48 = vmax.f32 %v5836_v42, 0.0  ;;  %v5607_v6 = vadd.f32 %v5606_v58, %v10432_v34  ;;  %v5762_v12 = vmul.f32 %v10472_v10, %v5605_v63  ;;  %v5959_v55 = vpack.c.bf16 %v5899_v45, %v5897_v54  ;;  %7087 = vmatpush3.bf16.msra.mxu1 %v7405_v35  ;;  %v10549_v54 = vpop.f32.mrf.mxu0 }
 0x616   : > { %v5608_v22 = vpop.f32.mrf.mxu1  ;;  %v5837_v44 = vadd.f32 %v10488_v47, %v5761_v30 }
 0x617   : > { %v5960_v32 = vpack.c.bf16 %v5900_v48, %v5898_v7  ;;  %v5763_v46 = vmul.f32 %v10475_v28, %v5607_v6  ;;  %v5609_v20 = vadd.f32 %v5608_v22, %v10436_v9  ;;  %v5838_v34 = vadd.f32 %v10484_v8, %v5762_v12 }
 0x618   : > { %v5612_v39 = vpop.f32.mrf.mxu1  ;;  %v5901_v13 = vmax.f32 %v5837_v44, 0.0 }
 0x619   : > { %v5839_v56 = vadd.f32 %v10488_v47, %v5763_v46  ;;  %6966 = vmatprep.mubr.msk.bf16.mxu0 %vm3098_vm3, %v5960_v32  ;;  %v5764_v4 = vmul.f32 %v10472_v10, %v5609_v20  ;;  %v5613_v21 = vadd.f32 %v5612_v39, %v10438_v11  ;;  %v5902_v14 = vmax.f32 %v5838_v34, 0.0  ;;  %v10555_v46 = vpop.f32.mrf.mxu0 }
 0x61a   : > { %v5614_v0 = vpop.f32.mrf.mxu1  ;;  %6149 = vmatmul.mubr.bf16.gmra.mxu0 %v5959_v55 }
 0x61b   : > { %v5615_v41 = vadd.f32 %v5614_v0, %v10444_v3  ;;  %v5840_v9 = vadd.f32 %v10484_v8, %v5764_v4  ;;  %v5903_v23 = vmax.f32 %v5839_v56, 0.0  ;;  %v5765_v42 = vmul.f32 %v10475_v28, %v5613_v21 }
 0x61c   : > { %v5616_v25 = vpop.f32.mrf.mxu1 }
 0x61d   : > { %v5766_v19 = vmul.f32 %v10472_v10, %v5615_v41  ;;  %v5617_v1 = vadd.f32 %v5616_v25, %v10450_v24  ;;  %v5904_v15 = vmax.f32 %v5840_v9, 0.0  ;;  %v5961_v58 = vpack.c.bf16 %v5903_v23, %v5901_v13  ;;  %v10562_v9 = vpop.f32.mrf.mxu0 }
 0x61e   : > { %v5618_v43 = vpop.f32.mrf.mxu1 }
 0x61f   : > { %v5767_v11 = vmul.f32 %v10475_v28, %v5617_v1  ;;  %v5619_v3 = vadd.f32 %v5618_v43, %v10456_v37  ;;  %v5962_v63 = vpack.c.bf16 %v5904_v15, %v5902_v14  ;;  %v5842_v24 = vadd.f32 %v10484_v8, %v5766_v19 }
 0x620   : > { %v5622_v45 = vpop.f32.mrf.mxu1  ;;  %v5841_v37 = vadd.f32 %v10488_v47, %v5765_v42  ;;  %v5463_v42 = vpop.f32.mrf.mxu0 }
 0x621   : > { %v5843_v7 = vadd.f32 %v10488_v47, %v5767_v11  ;;  %v5768_v48 = vmul.f32 %v10472_v10, %v5619_v3  ;;  %6967 = vmatprep.mubr.msk.bf16.mxu0 %vm3098_vm3, %v5962_v63  ;;  %v5623_v22 = vadd.f32 %v5622_v45, %v10460_v29  ;;  %v5906_v55 = vmax.f32 %v5842_v24, 0.0 }
 0x622   : > { %v5624_v6 = vpop.f32.mrf.mxu1  ;;  %6157 = vmatmul.mubr.bf16.gmra.mxu0 %v5961_v58  ;;  %v5905_v0 = vmax.f32 %v5841_v37, 0.0  ;;  %v5465_v37 = vpop.f32.mrf.mxu0 }
 0x623   : > { %v5844_v12 = vadd.f32 %v10484_v8, %v5768_v48  ;;  %v5625_v32 = vadd.f32 %v5624_v6, %v10466_v27  ;;  %v5907_v20 = vmax.f32 %v5843_v7, 0.0  ;;  %v5769_v21 = vmul.f32 %v10475_v28, %v5623_v22 }
 0x624   : > { %v5626_v30 = vpop.f32.mrf.mxu1 }
 0x625   : > { %v5908_v39 = vmax.f32 %v5844_v12, 0.0  ;;  %v5770_v56 = vmul.f32 %v10472_v10, %v5625_v32  ;;  %v5627_v34 = vadd.f32 %v5626_v30, %v10477_v17  ;;  %v5963_v25 = vpack.c.bf16 %v5907_v20, %v5905_v0 }
 0x626   : > { %v5628_v4 = vpop.f32.mrf.mxu1  ;;  %v5845_v14 = vadd.f32 %v10488_v47, %v5769_v21 }
 0x627   : > { %v5964_v44 = vpack.c.bf16 %v5908_v39, %v5906_v55  ;;  %v5629_v29 = vadd.f32 %v5628_v4, %v10490_v57  ;;  %v5771_v27 = vmul.f32 %v10475_v28, %v5627_v34  ;;  %v5846_v23 = vadd.f32 %v10484_v8, %v5770_v56 }
 0x628   : > { %v5632_v41 = vpop.f32.mrf.mxu1  ;;  %v5909_v24 = vmax.f32 %v5845_v14, 0.0 }
 0x629   : > { %v5772_v19 = vmul.f32 %v10472_v10, %v5629_v29  ;;  %6968 = vmatprep.mubr.msk.bf16.mxu0 %vm3098_vm3, %v5964_v44  ;;  %v5847_v17 = vadd.f32 %v10488_v47, %v5771_v27  ;;  %v5633_v57 = vadd.f32 %v5632_v41, %v10493_v2  ;;  %v5910_v11 = vmax.f32 %v5846_v23, 0.0  ;;  %v5469_v20 = vpop.f32.mrf.mxu0 }
 0x62a   : > { %v5634_v1 = vpop.f32.mrf.mxu1  ;;  %6165 = vmatmul.mubr.bf16.gmra.mxu0 %v5963_v25 }
 0x62b   : > { %v5848_v15 = vadd.f32 %v10484_v8, %v5772_v19  ;;  %v5635_v43 = vadd.f32 %v5634_v1, %v10500_v38  ;;  %v5911_v3 = vmax.f32 %v5847_v17, 0.0  ;;  %v5773_v48 = vmul.f32 %v10475_v28, %v5633_v57  ;;  %v5471_v25 = vpop.f32.mrf.mxu0 }
 0x62c   : > { %v5636_v13 = vpop.f32.mrf.mxu1 }
 0x62d   : > { %v5912_v35 = vmax.f32 %v5848_v15, 0.0  ;;  %v5637_v63 = vadd.f32 %v5636_v13, %v10506_v62  ;;  %v5774_v45 = vmul.f32 %v10472_v10, %v5635_v43  ;;  %v5965_v12 = vpack.c.bf16 %v5911_v3, %v5909_v24  ;;  %v5473_v43 = vpop.f32.mrf.mxu0 }
 0x62e   : > { %v5638_v58 = vpop.f32.mrf.mxu1  ;;  %v5849_v55 = vadd.f32 %v10488_v47, %v5773_v48 }
 0x62f   : > { %v5966_v7 = vpack.c.bf16 %v5912_v35, %v5910_v11  ;;  %v5775_v6 = vmul.f32 %v10475_v28, %v5637_v63  ;;  %v5639_v2 = vadd.f32 %v5638_v58, %v10516_v50  ;;  %v5850_v62 = vadd.f32 %v10484_v8, %v5774_v45 }
 0x630   : > { %v5642_v38 = vpop.f32.mrf.mxu1  ;;  %v5913_v41 = vmax.f32 %v5849_v55, 0.0 }
 0x631   : > { %v5851_v22 = vadd.f32 %v10488_v47, %v5775_v6  ;;  %6969 = vmatprep.mubr.msk.bf16.mxu0 %vm3098_vm3, %v5966_v7  ;;  %v5776_v32 = vmul.f32 %v10472_v10, %v5639_v2  ;;  %v5643_v39 = vadd.f32 %v5642_v38, %v10520_v53  ;;  %v5914_v21 = vmax.f32 %v5850_v62, 0.0  ;;  %v5475_v6 = vpop.f32.mrf.mxu0 }
 0x632   : > { %v5644_v30 = vpop.f32.mrf.mxu1  ;;  %6173 = vmatmul.mubr.bf16.gmra.mxu0 %v5965_v12 }
 0x633   : > { %v5645_v56 = vadd.f32 %v5644_v30, %v10529_v31  ;;  %v5852_v50 = vadd.f32 %v10484_v8, %v5776_v32  ;;  %v5915_v4 = vmax.f32 %v5851_v22, 0.0  ;;  %v5777_v23 = vmul.f32 %v10475_v28, %v5643_v39 }
 0x634   : > { %v5646_v34 = vpop.f32.mrf.mxu1 }
 0x635   : > { %v5778_v0 = vmul.f32 %v10472_v10, %v5645_v56  ;;  %v5647_v44 = vadd.f32 %v5646_v34, %v10537_v51  ;;  %v5916_v29 = vmax.f32 %v5852_v50, 0.0  ;;  %v5967_v1 = vpack.c.bf16 %v5915_v4, %v5913_v41 }
 0x636   : > { %v5648_v27 = vpop.f32.mrf.mxu1  ;;  %v5853_v13 = vadd.f32 %v10488_v47, %v5777_v23 }
 0x637   : > { %v5779_v53 = vmul.f32 %v10475_v28, %v5647_v44  ;;  %v5649_v31 = vadd.f32 %v5648_v27, %v10549_v54  ;;  %v5968_v19 = vpack.c.bf16 %v5916_v29, %v5914_v21  ;;  %v5854_v14 = vadd.f32 %v10484_v8, %v5778_v0 }
 0x638   : > { %v5652_v17 = vpop.f32.mrf.mxu1  ;;  %v5917_v2 = vmax.f32 %v5853_v13, 0.0 }
 0x639   : > { %v5855_v15 = vadd.f32 %v10488_v47, %v5779_v53  ;;  %v5780_v51 = vmul.f32 %v10472_v10, %v5649_v31  ;;  %6970 = vmatprep.mubr.msk.bf16.mxu0 %vm3098_vm3, %v5968_v19  ;;  %v5653_v3 = vadd.f32 %v5652_v17, %v10555_v46  ;;  %v5918_v63 = vmax.f32 %v5854_v14, 0.0 }
 0x63a   : > { %v5654_v57 = vpop.f32.mrf.mxu1  ;;  %6181 = vmatmul.mubr.bf16.gmra.mxu0 %v5967_v1 }
 0x63b   : > { %v5856_v11 = vadd.f32 %v10484_v8, %v5780_v51  ;;  %v5655_v54 = vadd.f32 %v5654_v57, %v10562_v9  ;;  %v5919_v45 = vmax.f32 %v5855_v15, 0.0  ;;  %v5781_v12 = vmul.f32 %v10475_v28, %v5653_v3 }
 0x63c   : > { %v5656_v35 = vpop.f32.mrf.mxu1  ;;  %v5479_v30 = vpop.f32.mrf.mxu0 }
 0x63d   : > { %v5920_v58 = vmax.f32 %v5856_v11, 0.0  ;;  %v5782_v24 = vmul.f32 %v10472_v10, %v5655_v54  ;;  %v5657_v7 = vadd.f32 %v5656_v35, %v5463_v42  ;;  %v5969_v32 = vpack.c.bf16 %v5919_v45, %v5917_v2 }
 0x63e   : > { %v5658_v48 = vpop.f32.mrf.mxu1  ;;  %v5857_v56 = vadd.f32 %v10488_v47, %v5781_v12  ;;  %v5481_v21 = vpop.f32.mrf.mxu0 }
 0x63f   : > { %v5970_v38 = vpack.c.bf16 %v5920_v58, %v5918_v63  ;;  %v5659_v22 = vadd.f32 %v5658_v48, %v5465_v37  ;;  %v5783_v62 = vmul.f32 %v10475_v28, %v5657_v7  ;;  %v5858_v9 = vadd.f32 %v10484_v8, %v5782_v24 }
 0x640   : > { %v5662_v46 = vpop.f32.mrf.mxu1  ;;  %v5921_v53 = vmax.f32 %v5857_v56, 0.0 }
 0x641   : > { %v5784_v55 = vmul.f32 %v10472_v10, %v5659_v22  ;;  %6971 = vmatprep.mubr.msk.bf16.mxu0 %vm3098_vm3, %v5970_v38  ;;  %v5859_v42 = vadd.f32 %v10488_v47, %v5783_v62  ;;  %v5663_v34 = vadd.f32 %v5662_v46, %v5469_v20  ;;  %v5922_v0 = vmax.f32 %v5858_v9, 0.0 }
 0x642   : > { %v5664_v39 = vpop.f32.mrf.mxu1  ;;  %6189 = vmatmul.mubr.bf16.gmra.mxu0 %v5969_v32 }
 0x643   : > { %v5860_v50 = vadd.f32 %v10484_v8, %v5784_v55  ;;  %v5665_v37 = vadd.f32 %v5664_v39, %v5471_v25  ;;  %v5923_v44 = vmax.f32 %v5859_v42, 0.0  ;;  %v5785_v19 = vmul.f32 %v10475_v28, %v5663_v34  ;;  %v5483_v25 = vpop.f32.mrf.mxu0 }
 0x644   : > { %v5666_v4 = vpop.f32.mrf.mxu1 }
 0x645   : > { %v5924_v29 = vmax.f32 %v5860_v50, 0.0  ;;  %v5667_v27 = vadd.f32 %v5666_v4, %v5473_v43  ;;  %v5786_v41 = vmul.f32 %v10472_v10, %v5665_v37  ;;  %v5971_v20 = vpack.c.bf16 %v5923_v44, %v5921_v53  ;;  %v5485_v63 = vpop.f32.mrf.mxu0 }
 0x646   : > { %v5668_v23 = vpop.f32.mrf.mxu1  ;;  %v5861_v13 = vadd.f32 %v10488_v47, %v5785_v19 }
 0x647   : > { %v5972_v31 = vpack.c.bf16 %v5924_v29, %v5922_v0  ;;  %v5787_v17 = vmul.f32 %v10475_v28, %v5667_v27  ;;  %v5669_v1 = vadd.f32 %v5668_v23, %v5475_v6  ;;  %v5862_v51 = vadd.f32 %v10484_v8, %v5786_v41 }
 0x648   : > { %v5672_v14 = vpop.f32.mrf.mxu1  ;;  %v5925_v2 = vmax.f32 %v5861_v13, 0.0 }
 0x649   : > { %v5863_v15 = vadd.f32 %v10488_v47, %v5787_v17  ;;  %6972 = vmatprep.mubr.msk.bf16.mxu0 %vm3098_vm3, %v5972_v31  ;;  %v5788_v57 = vmul.f32 %v10472_v10, %v5669_v1  ;;  %v5673_v11 = vadd.f32 %v5672_v14, %v5479_v30  ;;  %v5926_v7 = vmax.f32 %v5862_v51, 0.0 }
 0x64a   : > { %v5674_v43 = vpop.f32.mrf.mxu1  ;;  %6197 = vmatmul.mubr.bf16.gmra.mxu0 %v5971_v20  ;;  %v7406_v20 = vld [vmem:[%s10890_s21 + $0x10] sm:$0xff]  }
 0x64b   : > { %v5675_v3 = vadd.f32 %v5674_v43, %v5481_v21  ;;  %v5864_v54 = vadd.f32 %v10484_v8, %v5788_v57  ;;  %v5927_v45 = vmax.f32 %v5863_v15, 0.0  ;;  %v5789_v38 = vmul.f32 %v10475_v28, %v5673_v11  ;;  %7088 = vmatprep.subr.bf16.mxu1 %v7406_v20 }
 0x64c   : > { %v5676_v35 = vpop.f32.mrf.mxu1  ;;  %7089 = vmatpush3.bf16.msra.mxu1 %v7406_v20 }
 0x64d   : > { %v5790_v58 = vmul.f32 %v10472_v10, %v5675_v3  ;;  %v5677_v24 = vadd.f32 %v5676_v35, %v5483_v25  ;;  %v5928_v48 = vmax.f32 %v5864_v54, 0.0  ;;  %v5973_v9 = vpack.c.bf16 %v5927_v45, %v5925_v2 }
 0x64e   : > { %v5678_v6 = vpop.f32.mrf.mxu1  ;;  %v5865_v50 = vadd.f32 %v10488_v47, %v5789_v38 }
 0x64f   : > { %v5791_v12 = vmul.f32 %v10475_v28, %v5677_v24  ;;  %v5679_v22 = vadd.f32 %v5678_v6, %v5485_v63  ;;  %v5489_v62 = vpop.f32.mrf.mxu0  ;;  %v5974_v46 = vpack.c.bf16 %v5928_v48, %v5926_v7  ;;  %v5866_v30 = vadd.f32 %v10484_v8, %v5790_v58 }
 0x650   : > { %v5682_v32 = vpop.f32.mrf.mxu1  ;;  %v5929_v19 = vmax.f32 %v5865_v50, 0.0 }
 0x651   : > { %v5867_v55 = vadd.f32 %v10488_v47, %v5791_v12  ;;  %v5792_v42 = vmul.f32 %v10472_v10, %v5679_v22  ;;  %v5491_v39 = vpop.f32.mrf.mxu0  ;;  %6973 = vmatprep.mubr.msk.bf16.mxu0 %vm3098_vm3, %v5974_v46  ;;  %v5683_v37 = vadd.f32 %v5682_v32, %v5489_v62  ;;  %v5930_v21 = vmax.f32 %v5866_v30, 0.0  ;;  %v7407_v12 = vld [vmem:[%s10890_s21 + $0x8] sm:$0xff]  }
 0x652   : > { %v5684_v56 = vpop.f32.mrf.mxu1  ;;  %6205 = vmatmul.mubr.bf16.gmra.mxu0 %v5973_v9  ;;  %7090 = vmatprep.subr.bf16.mxu1 %v7407_v12 }
 0x653   : > { %v5868_v34 = vadd.f32 %v10484_v8, %v5792_v42  ;;  %v5685_v4 = vadd.f32 %v5684_v56, %v5491_v39  ;;  %v5493_v0 = vpop.f32.mrf.mxu0  ;;  %v5931_v29 = vmax.f32 %v5867_v55, 0.0  ;;  %v5793_v1 = vmul.f32 %v10475_v28, %v5683_v37  ;;  %7091 = vmatpush3.bf16.msra.mxu1 %v7407_v12  ;;  %v7408_v42 = vld [vmem:[%s10890_s21] sm:$0xff]  }
 0x654   : > { %v5686_v44 = vpop.f32.mrf.mxu1  ;;  %7092 = vmatprep.subr.bf16.mxu1 %v7408_v42 }
 0x655   : > { %v5932_v27 = vmax.f32 %v5868_v34, 0.0  ;;  %v5794_v41 = vmul.f32 %v10472_v10, %v5685_v4  ;;  %v5495_v23 = vpop.f32.mrf.mxu0  ;;  %v5687_v53 = vadd.f32 %v5686_v44, %v5493_v0  ;;  %v5975_v15 = vpack.c.bf16 %v5931_v29, %v5929_v19 }
 0x656   : > { %v5688_v31 = vpop.f32.mrf.mxu1  ;;  %v5869_v13 = vadd.f32 %v10488_v47, %v5793_v1 }
 0x657   : > { %v5976_v17 = vpack.c.bf16 %v5932_v27, %v5930_v21  ;;  %v5689_v14 = vadd.f32 %v5688_v31, %v5495_v23  ;;  %v5795_v25 = vmul.f32 %v10475_v28, %v5687_v53  ;;  %v5870_v51 = vadd.f32 %v10484_v8, %v5794_v41  ;;  %7093 = vmatpush3.bf16.msra.mxu1 %v7408_v42 }
 0x658   : > { %v5933_v63 = vmax.f32 %v5869_v13, 0.0 }
 0x659   : > { %v5796_v57 = vmul.f32 %v10472_v10, %v5689_v14  ;;  %6974 = vmatprep.mubr.msk.bf16.mxu0 %vm3098_vm3, %v5976_v17  ;;  %v5871_v43 = vadd.f32 %v10488_v47, %v5795_v25  ;;  %v5934_v3 = vmax.f32 %v5870_v51, 0.0 }
 0x65a   : > { %6213 = vmatmul.mubr.bf16.gmra.mxu0 %v5975_v15 }
 0x65b   : > { %v5872_v11 = vadd.f32 %v10484_v8, %v5796_v57  ;;  %v5935_v54 = vmax.f32 %v5871_v43, 0.0 }
 0x65d   : > { %v5936_v35 = vmax.f32 %v5872_v11, 0.0  ;;  %v5977_v58 = vpack.c.bf16 %v5935_v54, %v5933_v63 }
 0x65f   : > { %v5978_v45 = vpack.c.bf16 %v5936_v35, %v5934_v3 }
 0x661   : > { %6975 = vmatprep.mubr.msk.bf16.mxu0 %vm3098_vm3, %v5978_v45 }
 0x662   : > { %v5692_v24 = vpop.f32.mrf.mxu1  ;;  %v5499_v7 = vpop.f32.mrf.mxu0  ;;  %6221 = vmatmul.mubr.bf16.gmra.mxu0 %v5977_v58 }
 0x663   : > { %v5693_v48 = vadd.f32 %v5692_v24, %v5499_v7 }
 0x664   : > { %v5694_v6 = vpop.f32.mrf.mxu1  ;;  %v5501_v2 = vpop.f32.mrf.mxu0 }
 0x665   : > { %v5695_v38 = vadd.f32 %v5694_v6, %v5501_v2  ;;  %v5797_v9 = vmul.f32 %v10475_v28, %v5693_v48 }
 0x666   : > { %v5696_v22 = vpop.f32.mrf.mxu1  ;;  %v5503_v62 = vpop.f32.mrf.mxu0 }
 0x667   : > { %v5798_v46 = vmul.f32 %v10472_v10, %v5695_v38  ;;  %v5697_v32 = vadd.f32 %v5696_v22, %v5503_v62  ;;  %v5873_v4 = vadd.f32 %v10488_v47, %v5797_v9 }
 0x668   : > { %v5698_v30 = vpop.f32.mrf.mxu1  ;;  %v5505_v55 = vpop.f32.mrf.mxu0 }
 0x669   : > { %v5799_v39 = vmul.f32 %v10475_v28, %v5697_v32  ;;  %v5699_v56 = vadd.f32 %v5698_v30, %v5505_v55  ;;  %v5874_v50 = vadd.f32 %v10484_v8, %v5798_v46  ;;  %v5937_v27 = vmax.f32 %v5873_v4, 0.0 }
 0x66b   : > { %v5875_v34 = vadd.f32 %v10488_v47, %v5799_v39  ;;  %v5800_v37 = vmul.f32 %v10472_v10, %v5699_v56  ;;  %v5938_v21 = vmax.f32 %v5874_v50, 0.0 }
 0x66d   : > { %v5876_v0 = vadd.f32 %v10484_v8, %v5800_v37  ;;  %v5939_v44 = vmax.f32 %v5875_v34, 0.0 }
 0x66f   : > { %v5940_v29 = vmax.f32 %v5876_v0, 0.0  ;;  %v5979_v23 = vpack.c.bf16 %v5939_v44, %v5937_v27 }
 0x671   : > { %v5980_v41 = vpack.c.bf16 %v5940_v29, %v5938_v21 }
 0x673   : > { %6976 = vmatprep.mubr.msk.bf16.mxu0 %vm3098_vm3, %v5980_v41 }
 0x674   : > { %v5702_v53 = vpop.f32.mrf.mxu1  ;;  %6229 = vmatmul.mubr.bf16.gmra.mxu0 %v5979_v23 }
 0x675   : > { %v5509_v31 = vpop.f32.mrf.mxu0 }
 0x676   : > { %v5704_v19 = vpop.f32.mrf.mxu1  ;;  %v5703_v17 = vadd.f32 %v5702_v53, %v5509_v31 }
 0x677   : > { %v5511_v1 = vpop.f32.mrf.mxu0 }
 0x678   : > { %v5705_v14 = vadd.f32 %v5704_v19, %v5511_v1  ;;  %v5706_v20 = vpop.f32.mrf.mxu1  ;;  %v5801_v43 = vmul.f32 %v10475_v28, %v5703_v17 }
 0x679   : > { %v5513_v25 = vpop.f32.mrf.mxu0 }
 0x67a   : > { %v5802_v15 = vmul.f32 %v10472_v10, %v5705_v14  ;;  %v5707_v51 = vadd.f32 %v5706_v20, %v5513_v25  ;;  %v5708_v57 = vpop.f32.mrf.mxu1  ;;  %v5877_v24 = vadd.f32 %v10488_v47, %v5801_v43 }
 0x67b   : > { %v5515_v13 = vpop.f32.mrf.mxu0 }
 0x67c   : > { %v5803_v11 = vmul.f32 %v10475_v28, %v5707_v51  ;;  %v5709_v3 = vadd.f32 %v5708_v57, %v5515_v13  ;;  %v5712_v54 = vpop.f32.mrf.mxu1  ;;  %v5878_v35 = vadd.f32 %v10484_v8, %v5802_v15  ;;  %v5941_v9 = vmax.f32 %v5877_v24, 0.0 }
 0x67d   : > { %v5713_v7 = vadd.f32 %v5712_v54, %v10426_v59 }
 0x67e   : > { %v5879_v63 = vadd.f32 %v10488_v47, %v5803_v11  ;;  %v5804_v45 = vmul.f32 %v10472_v10, %v5709_v3  ;;  %v5714_v58 = vpop.f32.mrf.mxu1  ;;  %v5942_v62 = vmax.f32 %v5878_v35, 0.0 }
 0x67f   : > { %v5715_v48 = vadd.f32 %v5714_v58, %v10430_v18  ;;  %v5805_v30 = vmul.f32 %v10475_v28, %v5713_v7 }
 0x680   : > { %v5880_v6 = vadd.f32 %v10484_v8, %v5804_v45  ;;  %v5716_v2 = vpop.f32.mrf.mxu1  ;;  %v5943_v38 = vmax.f32 %v5879_v63, 0.0 }
 0x681   : > { %v5806_v12 = vmul.f32 %v10472_v10, %v5715_v48  ;;  %v5717_v22 = vadd.f32 %v5716_v2, %v10434_v16  ;;  %v5881_v37 = vadd.f32 %v10488_v47, %v5805_v30 }
 0x682   : > { %v5944_v46 = vmax.f32 %v5880_v6, 0.0  ;;  %v5718_v32 = vpop.f32.mrf.mxu1  ;;  %v5981_v39 = vpack.c.bf16 %v5943_v38, %v5941_v9  ;;  %v10704_v9 = vld [vmem:[%s10888_s19] ss:$0 sm:$0xff] }
 0x683   : > { %v5807_v55 = vmul.f32 %v10475_v28, %v5717_v22  ;;  %v5719_v59 = vadd.f32 %v5718_v32, %v10440_v36  ;;  %v5882_v56 = vadd.f32 %v10484_v8, %v5806_v12  ;;  %v5945_v31 = vmax.f32 %v5881_v37, 0.0 }
 0x684   : > { %v5982_v42 = vpack.c.bf16 %v5944_v46, %v5942_v62  ;;  %v5722_v18 = vpop.f32.mrf.mxu1 }
 0x685   : > { %v5883_v50 = vadd.f32 %v10488_v47, %v5807_v55  ;;  %v5808_v34 = vmul.f32 %v10472_v10, %v5719_v59  ;;  %v5723_v0 = vadd.f32 %v5722_v18, %v10442_v40  ;;  %v5946_v21 = vmax.f32 %v5882_v56, 0.0 }
 0x686   : > { %v5724_v16 = vpop.f32.mrf.mxu1  ;;  %6977 = vmatprep.mubr.msk.bf16.mxu0 %vm3098_vm3, %v5982_v42 }
 0x687   : > { %v5884_v4 = vadd.f32 %v10484_v8, %v5808_v34  ;;  %v5725_v36 = vadd.f32 %v5724_v16, %v10446_v61  ;;  %6237 = vmatmul.mubr.bf16.gmra.mxu0 %v5981_v39  ;;  %v5947_v29 = vmax.f32 %v5883_v50, 0.0  ;;  %v5809_v17 = vmul.f32 %v10475_v28, %v5723_v0 }
 0x688   : > { %v5726_v44 = vpop.f32.mrf.mxu1 }
 0x689   : > { %v5948_v27 = vmax.f32 %v5884_v4, 0.0  ;;  %v5810_v41 = vmul.f32 %v10472_v10, %v5725_v36  ;;  %v5727_v23 = vadd.f32 %v5726_v44, %v10448_v52  ;;  %v5983_v61 = vpack.c.bf16 %v5947_v29, %v5945_v31 }
 0x68a   : > { %v5728_v53 = vpop.f32.mrf.mxu1  ;;  %v5885_v51 = vadd.f32 %v10488_v47, %v5809_v17 }
 0x68b   : > { %v5984_v19 = vpack.c.bf16 %v5948_v27, %v5946_v21  ;;  %v5729_v1 = vadd.f32 %v5728_v53, %v10452_v26  ;;  %v5811_v40 = vmul.f32 %v10475_v28, %v5727_v23  ;;  %v5886_v20 = vadd.f32 %v10484_v8, %v5810_v41 }
 0x68c   : > { %v5732_v14 = vpop.f32.mrf.mxu1  ;;  %v5949_v58 = vmax.f32 %v5885_v51, 0.0 }
 0x68d   : > { %v5812_v25 = vmul.f32 %v10472_v10, %v5729_v1  ;;  %6978 = vmatprep.mubr.msk.bf16.mxu0 %vm3098_vm3, %v5984_v19  ;;  %v5887_v15 = vadd.f32 %v10488_v47, %v5811_v40  ;;  %v5733_v43 = vadd.f32 %v5732_v14, %v10454_v60  ;;  %v5950_v11 = vmax.f32 %v5886_v20, 0.0 }
 0x68e   : > { %v5734_v52 = vpop.f32.mrf.mxu1 }
 0x68f   : > { %v5888_v57 = vadd.f32 %v10484_v8, %v5812_v25  ;;  %v5735_v26 = vadd.f32 %v5734_v52, %v10458_v49  ;;  %6245 = vmatmul.mubr.bf16.gmra.mxu0 %v5983_v61  ;;  %v5951_v3 = vmax.f32 %v5887_v15, 0.0  ;;  %v5813_v7 = vmul.f32 %v10475_v28, %v5733_v43 }
 0x690   : > { %v5736_v13 = vpop.f32.mrf.mxu1 }
 0x691   : > { %v5952_v54 = vmax.f32 %v5888_v57, 0.0  ;;  %v5737_v35 = vadd.f32 %v5736_v13, %v10462_v33  ;;  %v5814_v63 = vmul.f32 %v10472_v10, %v5735_v26  ;;  %v5985_v6 = vpack.c.bf16 %v5951_v3, %v5949_v58 }
 0x692   : > { %v5738_v45 = vpop.f32.mrf.mxu1  ;;  %v5889_v38 = vadd.f32 %v10488_v47, %v5813_v7 }
 0x693   : > { %v5986_v24 = vpack.c.bf16 %v5952_v54, %v5950_v11  ;;  %v5815_v48 = vmul.f32 %v10475_v28, %v5737_v35  ;;  %v5739_v60 = vadd.f32 %v5738_v45, %v10464_v5  ;;  %v5890_v2 = vadd.f32 %v10484_v8, %v5814_v63 }
 0x694   : > { %v5953_v28 = vmax.f32 %v5889_v38, 0.0 }
 0x695   : > { %v5891_v49 = vadd.f32 %v10488_v47, %v5815_v48  ;;  %6979 = vmatprep.mubr.msk.bf16.mxu0 %vm3098_vm3, %v5986_v24  ;;  %v5816_v33 = vmul.f32 %v10472_v10, %v5739_v60  ;;  %v5954_v62 = vmax.f32 %v5890_v2, 0.0 }
 0x697   : > { %6253 = vmatmul.mubr.bf16.gmra.mxu0 %v5985_v6  ;;  %v5892_v12 = vadd.f32 %v10484_v8, %v5816_v33  ;;  %v5955_v22 = vmax.f32 %v5891_v49, 0.0  ;;  %v10710_v8 = vld [vmem:[%s10889_s20] ss:$0 sm:$0xff] }
 0x699   : > { %v5956_v46 = vmax.f32 %v5892_v12, 0.0  ;;  %v5987_v5 = vpack.c.bf16 %v5955_v22, %v5953_v28 }
 0x69b   : > { %v5988_v32 = vpack.c.bf16 %v5956_v46, %v5954_v62 }
 0x69d   : > { %6980 = vmatprep.mubr.msk.bf16.mxu0 %vm3098_vm3, %v5988_v32 }
 0x69f   : > { %6261 = vmatmul.mubr.bf16.gmra.mxu0 %v5987_v5 }
 0x6d2   : > { %v6142_v10 = vpop.f32.mrf.mxu0 }
 0x6d3   : > { %v6276_v47 = vmul.f32 %v10704_v9, %v6142_v10 }
 0x6d4   : > { %v6144_v30 = vpop.f32.mrf.mxu0 }
 0x6d5   : > { %v6315_v59 = vadd.f32 %v10710_v8, %v6276_v47 }
 0x6d6   : > { %v6145_v55 = vpop.f32.mrf.mxu0 }
 0x6d7   : > { %v6277_v42 = vmul.f32 %v10704_v9, %v6145_v55  ;;  %v6347_v50 = vmax.f32 %v6315_v59, 0.0 }
 0x6d8   : > { %v6147_v18 = vpop.f32.mrf.mxu0 }
 0x6d9   : > { %v6316_v39 = vadd.f32 %v10710_v8, %v6277_v42 }
 0x6da   : > { %v6150_v56 = vpop.f32.mrf.mxu0 }
 0x6db   : > { %v6348_v34 = vmax.f32 %v6316_v39, 0.0  ;;  %v6278_v16 = vmul.f32 %v10704_v9, %v6150_v56 }
 0x6dc   : > { %v6152_v37 = vpop.f32.mrf.mxu0 }
 0x6dd   : > { %v6379_v4 = vpack.c.bf16 %v6348_v34, %v6347_v50  ;;  %v6317_v36 = vadd.f32 %v10710_v8, %v6278_v16 }
 0x6de   : > { %v6153_v0 = vpop.f32.mrf.mxu0 }
 0x6df   : > { %v6279_v44 = vmul.f32 %v10704_v9, %v6153_v0  ;;  %7094 = vmatprep.mubr.msk.bf16.mxu1 %vm3478_vm4, %v6379_v4  ;;  %v6349_v27 = vmax.f32 %v6317_v36, 0.0 }
 0x6e0   : > { %v6155_v21 = vpop.f32.mrf.mxu0 }
 0x6e1   : > { %v6318_v29 = vadd.f32 %v10710_v8, %v6279_v44 }
 0x6e2   : > { %v6158_v23 = vpop.f32.mrf.mxu0 }
 0x6e3   : > { %v6350_v41 = vmax.f32 %v6318_v29, 0.0  ;;  %v6280_v53 = vmul.f32 %v10704_v9, %v6158_v23 }
 0x6e4   : > { %v6160_v19 = vpop.f32.mrf.mxu0 }
 0x6e5   : > { %v6380_v31 = vpack.c.bf16 %v6350_v41, %v6349_v27  ;;  %v6319_v1 = vadd.f32 %v10710_v8, %v6280_v53 }
 0x6e6   : > { %v6161_v17 = vpop.f32.mrf.mxu0 }
 0x6e7   : > { %7095 = vmatmul.mubr.msk.bf16.vlgmr.msra.gmra.mxu1 %vm3478_vm4, %v6380_v31  ;;  %v6281_v40 = vmul.f32 %v10704_v9, %v6161_v17  ;;  %v6351_v25 = vmax.f32 %v6319_v1, 0.0 }
 0x6e8   : > { %v6163_v14 = vpop.f32.mrf.mxu0 }
 0x6e9   : > { %v6320_v61 = vadd.f32 %v10710_v8, %v6281_v40 }
 0x6ea   : > { %v6166_v20 = vpop.f32.mrf.mxu0 }
 0x6eb   : > { %v6352_v15 = vmax.f32 %v6320_v61, 0.0  ;;  %v6282_v52 = vmul.f32 %v10704_v9, %v6166_v20 }
 0x6ec   : > { %v6168_v51 = vpop.f32.mrf.mxu0 }
 0x6ed   : > { %v6381_v57 = vpack.c.bf16 %v6352_v15, %v6351_v25  ;;  %v6321_v26 = vadd.f32 %v10710_v8, %v6282_v52 }
 0x6ee   : > { %v6169_v43 = vpop.f32.mrf.mxu0 }
 0x6ef   : > { %v6283_v13 = vmul.f32 %v10704_v9, %v6169_v43  ;;  %7098 = vmatprep.mubr.msk.bf16.mxu1 %vm3478_vm4, %v6381_v57  ;;  %v6353_v35 = vmax.f32 %v6321_v26, 0.0 }
 0x6f0   : > { %v6171_v11 = vpop.f32.mrf.mxu0 }
 0x6f1   : > { %v6322_v3 = vadd.f32 %v10710_v8, %v6283_v13 }
 0x6f2   : > { %v6174_v54 = vpop.f32.mrf.mxu0 }
 0x6f3   : > { %v6354_v63 = vmax.f32 %v6322_v3, 0.0  ;;  %v6284_v45 = vmul.f32 %v10704_v9, %v6174_v54 }
 0x6f4   : > { %v6176_v58 = vpop.f32.mrf.mxu0 }
 0x6f5   : > { %v6382_v24 = vpack.c.bf16 %v6354_v63, %v6353_v35  ;;  %v6323_v48 = vadd.f32 %v10710_v8, %v6284_v45 }
 0x6f6   : > { %v6177_v7 = vpop.f32.mrf.mxu0 }
 0x6f7   : > { %v6285_v60 = vmul.f32 %v10704_v9, %v6177_v7  ;;  %7099 = vmatmul.mubr.msk.bf16.gmra.mxu1 %vm3478_vm4, %v6382_v24  ;;  %v6355_v33 = vmax.f32 %v6323_v48, 0.0 }
 0x6f8   : > { %v6179_v6 = vpop.f32.mrf.mxu0 }
 0x6f9   : > { %v6324_v49 = vadd.f32 %v10710_v8, %v6285_v60 }
 0x6fa   : > { %v6182_v2 = vpop.f32.mrf.mxu0 }
 0x6fb   : > { %v6356_v38 = vmax.f32 %v6324_v49, 0.0  ;;  %v6286_v12 = vmul.f32 %v10704_v9, %v6182_v2 }
 0x6fc   : > { %v6184_v22 = vpop.f32.mrf.mxu0 }
 0x6fd   : > { %v6383_v62 = vpack.c.bf16 %v6356_v38, %v6355_v33  ;;  %v6325_v28 = vadd.f32 %v10710_v8, %v6286_v12 }
 0x6fe   : > { %v6185_v46 = vpop.f32.mrf.mxu0 }
 0x6ff   : > { %v6287_v32 = vmul.f32 %v10704_v9, %v6185_v46  ;;  %7102 = vmatprep.mubr.msk.bf16.mxu1 %vm3478_vm4, %v6383_v62  ;;  %v6357_v30 = vmax.f32 %v6325_v28, 0.0 }
 0x700   : > { %v6187_v5 = vpop.f32.mrf.mxu0 }
 0x701   : > { %v6326_v10 = vadd.f32 %v10710_v8, %v6287_v32 }
 0x702   : > { %v6190_v47 = vpop.f32.mrf.mxu0 }
 0x703   : > { %v6358_v55 = vmax.f32 %v6326_v10, 0.0  ;;  %v6288_v59 = vmul.f32 %v10704_v9, %v6190_v47 }
 0x704   : > { %v6192_v42 = vpop.f32.mrf.mxu0 }
 0x705   : > { %v6384_v18 = vpack.c.bf16 %v6358_v55, %v6357_v30  ;;  %v6327_v56 = vadd.f32 %v10710_v8, %v6288_v59 }
 0x706   : > { %v6193_v39 = vpop.f32.mrf.mxu0 }
 0x707   : > { %v6289_v50 = vmul.f32 %v10704_v9, %v6193_v39  ;;  %7103 = vmatmul.mubr.msk.bf16.gmra.mxu1 %vm3478_vm4, %v6384_v18  ;;  %v6359_v4 = vmax.f32 %v6327_v56, 0.0 }
 0x708   : > { %v6195_v34 = vpop.f32.mrf.mxu0 }
 0x709   : > { %v6328_v16 = vadd.f32 %v10710_v8, %v6289_v50 }
 0x70a   : > { %v6198_v37 = vpop.f32.mrf.mxu0 }
 0x70b   : > { %v6360_v0 = vmax.f32 %v6328_v16, 0.0  ;;  %v6290_v36 = vmul.f32 %v10704_v9, %v6198_v37 }
 0x70c   : > { %v6200_v44 = vpop.f32.mrf.mxu0 }
 0x70d   : > { %v6385_v21 = vpack.c.bf16 %v6360_v0, %v6359_v4  ;;  %v6329_v27 = vadd.f32 %v10710_v8, %v6290_v36 }
 0x70e   : > { %v6201_v29 = vpop.f32.mrf.mxu0 }
 0x70f   : > { %v6291_v41 = vmul.f32 %v10704_v9, %v6201_v29  ;;  %7106 = vmatprep.mubr.msk.bf16.mxu1 %vm3478_vm4, %v6385_v21  ;;  %v6361_v19 = vmax.f32 %v6329_v27, 0.0 }
 0x710   : > { %v6203_v23 = vpop.f32.mrf.mxu0 }
 0x711   : > { %v6330_v53 = vadd.f32 %v10710_v8, %v6291_v41 }
 0x712   : > { %v6206_v31 = vpop.f32.mrf.mxu0 }
 0x713   : > { %v6362_v17 = vmax.f32 %v6330_v53, 0.0  ;;  %v6292_v1 = vmul.f32 %v10704_v9, %v6206_v31 }
 0x714   : > { %v6208_v40 = vpop.f32.mrf.mxu0 }
 0x715   : > { %v6386_v14 = vpack.c.bf16 %v6362_v17, %v6361_v19  ;;  %v6331_v20 = vadd.f32 %v10710_v8, %v6292_v1 }
 0x716   : > { %v6209_v61 = vpop.f32.mrf.mxu0 }
 0x717   : > { %v6293_v25 = vmul.f32 %v10704_v9, %v6209_v61  ;;  %7107 = vmatmul.mubr.msk.bf16.gmra.mxu1 %vm3478_vm4, %v6386_v14  ;;  %v6363_v57 = vmax.f32 %v6331_v20, 0.0 }
 0x718   : > { %v6211_v15 = vpop.f32.mrf.mxu0 }
 0x719   : > { %v6332_v52 = vadd.f32 %v10710_v8, %v6293_v25 }
 0x71a   : > { %v6214_v51 = vpop.f32.mrf.mxu0 }
 0x71b   : > { %v6364_v43 = vmax.f32 %v6332_v52, 0.0  ;;  %v6294_v26 = vmul.f32 %v10704_v9, %v6214_v51 }
 0x71c   : > { %v6216_v13 = vpop.f32.mrf.mxu0 }
 0x71d   : > { %v6387_v11 = vpack.c.bf16 %v6364_v43, %v6363_v57  ;;  %v6333_v54 = vadd.f32 %v10710_v8, %v6294_v26 }
 0x71e   : > { %v6217_v3 = vpop.f32.mrf.mxu0 }
 0x71f   : > { %v6295_v35 = vmul.f32 %v10704_v9, %v6217_v3  ;;  %7110 = vmatprep.mubr.msk.bf16.mxu1 %vm3478_vm4, %v6387_v11  ;;  %v6365_v24 = vmax.f32 %v6333_v54, 0.0 }
 0x720   : > { %v6219_v63 = vpop.f32.mrf.mxu0 }
 0x721   : > { %v6334_v45 = vadd.f32 %v10710_v8, %v6295_v35 }
 0x722   : > { %v6222_v58 = vpop.f32.mrf.mxu0 }
 0x723   : > { %v6366_v7 = vmax.f32 %v6334_v45, 0.0  ;;  %v6296_v48 = vmul.f32 %v10704_v9, %v6222_v58 }
 0x724   : > { %v6224_v60 = vpop.f32.mrf.mxu0 }
 0x725   : > { %v6388_v6 = vpack.c.bf16 %v6366_v7, %v6365_v24  ;;  %v6335_v2 = vadd.f32 %v10710_v8, %v6296_v48 }
 0x726   : > { %v6225_v49 = vpop.f32.mrf.mxu0 }
 0x727   : > { %v6297_v33 = vmul.f32 %v10704_v9, %v6225_v49  ;;  %7111 = vmatmul.mubr.msk.bf16.gmra.mxu1 %vm3478_vm4, %v6388_v6  ;;  %v6367_v22 = vmax.f32 %v6335_v2, 0.0  ;;  %v10794_v2 = vld [vmem:[%s10891_s22] ss:$0 sm:$0xff] }
 0x728   : > { %v6227_v38 = vpop.f32.mrf.mxu0 }
 0x729   : > { %v6336_v12 = vadd.f32 %v10710_v8, %v6297_v33 }
 0x72b   : > { %v6368_v62 = vmax.f32 %v6336_v12, 0.0 }
 0x72d   : > { %v6389_v46 = vpack.c.bf16 %v6368_v62, %v6367_v22 }
 0x72f   : > { %7114 = vmatprep.mubr.msk.bf16.mxu1 %vm3478_vm4, %v6389_v46 }
 0x734   : > { %v6230_v28 = vpop.f32.mrf.mxu0 }
 0x735   : > { %v6298_v32 = vmul.f32 %v10704_v9, %v6230_v28 }
 0x736   : > { %v6232_v5 = vpop.f32.mrf.mxu0 }
 0x737   : > { %v6337_v47 = vadd.f32 %v10710_v8, %v6298_v32 }
 0x738   : > { %v6233_v10 = vpop.f32.mrf.mxu0 }
 0x739   : > { %v6299_v30 = vmul.f32 %v10704_v9, %v6233_v10  ;;  %v6369_v42 = vmax.f32 %v6337_v47, 0.0 }
 0x73a   : > { %v6235_v55 = vpop.f32.mrf.mxu0 }
 0x73b   : > { %v6338_v59 = vadd.f32 %v10710_v8, %v6299_v30 }
 0x73d   : > { %v6370_v18 = vmax.f32 %v6338_v59, 0.0 }
 0x73f   : > { %v6390_v39 = vpack.c.bf16 %v6370_v18, %v6369_v42 }
 0x741   : > { %7115 = vmatmul.mubr.msk.bf16.gmra.mxu1 %vm3478_vm4, %v6390_v39 }
 0x747   : > { %v6238_v56 = vpop.f32.mrf.mxu0 }
 0x748   : > { %v6300_v50 = vmul.f32 %v10704_v9, %v6238_v56 }
 0x749   : > { %v6240_v34 = vpop.f32.mrf.mxu0 }
 0x74a   : > { %v6339_v37 = vadd.f32 %v10710_v8, %v6300_v50 }
 0x74b   : > { %v6241_v16 = vpop.f32.mrf.mxu0 }
 0x74c   : > { %v6301_v4 = vmul.f32 %v10704_v9, %v6241_v16  ;;  %v6371_v21 = vmax.f32 %v6339_v37, 0.0 }
 0x74d   : > { %v6243_v0 = vpop.f32.mrf.mxu0 }
 0x74e   : > { %v6340_v36 = vadd.f32 %v10710_v8, %v6301_v4 }
 0x74f   : > { %v6246_v44 = vpop.f32.mrf.mxu0 }
 0x750   : > { %v6372_v29 = vmax.f32 %v6340_v36, 0.0  ;;  %v6302_v27 = vmul.f32 %v10704_v9, %v6246_v44 }
 0x751   : > { %v6248_v41 = vpop.f32.mrf.mxu0 }
 0x752   : > { %v6391_v23 = vpack.c.bf16 %v6372_v29, %v6371_v21  ;;  %v6341_v31 = vadd.f32 %v10710_v8, %v6302_v27 }
 0x753   : > { %v6249_v53 = vpop.f32.mrf.mxu0 }
 0x754   : > { %v6303_v19 = vmul.f32 %v10704_v9, %v6249_v53  ;;  %7118 = vmatprep.mubr.msk.bf16.mxu1 %vm3478_vm4, %v6391_v23  ;;  %v6373_v14 = vmax.f32 %v6341_v31, 0.0 }
 0x755   : > { %v6251_v17 = vpop.f32.mrf.mxu0 }
 0x756   : > { %v6342_v1 = vadd.f32 %v10710_v8, %v6303_v19 }
 0x757   : > { %v6254_v40 = vpop.f32.mrf.mxu0 }
 0x758   : > { %v6374_v61 = vmax.f32 %v6342_v1, 0.0  ;;  %v6304_v20 = vmul.f32 %v10704_v9, %v6254_v40 }
 0x759   : > { %v6256_v25 = vpop.f32.mrf.mxu0 }
 0x75a   : > { %v6392_v15 = vpack.c.bf16 %v6374_v61, %v6373_v14  ;;  %v6343_v51 = vadd.f32 %v10710_v8, %v6304_v20 }
 0x75b   : > { %v6257_v52 = vpop.f32.mrf.mxu0 }
 0x75c   : > { %v6305_v57 = vmul.f32 %v10704_v9, %v6257_v52  ;;  %7119 = vmatmul.mubr.msk.bf16.gmra.mxu1 %vm3478_vm4, %v6392_v15  ;;  %v6375_v11 = vmax.f32 %v6343_v51, 0.0 }
 0x75d   : > { %v6259_v43 = vpop.f32.mrf.mxu0 }
 0x75e   : > { %v6344_v26 = vadd.f32 %v10710_v8, %v6305_v57 }
 0x75f   : > { %v6262_v13 = vpop.f32.mrf.mxu0 }
 0x760   : > { %v6376_v3 = vmax.f32 %v6344_v26, 0.0  ;;  %v6306_v54 = vmul.f32 %v10704_v9, %v6262_v13 }
 0x761   : > { %v6264_v35 = vpop.f32.mrf.mxu0 }
 0x762   : > { %v6393_v63 = vpack.c.bf16 %v6376_v3, %v6375_v11  ;;  %v6345_v58 = vadd.f32 %v10710_v8, %v6306_v54 }
 0x763   : > { %v6265_v45 = vpop.f32.mrf.mxu0 }
 0x764   : > { %v6307_v24 = vmul.f32 %v10704_v9, %v6265_v45  ;;  %7122 = vmatprep.mubr.msk.bf16.mxu1 %vm3478_vm4, %v6393_v63  ;;  %v6377_v60 = vmax.f32 %v6345_v58, 0.0 }
 0x765   : > { %v6267_v7 = vpop.f32.mrf.mxu0 }
 0x766   : > { %v6346_v48 = vadd.f32 %v10710_v8, %v6307_v24 }
 0x768   : > { %v6378_v6 = vmax.f32 %v6346_v48, 0.0 }
 0x76a   : > { %v6394_v49 = vpack.c.bf16 %v6378_v6, %v6377_v60 }
 0x76c   : > { %7123 = vmatmul.mubr.msk.bf16.gmra.mxu1 %vm3478_vm4, %v6394_v49 }
 0x7a7   : > { %v7096_v33 = vpop.f32.mrf.mxu1 }
 0x7a8   : > { %v6525_v38 = vadd.f32 %v7096_v33, %v10794_v2 }
 0x7a9   : > { %v6516_v9 = vpop.f32.mrf.mxu1 }
 0x7aa   : > { %7473 = vtanh.f32 %v6525_v38  ;;  %v6517_v12 = vadd.f32 %v10794_v2, %v6516_v9 }
 0x7ab   : > { %v7097_v22 = vpop.f32.mrf.mxu1 }
 0x7ac   : > { %7475 = vtanh.f32 %v6517_v12  ;;  %v6528_v8 = vadd.f32 %v7097_v22, %v10794_v2 }
 0x7ad   : > { %v6519_v62 = vpop.f32.mrf.mxu1 }
 0x7ae   : > { %7477 = vtanh.f32 %v6528_v8  ;;  %v6520_v46 = vadd.f32 %v10794_v2, %v6519_v62 }
 0x7b0   : > { %7479 = vtanh.f32 %v6520_v46 }
 0x7b7   : > { %v7474_v28 = vpop.eup %7473  ;;  %v7100_v32 = vpop.f32.mrf.mxu1 }
 0x7b8   : > { %6677 = vst [vmem:[%s10804_s28 + $0x10] sm:$0xff] %v7474_v28  ;;  %v6541_v10 = vadd.f32 %v7100_v32, %v10794_v2 }
 0x7b9   : > { %v7476_v5 = vpop.eup %7475  ;;  %v6532_v47 = vpop.f32.mrf.mxu1 }
 0x7ba   : > { %6675 = vst [vmem:[%s10804_s28] sm:$0xff] %v7476_v5  ;;  %7481 = vtanh.f32 %v6541_v10  ;;  %v6533_v55 = vadd.f32 %v10794_v2, %v6532_v47 }
 0x7bb   : > { %v7478_v30 = vpop.eup %7477  ;;  %v7101_v59 = vpop.f32.mrf.mxu1 }
 0x7bc   : > { %6678 = vst [vmem:[%s10804_s28 + $0x18] sm:$0xff] %v7478_v30  ;;  %7483 = vtanh.f32 %v6533_v55  ;;  %v6544_v18 = vadd.f32 %v7101_v59, %v10794_v2 }
 0x7bd   : > { %v7480_v42 = vpop.eup %7479  ;;  %v6535_v39 = vpop.f32.mrf.mxu1 }
 0x7be   : > { %6676 = vst [vmem:[%s10804_s28 + $0x8] sm:$0xff] %v7480_v42  ;;  %7485 = vtanh.f32 %v6544_v18  ;;  %v6536_v56 = vadd.f32 %v10794_v2, %v6535_v39 }
 0x7c0   : > { %7487 = vtanh.f32 %v6536_v56 }
 0x7c7   : > { %v7482_v50 = vpop.eup %7481  ;;  %v7104_v34 = vpop.f32.mrf.mxu1 }
 0x7c8   : > { %6681 = vst [vmem:[%s10804_s28 + $0x30] sm:$0xff] %v7482_v50  ;;  %v6557_v16 = vadd.f32 %v7104_v34, %v10794_v2 }
 0x7c9   : > { %v7484_v37 = vpop.eup %7483  ;;  %v6548_v4 = vpop.f32.mrf.mxu1 }
 0x7ca   : > { %6679 = vst [vmem:[%s10804_s28 + $0x20] sm:$0xff] %v7484_v37  ;;  %7489 = vtanh.f32 %v6557_v16  ;;  %v6549_v0 = vadd.f32 %v10794_v2, %v6548_v4 }
 0x7cb   : > { %v7486_v36 = vpop.eup %7485  ;;  %v7105_v44 = vpop.f32.mrf.mxu1 }
 0x7cc   : > { %6682 = vst [vmem:[%s10804_s28 + $0x38] sm:$0xff] %v7486_v36  ;;  %7491 = vtanh.f32 %v6549_v0  ;;  %v6560_v21 = vadd.f32 %v7105_v44, %v10794_v2 }
 0x7cd   : > { %v7488_v29 = vpop.eup %7487  ;;  %v6551_v27 = vpop.f32.mrf.mxu1 }
 0x7ce   : > { %6680 = vst [vmem:[%s10804_s28 + $0x28] sm:$0xff] %v7488_v29  ;;  %7493 = vtanh.f32 %v6560_v21  ;;  %v6552_v41 = vadd.f32 %v10794_v2, %v6551_v27 }
 0x7d0   : > { %7495 = vtanh.f32 %v6552_v41 }
 0x7d7   : > { %v7490_v23 = vpop.eup %7489  ;;  %v7108_v53 = vpop.f32.mrf.mxu1 }
 0x7d8   : > { %6685 = vst [vmem:[%s10804_s28 + $0x50] sm:$0xff] %v7490_v23  ;;  %v6573_v31 = vadd.f32 %v7108_v53, %v10794_v2 }
 0x7d9   : > { %v7492_v19 = vpop.eup %7491  ;;  %v6564_v17 = vpop.f32.mrf.mxu1 }
 0x7da   : > { %6683 = vst [vmem:[%s10804_s28 + $0x40] sm:$0xff] %v7492_v19  ;;  %7497 = vtanh.f32 %v6573_v31  ;;  %v6565_v1 = vadd.f32 %v10794_v2, %v6564_v17 }
 0x7db   : > { %v7494_v40 = vpop.eup %7493  ;;  %v7109_v14 = vpop.f32.mrf.mxu1 }
 0x7dc   : > { %6686 = vst [vmem:[%s10804_s28 + $0x58] sm:$0xff] %v7494_v40  ;;  %7499 = vtanh.f32 %v6565_v1  ;;  %v6576_v61 = vadd.f32 %v7109_v14, %v10794_v2 }
 0x7dd   : > { %v7496_v20 = vpop.eup %7495  ;;  %v6567_v25 = vpop.f32.mrf.mxu1 }
 0x7de   : > { %6684 = vst [vmem:[%s10804_s28 + $0x48] sm:$0xff] %v7496_v20  ;;  %7501 = vtanh.f32 %v6576_v61  ;;  %v6568_v15 = vadd.f32 %v10794_v2, %v6567_v25 }
 0x7e0   : > { %7503 = vtanh.f32 %v6568_v15 }
 0x7e7   : > { %v7498_v52 = vpop.eup %7497  ;;  %v7112_v51 = vpop.f32.mrf.mxu1 }
 0x7e8   : > { %6689 = vst [vmem:[%s10804_s28 + $0x70] sm:$0xff] %v7498_v52  ;;  %v6589_v57 = vadd.f32 %v7112_v51, %v10794_v2 }
 0x7e9   : > { %v7500_v43 = vpop.eup %7499  ;;  %v6580_v26 = vpop.f32.mrf.mxu1 }
 0x7ea   : > { %6687 = vst [vmem:[%s10804_s28 + $0x60] sm:$0xff] %v7500_v43  ;;  %7505 = vtanh.f32 %v6589_v57  ;;  %v6581_v13 = vadd.f32 %v10794_v2, %v6580_v26 }
 0x7eb   : > { %v7502_v11 = vpop.eup %7501  ;;  %v7113_v3 = vpop.f32.mrf.mxu1 }
 0x7ec   : > { %6690 = vst [vmem:[%s10804_s28 + $0x78] sm:$0xff] %v7502_v11  ;;  %7507 = vtanh.f32 %v6581_v13  ;;  %v6592_v54 = vadd.f32 %v7113_v3, %v10794_v2 }
 0x7ed   : > { %v7504_v35 = vpop.eup %7503  ;;  %v6583_v63 = vpop.f32.mrf.mxu1 }
 0x7ee   : > { %6688 = vst [vmem:[%s10804_s28 + $0x68] sm:$0xff] %v7504_v35  ;;  %7509 = vtanh.f32 %v6592_v54  ;;  %v6584_v45 = vadd.f32 %v10794_v2, %v6583_v63 }
 0x7f0   : > { %7511 = vtanh.f32 %v6584_v45 }
 0x7f7   : > { %v7506_v58 = vpop.eup %7505 }
 0x7f8   : > { %6693 = vst [vmem:[%s10804_s28 + $0x90] sm:$0xff] %v7506_v58 }
 0x7f9   : > { %v7508_v24 = vpop.eup %7507 }
 0x7fa   : > { %6691 = vst [vmem:[%s10804_s28 + $0x80] sm:$0xff] %v7508_v24 }
 0x7fb   : > { %v7510_v7 = vpop.eup %7509 }
 0x7fc   : > { %6694 = vst [vmem:[%s10804_s28 + $0x98] sm:$0xff] %v7510_v7 }
 0x7fd   : > { %v7512_v48 = vpop.eup %7511 }
 0x7fe   : > { %6692 = vst [vmem:[%s10804_s28 + $0x88] sm:$0xff] %v7512_v48 }
 0x801   : > { %v7116_v60 = vpop.f32.mrf.mxu1 }
 0x802   : > { %v6605_v6 = vadd.f32 %v7116_v60, %v10794_v2 }
 0x803   : > { %v6596_v49 = vpop.f32.mrf.mxu1 }
 0x804   : > { %7513 = vtanh.f32 %v6605_v6  ;;  %v6597_v33 = vadd.f32 %v10794_v2, %v6596_v49 }
 0x805   : > { %v7117_v38 = vpop.f32.mrf.mxu1 }
 0x806   : > { %7515 = vtanh.f32 %v6597_v33  ;;  %v6608_v9 = vadd.f32 %v7117_v38, %v10794_v2 }
 0x807   : > { %v6599_v12 = vpop.f32.mrf.mxu1 }
 0x808   : > { %7517 = vtanh.f32 %v6608_v9  ;;  %v6600_v22 = vadd.f32 %v10794_v2, %v6599_v12 }
 0x80a   : > { %7519 = vtanh.f32 %v6600_v22 }
 0x811   : > { %v7514_v8 = vpop.eup %7513 }
 0x812   : > { %6697 = vst [vmem:[%s10804_s28 + $0xb0] sm:$0xff] %v7514_v8 }
 0x813   : > { %v7516_v62 = vpop.eup %7515 }
 0x814   : > { %6695 = vst [vmem:[%s10804_s28 + $0xa0] sm:$0xff] %v7516_v62 }
 0x815   : > { %v7518_v46 = vpop.eup %7517 }
 0x816   : > { %6698 = vst [vmem:[%s10804_s28 + $0xb8] sm:$0xff] %v7518_v46 }
 0x817   : > { %v7520_v28 = vpop.eup %7519 }
 0x818   : > { %6696 = vst [vmem:[%s10804_s28 + $0xa8] sm:$0xff] %v7520_v28 }
 0x81c   : > { %v7120_v32 = vpop.f32.mrf.mxu1 }
 0x81d   : > { %v6621_v5 = vadd.f32 %v7120_v32, %v10794_v2 }
 0x81e   : > { %v6612_v10 = vpop.f32.mrf.mxu1 }
 0x81f   : > { %7521 = vtanh.f32 %v6621_v5  ;;  %v6613_v47 = vadd.f32 %v10794_v2, %v6612_v10 }
 0x820   : > { %v7121_v30 = vpop.f32.mrf.mxu1 }
 0x821   : > { %7523 = vtanh.f32 %v6613_v47  ;;  %v6624_v55 = vadd.f32 %v7121_v30, %v10794_v2 }
 0x822   : > { %v6615_v59 = vpop.f32.mrf.mxu1 }
 0x823   : > { %7525 = vtanh.f32 %v6624_v55  ;;  %v6616_v42 = vadd.f32 %v10794_v2, %v6615_v59 }
 0x825   : > { %7527 = vtanh.f32 %v6616_v42 }
 0x82c   : > { %v7522_v18 = vpop.eup %7521  ;;  %v7124_v39 = vpop.f32.mrf.mxu1 }
 0x82d   : > { %6701 = vst [vmem:[%s10804_s28 + $0xd0] sm:$0xff] %v7522_v18  ;;  %v6637_v56 = vadd.f32 %v7124_v39, %v10794_v2 }
 0x82e   : > { %v7524_v50 = vpop.eup %7523  ;;  %v6628_v34 = vpop.f32.mrf.mxu1 }
 0x82f   : > { %6699 = vst [vmem:[%s10804_s28 + $0xc0] sm:$0xff] %v7524_v50  ;;  %7529 = vtanh.f32 %v6637_v56  ;;  %v6629_v16 = vadd.f32 %v10794_v2, %v6628_v34 }
 0x830   : > { %v7526_v37 = vpop.eup %7525  ;;  %v7125_v4 = vpop.f32.mrf.mxu1 }
 0x831   : > { %6702 = vst [vmem:[%s10804_s28 + $0xd8] sm:$0xff] %v7526_v37  ;;  %7531 = vtanh.f32 %v6629_v16  ;;  %v6640_v0 = vadd.f32 %v7125_v4, %v10794_v2 }
 0x832   : > { %v7528_v36 = vpop.eup %7527  ;;  %v6631_v44 = vpop.f32.mrf.mxu1 }
 0x833   : > { %6700 = vst [vmem:[%s10804_s28 + $0xc8] sm:$0xff] %v7528_v36  ;;  %7533 = vtanh.f32 %v6640_v0  ;;  %v6632_v21 = vadd.f32 %v10794_v2, %v6631_v44 }
 0x835   : > { %7535 = vtanh.f32 %v6632_v21 }
 0x83c   : > { %v7530_v29 = vpop.eup %7529 }
 0x83d   : > { %6705 = vst [vmem:[%s10804_s28 + $0xf0] sm:$0xff] %v7530_v29 }
 0x83e   : > { %v7532_v27 = vpop.eup %7531 }
 0x83f   : > { %6703 = vst [vmem:[%s10804_s28 + $0xe0] sm:$0xff] %v7532_v27 }
 0x840   : > { %v7534_v41 = vpop.eup %7533 }
 0x841   : > { %6706 = vst [vmem:[%s10804_s28 + $0xf8] sm:$0xff] %v7534_v41 }
 0x842   : > { %v7536_v23 = vpop.eup %7535 }
 0x843   : > { %6704 = vst [vmem:[%s10804_s28 + $0xe8] sm:$0xff] %v7536_v23 }
 0x844 PF: > { %s35_s5 = sadd.s32 1, %s7554_s5  }
 0x845   : > { %p32_p4 = scmp.ge.s32.totalorder %s35_s5, 4  }
 0x847   :  { %34 = sbr.rel (!%p32_p4) target bundleno = 10 (0xa), region = 154 }

</bundles_post_ra>
